<compile_context>
chip_gen: v6e
topology: v6e:2x2x1
jax: 0.10.0
libtpu: 0.0.40
codegen_flags: <defaults>
</compile_context>

<pallas_src>
import functools
import math

import jax
import jax.numpy as jnp
from jax import lax
from jax.experimental import pallas as pl
from jax.experimental.pallas import tpu as pltpu

_EPS = 1e-5  # PyTorch BatchNorm2d default eps.


def _aspp_kernel(x_ref, w0_ref, b0_ref, wd_ref, bd_ref, p_ref, c_ref, o_ref,
                 *, TH, W, Cin, Cout, pad, rates):
    """Fused ASPP forward for one (batch, row-strip) tile.

    x_ref  : (Hp, Wp, Cin)         zero-padded input (pad = max rate)
    w0_ref : (Cin, Cout)           1x1 branch weight (BN folded)
    b0_ref : (1, Cout)             1x1 branch bias   (BN folded)
    wd_ref : (B, 9*Cin, Cout)      fused per-branch 3x3 tap weights (BN folded)
    bd_ref : (B, Cout)             dilated-branch biases (BN folded)
    p_ref  : (B+1, Cout, Cout)     projection weight blocks for branches 0..B
    c_ref  : (1, Cout)             pooled-branch @ P_pool + projection bias
    o_ref  : (TH*W, Cout)          output tile (rows flattened, lane-dense)
    """
    t = pl.program_id(1)
    row0 = pl.multiple_of(t * TH, TH)        # first output row of this strip
    M = TH * W

    # ---- branch 0: 1x1 conv (+BN) + ReLU, folded straight into projection.
    x0 = x_ref[pl.ds(row0 + pad, TH), pl.ds(pad, W), :].reshape(M, Cin)
    b0 = jnp.maximum(
        jnp.dot(x0, w0_ref[...], preferred_element_type=jnp.float32)
        + b0_ref[...], 0.0)
    acc = jnp.dot(b0, p_ref[0], preferred_element_type=jnp.float32)

    # ---- dilated 3x3 branches: the 9 taps are fused into ONE K = 9*Cin MXU
    #      matmul (LHS built by channel-axis concat of the tap windows).
    for bi, r in enumerate(rates):
        taps = [[None] * 3 for _ in range(3)]
        for kw in range(3):
            dw = (kw - 1) * r
            # One sublane (W) shift per kw offset; the three kh taps are cheap
            # leading-axis slices of this slab.
            slab = x_ref[pl.ds(row0 + (pad - r), TH + 2 * r),
                         pl.ds(pad + dw, W), :]
            for kh in range(3):
                taps[kh][kw] = slab[kh * r:kh * r + TH].reshape(M, Cin)
        lhs = jnp.concatenate(
            [taps[kh][kw] for kh in range(3) for kw in range(3)], axis=-1)
        branch = jnp.maximum(
            jnp.dot(lhs, wd_ref[bi], preferred_element_type=jnp.float32)
            + bd_ref[bi, :].reshape(1, Cout), 0.0)
        acc = acc + jnp.dot(branch, p_ref[bi + 1],
                            preferred_element_type=jnp.float32)

    # ---- pooled-branch contribution + projection bias (per-batch constant),
    #      final ReLU, lane-dense store (trailing dim = Cout = 256).
    o_ref[...] = jnp.maximum(acc + c_ref[...], 0.0).astype(o_ref.dtype)


def aspp_forward(x_nchw, params, rates, *, target_m=512):
    """ASPP forward (inference semantics: BN uses running stats, Dropout=id).

    x_nchw: (N, Cin, H, W).  Returns (N, 256, H, W)."""
    N, Cin, H, W = x_nchw.shape
    Cout = params["w_b0"].shape[0]
    rates = tuple(int(r) for r in rates)
    B = len(rates)
    pad = max(rates)

    def fold(w, bn):
        gamma, beta, mean, var = bn
        s = gamma / jnp.sqrt(var + _EPS)
        return w * s[:, None, None, None], beta - s * mean

    # Branch 0 (1x1 conv + BN).
    w0f, b0f = fold(params["w_b0"], params["bn_b0"])
    w0 = jnp.transpose(w0f[:, :, 0, 0], (1, 0))               # (Cin, Cout)
    b0 = b0f.reshape(1, Cout)

    # Dilated 3x3 branches: fold BN, flatten the 9 taps into a K=9*Cin matrix.
    wds, bds = [], []
    for i in range(B):
        wf, bf = fold(params[f"w_b{i + 1}"], params[f"bn_b{i + 1}"])
        # (Cout, Cin, 3, 3) -> (kh, kw, Cin, Cout) -> (9*Cin, Cout)
        wds.append(jnp.transpose(wf, (2, 3, 1, 0)).reshape(9 * Cin, Cout))
        bds.append(bf)
    wd = jnp.stack(wds, axis=0)                               # (B, 9*Cin, Cout)
    bd = jnp.stack(bds, axis=0)                               # (B, Cout)

    # Pooled-branch weights.
    wpf, bpf = fold(params["w_pool"], params["bn_pool"])
    wp = jnp.transpose(wpf[:, :, 0, 0], (1, 0))               # (Cin, Cout)

    # Projection 1x1 conv (+BN) split into per-branch (Cout, Cout) blocks so
    # the 5*Cout concat is never materialized.
    wprf, bprf = fold(params["w_proj"], params["bn_proj"])
    pblk = jnp.transpose(wprf[:, :, 0, 0], (1, 0)).reshape(B + 2, Cout, Cout)
    p_br = pblk[:B + 1]                                       # branches 0..B

    # NCHW -> NHWC once; pooled mean reuses the NHWC tensor (no extra HBM pass
    # over the NCHW input); then zero-pad once with the maximum dilation.
    x = jnp.transpose(x_nchw, (0, 2, 3, 1)).astype(jnp.float32)
    xm = jnp.mean(x, axis=(1, 2))                             # (N, Cin)
    pool = jax.nn.relu(jnp.dot(xm, wp, precision=lax.Precision.HIGHEST)
                       + bpf[None, :])                        # (N, Cout)
    c = (jnp.dot(pool, pblk[B + 1], precision=lax.Precision.HIGHEST)
         + bprf[None, :]).reshape(N, 1, Cout)                 # (N, 1, Cout)

    # Row-strip tiling: aim for M = TH*W in the 256-512 range, keep TH*W a
    # multiple of 8 (aligned, unmasked stores), pad H so it divides evenly.
    TH = min(H, max(1, math.ceil(target_m / W)))
    while (TH * W) % 8:
        TH += 1
    Hpad = math.ceil(H / TH) * TH
    n_tiles = Hpad // TH

    x = jnp.pad(x, ((0, 0), (pad, pad + (Hpad - H)), (pad, pad), (0, 0)))
    Hp, Wp = x.shape[1], x.shape[2]

    kernel = functools.partial(
        _aspp_kernel, TH=TH, W=W, Cin=Cin, Cout=Cout, pad=pad, rates=rates)

    out_flat = pl.pallas_call(
        kernel,
        out_shape=jax.ShapeDtypeStruct((N, Hpad * W, Cout), x_nchw.dtype),
        grid_spec=pltpu.PrefetchScalarGridSpec(
            num_scalar_prefetch=0,
            grid=(N, n_tiles),
            in_specs=[
                # Whole padded image per batch; block index constant in t so it
                # stays resident across the row-strip axis.
                pl.BlockSpec((None, Hp, Wp, Cin), lambda n, t: (n, 0, 0, 0)),
                pl.BlockSpec((Cin, Cout), lambda n, t: (0, 0)),
                pl.BlockSpec((1, Cout), lambda n, t: (0, 0)),
                pl.BlockSpec((B, 9 * Cin, Cout), lambda n, t: (0, 0, 0)),
                pl.BlockSpec((B, Cout), lambda n, t: (0, 0)),
                pl.BlockSpec((B + 1, Cout, Cout), lambda n, t: (0, 0, 0)),
                pl.BlockSpec((None, 1, Cout), lambda n, t: (n, 0, 0)),
            ],
            out_specs=pl.BlockSpec((None, TH * W, Cout),
                                   lambda n, t: (n, t, 0)),
        ),
        compiler_params=pltpu.CompilerParams(
            dimension_semantics=("parallel", "parallel")),
    )(x, w0, b0, wd, bd, p_br, c)

    # NHWC(flat) -> NCHW only at the module boundary; crop padded tail rows.
    out = out_flat.reshape(N, Hpad, W, Cout)[:, :H]
    return jnp.transpose(out, (0, 3, 1, 2))


# ----------------------------- pure-JAX reference -----------------------------
def _conv_nchw(x, w, padding=0, dilation=1):
    dn = lax.conv_dimension_numbers(x.shape, w.shape, ("NCHW", "OIHW", "NCHW"))
    return lax.conv_general_dilated(
        x, w, (1, 1), ((padding, padding), (padding, padding)),
        rhs_dilation=(dilation, dilation), dimension_numbers=dn,
        precision=lax.Precision.HIGHEST)


def _bn_eval(x, bn):
    gamma, beta, mean, var = bn
    r = lambda v: v.reshape(1, -1, 1, 1)
    return (x - r(mean)) * (r(gamma) / jnp.sqrt(r(var) + _EPS)) + r(beta)


def aspp_reference(x, params, rates):
    outs = [jax.nn.relu(_bn_eval(_conv_nchw(x, params["w_b0"]),
                                 params["bn_b0"]))]
    for i, r in enumerate(rates):
        outs.append(jax.nn.relu(_bn_eval(
            _conv_nchw(x, params[f"w_b{i + 1}"], padding=r, dilation=r),
            params[f"bn_b{i + 1}"])))
    g = jnp.mean(x, axis=(2, 3), keepdims=True)
    g = jax.nn.relu(_bn_eval(_conv_nchw(g, params["w_pool"]),
                             params["bn_pool"]))
    outs.append(jnp.broadcast_to(g, (x.shape[0], g.shape[1],
                                     x.shape[2], x.shape[3])))
    cat = jnp.concatenate(outs, axis=1)
    # Dropout(0.1) is identity in eval mode.
    return jax.nn.relu(_bn_eval(_conv_nchw(cat, params["w_proj"]),
                                params["bn_proj"]))


if __name__ == "__main__":
    # Small test config: ASPP(in_channels=4, atrous_rates=(2, 4, 6)) on a
    # (2, 4, 16, 16) input.  out_channels=256 is hardcoded in the module.
    N, Cin, H, W = 2, 4, 16, 16
    Cout = 256
    rates = (2, 4, 6)

    key = jax.random.PRNGKey(0)
    keys = jax.random.split(key, 16)
    ki = iter(keys)

    def conv_w(k, co, ci, kh, kw):
        fan_in = ci * kh * kw
        return jax.random.normal(k, (co, ci, kh, kw), jnp.float32) * \
            (2.0 / fan_in) ** 0.5

    def bn_p(k):
        k1, k2, k3, k4 = jax.random.split(k, 4)
        gamma = 1.0 + 0.1 * jax.random.normal(k1, (Cout,), jnp.float32)
        beta = 0.1 * jax.random.normal(k2, (Cout,), jnp.float32)
        mean = 0.1 * jax.random.normal(k3, (Cout,), jnp.float32)
        var = jax.nn.softplus(jax.random.normal(k4, (Cout,), jnp.float32)) + 0.5
        return (gamma, beta, mean, var)

    params = {
        "w_b0": conv_w(next(ki), Cout, Cin, 1, 1), "bn_b0": bn_p(next(ki)),
    }
    for i in range(3):
        params[f"w_b{i + 1}"] = conv_w(next(ki), Cout, Cin, 3, 3)
        params[f"bn_b{i + 1}"] = bn_p(next(ki))
    params["w_pool"] = conv_w(next(ki), Cout, Cin, 1, 1)
    params["bn_pool"] = bn_p(next(ki))
    params["w_proj"] = conv_w(next(ki), Cout, 5 * Cout, 1, 1)
    params["bn_proj"] = bn_p(next(ki))

    x = jax.random.normal(next(ki), (N, Cin, H, W), jnp.float32)

    out = aspp_forward(x, params, rates)
    out = jax.block_until_ready(out)

    ref = aspp_reference(x, params, rates)
    assert out.shape == (N, Cout, H, W), out.shape
    max_err = float(jnp.max(jnp.abs(out - ref)))
    assert jnp.allclose(out, ref, atol=5e-3, rtol=5e-3), max_err

    print("KERNEL_OK")
</pallas_src>

<mosaic_0001>
module attributes {stable_mosaic.version = 11 : i64} {
  func.func @_aspp_kernel(%arg0: i32, %arg1: i32, %arg2: memref<1x28x28x4xf32, #tpu.memory_space<vmem>>, %arg3: memref<4x256xf32, #tpu.memory_space<vmem>>, %arg4: memref<1x256xf32, #tpu.memory_space<vmem>>, %arg5: memref<3x36x256xf32, #tpu.memory_space<vmem>>, %arg6: memref<3x256xf32, #tpu.memory_space<vmem>>, %arg7: memref<4x256x256xf32, #tpu.memory_space<vmem>>, %arg8: memref<1x1x256xf32, #tpu.memory_space<vmem>>, %arg9: memref<1x256x256xf32, #tpu.memory_space<vmem>>) attributes {dimension_semantics = [#tpu.dimension_semantics<parallel>, #tpu.dimension_semantics<parallel>], iteration_bounds = array<i64: 2, 1>, scalar_prefetch = 0 : i64, scratch_operands = 0 : i64, tpu.core_type = #tpu.core_type<tc>, window_params = [{transform_indices = @transform_0, window_bounds = array<i64: 1, 28, 28, 4>}, {pipeline_mode = #tpu.pipeline_mode<synchronous>, transform_indices = @transform_1, window_bounds = array<i64: 4, 256>}, {pipeline_mode = #tpu.pipeline_mode<synchronous>, transform_indices = @transform_2, window_bounds = array<i64: 1, 256>}, {pipeline_mode = #tpu.pipeline_mode<synchronous>, transform_indices = @transform_3, window_bounds = array<i64: 3, 36, 256>}, {pipeline_mode = #tpu.pipeline_mode<synchronous>, transform_indices = @transform_4, window_bounds = array<i64: 3, 256>}, {pipeline_mode = #tpu.pipeline_mode<synchronous>, transform_indices = @transform_5, window_bounds = array<i64: 4, 256, 256>}, {transform_indices = @transform_6, window_bounds = array<i64: 1, 1, 256>}, {transform_indices = @transform_7, window_bounds = array<i64: 1, 256, 256>}]} {
    %c16_i32 = arith.constant 16 : i32
    %0 = arith.muli %arg1, %c16_i32 : i32
    %1 = tpu.assume_multiple %0, 16 : i32
    %c6_i32 = arith.constant 6 : i32
    %2 = arith.addi %1, %c6_i32 : i32
    %c0 = arith.constant 0 : index
    %3 = arith.index_cast %2 : i32 to index
    %c6 = arith.constant 6 : index
    %c0_0 = arith.constant 0 : index
    %4 = vector.load %arg2[%c0, %3, %c6, %c0_0] : memref<1x28x28x4xf32, #tpu.memory_space<vmem>>, vector<1x16x16x4xf32>
    %5 = vector.shape_cast %4 : vector<1x16x16x4xf32> to vector<16x16x4xf32>
    %6 = vector.shape_cast %5 : vector<16x16x4xf32> to vector<256x4xf32>
    %c0_1 = arith.constant 0 : index
    %c0_2 = arith.constant 0 : index
    %7 = vector.load %arg3[%c0_1, %c0_2] : memref<4x256xf32, #tpu.memory_space<vmem>>, vector<4x256xf32>
    %cst = arith.constant dense<0.000000e+00> : vector<256x256xf32>
    %8 = tpu.matmul %6, %7, %cst {dimension_numbers = #tpu.dot_dimension_numbers<[1], [0], [0], [1], [0, 0, 1, 1], [], []>} : vector<256x4xf32>, vector<4x256xf32>, vector<256x256xf32> -> vector<256x256xf32>
    %c0_3 = arith.constant 0 : index
    %c0_4 = arith.constant 0 : index
    %9 = vector.load %arg4[%c0_3, %c0_4] : memref<1x256xf32, #tpu.memory_space<vmem>>, vector<1x256xf32>
    %10 = vector.broadcast %9 : vector<1x256xf32> to vector<256x256xf32>
    %11 = arith.addf %8, %10 : vector<256x256xf32>
    %cst_5 = arith.constant 0.000000e+00 : f32
    %12 = vector.broadcast %cst_5 : f32 to vector<256x256xf32>
    %13 = arith.maximumf %11, %12 : vector<256x256xf32>
    %c0_6 = arith.constant 0 : index
    %c0_7 = arith.constant 0 : index
    %c0_8 = arith.constant 0 : index
    %14 = vector.load %arg7[%c0_6, %c0_7, %c0_8] : memref<4x256x256xf32, #tpu.memory_space<vmem>>, vector<1x256x256xf32>
    %15 = vector.shape_cast %14 : vector<1x256x256xf32> to vector<256x256xf32>
    %cst_9 = arith.constant dense<0.000000e+00> : vector<256x256xf32>
    %16 = tpu.matmul %13, %15, %cst_9 {dimension_numbers = #tpu.dot_dimension_numbers<[1], [0], [0], [1], [0, 0, 1, 1], [], []>} : vector<256x256xf32>, vector<256x256xf32>, vector<256x256xf32> -> vector<256x256xf32>
    %c4_i32 = arith.constant 4 : i32
    %17 = arith.addi %1, %c4_i32 : i32
    %c0_10 = arith.constant 0 : index
    %18 = arith.index_cast %17 : i32 to index
    %c4 = arith.constant 4 : index
    %c0_11 = arith.constant 0 : index
    %19 = vector.load %arg2[%c0_10, %18, %c4, %c0_11] : memref<1x28x28x4xf32, #tpu.memory_space<vmem>>, vector<1x20x16x4xf32>
    %20 = vector.shape_cast %19 : vector<1x20x16x4xf32> to vector<20x16x4xf32>
    %21 = vector.extract_strided_slice %20 {offsets = [0, 0, 0], sizes = [16, 16, 4], strides = [1, 1, 1]} : vector<20x16x4xf32> to vector<16x16x4xf32>
    %22 = vector.shape_cast %21 : vector<16x16x4xf32> to vector<256x4xf32>
    %23 = vector.extract_strided_slice %20 {offsets = [2, 0, 0], sizes = [16, 16, 4], strides = [1, 1, 1]} : vector<20x16x4xf32> to vector<16x16x4xf32>
    %24 = vector.shape_cast %23 : vector<16x16x4xf32> to vector<256x4xf32>
    %25 = vector.extract_strided_slice %20 {offsets = [4, 0, 0], sizes = [16, 16, 4], strides = [1, 1, 1]} : vector<20x16x4xf32> to vector<16x16x4xf32>
    %26 = vector.shape_cast %25 : vector<16x16x4xf32> to vector<256x4xf32>
    %c4_i32_12 = arith.constant 4 : i32
    %27 = arith.addi %1, %c4_i32_12 : i32
    %c0_13 = arith.constant 0 : index
    %28 = arith.index_cast %27 : i32 to index
    %c6_14 = arith.constant 6 : index
    %c0_15 = arith.constant 0 : index
    %29 = vector.load %arg2[%c0_13, %28, %c6_14, %c0_15] : memref<1x28x28x4xf32, #tpu.memory_space<vmem>>, vector<1x20x16x4xf32>
    %30 = vector.shape_cast %29 : vector<1x20x16x4xf32> to vector<20x16x4xf32>
    %31 = vector.extract_strided_slice %30 {offsets = [0, 0, 0], sizes = [16, 16, 4], strides = [1, 1, 1]} : vector<20x16x4xf32> to vector<16x16x4xf32>
    %32 = vector.shape_cast %31 : vector<16x16x4xf32> to vector<256x4xf32>
    %33 = vector.extract_strided_slice %30 {offsets = [2, 0, 0], sizes = [16, 16, 4], strides = [1, 1, 1]} : vector<20x16x4xf32> to vector<16x16x4xf32>
    %34 = vector.shape_cast %33 : vector<16x16x4xf32> to vector<256x4xf32>
    %35 = vector.extract_strided_slice %30 {offsets = [4, 0, 0], sizes = [16, 16, 4], strides = [1, 1, 1]} : vector<20x16x4xf32> to vector<16x16x4xf32>
    %36 = vector.shape_cast %35 : vector<16x16x4xf32> to vector<256x4xf32>
    %c4_i32_16 = arith.constant 4 : i32
    %37 = arith.addi %1, %c4_i32_16 : i32
    %c0_17 = arith.constant 0 : index
    %38 = arith.index_cast %37 : i32 to index
    %c8 = arith.constant 8 : index
    %c0_18 = arith.constant 0 : index
    %39 = vector.load %arg2[%c0_17, %38, %c8, %c0_18] : memref<1x28x28x4xf32, #tpu.memory_space<vmem>>, vector<1x20x16x4xf32>
    %40 = vector.shape_cast %39 : vector<1x20x16x4xf32> to vector<20x16x4xf32>
    %41 = vector.extract_strided_slice %40 {offsets = [0, 0, 0], sizes = [16, 16, 4], strides = [1, 1, 1]} : vector<20x16x4xf32> to vector<16x16x4xf32>
    %42 = vector.shape_cast %41 : vector<16x16x4xf32> to vector<256x4xf32>
    %43 = vector.extract_strided_slice %40 {offsets = [2, 0, 0], sizes = [16, 16, 4], strides = [1, 1, 1]} : vector<20x16x4xf32> to vector<16x16x4xf32>
    %44 = vector.shape_cast %43 : vector<16x16x4xf32> to vector<256x4xf32>
    %45 = vector.extract_strided_slice %40 {offsets = [4, 0, 0], sizes = [16, 16, 4], strides = [1, 1, 1]} : vector<20x16x4xf32> to vector<16x16x4xf32>
    %46 = vector.shape_cast %45 : vector<16x16x4xf32> to vector<256x4xf32>
    %47 = tpu.concatenate %22, %32, %42, %24, %34, %44, %26, %36, %46 in 1 : vector<256x4xf32>, vector<256x4xf32>, vector<256x4xf32>, vector<256x4xf32>, vector<256x4xf32>, vector<256x4xf32>, vector<256x4xf32>, vector<256x4xf32>, vector<256x4xf32> -> vector<256x36xf32>
    %c0_19 = arith.constant 0 : index
    %c0_20 = arith.constant 0 : index
    %c0_21 = arith.constant 0 : index
    %48 = vector.load %arg5[%c0_19, %c0_20, %c0_21] : memref<3x36x256xf32, #tpu.memory_space<vmem>>, vector<1x36x256xf32>
    %49 = vector.shape_cast %48 : vector<1x36x256xf32> to vector<36x256xf32>
    %cst_22 = arith.constant dense<0.000000e+00> : vector<256x256xf32>
    %50 = tpu.matmul %47, %49, %cst_22 {dimension_numbers = #tpu.dot_dimension_numbers<[1], [0], [0], [1], [0, 0, 1, 1], [], []>} : vector<256x36xf32>, vector<36x256xf32>, vector<256x256xf32> -> vector<256x256xf32>
    %c0_23 = arith.constant 0 : index
    %c0_24 = arith.constant 0 : index
    %51 = vector.load %arg6[%c0_23, %c0_24] : memref<3x256xf32, #tpu.memory_space<vmem>>, vector<1x256xf32>
    %52 = vector.shape_cast %51 : vector<1x256xf32> to vector<256xf32>
    %53 = vector.shape_cast %52 : vector<256xf32> to vector<1x256xf32>
    %54 = vector.broadcast %53 : vector<1x256xf32> to vector<256x256xf32>
    %55 = arith.addf %50, %54 : vector<256x256xf32>
    %cst_25 = arith.constant 0.000000e+00 : f32
    %56 = vector.broadcast %cst_25 : f32 to vector<256x256xf32>
    %57 = arith.maximumf %55, %56 : vector<256x256xf32>
    %c1 = arith.constant 1 : index
    %c0_26 = arith.constant 0 : index
    %c0_27 = arith.constant 0 : index
    %58 = vector.load %arg7[%c1, %c0_26, %c0_27] : memref<4x256x256xf32, #tpu.memory_space<vmem>>, vector<1x256x256xf32>
    %59 = vector.shape_cast %58 : vector<1x256x256xf32> to vector<256x256xf32>
    %cst_28 = arith.constant dense<0.000000e+00> : vector<256x256xf32>
    %60 = tpu.matmul %57, %59, %cst_28 {dimension_numbers = #tpu.dot_dimension_numbers<[1], [0], [0], [1], [0, 0, 1, 1], [], []>} : vector<256x256xf32>, vector<256x256xf32>, vector<256x256xf32> -> vector<256x256xf32>
    %61 = arith.addf %16, %60 : vector<256x256xf32>
    %c2_i32 = arith.constant 2 : i32
    %62 = arith.addi %1, %c2_i32 : i32
    %c0_29 = arith.constant 0 : index
    %63 = arith.index_cast %62 : i32 to index
    %c2 = arith.constant 2 : index
    %c0_30 = arith.constant 0 : index
    %64 = vector.load %arg2[%c0_29, %63, %c2, %c0_30] : memref<1x28x28x4xf32, #tpu.memory_space<vmem>>, vector<1x24x16x4xf32>
    %65 = vector.shape_cast %64 : vector<1x24x16x4xf32> to vector<24x16x4xf32>
    %66 = vector.extract_strided_slice %65 {offsets = [0, 0, 0], sizes = [16, 16, 4], strides = [1, 1, 1]} : vector<24x16x4xf32> to vector<16x16x4xf32>
    %67 = vector.shape_cast %66 : vector<16x16x4xf32> to vector<256x4xf32>
    %68 = vector.extract_strided_slice %65 {offsets = [4, 0, 0], sizes = [16, 16, 4], strides = [1, 1, 1]} : vector<24x16x4xf32> to vector<16x16x4xf32>
    %69 = vector.shape_cast %68 : vector<16x16x4xf32> to vector<256x4xf32>
    %70 = vector.extract_strided_slice %65 {offsets = [8, 0, 0], sizes = [16, 16, 4], strides = [1, 1, 1]} : vector<24x16x4xf32> to vector<16x16x4xf32>
    %71 = vector.shape_cast %70 : vector<16x16x4xf32> to vector<256x4xf32>
    %c2_i32_31 = arith.constant 2 : i32
    %72 = arith.addi %1, %c2_i32_31 : i32
    %c0_32 = arith.constant 0 : index
    %73 = arith.index_cast %72 : i32 to index
    %c6_33 = arith.constant 6 : index
    %c0_34 = arith.constant 0 : index
    %74 = vector.load %arg2[%c0_32, %73, %c6_33, %c0_34] : memref<1x28x28x4xf32, #tpu.memory_space<vmem>>, vector<1x24x16x4xf32>
    %75 = vector.shape_cast %74 : vector<1x24x16x4xf32> to vector<24x16x4xf32>
    %76 = vector.extract_strided_slice %75 {offsets = [0, 0, 0], sizes = [16, 16, 4], strides = [1, 1, 1]} : vector<24x16x4xf32> to vector<16x16x4xf32>
    %77 = vector.shape_cast %76 : vector<16x16x4xf32> to vector<256x4xf32>
    %78 = vector.extract_strided_slice %75 {offsets = [4, 0, 0], sizes = [16, 16, 4], strides = [1, 1, 1]} : vector<24x16x4xf32> to vector<16x16x4xf32>
    %79 = vector.shape_cast %78 : vector<16x16x4xf32> to vector<256x4xf32>
    %80 = vector.extract_strided_slice %75 {offsets = [8, 0, 0], sizes = [16, 16, 4], strides = [1, 1, 1]} : vector<24x16x4xf32> to vector<16x16x4xf32>
    %81 = vector.shape_cast %80 : vector<16x16x4xf32> to vector<256x4xf32>
    %c2_i32_35 = arith.constant 2 : i32
    %82 = arith.addi %1, %c2_i32_35 : i32
    %c0_36 = arith.constant 0 : index
    %83 = arith.index_cast %82 : i32 to index
    %c10 = arith.constant 10 : index
    %c0_37 = arith.constant 0 : index
    %84 = vector.load %arg2[%c0_36, %83, %c10, %c0_37] : memref<1x28x28x4xf32, #tpu.memory_space<vmem>>, vector<1x24x16x4xf32>
    %85 = vector.shape_cast %84 : vector<1x24x16x4xf32> to vector<24x16x4xf32>
    %86 = vector.extract_strided_slice %85 {offsets = [0, 0, 0], sizes = [16, 16, 4], strides = [1, 1, 1]} : vector<24x16x4xf32> to vector<16x16x4xf32>
    %87 = vector.shape_cast %86 : vector<16x16x4xf32> to vector<256x4xf32>
    %88 = vector.extract_strided_slice %85 {offsets = [4, 0, 0], sizes = [16, 16, 4], strides = [1, 1, 1]} : vector<24x16x4xf32> to vector<16x16x4xf32>
    %89 = vector.shape_cast %88 : vector<16x16x4xf32> to vector<256x4xf32>
    %90 = vector.extract_strided_slice %85 {offsets = [8, 0, 0], sizes = [16, 16, 4], strides = [1, 1, 1]} : vector<24x16x4xf32> to vector<16x16x4xf32>
    %91 = vector.shape_cast %90 : vector<16x16x4xf32> to vector<256x4xf32>
    %92 = tpu.concatenate %67, %77, %87, %69, %79, %89, %71, %81, %91 in 1 : vector<256x4xf32>, vector<256x4xf32>, vector<256x4xf32>, vector<256x4xf32>, vector<256x4xf32>, vector<256x4xf32>, vector<256x4xf32>, vector<256x4xf32>, vector<256x4xf32> -> vector<256x36xf32>
    %c1_38 = arith.constant 1 : index
    %c0_39 = arith.constant 0 : index
    %c0_40 = arith.constant 0 : index
    %93 = vector.load %arg5[%c1_38, %c0_39, %c0_40] : memref<3x36x256xf32, #tpu.memory_space<vmem>>, vector<1x36x256xf32>
    %94 = vector.shape_cast %93 : vector<1x36x256xf32> to vector<36x256xf32>
    %cst_41 = arith.constant dense<0.000000e+00> : vector<256x256xf32>
    %95 = tpu.matmul %92, %94, %cst_41 {dimension_numbers = #tpu.dot_dimension_numbers<[1], [0], [0], [1], [0, 0, 1, 1], [], []>} : vector<256x36xf32>, vector<36x256xf32>, vector<256x256xf32> -> vector<256x256xf32>
    %c1_42 = arith.constant 1 : index
    %c0_43 = arith.constant 0 : index
    %96 = vector.load %arg6[%c1_42, %c0_43] : memref<3x256xf32, #tpu.memory_space<vmem>>, vector<1x256xf32>
    %97 = vector.shape_cast %96 : vector<1x256xf32> to vector<256xf32>
    %98 = vector.shape_cast %97 : vector<256xf32> to vector<1x256xf32>
    %99 = vector.broadcast %98 : vector<1x256xf32> to vector<256x256xf32>
    %100 = arith.addf %95, %99 : vector<256x256xf32>
    %cst_44 = arith.constant 0.000000e+00 : f32
    %101 = vector.broadcast %cst_44 : f32 to vector<256x256xf32>
    %102 = arith.maximumf %100, %101 : vector<256x256xf32>
    %c2_45 = arith.constant 2 : index
    %c0_46 = arith.constant 0 : index
    %c0_47 = arith.constant 0 : index
    %103 = vector.load %arg7[%c2_45, %c0_46, %c0_47] : memref<4x256x256xf32, #tpu.memory_space<vmem>>, vector<1x256x256xf32>
    %104 = vector.shape_cast %103 : vector<1x256x256xf32> to vector<256x256xf32>
    %cst_48 = arith.constant dense<0.000000e+00> : vector<256x256xf32>
    %105 = tpu.matmul %102, %104, %cst_48 {dimension_numbers = #tpu.dot_dimension_numbers<[1], [0], [0], [1], [0, 0, 1, 1], [], []>} : vector<256x256xf32>, vector<256x256xf32>, vector<256x256xf32> -> vector<256x256xf32>
    %106 = arith.addf %61, %105 : vector<256x256xf32>
    %c0_i32 = arith.constant 0 : i32
    %107 = arith.addi %1, %c0_i32 : i32
    %c0_49 = arith.constant 0 : index
    %108 = arith.index_cast %107 : i32 to index
    %c0_50 = arith.constant 0 : index
    %c0_51 = arith.constant 0 : index
    %109 = vector.load %arg2[%c0_49, %108, %c0_50, %c0_51] : memref<1x28x28x4xf32, #tpu.memory_space<vmem>>, vector<1x28x16x4xf32>
    %110 = vector.shape_cast %109 : vector<1x28x16x4xf32> to vector<28x16x4xf32>
    %111 = vector.extract_strided_slice %110 {offsets = [0, 0, 0], sizes = [16, 16, 4], strides = [1, 1, 1]} : vector<28x16x4xf32> to vector<16x16x4xf32>
    %112 = vector.shape_cast %111 : vector<16x16x4xf32> to vector<256x4xf32>
    %113 = vector.extract_strided_slice %110 {offsets = [6, 0, 0], sizes = [16, 16, 4], strides = [1, 1, 1]} : vector<28x16x4xf32> to vector<16x16x4xf32>
    %114 = vector.shape_cast %113 : vector<16x16x4xf32> to vector<256x4xf32>
    %115 = vector.extract_strided_slice %110 {offsets = [12, 0, 0], sizes = [16, 16, 4], strides = [1, 1, 1]} : vector<28x16x4xf32> to vector<16x16x4xf32>
    %116 = vector.shape_cast %115 : vector<16x16x4xf32> to vector<256x4xf32>
    %c0_i32_52 = arith.constant 0 : i32
    %117 = arith.addi %1, %c0_i32_52 : i32
    %c0_53 = arith.constant 0 : index
    %118 = arith.index_cast %117 : i32 to index
    %c6_54 = arith.constant 6 : index
    %c0_55 = arith.constant 0 : index
    %119 = vector.load %arg2[%c0_53, %118, %c6_54, %c0_55] : memref<1x28x28x4xf32, #tpu.memory_space<vmem>>, vector<1x28x16x4xf32>
    %120 = vector.shape_cast %119 : vector<1x28x16x4xf32> to vector<28x16x4xf32>
    %121 = vector.extract_strided_slice %120 {offsets = [0, 0, 0], sizes = [16, 16, 4], strides = [1, 1, 1]} : vector<28x16x4xf32> to vector<16x16x4xf32>
    %122 = vector.shape_cast %121 : vector<16x16x4xf32> to vector<256x4xf32>
    %123 = vector.extract_strided_slice %120 {offsets = [6, 0, 0], sizes = [16, 16, 4], strides = [1, 1, 1]} : vector<28x16x4xf32> to vector<16x16x4xf32>
    %124 = vector.shape_cast %123 : vector<16x16x4xf32> to vector<256x4xf32>
    %125 = vector.extract_strided_slice %120 {offsets = [12, 0, 0], sizes = [16, 16, 4], strides = [1, 1, 1]} : vector<28x16x4xf32> to vector<16x16x4xf32>
    %126 = vector.shape_cast %125 : vector<16x16x4xf32> to vector<256x4xf32>
    %c0_i32_56 = arith.constant 0 : i32
    %127 = arith.addi %1, %c0_i32_56 : i32
    %c0_57 = arith.constant 0 : index
    %128 = arith.index_cast %127 : i32 to index
    %c12 = arith.constant 12 : index
    %c0_58 = arith.constant 0 : index
    %129 = vector.load %arg2[%c0_57, %128, %c12, %c0_58] : memref<1x28x28x4xf32, #tpu.memory_space<vmem>>, vector<1x28x16x4xf32>
    %130 = vector.shape_cast %129 : vector<1x28x16x4xf32> to vector<28x16x4xf32>
    %131 = vector.extract_strided_slice %130 {offsets = [0, 0, 0], sizes = [16, 16, 4], strides = [1, 1, 1]} : vector<28x16x4xf32> to vector<16x16x4xf32>
    %132 = vector.shape_cast %131 : vector<16x16x4xf32> to vector<256x4xf32>
    %133 = vector.extract_strided_slice %130 {offsets = [6, 0, 0], sizes = [16, 16, 4], strides = [1, 1, 1]} : vector<28x16x4xf32> to vector<16x16x4xf32>
    %134 = vector.shape_cast %133 : vector<16x16x4xf32> to vector<256x4xf32>
    %135 = vector.extract_strided_slice %130 {offsets = [12, 0, 0], sizes = [16, 16, 4], strides = [1, 1, 1]} : vector<28x16x4xf32> to vector<16x16x4xf32>
    %136 = vector.shape_cast %135 : vector<16x16x4xf32> to vector<256x4xf32>
    %137 = tpu.concatenate %112, %122, %132, %114, %124, %134, %116, %126, %136 in 1 : vector<256x4xf32>, vector<256x4xf32>, vector<256x4xf32>, vector<256x4xf32>, vector<256x4xf32>, vector<256x4xf32>, vector<256x4xf32>, vector<256x4xf32>, vector<256x4xf32> -> vector<256x36xf32>
    %c2_59 = arith.constant 2 : index
    %c0_60 = arith.constant 0 : index
    %c0_61 = arith.constant 0 : index
    %138 = vector.load %arg5[%c2_59, %c0_60, %c0_61] : memref<3x36x256xf32, #tpu.memory_space<vmem>>, vector<1x36x256xf32>
    %139 = vector.shape_cast %138 : vector<1x36x256xf32> to vector<36x256xf32>
    %cst_62 = arith.constant dense<0.000000e+00> : vector<256x256xf32>
    %140 = tpu.matmul %137, %139, %cst_62 {dimension_numbers = #tpu.dot_dimension_numbers<[1], [0], [0], [1], [0, 0, 1, 1], [], []>} : vector<256x36xf32>, vector<36x256xf32>, vector<256x256xf32> -> vector<256x256xf32>
    %c2_63 = arith.constant 2 : index
    %c0_64 = arith.constant 0 : index
    %141 = vector.load %arg6[%c2_63, %c0_64] : memref<3x256xf32, #tpu.memory_space<vmem>>, vector<1x256xf32>
    %142 = vector.shape_cast %141 : vector<1x256xf32> to vector<256xf32>
    %143 = vector.shape_cast %142 : vector<256xf32> to vector<1x256xf32>
    %144 = vector.broadcast %143 : vector<1x256xf32> to vector<256x256xf32>
    %145 = arith.addf %140, %144 : vector<256x256xf32>
    %cst_65 = arith.constant 0.000000e+00 : f32
    %146 = vector.broadcast %cst_65 : f32 to vector<256x256xf32>
    %147 = arith.maximumf %145, %146 : vector<256x256xf32>
    %c3 = arith.constant 3 : index
    %c0_66 = arith.constant 0 : index
    %c0_67 = arith.constant 0 : index
    %148 = vector.load %arg7[%c3, %c0_66, %c0_67] : memref<4x256x256xf32, #tpu.memory_space<vmem>>, vector<1x256x256xf32>
    %149 = vector.shape_cast %148 : vector<1x256x256xf32> to vector<256x256xf32>
    %cst_68 = arith.constant dense<0.000000e+00> : vector<256x256xf32>
    %150 = tpu.matmul %147, %149, %cst_68 {dimension_numbers = #tpu.dot_dimension_numbers<[1], [0], [0], [1], [0, 0, 1, 1], [], []>} : vector<256x256xf32>, vector<256x256xf32>, vector<256x256xf32> -> vector<256x256xf32>
    %151 = arith.addf %106, %150 : vector<256x256xf32>
    %c0_69 = arith.constant 0 : index
    %c0_70 = arith.constant 0 : index
    %c0_71 = arith.constant 0 : index
    %152 = vector.load %arg8[%c0_69, %c0_70, %c0_71] : memref<1x1x256xf32, #tpu.memory_space<vmem>>, vector<1x1x256xf32>
    %153 = vector.shape_cast %152 : vector<1x1x256xf32> to vector<1x256xf32>
    %154 = vector.broadcast %153 : vector<1x256xf32> to vector<256x256xf32>
    %155 = arith.addf %151, %154 : vector<256x256xf32>
    %cst_72 = arith.constant 0.000000e+00 : f32
    %156 = vector.broadcast %cst_72 : f32 to vector<256x256xf32>
    %157 = arith.maximumf %155, %156 : vector<256x256xf32>
    %c0_73 = arith.constant 0 : index
    %c0_74 = arith.constant 0 : index
    %c0_75 = arith.constant 0 : index
    %158 = vector.load %arg9[%c0_73, %c0_74, %c0_75] : memref<1x256x256xf32, #tpu.memory_space<vmem>>, vector<1x256x256xf32>
    %159 = vector.shape_cast %158 : vector<1x256x256xf32> to vector<256x256xf32>
    %160 = vector.shape_cast %157 : vector<256x256xf32> to vector<1x256x256xf32>
    tpu.vector_store %arg9[%c0_73, %c0_74, %c0_75], %160 {strides = array<i32>} : memref<1x256x256xf32, #tpu.memory_space<vmem>>, vector<1x256x256xf32>,
    return
  }
  func.func @transform_0(%arg0: i32, %arg1: i32) -> (i32, i32, i32, i32) {
    %c0_i32 = arith.constant 0 : i32
    %c0_i32_0 = arith.constant 0 : i32
    %c0_i32_1 = arith.constant 0 : i32
    %c0_i32_2 = arith.constant 0 : i32
    return %arg0, %c0_i32, %c0_i32_0, %c0_i32_1 : i32, i32, i32, i32
  }
  func.func @transform_1(%arg0: i32, %arg1: i32) -> (i32, i32) {
    %c0_i32 = arith.constant 0 : i32
    %c0_i32_0 = arith.constant 0 : i32
    %c0_i32_1 = arith.constant 0 : i32
    return %c0_i32, %c0_i32_0 : i32, i32
  }
  func.func @transform_2(%arg0: i32, %arg1: i32) -> (i32, i32) {
    %c0_i32 = arith.constant 0 : i32
    %c0_i32_0 = arith.constant 0 : i32
    %c0_i32_1 = arith.constant 0 : i32
    return %c0_i32, %c0_i32_0 : i32, i32
  }
  func.func @transform_3(%arg0: i32, %arg1: i32) -> (i32, i32, i32) {
    %c0_i32 = arith.constant 0 : i32
    %c0_i32_0 = arith.constant 0 : i32
    %c0_i32_1 = arith.constant 0 : i32
    %c0_i32_2 = arith.constant 0 : i32
    return %c0_i32, %c0_i32_0, %c0_i32_1 : i32, i32, i32
  }
  func.func @transform_4(%arg0: i32, %arg1: i32) -> (i32, i32) {
    %c0_i32 = arith.constant 0 : i32
    %c0_i32_0 = arith.constant 0 : i32
    %c0_i32_1 = arith.constant 0 : i32
    return %c0_i32, %c0_i32_0 : i32, i32
  }
  func.func @transform_5(%arg0: i32, %arg1: i32) -> (i32, i32, i32) {
    %c0_i32 = arith.constant 0 : i32
    %c0_i32_0 = arith.constant 0 : i32
    %c0_i32_1 = arith.constant 0 : i32
    %c0_i32_2 = arith.constant 0 : i32
    return %c0_i32, %c0_i32_0, %c0_i32_1 : i32, i32, i32
  }
  func.func @transform_6(%arg0: i32, %arg1: i32) -> (i32, i32, i32) {
    %c0_i32 = arith.constant 0 : i32
    %c0_i32_0 = arith.constant 0 : i32
    %c0_i32_1 = arith.constant 0 : i32
    return %arg0, %c0_i32, %c0_i32_0 : i32, i32, i32
  }
  func.func @transform_7(%arg0: i32, %arg1: i32) -> (i32, i32, i32) {
    %c0_i32 = arith.constant 0 : i32
    %c0_i32_0 = arith.constant 0 : i32
    return %arg0, %arg1, %c0_i32 : i32, i32, i32
  }
}

</mosaic_0001>

<bundles_post_ra>
// kernel: tpu_custom_call.1
= control target key start
LH: loop header
LB: loop body
LE: loop exit
PB: predicated region body
PF: predicated region fallthrough
CT: control target
= control target key end

     0   :  { %s14953_s0 = inlined_call_operand.vmem [shape: f32[2,28,28,4], index: 0, kind: input, shape index: {}]   ;;  %s14954_s1 = inlined_call_operand.vmem [shape: f32[4,256], index: 1, kind: input, shape index: {}]   ;;  %s14955_s2 = inlined_call_operand.vmem [shape: f32[1,256], index: 2, kind: input, shape index: {}]   ;;  %s14956_s3 = inlined_call_operand.vmem [shape: f32[3,36,256], index: 3, kind: input, shape index: {}]   ;;  %s14957_s4 = inlined_call_operand.vmem [shape: f32[3,256], index: 4, kind: input, shape index: {}]   ;;  %s14958_s5 = inlined_call_operand.hbm [shape: f32[4,256,256], index: 5, kind: input, shape index: {}]   ;;  %s14959_s6 = inlined_call_operand.vmem [shape: f32[2,1,256], index: 6, kind: input, shape index: {}]   ;;  %s14960_s7 = inlined_call_operand.hbm [shape: f32[2,256,256], index: 7, kind: output, shape index: {}]  }
   0x1   :  { %15010 = sst [smem:[#allocation186_spill]] %s14953_s0 }
   0x2   :  { %12 = vsyncpa [#allocation3], 0 }
   0x3   :  { %13 = vsyncpa [#allocation4], 0 }
   0x4   :  { %15 = vsyncpa [#allocation4 + $0x1], 0  ;;  %s8785_s24 = smov 0   ;;  %s8787_s25 = smov 0  }
   0x5   :  { %s8789_s26 = smov 0   ;;  %s8791_s27 = smov 0  }
   0x6   :  { %s8793_s28 = smov 0   ;;  %s8795_s29 = smov 0  }
   0x7 LB: > { %s7768_s30 = sadd.s32 4294967295, %s8729_s29   ;;  %s7769_s8 = sadd.s32 4294967294, %s8729_s29   ;;  %s8729_s29 = sphi %s8795_s29, %s21_s29   ;;  %s8725_s28 = sphi %s8793_s28, %s15918_s28   ;;  %s8721_s27 = sphi %s8791_s27, %s15917_s27   ;;  %s8717_s26 = sphi %s8789_s26, %s15916_s26   ;;  %s8713_s25 = sphi %s8787_s25, %s15915_s25   ;;  %s8709_s24 = sphi %s8785_s24, %s15914_s24  }
   0x8   : > { %s33_s9 = sadd.s32 1, %s8725_s28  ;;  %s199_s10 = sadd.s32 1, %s8717_s26 }
   0x9   : > { %p35_p0 = scmp.ge.s32.totalorder %s33_s9, 2  ;;  %p209_p1 = scmp.ne.s32.totalorder %s8717_s26, %s8713_s25 }
   0xa   : > { %p210_p2 = scmp.eq.s32.totalorder %s7768_s30, 1  ;;  %p215_p3 = scmp.ne.s32.totalorder %s8713_s25, %s8709_s24 }
   0xb   : > { %s15920_s9 = smov (%p35_p0, %s33_s9), 0  ;;  %p216_p5 = scmp.eq.s32.totalorder %s7769_s8, 1 }
   0xc   : > { %p8825_p4 = por %p210_p2, %p209_p1  ;;  %s194_s12 = ssub.s32 %s8725_s28, %s15920_s9 }
   0xd   : > { %p7770_p6 = scmp.ge.s32.totalorder %s8729_s29, 1  ;;  %p197_p7 = scmp.eq.s32.totalorder %s194_s12, 0 }
   0xe   : > { %p8832_p8 = por %p216_p5, %p215_p3  ;;  %p223_p9 = scmp.lt.s32.totalorder %s8729_s29, 3 }
   0xf   : > { %s8838_s14 = scalar_select %p197_p7, %s8717_s26, %s199_s10  }
  0x10   : > { %p8840_p10 = pnand %p7770_p6, %p223_p9  ;;  %p8844_p11 = scmp.eq.s32.totalorder %s7768_s30, 0 }
  0x11   : > { %s8731_s17 = smov [#allocation2]  }
  0x12   : > { %p8285_p12 = pneg %p8840_p10  ;;  %s247_s18 = sshll.u32 %s8731_s17, 4  ;;  %s248_s18 = int_to_ptr.vmem [resolvable:$true] %s247_s18 }
  0x13   : > { %s8634_s19 = scalar_lea.vmem %s248_s18, 32768  ;;  %p8642_p5 = scmp.lt.s32.totalorder %s248_s18, %s248_s18 }
  0x14   : > { %p8286_p13 = pnand %p8844_p11, %p8285_p12  ;;  %p8635_p1 = scmp.ne.s32.totalorder %s248_s18, %s8634_s19 }
  0x15   : > { %p8643_p6 = scmp.lt.s32.totalorder %s8634_s19, %s8634_s19 }
  0x16   : > { %p8625_p0 = pneg %p8286_p13 }
  0x17   : > { %p8644_p7 = por %p8643_p6, %p8642_p5 }
  0x18   : > { %p8637_p2 = pnand %p8635_p1, %p8625_p0 }
  0x1a   : > { %p8638_p3 = pneg %p8637_p2 }
  0x1c   : > { %p8645_p9 = pnand %p8644_p7, %p8638_p3 }
  0x1e   : > { %8648 = shalt.err (!%p8645_p9)
}
  0x1f   : > { %s8732_s20 = smov 256   ;;  %s8733_s21 = smov 16  }
  0x20   : > { %8288 = dma.hbm_to_vmem [thread:$0]  (!%p8286_p13), %s14958_s5, 32768, %s248_s18, [#allocation3], %s8732_s20, %s8732_s20, %s8733_s21  }
  0x21   : > { %278 = sbr.rel (%p8840_p10) target bundleno = 2123 (0x84b), region = 48 }
  0x26   : > { %8700 = dma.done.wait (%p8844_p11), [#allocation3], 32768  }
  0x27   : > { %8702 = vsyncadd (%p8844_p11), [#allocation3], 4294934528  ;;  %p314_p12 = scmp.lt.s32.totalorder %s8721_s27, 1  ;;  %s15015_s0 = sld [smem:[#allocation186_spill]]  ;;  %vm472_vm0 = vcmask 1043456   ;;  %vm375_vm1 = vcmask 31744  }
  0x28   : > { %s15006_s15 = smov 4   ;;  %s15004_s16 = smov 8   ;;  %vm1901_vm2 = vcmask 64512   ;;  %vm1934_vm3 = vcmask 97280   ;;  %vm1967_vm4 = vcmask 130048   ;;  %vm2000_vm5 = vcmask 162816  }
  0x29   : > { %s8863_s30 = scalar_select %p314_p12, %s8721_s27, 1  ;;  %vm2033_vm6 = vcmask 195584   ;;  %vm2066_vm7 = vcmask 228352   ;;  %vm2099_vm8 = vcmask 261120   ;;  %vm2154_vm9 = vcmask 293888  }
  0x2a   : > { %s14996_s18 = smov 12   ;;  %s14994_s19 = smov 16  }
  0x2b   : > { %s8278_s8 = smul.u32 896, %s8863_s30  ;;  %s14992_s20 = smov 20  }
  0x2c   : > { %s14990_s21 = smov 24   ;;  %s15008_s22 = smov 28  }
  0x2d   : > { %s8869_s17 = scalar_lea.vmem %s15015_s0, %s8278_s8  ;;  %s15495_s12 = smov 20  }
  0x2e   : > { %v7886_v0 = vld [vmem:[%s8869_s17 + $0xa6] sm:$0xff]  ;;  %v7887_v2 = vld [vmem:[%s8869_s17 + $0xae] sm:$0xff]  ;;  %s15608_s23 = smov 4   ;;  %s15616_s8 = smov 28  }
  0x2f   : > { %v7884_v1 = vld [vmem:[%s8869_s17 + $0x86] sm:$0xff]  ;;  %1021 = vrot.lane.b32.xlu1 %v7886_v0, %s15006_s15  ;;  %v7885_v3 = vld [vmem:[%s8869_s17 + $0x8e] sm:$0xff] }
  0x30   : > { %1017 = vrot.lane.b32.xlu0 %v7884_v1, %s15006_s15  ;;  %v8880_v4 = vld [vmem:[%s8869_s17 + $0xce] sm:$0xff]  ;;  %v8883_v5 = vld [vmem:[%s8869_s17 + $0xc6] sm:$0xff] }
  0x31   : > { %v8890_v6 = vld [vmem:[%s8869_s17 + $0xee] sm:$0xff]  ;;  %v8893_v7 = vld [vmem:[%s8869_s17 + $0xe6] sm:$0xff] }
  0x32   : > { %v8900_v8 = vld [vmem:[%s8869_s17 + $0x10e] sm:$0xff]  ;;  %v8903_v9 = vld [vmem:[%s8869_s17 + $0x106] sm:$0xff] }
  0x33   : > { %1023 = vrot.lane.b32.xlu1 %v7887_v2, %s15006_s15  ;;  %v8910_v10 = vld [vmem:[%s8869_s17 + $0x12e] sm:$0xff]  ;;  %v8913_v11 = vld [vmem:[%s8869_s17 + $0x126] sm:$0xff] }
  0x34   : > { %1019 = vrot.lane.b32.xlu0 %v7885_v3, %s15006_s15  ;;  %v8920_v12 = vld [vmem:[%s8869_s17 + $0x14e] sm:$0xff]  ;;  %v8923_v13 = vld [vmem:[%s8869_s17 + $0x146] sm:$0xff] }
  0x35   : > { %v8930_v14 = vld [vmem:[%s8869_s17 + $0x16e] sm:$0xff]  ;;  %v8933_v15 = vld [vmem:[%s8869_s17 + $0x166] sm:$0xff] }
  0x36   : > { %v8940_v16 = vld [vmem:[%s8869_s17 + $0x18e] sm:$0xff]  ;;  %v8943_v17 = vld [vmem:[%s8869_s17 + $0x186] sm:$0xff] }
  0x37   : > { %1027 = vrot.lane.b32.xlu1 %v8880_v4, %s15006_s15  ;;  %v8950_v18 = vld [vmem:[%s8869_s17 + $0x1ae] sm:$0xff]  ;;  %v8953_v19 = vld [vmem:[%s8869_s17 + $0x1a6] sm:$0xff] }
  0x38   : > { %1025 = vrot.lane.b32.xlu0 %v8883_v5, %s15006_s15  ;;  %v8960_v20 = vld [vmem:[%s8869_s17 + $0x1ce] sm:$0xff]  ;;  %v8963_v21 = vld [vmem:[%s8869_s17 + $0x1c6] sm:$0xff] }
  0x39   : > { %v8970_v22 = vld [vmem:[%s8869_s17 + $0x1ee] sm:$0xff]  ;;  %v8973_v23 = vld [vmem:[%s8869_s17 + $0x1e6] sm:$0xff] }
  0x3a   : > { %v8980_v24 = vld [vmem:[%s8869_s17 + $0x20e] sm:$0xff]  ;;  %v8983_v25 = vld [vmem:[%s8869_s17 + $0x206] sm:$0xff] }
  0x3b   : > { %1031 = vrot.lane.b32.xlu1 %v8890_v6, %s15006_s15  ;;  %v8990_v26 = vld [vmem:[%s8869_s17 + $0x22e] sm:$0xff]  ;;  %v8993_v27 = vld [vmem:[%s8869_s17 + $0x226] sm:$0xff] }
  0x3c   : > { %1029 = vrot.lane.b32.xlu0 %v8893_v7, %s15006_s15  ;;  %v9000_v28 = vld [vmem:[%s8869_s17 + $0x24e] sm:$0xff]  ;;  %v9003_v29 = vld [vmem:[%s8869_s17 + $0x246] sm:$0xff] }
  0x3d   : > { %v9010_v30 = vld [vmem:[%s8869_s17 + $0x26e] sm:$0xff]  ;;  %v9013_v31 = vld [vmem:[%s8869_s17 + $0x266] sm:$0xff] }
  0x3e   : > { %v7925_v32 = vld [vmem:[%s8869_s17 + $0x90] sm:$0xff]  ;;  %v7924_v33 = vld [vmem:[%s8869_s17 + $0x88] sm:$0xff] }
  0x3f   : > { %1035 = vrot.lane.b32.xlu1 %v8900_v8, %s15006_s15  ;;  %v7927_v34 = vld [vmem:[%s8869_s17 + $0xb0] sm:$0xff]  ;;  %v7926_v35 = vld [vmem:[%s8869_s17 + $0xa8] sm:$0xff] }
  0x40   : > { %1033 = vrot.lane.b32.xlu0 %v8903_v9, %s15006_s15  ;;  %v9028_v36 = vld [vmem:[%s8869_s17 + $0xd0] sm:$0xff]  ;;  %v9031_v37 = vld [vmem:[%s8869_s17 + $0xc8] sm:$0xff] }
  0x41   : > { %v9038_v38 = vld [vmem:[%s8869_s17 + $0xf0] sm:$0xff]  ;;  %v9041_v39 = vld [vmem:[%s8869_s17 + $0xe8] sm:$0xff] }
  0x42   : > { %v9048_v40 = vld [vmem:[%s8869_s17 + $0x110] sm:$0xff]  ;;  %v9051_v41 = vld [vmem:[%s8869_s17 + $0x108] sm:$0xff] }
  0x43   : > { %1039 = vrot.lane.b32.xlu1 %v8910_v10, %s15006_s15  ;;  %v9058_v42 = vld [vmem:[%s8869_s17 + $0x130] sm:$0xff]  ;;  %v9061_v43 = vld [vmem:[%s8869_s17 + $0x128] sm:$0xff] }
  0x44   : > { %1037 = vrot.lane.b32.xlu0 %v8913_v11, %s15006_s15  ;;  %v9068_v44 = vld [vmem:[%s8869_s17 + $0x150] sm:$0xff]  ;;  %v9071_v45 = vld [vmem:[%s8869_s17 + $0x148] sm:$0xff] }
  0x45   : > { %v9078_v46 = vld [vmem:[%s8869_s17 + $0x170] sm:$0xff]  ;;  %v9081_v47 = vld [vmem:[%s8869_s17 + $0x168] sm:$0xff] }
  0x46   : > { %v9088_v48 = vld [vmem:[%s8869_s17 + $0x190] sm:$0xff]  ;;  %v9091_v49 = vld [vmem:[%s8869_s17 + $0x188] sm:$0xff] }
  0x47   : > { %1043 = vrot.lane.b32.xlu1 %v8920_v12, %s15006_s15  ;;  %v9098_v50 = vld [vmem:[%s8869_s17 + $0x1b0] sm:$0xff]  ;;  %v9101_v51 = vld [vmem:[%s8869_s17 + $0x1a8] sm:$0xff] }
  0x48   : > { %1041 = vrot.lane.b32.xlu0 %v8923_v13, %s15006_s15  ;;  %v9108_v52 = vld [vmem:[%s8869_s17 + $0x1d0] sm:$0xff]  ;;  %v9111_v53 = vld [vmem:[%s8869_s17 + $0x1c8] sm:$0xff] }
  0x49   : > { %v9118_v54 = vld [vmem:[%s8869_s17 + $0x1f0] sm:$0xff]  ;;  %v9121_v55 = vld [vmem:[%s8869_s17 + $0x1e8] sm:$0xff] }
  0x4a   : > { %v9128_v56 = vld [vmem:[%s8869_s17 + $0x210] sm:$0xff]  ;;  %v9131_v57 = vld [vmem:[%s8869_s17 + $0x208] sm:$0xff] }
  0x4b   : > { %1047 = vrot.lane.b32.xlu1 %v8930_v14, %s15006_s15  ;;  %v9138_v58 = vld [vmem:[%s8869_s17 + $0x230] sm:$0xff]  ;;  %v9141_v59 = vld [vmem:[%s8869_s17 + $0x228] sm:$0xff] }
  0x4c   : > { %1045 = vrot.lane.b32.xlu0 %v8933_v15, %s15006_s15  ;;  %v9152_v62 = vld [vmem:[%s8869_s17 + $0x250] sm:$0xff]  ;;  %v9155_v63 = vld [vmem:[%s8869_s17 + $0x248] sm:$0xff] }
  0x4d   : > { %v9166_v2 = vld [vmem:[%s8869_s17 + $0x270] sm:$0xff]  ;;  %v9169_v3 = vld [vmem:[%s8869_s17 + $0x268] sm:$0xff] }
  0x4e   : > { %15020 = vst [vmem:[#allocation12_spill] sm:$0xff] %v9169_v3 }
  0x4f   : > { %1051 = vrot.lane.b32.xlu1 %v8940_v16, %s15006_s15 }
  0x50   : > { %1049 = vrot.lane.b32.xlu0 %v8943_v17, %s15006_s15 }
  0x53   : > { %1055 = vrot.lane.b32.xlu1 %v8950_v18, %s15006_s15 }
  0x54   : > { %1053 = vrot.lane.b32.xlu0 %v8953_v19, %s15006_s15 }
  0x57   : > { %1059 = vrot.lane.b32.xlu1 %v8960_v20, %s15006_s15 }
  0x58   : > { %1057 = vrot.lane.b32.xlu0 %v8963_v21, %s15006_s15 }
  0x5b   : > { %1063 = vrot.lane.b32.xlu1 %v8970_v22, %s15006_s15 }
  0x5c   : > { %1061 = vrot.lane.b32.xlu0 %v8973_v23, %s15006_s15 }
  0x5f   : > { %1067 = vrot.lane.b32.xlu1 %v8980_v24, %s15006_s15 }
  0x60   : > { %1065 = vrot.lane.b32.xlu0 %v8983_v25, %s15006_s15 }
  0x63   : > { %1071 = vrot.lane.b32.xlu1 %v8990_v26, %s15006_s15 }
  0x64   : > { %1069 = vrot.lane.b32.xlu0 %v8993_v27, %s15006_s15 }
  0x67   : > { %1075 = vrot.lane.b32.xlu1 %v9000_v28, %s15006_s15 }
  0x68   : > { %1073 = vrot.lane.b32.xlu0 %v9003_v29, %s15006_s15 }
  0x6b   : > { %1079 = vrot.lane.b32.xlu1 %v9010_v30, %s15006_s15 }
  0x6c   : > { %1077 = vrot.lane.b32.xlu0 %v9013_v31, %s15006_s15 }
  0x6f   : > { %1147 = vrot.lane.b32.xlu1 %v7925_v32, %s15004_s16 }
  0x70   : > { %1145 = vrot.lane.b32.xlu0 %v7924_v33, %s15004_s16 }
  0x73   : > { %1151 = vrot.lane.b32.xlu1 %v7927_v34, %s15004_s16 }
  0x74   : > { %1149 = vrot.lane.b32.xlu0 %v7926_v35, %s15004_s16 }
  0x77   : > { %1155 = vrot.lane.b32.xlu1 %v9028_v36, %s15004_s16 }
  0x78   : > { %1153 = vrot.lane.b32.xlu0 %v9031_v37, %s15004_s16 }
  0x7b   : > { %1159 = vrot.lane.b32.xlu1 %v9038_v38, %s15004_s16 }
  0x7c   : > { %1157 = vrot.lane.b32.xlu0 %v9041_v39, %s15004_s16 }
  0x7f   : > { %1163 = vrot.lane.b32.xlu1 %v9048_v40, %s15004_s16 }
  0x80   : > { %1161 = vrot.lane.b32.xlu0 %v9051_v41, %s15004_s16 }
  0x83   : > { %1167 = vrot.lane.b32.xlu1 %v9058_v42, %s15004_s16 }
  0x84   : > { %1165 = vrot.lane.b32.xlu0 %v9061_v43, %s15004_s16 }
  0x87   : > { %1171 = vrot.lane.b32.xlu1 %v9068_v44, %s15004_s16 }
  0x88   : > { %1169 = vrot.lane.b32.xlu0 %v9071_v45, %s15004_s16 }
  0x8b   : > { %1175 = vrot.lane.b32.xlu1 %v9078_v46, %s15004_s16 }
  0x8c   : > { %1173 = vrot.lane.b32.xlu0 %v9081_v47, %s15004_s16 }
  0x8f   : > { %1179 = vrot.lane.b32.xlu1 %v9088_v48, %s15004_s16 }
  0x90   : > { %1177 = vrot.lane.b32.xlu0 %v9091_v49, %s15004_s16 }
  0x93   : > { %1183 = vrot.lane.b32.xlu1 %v9098_v50, %s15004_s16 }
  0x94   : > { %1181 = vrot.lane.b32.xlu0 %v9101_v51, %s15004_s16 }
  0x97   : > { %1187 = vrot.lane.b32.xlu1 %v9108_v52, %s15004_s16 }
  0x98   : > { %1185 = vrot.lane.b32.xlu0 %v9111_v53, %s15004_s16 }
  0x9b   : > { %1191 = vrot.lane.b32.xlu1 %v9118_v54, %s15004_s16 }
  0x9c   : > { %1189 = vrot.lane.b32.xlu0 %v9121_v55, %s15004_s16 }
  0x9f   : > { %1195 = vrot.lane.b32.xlu1 %v9128_v56, %s15004_s16 }
  0xa0   : > { %1193 = vrot.lane.b32.xlu0 %v9131_v57, %s15004_s16 }
  0xa1   : > { %v9143_v60 = vpop.permute.xlu1 %1021 }
  0xa2   : > { %15016 = vst [vmem:[#allocation8_spill] sm:$0xff] %v9143_v60  ;;  %v9145_v61 = vpop.permute.xlu0 %1017  ;;  %v7848_v60 = vld [vmem:[%s8869_s17 + $0xc4] sm:$0xff] }
  0xa3   : > { %15017 = vst [vmem:[#allocation9_spill] sm:$0xff] %v9145_v61  ;;  %1199 = vrot.lane.b32.xlu1 %v9138_v58, %s15004_s16  ;;  %v7850_v61 = vld [vmem:[%s8869_s17 + $0xe4] sm:$0xff] }
  0xa4   : > { %1197 = vrot.lane.b32.xlu0 %v9141_v59, %s15004_s16 }
  0xa5   : > { %v9157_v0 = vpop.permute.xlu1 %1023 }
  0xa6   : > { %15018 = vst [vmem:[#allocation10_spill] sm:$0xff] %v9157_v0  ;;  %v9159_v1 = vpop.permute.xlu0 %1019  ;;  %v7849_v0 = vld [vmem:[%s8869_s17 + $0xcc] sm:$0xff] }
  0xa7   : > { %15019 = vst [vmem:[#allocation11_spill] sm:$0xff] %v9159_v1  ;;  %1203 = vrot.lane.b32.xlu1 %v9152_v62, %s15004_s16  ;;  %v7851_v1 = vld [vmem:[%s8869_s17 + $0xec] sm:$0xff] }
  0xa8   : > { %1201 = vrot.lane.b32.xlu0 %v9155_v63, %s15004_s16 }
  0xa9   : > { %v9171_v32 = vpop.permute.xlu1 %1027 }
  0xaa   : > { %15021 = vst [vmem:[#allocation13_spill] sm:$0xff] %v9171_v32  ;;  %v9173_v33 = vpop.permute.xlu0 %1025 }
  0xab   : > { %15022 = vst [vmem:[#allocation14_spill] sm:$0xff] %v9173_v33  ;;  %1207 = vrot.lane.b32.xlu1 %v9166_v2, %s15004_s16 }
  0xac   : > { %1205 = vrot.lane.b32.xlu0 %v9169_v3, %s15004_s16 }
  0xad   : > { %v9179_v34 = vpop.permute.xlu1 %1031 }
  0xae   : > { %15023 = vst [vmem:[#allocation15_spill] sm:$0xff] %v9179_v34  ;;  %v9181_v35 = vpop.permute.xlu0 %1029 }
  0xaf   : > { %15024 = vst [vmem:[#allocation16_spill] sm:$0xff] %v9181_v35  ;;  %1275 = vrot.lane.b32.xlu1 %v7849_v0, %s14996_s18  ;;  %v9200_v0 = vld [vmem:[%s8869_s17 + $0x10c] sm:$0xff] }
  0xb0   : > { %1273 = vrot.lane.b32.xlu0 %v7848_v60, %s14996_s18  ;;  %15029 = vst [vmem:[#allocation21_spill] sm:$0xff] %v9200_v0  ;;  %v9203_v60 = vld [vmem:[%s8869_s17 + $0x104] sm:$0xff] }
  0xb1   : > { %v9187_v32 = vpop.permute.xlu1 %1035  ;;  %15030 = vst [vmem:[#allocation22_spill] sm:$0xff] %v9203_v60 }
  0xb2   : > { %15025 = vst [vmem:[#allocation17_spill] sm:$0xff] %v9187_v32  ;;  %v9189_v33 = vpop.permute.xlu0 %1033  ;;  %v9214_v32 = vld [vmem:[%s8869_s17 + $0x12c] sm:$0xff] }
  0xb3   : > { %15026 = vst [vmem:[#allocation18_spill] sm:$0xff] %v9189_v33  ;;  %1279 = vrot.lane.b32.xlu1 %v7851_v1, %s14996_s18  ;;  %15033 = vst [vmem:[#allocation25_spill] sm:$0xff] %v9214_v32 }
  0xb4   : > { %1277 = vrot.lane.b32.xlu0 %v7850_v61, %s14996_s18 }
  0xb5   : > { %v9195_v34 = vpop.permute.xlu1 %1039 }
  0xb6   : > { %15027 = vst [vmem:[#allocation19_spill] sm:$0xff] %v9195_v34  ;;  %v9197_v35 = vpop.permute.xlu0 %1037  ;;  %v9217_v34 = vld [vmem:[%s8869_s17 + $0x124] sm:$0xff] }
  0xb7   : > { %15028 = vst [vmem:[#allocation20_spill] sm:$0xff] %v9197_v35  ;;  %1283 = vrot.lane.b32.xlu1 %v9200_v0, %s14996_s18  ;;  %15034 = vst [vmem:[#allocation26_spill] sm:$0xff] %v9217_v34 }
  0xb8   : > { %1281 = vrot.lane.b32.xlu0 %v9203_v60, %s14996_s18  ;;  %v9228_v60 = vld [vmem:[%s8869_s17 + $0x14c] sm:$0xff] }
  0xb9   : > { %v9209_v1 = vpop.permute.xlu1 %1043  ;;  %15037 = vst [vmem:[#allocation29_spill] sm:$0xff] %v9228_v60 }
  0xba   : > { %15031 = vst [vmem:[#allocation23_spill] sm:$0xff] %v9209_v1  ;;  %v9211_v61 = vpop.permute.xlu0 %1041  ;;  %v9231_v1 = vld [vmem:[%s8869_s17 + $0x144] sm:$0xff] }
  0xbb   : > { %15032 = vst [vmem:[#allocation24_spill] sm:$0xff] %v9211_v61  ;;  %1287 = vrot.lane.b32.xlu1 %v9214_v32, %s14996_s18  ;;  %15038 = vst [vmem:[#allocation30_spill] sm:$0xff] %v9231_v1  ;;  %v9242_v32 = vld [vmem:[%s8869_s17 + $0x16c] sm:$0xff] }
  0xbc   : > { %1285 = vrot.lane.b32.xlu0 %v9217_v34, %s14996_s18  ;;  %15041 = vst [vmem:[#allocation33_spill] sm:$0xff] %v9242_v32 }
  0xbd   : > { %v9223_v35 = vpop.permute.xlu1 %1047 }
  0xbe   : > { %15035 = vst [vmem:[#allocation27_spill] sm:$0xff] %v9223_v35  ;;  %v9225_v33 = vpop.permute.xlu0 %1045  ;;  %v9245_v35 = vld [vmem:[%s8869_s17 + $0x164] sm:$0xff] }
  0xbf   : > { %15036 = vst [vmem:[#allocation28_spill] sm:$0xff] %v9225_v33  ;;  %1291 = vrot.lane.b32.xlu1 %v9228_v60, %s14996_s18  ;;  %15042 = vst [vmem:[#allocation34_spill] sm:$0xff] %v9245_v35  ;;  %v9256_v60 = vld [vmem:[%s8869_s17 + $0x18c] sm:$0xff] }
  0xc0   : > { %1289 = vrot.lane.b32.xlu0 %v9231_v1, %s14996_s18  ;;  %15045 = vst [vmem:[#allocation37_spill] sm:$0xff] %v9256_v60 }
  0xc1   : > { %v9237_v61 = vpop.permute.xlu1 %1051 }
  0xc2   : > { %15039 = vst [vmem:[#allocation31_spill] sm:$0xff] %v9237_v61  ;;  %v9239_v34 = vpop.permute.xlu0 %1049  ;;  %v9259_v61 = vld [vmem:[%s8869_s17 + $0x184] sm:$0xff] }
  0xc3   : > { %15040 = vst [vmem:[#allocation32_spill] sm:$0xff] %v9239_v34  ;;  %1295 = vrot.lane.b32.xlu1 %v9242_v32, %s14996_s18  ;;  %15046 = vst [vmem:[#allocation38_spill] sm:$0xff] %v9259_v61  ;;  %v9270_v32 = vld [vmem:[%s8869_s17 + $0x1ac] sm:$0xff] }
  0xc4   : > { %1293 = vrot.lane.b32.xlu0 %v9245_v35, %s14996_s18  ;;  %15049 = vst [vmem:[#allocation41_spill] sm:$0xff] %v9270_v32 }
  0xc5   : > { %v9251_v33 = vpop.permute.xlu1 %1055 }
  0xc6   : > { %15043 = vst [vmem:[#allocation35_spill] sm:$0xff] %v9251_v33  ;;  %v9253_v1 = vpop.permute.xlu0 %1053  ;;  %v9273_v33 = vld [vmem:[%s8869_s17 + $0x1a4] sm:$0xff] }
  0xc7   : > { %15044 = vst [vmem:[#allocation36_spill] sm:$0xff] %v9253_v1  ;;  %1299 = vrot.lane.b32.xlu1 %v9256_v60, %s14996_s18  ;;  %15050 = vst [vmem:[#allocation42_spill] sm:$0xff] %v9273_v33  ;;  %v9284_v60 = vld [vmem:[%s8869_s17 + $0x1cc] sm:$0xff] }
  0xc8   : > { %1297 = vrot.lane.b32.xlu0 %v9259_v61, %s14996_s18  ;;  %15053 = vst [vmem:[#allocation45_spill] sm:$0xff] %v9284_v60 }
  0xc9   : > { %v9265_v34 = vpop.permute.xlu1 %1059 }
  0xca   : > { %15047 = vst [vmem:[#allocation39_spill] sm:$0xff] %v9265_v34  ;;  %v9267_v35 = vpop.permute.xlu0 %1057  ;;  %v9287_v34 = vld [vmem:[%s8869_s17 + $0x1c4] sm:$0xff] }
  0xcb   : > { %15048 = vst [vmem:[#allocation40_spill] sm:$0xff] %v9267_v35  ;;  %1303 = vrot.lane.b32.xlu1 %v9270_v32, %s14996_s18  ;;  %15054 = vst [vmem:[#allocation46_spill] sm:$0xff] %v9287_v34  ;;  %v9298_v32 = vld [vmem:[%s8869_s17 + $0x1ec] sm:$0xff] }
  0xcc   : > { %1301 = vrot.lane.b32.xlu0 %v9273_v33, %s14996_s18  ;;  %15057 = vst [vmem:[#allocation49_spill] sm:$0xff] %v9298_v32 }
  0xcd   : > { %v9279_v1 = vpop.permute.xlu1 %1063 }
  0xce   : > { %15051 = vst [vmem:[#allocation43_spill] sm:$0xff] %v9279_v1  ;;  %v9281_v61 = vpop.permute.xlu0 %1061  ;;  %v9301_v1 = vld [vmem:[%s8869_s17 + $0x1e4] sm:$0xff] }
  0xcf   : > { %15052 = vst [vmem:[#allocation44_spill] sm:$0xff] %v9281_v61  ;;  %1307 = vrot.lane.b32.xlu1 %v9284_v60, %s14996_s18  ;;  %15058 = vst [vmem:[#allocation50_spill] sm:$0xff] %v9301_v1  ;;  %v9312_v60 = vld [vmem:[%s8869_s17 + $0x20c] sm:$0xff] }
  0xd0   : > { %1305 = vrot.lane.b32.xlu0 %v9287_v34, %s14996_s18  ;;  %15061 = vst [vmem:[#allocation53_spill] sm:$0xff] %v9312_v60 }
  0xd1   : > { %v9293_v35 = vpop.permute.xlu1 %1067 }
  0xd2   : > { %15055 = vst [vmem:[#allocation47_spill] sm:$0xff] %v9293_v35  ;;  %v9295_v33 = vpop.permute.xlu0 %1065  ;;  %v9315_v35 = vld [vmem:[%s8869_s17 + $0x204] sm:$0xff] }
  0xd3   : > { %15056 = vst [vmem:[#allocation48_spill] sm:$0xff] %v9295_v33  ;;  %1311 = vrot.lane.b32.xlu1 %v9298_v32, %s14996_s18  ;;  %15062 = vst [vmem:[#allocation54_spill] sm:$0xff] %v9315_v35  ;;  %v9326_v32 = vld [vmem:[%s8869_s17 + $0x22c] sm:$0xff] }
  0xd4   : > { %1309 = vrot.lane.b32.xlu0 %v9301_v1, %s14996_s18  ;;  %15065 = vst [vmem:[#allocation57_spill] sm:$0xff] %v9326_v32 }
  0xd5   : > { %v9307_v61 = vpop.permute.xlu1 %1071 }
  0xd6   : > { %15059 = vst [vmem:[#allocation51_spill] sm:$0xff] %v9307_v61  ;;  %v9309_v34 = vpop.permute.xlu0 %1069  ;;  %v9329_v61 = vld [vmem:[%s8869_s17 + $0x224] sm:$0xff] }
  0xd7   : > { %15060 = vst [vmem:[#allocation52_spill] sm:$0xff] %v9309_v34  ;;  %1315 = vrot.lane.b32.xlu1 %v9312_v60, %s14996_s18  ;;  %15066 = vst [vmem:[#allocation58_spill] sm:$0xff] %v9329_v61  ;;  %v9340_v60 = vld [vmem:[%s8869_s17 + $0x24c] sm:$0xff] }
  0xd8   : > { %1313 = vrot.lane.b32.xlu0 %v9315_v35, %s14996_s18  ;;  %15069 = vst [vmem:[#allocation61_spill] sm:$0xff] %v9340_v60 }
  0xd9   : > { %v9321_v33 = vpop.permute.xlu1 %1075 }
  0xda   : > { %15063 = vst [vmem:[#allocation55_spill] sm:$0xff] %v9321_v33  ;;  %v9323_v1 = vpop.permute.xlu0 %1073  ;;  %v9343_v33 = vld [vmem:[%s8869_s17 + $0x244] sm:$0xff] }
  0xdb   : > { %15064 = vst [vmem:[#allocation56_spill] sm:$0xff] %v9323_v1  ;;  %1319 = vrot.lane.b32.xlu1 %v9326_v32, %s14996_s18  ;;  %15070 = vst [vmem:[#allocation62_spill] sm:$0xff] %v9343_v33 }
  0xdc   : > { %1317 = vrot.lane.b32.xlu0 %v9329_v61, %s14996_s18  ;;  %v9354_v61 = vld [vmem:[%s8869_s17 + $0x26c] sm:$0xff] }
  0xdd   : > { %v9335_v34 = vpop.permute.xlu1 %1079  ;;  %15073 = vst [vmem:[#allocation65_spill] sm:$0xff] %v9354_v61 }
  0xde   : > { %15067 = vst [vmem:[#allocation59_spill] sm:$0xff] %v9335_v34  ;;  %v9337_v35 = vpop.permute.xlu0 %1077  ;;  %v9357_v34 = vld [vmem:[%s8869_s17 + $0x264] sm:$0xff] }
  0xdf   : > { %15068 = vst [vmem:[#allocation60_spill] sm:$0xff] %v9337_v35  ;;  %1323 = vrot.lane.b32.xlu1 %v9340_v60, %s14996_s18  ;;  %15074 = vst [vmem:[#allocation66_spill] sm:$0xff] %v9357_v34  ;;  %v9364_v35 = vld [vmem:[%s8869_s17 + $0x28c] sm:$0xff]  ;;  %v9367_v60 = vld [vmem:[%s8869_s17 + $0x284] sm:$0xff] }
  0xe0   : > { %1321 = vrot.lane.b32.xlu0 %v9343_v33, %s14996_s18 }
  0xe1   : > { %v9349_v1 = vpop.permute.xlu1 %1147 }
  0xe2   : > { %15071 = vst [vmem:[#allocation63_spill] sm:$0xff] %v9349_v1  ;;  %v9351_v32 = vpop.permute.xlu0 %1145  ;;  %v9378_v1 = vld [vmem:[%s8869_s17 + $0x2ac] sm:$0xff] }
  0xe3   : > { %15072 = vst [vmem:[#allocation64_spill] sm:$0xff] %v9351_v32  ;;  %1327 = vrot.lane.b32.xlu1 %v9354_v61, %s14996_s18  ;;  %v9381_v32 = vld [vmem:[%s8869_s17 + $0x2a4] sm:$0xff] }
  0xe4   : > { %1325 = vrot.lane.b32.xlu0 %v9357_v34, %s14996_s18 }
  0xe5   : > { %v9369_v0 = vpop.permute.xlu1 %1151 }
  0xe6   : > { %15075 = vst [vmem:[#allocation67_spill] sm:$0xff] %v9369_v0  ;;  %v9371_v33 = vpop.permute.xlu0 %1149 }
  0xe7   : > { %15076 = vst [vmem:[#allocation68_spill] sm:$0xff] %v9371_v33  ;;  %1331 = vrot.lane.b32.xlu1 %v9364_v35, %s14996_s18 }
  0xe8   : > { %1329 = vrot.lane.b32.xlu0 %v9367_v60, %s14996_s18 }
  0xe9   : > { %v9383_v61 = vpop.permute.xlu1 %1155 }
  0xea   : > { %15077 = vst [vmem:[#allocation69_spill] sm:$0xff] %v9383_v61  ;;  %v9385_v34 = vpop.permute.xlu0 %1153 }
  0xeb   : > { %15078 = vst [vmem:[#allocation70_spill] sm:$0xff] %v9385_v34  ;;  %1335 = vrot.lane.b32.xlu1 %v9378_v1, %s14996_s18 }
  0xec   : > { %1333 = vrot.lane.b32.xlu0 %v9381_v32, %s14996_s18  ;;  %s8742_s18 = smov 32  }
  0xed   : > { %v9391_v0 = vpop.permute.xlu1 %1159 }
  0xee   : > { %15079 = vst [vmem:[#allocation71_spill] sm:$0xff] %v9391_v0  ;;  %v9393_v33 = vpop.permute.xlu0 %1157 }
  0xef   : > { %15080 = vst [vmem:[#allocation72_spill] sm:$0xff] %v9393_v33  ;;  %1375 = vrot.lane.b32.xlu1 %v8880_v4, %s14994_s19 }
  0xf0   : > { %1373 = vrot.lane.b32.xlu0 %v8883_v5, %s14994_s19 }
  0xf1   : > { %v9399_v61 = vpop.permute.xlu1 %1163 }
  0xf2   : > { %15081 = vst [vmem:[#allocation73_spill] sm:$0xff] %v9399_v61  ;;  %v9401_v34 = vpop.permute.xlu0 %1161  ;;  %v9518_v61 = vld [vmem:[%s8869_s17 + $0x2ae] sm:$0xff] }
  0xf3   : > { %15082 = vst [vmem:[#allocation74_spill] sm:$0xff] %v9401_v34  ;;  %1379 = vrot.lane.b32.xlu1 %v8890_v6, %s14994_s19  ;;  %v9521_v34 = vld [vmem:[%s8869_s17 + $0x2a6] sm:$0xff] }
  0xf4   : > { %1377 = vrot.lane.b32.xlu0 %v8893_v7, %s14994_s19 }
  0xf5   : > { %v9407_v0 = vpop.permute.xlu1 %1167 }
  0xf6   : > { %15083 = vst [vmem:[#allocation75_spill] sm:$0xff] %v9407_v0  ;;  %v9409_v33 = vpop.permute.xlu0 %1165 }
  0xf7   : > { %15084 = vst [vmem:[#allocation76_spill] sm:$0xff] %v9409_v33  ;;  %1383 = vrot.lane.b32.xlu1 %v8900_v8, %s14994_s19 }
  0xf8   : > { %1381 = vrot.lane.b32.xlu0 %v8903_v9, %s14994_s19 }
  0xf9   : > { %v9415_v4 = vpop.permute.xlu1 %1171 }
  0xfa   : > { %15085 = vst [vmem:[#allocation77_spill] sm:$0xff] %v9415_v4  ;;  %v9417_v5 = vpop.permute.xlu0 %1169 }
  0xfb   : > { %15086 = vst [vmem:[#allocation78_spill] sm:$0xff] %v9417_v5  ;;  %1387 = vrot.lane.b32.xlu1 %v8910_v10, %s14994_s19 }
  0xfc   : > { %1385 = vrot.lane.b32.xlu0 %v8913_v11, %s14994_s19 }
  0xfd   : > { %v9423_v6 = vpop.permute.xlu1 %1175 }
  0xfe   : > { %15087 = vst [vmem:[#allocation79_spill] sm:$0xff] %v9423_v6  ;;  %v9425_v7 = vpop.permute.xlu0 %1173 }
  0xff   : > { %15088 = vst [vmem:[#allocation80_spill] sm:$0xff] %v9425_v7  ;;  %1391 = vrot.lane.b32.xlu1 %v8920_v12, %s14994_s19 }
 0x100   : > { %1389 = vrot.lane.b32.xlu0 %v8923_v13, %s14994_s19 }
 0x101   : > { %v9431_v0 = vpop.permute.xlu1 %1179 }
 0x102   : > { %15089 = vst [vmem:[#allocation81_spill] sm:$0xff] %v9431_v0  ;;  %v9433_v4 = vpop.permute.xlu0 %1177 }
 0x103   : > { %15090 = vst [vmem:[#allocation82_spill] sm:$0xff] %v9433_v4  ;;  %1395 = vrot.lane.b32.xlu1 %v8930_v14, %s14994_s19 }
 0x104   : > { %1393 = vrot.lane.b32.xlu0 %v8933_v15, %s14994_s19 }
 0x105   : > { %v9439_v5 = vpop.permute.xlu1 %1183 }
 0x106   : > { %15091 = vst [vmem:[#allocation83_spill] sm:$0xff] %v9439_v5  ;;  %v9441_v6 = vpop.permute.xlu0 %1181 }
 0x107   : > { %15092 = vst [vmem:[#allocation84_spill] sm:$0xff] %v9441_v6  ;;  %1399 = vrot.lane.b32.xlu1 %v8940_v16, %s14994_s19 }
 0x108   : > { %1397 = vrot.lane.b32.xlu0 %v8943_v17, %s14994_s19 }
 0x109   : > { %v9447_v7 = vpop.permute.xlu1 %1187 }
 0x10a   : > { %15093 = vst [vmem:[#allocation85_spill] sm:$0xff] %v9447_v7  ;;  %v9449_v0 = vpop.permute.xlu0 %1185 }
 0x10b   : > { %15094 = vst [vmem:[#allocation86_spill] sm:$0xff] %v9449_v0  ;;  %1403 = vrot.lane.b32.xlu1 %v8950_v18, %s14994_s19 }
 0x10c   : > { %1401 = vrot.lane.b32.xlu0 %v8953_v19, %s14994_s19 }
 0x10d   : > { %v9455_v4 = vpop.permute.xlu1 %1191 }
 0x10e   : > { %15095 = vst [vmem:[#allocation87_spill] sm:$0xff] %v9455_v4  ;;  %v9457_v5 = vpop.permute.xlu0 %1189 }
 0x10f   : > { %15096 = vst [vmem:[#allocation88_spill] sm:$0xff] %v9457_v5  ;;  %1407 = vrot.lane.b32.xlu1 %v8960_v20, %s14994_s19  ;;  %v9504_v5 = vld [vmem:[%s8869_s17 + $0x28e] sm:$0xff] }
 0x110   : > { %1405 = vrot.lane.b32.xlu0 %v8963_v21, %s14994_s19 }
 0x111   : > { %v9463_v6 = vpop.permute.xlu1 %1195 }
 0x112   : > { %15097 = vst [vmem:[#allocation89_spill] sm:$0xff] %v9463_v6  ;;  %v9465_v7 = vpop.permute.xlu0 %1193 }
 0x113   : > { %15098 = vst [vmem:[#allocation90_spill] sm:$0xff] %v9465_v7  ;;  %1411 = vrot.lane.b32.xlu1 %v8970_v22, %s14994_s19 }
 0x114   : > { %1409 = vrot.lane.b32.xlu0 %v8973_v23, %s14994_s19 }
 0x115   : > { %v9471_v0 = vpop.permute.xlu1 %1199 }
 0x116   : > { %15099 = vst [vmem:[#allocation91_spill] sm:$0xff] %v9471_v0  ;;  %v9473_v4 = vpop.permute.xlu0 %1197 }
 0x117   : > { %15100 = vst [vmem:[#allocation92_spill] sm:$0xff] %v9473_v4  ;;  %1415 = vrot.lane.b32.xlu1 %v8980_v24, %s14994_s19 }
 0x118   : > { %1413 = vrot.lane.b32.xlu0 %v8983_v25, %s14994_s19 }
 0x119   : > { %v9479_v6 = vpop.permute.xlu1 %1203 }
 0x11a   : > { %15101 = vst [vmem:[#allocation93_spill] sm:$0xff] %v9479_v6  ;;  %v9481_v7 = vpop.permute.xlu0 %1201 }
 0x11b   : > { %15102 = vst [vmem:[#allocation94_spill] sm:$0xff] %v9481_v7  ;;  %1419 = vrot.lane.b32.xlu1 %v8990_v26, %s14994_s19 }
 0x11c   : > { %1417 = vrot.lane.b32.xlu0 %v8993_v27, %s14994_s19 }
 0x11d   : > { %v9487_v0 = vpop.permute.xlu1 %1207 }
 0x11e   : > { %15103 = vst [vmem:[#allocation95_spill] sm:$0xff] %v9487_v0  ;;  %v9489_v4 = vpop.permute.xlu0 %1205  ;;  %v9507_v0 = vld [vmem:[%s8869_s17 + $0x286] sm:$0xff] }
 0x11f   : > { %15104 = vst [vmem:[#allocation96_spill] sm:$0xff] %v9489_v4  ;;  %1423 = vrot.lane.b32.xlu1 %v9000_v28, %s14994_s19 }
 0x120   : > { %1421 = vrot.lane.b32.xlu0 %v9003_v29, %s14994_s19 }
 0x121   : > { %v9495_v6 = vpop.permute.xlu1 %1275 }
 0x122   : > { %15105 = vst [vmem:[#allocation97_spill] sm:$0xff] %v9495_v6  ;;  %v9497_v7 = vpop.permute.xlu0 %1273 }
 0x123   : > { %15106 = vst [vmem:[#allocation98_spill] sm:$0xff] %v9497_v7  ;;  %1427 = vrot.lane.b32.xlu1 %v9010_v30, %s14994_s19 }
 0x124   : > { %1425 = vrot.lane.b32.xlu0 %v9013_v31, %s14994_s19 }
 0x125   : > { %v9509_v4 = vpop.permute.xlu1 %1279 }
 0x126   : > { %15107 = vst [vmem:[#allocation99_spill] sm:$0xff] %v9509_v4  ;;  %v9511_v33 = vpop.permute.xlu0 %1277 }
 0x127   : > { %15108 = vst [vmem:[#allocation100_spill] sm:$0xff] %v9511_v33  ;;  %1431 = vrot.lane.b32.xlu1 %v9504_v5, %s14994_s19 }
 0x128   : > { %1429 = vrot.lane.b32.xlu0 %v9507_v0, %s14994_s19 }
 0x129   : > { %v9523_v6 = vpop.permute.xlu1 %1283 }
 0x12a   : > { %15109 = vst [vmem:[#allocation101_spill] sm:$0xff] %v9523_v6  ;;  %v9525_v7 = vpop.permute.xlu0 %1281 }
 0x12b   : > { %15110 = vst [vmem:[#allocation102_spill] sm:$0xff] %v9525_v7  ;;  %1435 = vrot.lane.b32.xlu1 %v9518_v61, %s14994_s19 }
 0x12c   : > { %1433 = vrot.lane.b32.xlu0 %v9521_v34, %s14994_s19  ;;  %s15362_s19 = smov 12  }
 0x12d   : > { %v9531_v4 = vpop.permute.xlu1 %1287 }
 0x12e   : > { %15111 = vst [vmem:[#allocation103_spill] sm:$0xff] %v9531_v4  ;;  %v9533_v33 = vpop.permute.xlu0 %1285 }
 0x12f   : > { %15112 = vst [vmem:[#allocation104_spill] sm:$0xff] %v9533_v33  ;;  %1475 = vrot.lane.b32.xlu1 %v9028_v36, %s14992_s20 }
 0x130   : > { %1473 = vrot.lane.b32.xlu0 %v9031_v37, %s14992_s20 }
 0x131   : > { %v9539_v6 = vpop.permute.xlu1 %1291 }
 0x132   : > { %15113 = vst [vmem:[#allocation105_spill] sm:$0xff] %v9539_v6  ;;  %v9541_v7 = vpop.permute.xlu0 %1289  ;;  %v9658_v6 = vld [vmem:[%s8869_s17 + $0x2b0] sm:$0xff] }
 0x133   : > { %15114 = vst [vmem:[#allocation106_spill] sm:$0xff] %v9541_v7  ;;  %1479 = vrot.lane.b32.xlu1 %v9038_v38, %s14992_s20  ;;  %15143 = vst [vmem:[#allocation135_spill] sm:$0xff] %v9658_v6  ;;  %v9661_v7 = vld [vmem:[%s8869_s17 + $0x2a8] sm:$0xff] }
 0x134   : > { %1477 = vrot.lane.b32.xlu0 %v9041_v39, %s14992_s20  ;;  %15144 = vst [vmem:[#allocation136_spill] sm:$0xff] %v9661_v7 }
 0x135   : > { %v9547_v4 = vpop.permute.xlu1 %1295 }
 0x136   : > { %15115 = vst [vmem:[#allocation107_spill] sm:$0xff] %v9547_v4  ;;  %v9549_v33 = vpop.permute.xlu0 %1293 }
 0x137   : > { %15116 = vst [vmem:[#allocation108_spill] sm:$0xff] %v9549_v33  ;;  %1483 = vrot.lane.b32.xlu1 %v9048_v40, %s14992_s20 }
 0x138   : > { %1481 = vrot.lane.b32.xlu0 %v9051_v41, %s14992_s20 }
 0x139   : > { %v9555_v36 = vpop.permute.xlu1 %1299 }
 0x13a   : > { %15117 = vst [vmem:[#allocation109_spill] sm:$0xff] %v9555_v36  ;;  %v9557_v37 = vpop.permute.xlu0 %1297 }
 0x13b   : > { %15118 = vst [vmem:[#allocation110_spill] sm:$0xff] %v9557_v37  ;;  %1487 = vrot.lane.b32.xlu1 %v9058_v42, %s14992_s20 }
 0x13c   : > { %1485 = vrot.lane.b32.xlu0 %v9061_v43, %s14992_s20 }
 0x13d   : > { %v9563_v38 = vpop.permute.xlu1 %1303 }
 0x13e   : > { %15119 = vst [vmem:[#allocation111_spill] sm:$0xff] %v9563_v38  ;;  %v9565_v39 = vpop.permute.xlu0 %1301 }
 0x13f   : > { %15120 = vst [vmem:[#allocation112_spill] sm:$0xff] %v9565_v39  ;;  %1491 = vrot.lane.b32.xlu1 %v9068_v44, %s14992_s20 }
 0x140   : > { %1489 = vrot.lane.b32.xlu0 %v9071_v45, %s14992_s20 }
 0x141   : > { %v9571_v4 = vpop.permute.xlu1 %1307 }
 0x142   : > { %15121 = vst [vmem:[#allocation113_spill] sm:$0xff] %v9571_v4  ;;  %v9573_v36 = vpop.permute.xlu0 %1305 }
 0x143   : > { %15122 = vst [vmem:[#allocation114_spill] sm:$0xff] %v9573_v36  ;;  %1495 = vrot.lane.b32.xlu1 %v9078_v46, %s14992_s20 }
 0x144   : > { %1493 = vrot.lane.b32.xlu0 %v9081_v47, %s14992_s20 }
 0x145   : > { %v9579_v37 = vpop.permute.xlu1 %1311 }
 0x146   : > { %15123 = vst [vmem:[#allocation115_spill] sm:$0xff] %v9579_v37  ;;  %v9581_v38 = vpop.permute.xlu0 %1309 }
 0x147   : > { %15124 = vst [vmem:[#allocation116_spill] sm:$0xff] %v9581_v38  ;;  %1499 = vrot.lane.b32.xlu1 %v9088_v48, %s14992_s20 }
 0x148   : > { %1497 = vrot.lane.b32.xlu0 %v9091_v49, %s14992_s20 }
 0x149   : > { %v9587_v39 = vpop.permute.xlu1 %1315 }
 0x14a   : > { %15125 = vst [vmem:[#allocation117_spill] sm:$0xff] %v9587_v39  ;;  %v9589_v4 = vpop.permute.xlu0 %1313 }
 0x14b   : > { %15126 = vst [vmem:[#allocation118_spill] sm:$0xff] %v9589_v4  ;;  %1503 = vrot.lane.b32.xlu1 %v9098_v50, %s14992_s20 }
 0x14c   : > { %1501 = vrot.lane.b32.xlu0 %v9101_v51, %s14992_s20 }
 0x14d   : > { %v9595_v36 = vpop.permute.xlu1 %1319 }
 0x14e   : > { %15127 = vst [vmem:[#allocation119_spill] sm:$0xff] %v9595_v36  ;;  %v9597_v37 = vpop.permute.xlu0 %1317 }
 0x14f   : > { %15128 = vst [vmem:[#allocation120_spill] sm:$0xff] %v9597_v37  ;;  %1507 = vrot.lane.b32.xlu1 %v9108_v52, %s14992_s20  ;;  %v9644_v37 = vld [vmem:[%s8869_s17 + $0x290] sm:$0xff] }
 0x150   : > { %1505 = vrot.lane.b32.xlu0 %v9111_v53, %s14992_s20  ;;  %15139 = vst [vmem:[#allocation131_spill] sm:$0xff] %v9644_v37 }
 0x151   : > { %v9603_v38 = vpop.permute.xlu1 %1323 }
 0x152   : > { %15129 = vst [vmem:[#allocation121_spill] sm:$0xff] %v9603_v38  ;;  %v9605_v39 = vpop.permute.xlu0 %1321 }
 0x153   : > { %15130 = vst [vmem:[#allocation122_spill] sm:$0xff] %v9605_v39  ;;  %1511 = vrot.lane.b32.xlu1 %v9118_v54, %s14992_s20 }
 0x154   : > { %1509 = vrot.lane.b32.xlu0 %v9121_v55, %s14992_s20 }
 0x155   : > { %v9611_v4 = vpop.permute.xlu1 %1327 }
 0x156   : > { %15131 = vst [vmem:[#allocation123_spill] sm:$0xff] %v9611_v4  ;;  %v9613_v36 = vpop.permute.xlu0 %1325 }
 0x157   : > { %15132 = vst [vmem:[#allocation124_spill] sm:$0xff] %v9613_v36  ;;  %1515 = vrot.lane.b32.xlu1 %v9128_v56, %s14992_s20 }
 0x158   : > { %1513 = vrot.lane.b32.xlu0 %v9131_v57, %s14992_s20 }
 0x159   : > { %v9619_v38 = vpop.permute.xlu1 %1331 }
 0x15a   : > { %15133 = vst [vmem:[#allocation125_spill] sm:$0xff] %v9619_v38  ;;  %v9621_v39 = vpop.permute.xlu0 %1329 }
 0x15b   : > { %15134 = vst [vmem:[#allocation126_spill] sm:$0xff] %v9621_v39  ;;  %1519 = vrot.lane.b32.xlu1 %v9138_v58, %s14992_s20 }
 0x15c   : > { %1517 = vrot.lane.b32.xlu0 %v9141_v59, %s14992_s20 }
 0x15d   : > { %v9627_v4 = vpop.permute.xlu1 %1335 }
 0x15e   : > { %15135 = vst [vmem:[#allocation127_spill] sm:$0xff] %v9627_v4  ;;  %v9629_v36 = vpop.permute.xlu0 %1333  ;;  %v9647_v4 = vld [vmem:[%s8869_s17 + $0x288] sm:$0xff] }
 0x15f   : > { %15136 = vst [vmem:[#allocation128_spill] sm:$0xff] %v9629_v36  ;;  %1523 = vrot.lane.b32.xlu1 %v9152_v62, %s14992_s20  ;;  %15140 = vst [vmem:[#allocation132_spill] sm:$0xff] %v9647_v4 }
 0x160   : > { %1521 = vrot.lane.b32.xlu0 %v9155_v63, %s14992_s20 }
 0x161   : > { %v9635_v38 = vpop.permute.xlu1 %1375 }
 0x162   : > { %15137 = vst [vmem:[#allocation129_spill] sm:$0xff] %v9635_v38  ;;  %v9637_v39 = vpop.permute.xlu0 %1373 }
 0x163   : > { %15138 = vst [vmem:[#allocation130_spill] sm:$0xff] %v9637_v39  ;;  %1527 = vrot.lane.b32.xlu1 %v9166_v2, %s14992_s20 }
 0x164   : > { %1525 = vrot.lane.b32.xlu0 %v9169_v3, %s14992_s20  ;;  %v15157_v3 = vld [vmem:[#allocation29_spill] sm:$0xff] }
 0x165   : > { %v9649_v36 = vpop.permute.xlu1 %1379 }
 0x166   : > { %15141 = vst [vmem:[#allocation133_spill] sm:$0xff] %v9649_v36  ;;  %v9651_v33 = vpop.permute.xlu0 %1377 }
 0x167   : > { %15142 = vst [vmem:[#allocation134_spill] sm:$0xff] %v9651_v33  ;;  %1531 = vrot.lane.b32.xlu1 %v9644_v37, %s14992_s20  ;;  %v15150_v37 = vld [vmem:[#allocation22_spill] sm:$0xff] }
 0x168   : > { %1529 = vrot.lane.b32.xlu0 %v9647_v4, %s14992_s20  ;;  %v15149_v4 = vld [vmem:[#allocation21_spill] sm:$0xff] }
 0x169   : > { %v9663_v38 = vpop.permute.xlu1 %1383 }
 0x16a   : > { %15145 = vst [vmem:[#allocation137_spill] sm:$0xff] %v9663_v38  ;;  %v9665_v39 = vpop.permute.xlu0 %1381 }
 0x16b   : > { %15146 = vst [vmem:[#allocation138_spill] sm:$0xff] %v9665_v39  ;;  %1535 = vrot.lane.b32.xlu1 %v9658_v6, %s14992_s20  ;;  %v15153_v6 = vld [vmem:[#allocation25_spill] sm:$0xff] }
 0x16c   : > { %1533 = vrot.lane.b32.xlu0 %v9661_v7, %s14992_s20  ;;  %v15154_v7 = vld [vmem:[#allocation26_spill] sm:$0xff]  ;;  %s15467_s20 = smov 16  }
 0x16d   : > { %v9671_v36 = vpop.permute.xlu1 %1387 }
 0x16e   : > { %15147 = vst [vmem:[#allocation139_spill] sm:$0xff] %v9671_v36  ;;  %v9673_v33 = vpop.permute.xlu0 %1385 }
 0x16f   : > { %15148 = vst [vmem:[#allocation140_spill] sm:$0xff] %v9673_v33  ;;  %1575 = vrot.lane.b32.xlu1 %v15149_v4, %s14990_s21  ;;  %v15158_v4 = vld [vmem:[#allocation30_spill] sm:$0xff] }
 0x170   : > { %1573 = vrot.lane.b32.xlu0 %v15150_v37, %s14990_s21 }
 0x171   : > { %v9679_v38 = vpop.permute.xlu1 %1391 }
 0x172   : > { %15151 = vst [vmem:[#allocation21_spill] sm:$0xff] %v9679_v38  ;;  %v9681_v39 = vpop.permute.xlu0 %1389 }
 0x173   : > { %15152 = vst [vmem:[#allocation22_spill] sm:$0xff] %v9681_v39  ;;  %1579 = vrot.lane.b32.xlu1 %v15153_v6, %s14990_s21  ;;  %v15161_v39 = vld [vmem:[#allocation33_spill] sm:$0xff]  ;;  %v15162_v6 = vld [vmem:[#allocation34_spill] sm:$0xff] }
 0x174   : > { %1577 = vrot.lane.b32.xlu0 %v15154_v7, %s14990_s21 }
 0x175   : > { %v9687_v36 = vpop.permute.xlu1 %1395 }
 0x176   : > { %15155 = vst [vmem:[#allocation25_spill] sm:$0xff] %v9687_v36  ;;  %v9689_v33 = vpop.permute.xlu0 %1393 }
 0x177   : > { %15156 = vst [vmem:[#allocation26_spill] sm:$0xff] %v9689_v33  ;;  %1583 = vrot.lane.b32.xlu1 %v15157_v3, %s14990_s21  ;;  %v15165_v33 = vld [vmem:[#allocation37_spill] sm:$0xff]  ;;  %v15166_v3 = vld [vmem:[#allocation38_spill] sm:$0xff] }
 0x178   : > { %1581 = vrot.lane.b32.xlu0 %v15158_v4, %s14990_s21 }
 0x179   : > { %v9695_v37 = vpop.permute.xlu1 %1399 }
 0x17a   : > { %15159 = vst [vmem:[#allocation29_spill] sm:$0xff] %v9695_v37  ;;  %v9697_v38 = vpop.permute.xlu0 %1397 }
 0x17b   : > { %15160 = vst [vmem:[#allocation30_spill] sm:$0xff] %v9697_v38  ;;  %1587 = vrot.lane.b32.xlu1 %v15161_v39, %s14990_s21  ;;  %v15169_v38 = vld [vmem:[#allocation41_spill] sm:$0xff]  ;;  %v15170_v39 = vld [vmem:[#allocation42_spill] sm:$0xff] }
 0x17c   : > { %1585 = vrot.lane.b32.xlu0 %v15162_v6, %s14990_s21 }
 0x17d   : > { %v9703_v7 = vpop.permute.xlu1 %1403 }
 0x17e   : > { %15163 = vst [vmem:[#allocation33_spill] sm:$0xff] %v9703_v7  ;;  %v9705_v36 = vpop.permute.xlu0 %1401 }
 0x17f   : > { %15164 = vst [vmem:[#allocation34_spill] sm:$0xff] %v9705_v36  ;;  %1591 = vrot.lane.b32.xlu1 %v15165_v33, %s14990_s21  ;;  %v15173_v36 = vld [vmem:[#allocation45_spill] sm:$0xff]  ;;  %v15174_v33 = vld [vmem:[#allocation46_spill] sm:$0xff] }
 0x180   : > { %1589 = vrot.lane.b32.xlu0 %v15166_v3, %s14990_s21 }
 0x181   : > { %v9711_v4 = vpop.permute.xlu1 %1407 }
 0x182   : > { %15167 = vst [vmem:[#allocation37_spill] sm:$0xff] %v9711_v4  ;;  %v9713_v37 = vpop.permute.xlu0 %1405 }
 0x183   : > { %15168 = vst [vmem:[#allocation38_spill] sm:$0xff] %v9713_v37  ;;  %1595 = vrot.lane.b32.xlu1 %v15169_v38, %s14990_s21  ;;  %v15177_v37 = vld [vmem:[#allocation49_spill] sm:$0xff]  ;;  %v15178_v38 = vld [vmem:[#allocation50_spill] sm:$0xff] }
 0x184   : > { %1593 = vrot.lane.b32.xlu0 %v15170_v39, %s14990_s21 }
 0x185   : > { %v9719_v6 = vpop.permute.xlu1 %1411 }
 0x186   : > { %15171 = vst [vmem:[#allocation41_spill] sm:$0xff] %v9719_v6  ;;  %v9721_v7 = vpop.permute.xlu0 %1409 }
 0x187   : > { %15172 = vst [vmem:[#allocation42_spill] sm:$0xff] %v9721_v7  ;;  %1599 = vrot.lane.b32.xlu1 %v15173_v36, %s14990_s21  ;;  %v15181_v7 = vld [vmem:[#allocation53_spill] sm:$0xff]  ;;  %v15182_v36 = vld [vmem:[#allocation54_spill] sm:$0xff] }
 0x188   : > { %1597 = vrot.lane.b32.xlu0 %v15174_v33, %s14990_s21 }
 0x189   : > { %v9727_v3 = vpop.permute.xlu1 %1415 }
 0x18a   : > { %15175 = vst [vmem:[#allocation45_spill] sm:$0xff] %v9727_v3  ;;  %v9729_v4 = vpop.permute.xlu0 %1413 }
 0x18b   : > { %15176 = vst [vmem:[#allocation46_spill] sm:$0xff] %v9729_v4  ;;  %1603 = vrot.lane.b32.xlu1 %v15177_v37, %s14990_s21  ;;  %v15185_v4 = vld [vmem:[#allocation57_spill] sm:$0xff]  ;;  %v15186_v37 = vld [vmem:[#allocation58_spill] sm:$0xff] }
 0x18c   : > { %1601 = vrot.lane.b32.xlu0 %v15178_v38, %s14990_s21 }
 0x18d   : > { %v9735_v39 = vpop.permute.xlu1 %1419 }
 0x18e   : > { %15179 = vst [vmem:[#allocation49_spill] sm:$0xff] %v9735_v39  ;;  %v9737_v6 = vpop.permute.xlu0 %1417 }
 0x18f   : > { %15180 = vst [vmem:[#allocation50_spill] sm:$0xff] %v9737_v6  ;;  %1607 = vrot.lane.b32.xlu1 %v15181_v7, %s14990_s21  ;;  %v15189_v7 = vld [vmem:[#allocation61_spill] sm:$0xff] }
 0x190   : > { %1605 = vrot.lane.b32.xlu0 %v15182_v36, %s14990_s21  ;;  %v15190_v36 = vld [vmem:[#allocation62_spill] sm:$0xff] }
 0x191   : > { %v9743_v33 = vpop.permute.xlu1 %1423  ;;  %v10053_v6 = vld [vmem:[%s8869_s17 + $0x12e] sm:$0xff] }
 0x192   : > { %15183 = vst [vmem:[#allocation53_spill] sm:$0xff] %v9743_v33  ;;  %v9745_v3 = vpop.permute.xlu0 %1421 }
 0x193   : > { %15184 = vst [vmem:[#allocation54_spill] sm:$0xff] %v9745_v3  ;;  %1611 = vrot.lane.b32.xlu1 %v15185_v4, %s14990_s21  ;;  %v15193_v4 = vld [vmem:[#allocation65_spill] sm:$0xff] }
 0x194   : > { %1609 = vrot.lane.b32.xlu0 %v15186_v37, %s14990_s21  ;;  %v15194_v37 = vld [vmem:[#allocation66_spill] sm:$0xff] }
 0x195   : > { %v9751_v38 = vpop.permute.xlu1 %1427 }
 0x196   : > { %15187 = vst [vmem:[#allocation57_spill] sm:$0xff] %v9751_v38  ;;  %v9753_v39 = vpop.permute.xlu0 %1425 }
 0x197   : > { %15188 = vst [vmem:[#allocation58_spill] sm:$0xff] %v9753_v39  ;;  %1615 = vrot.lane.b32.xlu1 %v15189_v7, %s14990_s21 }
 0x198   : > { %1613 = vrot.lane.b32.xlu0 %v15190_v36, %s14990_s21 }
 0x199   : > { %v9759_v33 = vpop.permute.xlu1 %1431 }
 0x19a   : > { %15191 = vst [vmem:[#allocation61_spill] sm:$0xff] %v9759_v33  ;;  %v9761_v3 = vpop.permute.xlu0 %1429 }
 0x19b   : > { %15192 = vst [vmem:[#allocation62_spill] sm:$0xff] %v9761_v3  ;;  %1619 = vrot.lane.b32.xlu1 %v15193_v4, %s14990_s21  ;;  %v7881_v4 = vld [vmem:[%s8869_s17 + $0x2cc] sm:$0xff] }
 0x19c   : > { %1617 = vrot.lane.b32.xlu0 %v15194_v37, %s14990_s21  ;;  %v7880_v37 = vld [vmem:[%s8869_s17 + $0x2c4] sm:$0xff] }
 0x19d   : > { %v9767_v38 = vpop.permute.xlu1 %1435 }
 0x19e   : > { %15195 = vst [vmem:[#allocation65_spill] sm:$0xff] %v9767_v38  ;;  %v9769_v39 = vpop.permute.xlu0 %1433 }
 0x19f   : > { %15196 = vst [vmem:[#allocation66_spill] sm:$0xff] %v9769_v39  ;;  %1623 = vrot.lane.b32.xlu1 %v9364_v35, %s14990_s21  ;;  %v7883_v35 = vld [vmem:[%s8869_s17 + $0x2ec] sm:$0xff] }
 0x1a0   : > { %1621 = vrot.lane.b32.xlu0 %v9367_v60, %s14990_s21  ;;  %v7882_v60 = vld [vmem:[%s8869_s17 + $0x2e4] sm:$0xff] }
 0x1a1   : > { %v9775_v7 = vpop.permute.xlu1 %1475 }
 0x1a2   : > { %v9777_v36 = vpop.permute.xlu0 %1473 }
 0x1a3   : > { %1627 = vrot.lane.b32.xlu1 %v9378_v1, %s14990_s21 }
 0x1a4   : > { %1625 = vrot.lane.b32.xlu0 %v9381_v32, %s14990_s21 }
 0x1a5   : > { %v9785_v38 = vpop.permute.xlu1 %1479 }
 0x1a6   : > { %v9787_v39 = vpop.permute.xlu0 %1477 }
 0x1a7   : > { %1631 = vrot.lane.b32.xlu1 %v7881_v4, %s14990_s21 }
 0x1a8   : > { %1629 = vrot.lane.b32.xlu0 %v7880_v37, %s14990_s21 }
 0x1a9   : > { %v9793_v33 = vpop.permute.xlu1 %1483 }
 0x1aa   : > { %v9795_v3 = vpop.permute.xlu0 %1481 }
 0x1ab   : > { %1635 = vrot.lane.b32.xlu1 %v7883_v35, %s14990_s21 }
 0x1ac   : > { %1633 = vrot.lane.b32.xlu0 %v7882_v60, %s14990_s21  ;;  %s15520_s21 = smov 24  }
 0x1ad   : > { %v9799_v32 = vpop.permute.xlu1 %1487 }
 0x1ae   : > { %v9801_v1 = vpop.permute.xlu0 %1485 }
 0x1af   : > { %1675 = vrot.lane.b32.xlu1 %v8900_v8, %s15008_s22 }
 0x1b0   : > { %1673 = vrot.lane.b32.xlu0 %v8903_v9, %s15008_s22 }
 0x1b1   : > { %v9807_v4 = vpop.permute.xlu1 %1491 }
 0x1b2   : > { %v9809_v37 = vpop.permute.xlu0 %1489 }
 0x1b3   : > { %1679 = vrot.lane.b32.xlu1 %v8910_v10, %s15008_s22 }
 0x1b4   : > { %1677 = vrot.lane.b32.xlu0 %v8913_v11, %s15008_s22 }
 0x1b5   : > { %v9815_v35 = vpop.permute.xlu1 %1495 }
 0x1b6   : > { %v9817_v60 = vpop.permute.xlu0 %1493 }
 0x1b7   : > { %1683 = vrot.lane.b32.xlu1 %v8920_v12, %s15008_s22 }
 0x1b8   : > { %1681 = vrot.lane.b32.xlu0 %v8923_v13, %s15008_s22 }
 0x1b9   : > { %v9823_v8 = vpop.permute.xlu1 %1499 }
 0x1ba   : > { %15197 = vst [vmem:[#allocation141_spill] sm:$0xff] %v9823_v8  ;;  %v9825_v9 = vpop.permute.xlu0 %1497  ;;  %v10237_v8 = vld [vmem:[%s8869_s17 + $0x206] sm:$0xff] }
 0x1bb   : > { %15198 = vst [vmem:[#allocation142_spill] sm:$0xff] %v9825_v9  ;;  %1687 = vrot.lane.b32.xlu1 %v8930_v14, %s15008_s22 }
 0x1bc   : > { %1685 = vrot.lane.b32.xlu0 %v8933_v15, %s15008_s22 }
 0x1bd   : > { %v9831_v10 = vpop.permute.xlu1 %1503 }
 0x1be   : > { %15199 = vst [vmem:[#allocation143_spill] sm:$0xff] %v9831_v10  ;;  %v9833_v11 = vpop.permute.xlu0 %1501 }
 0x1bf   : > { %15200 = vst [vmem:[#allocation144_spill] sm:$0xff] %v9833_v11  ;;  %1691 = vrot.lane.b32.xlu1 %v8940_v16, %s15008_s22 }
 0x1c0   : > { %1689 = vrot.lane.b32.xlu0 %v8943_v17, %s15008_s22 }
 0x1c1   : > { %v9839_v12 = vpop.permute.xlu1 %1507 }
 0x1c2   : > { %15201 = vst [vmem:[#allocation145_spill] sm:$0xff] %v9839_v12  ;;  %v9841_v13 = vpop.permute.xlu0 %1505 }
 0x1c3   : > { %15202 = vst [vmem:[#allocation146_spill] sm:$0xff] %v9841_v13  ;;  %1695 = vrot.lane.b32.xlu1 %v8950_v18, %s15008_s22  ;;  %v10209_v13 = vld [vmem:[%s8869_s17 + $0x1e6] sm:$0xff] }
 0x1c4   : > { %1693 = vrot.lane.b32.xlu0 %v8953_v19, %s15008_s22 }
 0x1c5   : > { %v9847_v14 = vpop.permute.xlu1 %1511 }
 0x1c6   : > { %15203 = vst [vmem:[#allocation147_spill] sm:$0xff] %v9847_v14  ;;  %v9849_v15 = vpop.permute.xlu0 %1509  ;;  %v10181_v14 = vld [vmem:[%s8869_s17 + $0x1c6] sm:$0xff] }
 0x1c7   : > { %15204 = vst [vmem:[#allocation148_spill] sm:$0xff] %v9849_v15  ;;  %1699 = vrot.lane.b32.xlu1 %v8960_v20, %s15008_s22 }
 0x1c8   : > { %1697 = vrot.lane.b32.xlu0 %v8963_v21, %s15008_s22 }
 0x1c9   : > { %v9855_v16 = vpop.permute.xlu1 %1515 }
 0x1ca   : > { %15205 = vst [vmem:[#allocation149_spill] sm:$0xff] %v9855_v16  ;;  %v9857_v17 = vpop.permute.xlu0 %1513  ;;  %v10067_v16 = vld [vmem:[%s8869_s17 + $0x146] sm:$0xff] }
 0x1cb   : > { %15206 = vst [vmem:[#allocation150_spill] sm:$0xff] %v9857_v17  ;;  %1703 = vrot.lane.b32.xlu1 %v8970_v22, %s15008_s22  ;;  %v10081_v17 = vld [vmem:[%s8869_s17 + $0x14e] sm:$0xff] }
 0x1cc   : > { %1701 = vrot.lane.b32.xlu0 %v8973_v23, %s15008_s22 }
 0x1cd   : > { %v9863_v18 = vpop.permute.xlu1 %1519 }
 0x1ce   : > { %15207 = vst [vmem:[#allocation151_spill] sm:$0xff] %v9863_v18  ;;  %v9865_v19 = vpop.permute.xlu0 %1517  ;;  %v10025_v18 = vld [vmem:[%s8869_s17 + $0x10e] sm:$0xff] }
 0x1cf   : > { %15208 = vst [vmem:[#allocation152_spill] sm:$0xff] %v9865_v19  ;;  %1707 = vrot.lane.b32.xlu1 %v8980_v24, %s15008_s22  ;;  %v2141_v24 = vld [vmem:[%s14956_s3 + $0x48] sm:$0xf] }
 0x1d0   : > { %1705 = vrot.lane.b32.xlu0 %v8983_v25, %s15008_s22  ;;  %7964 = vmatprep.subr.msk.mxu1 %vm472_vm0, %v2141_v24  ;;  %v2137_v24 = vld [vmem:[%s14956_s3 + $0x28] sm:$0xff] }
 0x1d1   : > { %v9871_v20 = vpop.permute.xlu1 %1523  ;;  %v10039_v19 = vld [vmem:[%s8869_s17 + $0x126] sm:$0xff] }
 0x1d2   : > { %15209 = vst [vmem:[#allocation153_spill] sm:$0xff] %v9871_v20  ;;  %v9873_v21 = vpop.permute.xlu0 %1521  ;;  %v9997_v20 = vld [vmem:[%s8869_s17 + $0xee] sm:$0xff] }
 0x1d3   : > { %15210 = vst [vmem:[#allocation154_spill] sm:$0xff] %v9873_v21  ;;  %1711 = vrot.lane.b32.xlu1 %v8990_v26, %s15008_s22  ;;  %v10011_v21 = vld [vmem:[%s8869_s17 + $0x106] sm:$0xff] }
 0x1d4   : > { %1709 = vrot.lane.b32.xlu0 %v8993_v27, %s15008_s22  ;;  %v2140_v27 = vld [vmem:[%s14956_s3 + $0x40] sm:$0xf] }
 0x1d5   : > { %v9879_v22 = vpop.permute.xlu1 %1527  ;;  %7965 = vmatpush1.msk.msra.mxu1 %vm472_vm0, %v2140_v27 }
 0x1d6   : > { %15211 = vst [vmem:[#allocation155_spill] sm:$0xff] %v9879_v22  ;;  %v9881_v23 = vpop.permute.xlu0 %1525  ;;  %v9955_v22 = vld [vmem:[%s8869_s17 + $0xc6] sm:$0xff] }
 0x1d7   : > { %15212 = vst [vmem:[#allocation156_spill] sm:$0xff] %v9881_v23  ;;  %1715 = vrot.lane.b32.xlu1 %v9000_v28, %s15008_s22  ;;  %v2139_v28 = vld [vmem:[%s14956_s3 + $0x38] sm:$0xff] }
 0x1d8   : > { %1713 = vrot.lane.b32.xlu0 %v9003_v29, %s15008_s22  ;;  %v2138_v29 = vld [vmem:[%s14956_s3 + $0x30] sm:$0xff]  ;;  %2281 = vmatprep.subr.mxu1 %v2139_v28 }
 0x1d9   : > { %v9891_v25 = vpop.permute.xlu1 %1531  ;;  %2282 = vmatpush1.msra.mxu1 %v2138_v29  ;;  %v2134_v28 = vld [vmem:[%s14956_s3 + $0x10] sm:$0xff]  ;;  %v360_v29 = vld [vmem:[%s14954_s1] sm:$0xff] }
 0x1da   : > { %15213 = vst [vmem:[#allocation157_spill] sm:$0xff] %v9891_v25  ;;  %v9893_v26 = vpop.permute.xlu0 %1529  ;;  %2283 = vmatprep.subr.mxu1 %v2137_v24 }
 0x1db   : > { %15214 = vst [vmem:[#allocation158_spill] sm:$0xff] %v9893_v26  ;;  %1719 = vrot.lane.b32.xlu1 %v9010_v30, %s15008_s22  ;;  %v2136_v30 = vld [vmem:[%s14956_s3 + $0x20] sm:$0xff] }
 0x1dc   : > { %1717 = vrot.lane.b32.xlu0 %v9013_v31, %s15008_s22  ;;  %v2135_v31 = vld [vmem:[%s14956_s3 + $0x18] sm:$0xff]  ;;  %2284 = vmatpush1.msra.mxu1 %v2136_v30  ;;  %v2132_v30 = vld [vmem:[%s14956_s3] sm:$0xff] }
 0x1dd   : > { %v9912_v27 = vpop.permute.xlu1 %1535  ;;  %2285 = vmatprep.subr.mxu1 %v2135_v31  ;;  %v7921_v31 = vld [vmem:[%s8869_s17 + $0x2ce] sm:$0xff]  ;;  %v7920_v26 = vld [vmem:[%s8869_s17 + $0x2c6] sm:$0xff] }
 0x1de   : > { %15215 = vst [vmem:[#allocation159_spill] sm:$0xff] %v9912_v27  ;;  %v9914_v25 = vpop.permute.xlu0 %1533  ;;  %2286 = vmatpush1.msra.mxu1 %v2134_v28 }
 0x1df   : > { %15216 = vst [vmem:[#allocation160_spill] sm:$0xff] %v9914_v25  ;;  %1723 = vrot.lane.b32.xlu1 %v9504_v5, %s15008_s22  ;;  %v374_v5 = vcombine.high %v360_v29, %v360_v29  ;;  %v14998_v25 = vmov 0.0  }
 0x1e0   : > { %1721 = vrot.lane.b32.xlu0 %v9507_v0, %s15008_s22  ;;  %v2133_v0 = vld [vmem:[%s14956_s3 + $0x8] sm:$0xff]  ;;  %541 = vmatprep.mubr.f32.mxu0 %v14998_v25 }
 0x1e1   : > { %v9932_v24 = vpop.permute.xlu1 %1575  ;;  %2287 = vmatprep.subr.mxu1 %v2133_v0  ;;  %7810 = vmatprep.subr.msk.mxu0 %vm472_vm0, %v374_v5  ;;  %v7922_v0 = vld [vmem:[%s8869_s17 + $0x2e6] sm:$0xff] }
 0x1e2   : > { %v9934_v27 = vpop.permute.xlu0 %1573  ;;  %7811 = vmatpush1.msk.msra.mxu0 %vm472_vm0, %v360_v29  ;;  %2288 = vmatpush1.msra.mxu1 %v2132_v30  ;;  %v9971_v29 = vld [vmem:[%s8869_s17 + $0xce] sm:$0xff] }
 0x1e3   : > { %1727 = vrot.lane.b32.xlu1 %v9518_v61, %s15008_s22  ;;  %v15217_v61 = vmov 0.0   ;;  %7812 = vmatmul.mubr.msk.f32.vlgmr.msra.gmra.mxu0 %vm375_vm1, %v9955_v22 }
 0x1e4   : > { %1725 = vrot.lane.b32.xlu0 %v9521_v34, %s15008_s22  ;;  %2321 = vmatprep.mubr.f32.mxu1 %v15217_v61  ;;  %v7923_v34 = vld [vmem:[%s8869_s17 + $0x2ee] sm:$0xff] }
 0x1e5   : > { %v9950_v28 = vpop.permute.xlu1 %1579  ;;  %547 = vmatprep.mubr.f32.mxu0 %v15217_v61 }
 0x1e6   : > { %v9952_v25 = vpop.permute.xlu0 %1577 }
 0x1e7   : > { %1731 = vrot.lane.b32.xlu1 %v7921_v31, %s15008_s22  ;;  %7813 = vmatmul.mubr.msk.f32.gmra.mxu0 %vm375_vm1, %v9971_v29  ;;  %v9983_v31 = vld [vmem:[%s8869_s17 + $0xe6] sm:$0xff] }
 0x1e8   : > { %1729 = vrot.lane.b32.xlu0 %v7920_v26, %s15008_s22  ;;  %553 = vmatprep.mubr.f32.mxu0 %v15217_v61 }
 0x1e9   : > { %v9966_v5 = vpop.permute.xlu1 %1583 }
 0x1ea   : > { %v9968_v23 = vpop.permute.xlu0 %1581 }
 0x1eb   : > { %1735 = vrot.lane.b32.xlu1 %v7923_v34, %s15008_s22  ;;  %7814 = vmatmul.mubr.msk.f32.gmra.mxu0 %vm375_vm1, %v9983_v31 }
 0x1ec   : > { %1733 = vrot.lane.b32.xlu0 %v7922_v0, %s15008_s22  ;;  %559 = vmatprep.mubr.f32.mxu0 %v15217_v61 }
 0x1ed   : > { %v9978_v26 = vpop.permute.xlu1 %1587 }
 0x1ee   : > { %v9980_v30 = vpop.permute.xlu0 %1585 }
 0x1ef   : > { %1775 = vrot.lane.b32.xlu1 %v9048_v40, %s8742_s18  ;;  %7815 = vmatmul.mubr.msk.f32.gmra.mxu0 %vm375_vm1, %v9997_v20 }
 0x1f0   : > { %1773 = vrot.lane.b32.xlu0 %v9051_v41, %s8742_s18  ;;  %565 = vmatprep.mubr.f32.mxu0 %v15217_v61 }
 0x1f1   : > { %v9992_v34 = vpop.permute.xlu1 %1591 }
 0x1f2   : > { %v9994_v0 = vpop.permute.xlu0 %1589 }
 0x1f3   : > { %1779 = vrot.lane.b32.xlu1 %v9058_v42, %s8742_s18  ;;  %7816 = vmatmul.mubr.msk.f32.gmra.mxu0 %vm375_vm1, %v10011_v21 }
 0x1f4   : > { %1777 = vrot.lane.b32.xlu0 %v9061_v43, %s8742_s18  ;;  %571 = vmatprep.mubr.f32.mxu0 %v15217_v61 }
 0x1f5   : > { %v10006_v40 = vpop.permute.xlu1 %1595 }
 0x1f6   : > { %v10008_v41 = vpop.permute.xlu0 %1593 }
 0x1f7   : > { %1783 = vrot.lane.b32.xlu1 %v9068_v44, %s8742_s18  ;;  %7817 = vmatmul.mubr.msk.f32.gmra.mxu0 %vm375_vm1, %v10025_v18 }
 0x1f8   : > { %1781 = vrot.lane.b32.xlu0 %v9071_v45, %s8742_s18  ;;  %577 = vmatprep.mubr.f32.mxu0 %v15217_v61 }
 0x1f9   : > { %v10020_v42 = vpop.permute.xlu1 %1599 }
 0x1fa   : > { %15218 = vst [vmem:[#allocation161_spill] sm:$0xff] %v10020_v42  ;;  %v10022_v43 = vpop.permute.xlu0 %1597 }
 0x1fb   : > { %15219 = vst [vmem:[#allocation162_spill] sm:$0xff] %v10022_v43  ;;  %1787 = vrot.lane.b32.xlu1 %v9078_v46, %s8742_s18  ;;  %7818 = vmatmul.mubr.msk.f32.gmra.mxu0 %vm375_vm1, %v10039_v19 }
 0x1fc   : > { %1785 = vrot.lane.b32.xlu0 %v9081_v47, %s8742_s18  ;;  %583 = vmatprep.mubr.f32.mxu0 %v15217_v61 }
 0x1fd   : > { %v10034_v44 = vpop.permute.xlu1 %1603 }
 0x1fe   : > { %15220 = vst [vmem:[#allocation163_spill] sm:$0xff] %v10034_v44  ;;  %v10036_v45 = vpop.permute.xlu0 %1601 }
 0x1ff   : > { %15221 = vst [vmem:[#allocation164_spill] sm:$0xff] %v10036_v45  ;;  %1791 = vrot.lane.b32.xlu1 %v9088_v48, %s8742_s18  ;;  %7819 = vmatmul.mubr.msk.f32.gmra.mxu0 %vm375_vm1, %v10053_v6  ;;  %v10223_v45 = vld [vmem:[%s8869_s17 + $0x1ee] sm:$0xff] }
 0x200   : > { %1789 = vrot.lane.b32.xlu0 %v9091_v49, %s8742_s18  ;;  %589 = vmatprep.mubr.f32.mxu0 %v15217_v61 }
 0x201   : > { %v10048_v46 = vpop.permute.xlu1 %1607 }
 0x202   : > { %15222 = vst [vmem:[#allocation165_spill] sm:$0xff] %v10048_v46  ;;  %v10050_v47 = vpop.permute.xlu0 %1605  ;;  %v10195_v46 = vld [vmem:[%s8869_s17 + $0x1ce] sm:$0xff] }
 0x203   : > { %15223 = vst [vmem:[#allocation166_spill] sm:$0xff] %v10050_v47  ;;  %1795 = vrot.lane.b32.xlu1 %v9098_v50, %s8742_s18  ;;  %7820 = vmatmul.mubr.msk.f32.gmra.mxu0 %vm375_vm1, %v10067_v16 }
 0x204   : > { %1793 = vrot.lane.b32.xlu0 %v9101_v51, %s8742_s18  ;;  %595 = vmatprep.mubr.f32.mxu0 %v15217_v61 }
 0x205   : > { %v10062_v48 = vpop.permute.xlu1 %1611 }
 0x206   : > { %15224 = vst [vmem:[#allocation167_spill] sm:$0xff] %v10062_v48  ;;  %v10064_v49 = vpop.permute.xlu0 %1609 }
 0x207   : > { %15225 = vst [vmem:[#allocation168_spill] sm:$0xff] %v10064_v49  ;;  %1799 = vrot.lane.b32.xlu1 %v9108_v52, %s8742_s18  ;;  %7821 = vmatmul.mubr.msk.f32.gmra.mxu0 %vm375_vm1, %v10081_v17 }
 0x208   : > { %1797 = vrot.lane.b32.xlu0 %v9111_v53, %s8742_s18  ;;  %601 = vmatprep.mubr.f32.mxu0 %v15217_v61 }
 0x209   : > { %v10076_v50 = vpop.permute.xlu1 %1615 }
 0x20a   : > { %15226 = vst [vmem:[#allocation169_spill] sm:$0xff] %v10076_v50  ;;  %v10078_v51 = vpop.permute.xlu0 %1613  ;;  %v10095_v50 = vld [vmem:[%s8869_s17 + $0x166] sm:$0xff] }
 0x20b   : > { %15227 = vst [vmem:[#allocation170_spill] sm:$0xff] %v10078_v51  ;;  %1803 = vrot.lane.b32.xlu1 %v9118_v54, %s8742_s18  ;;  %7822 = vmatmul.mubr.msk.f32.gmra.mxu0 %vm375_vm1, %v10095_v50 }
 0x20c   : > { %1801 = vrot.lane.b32.xlu0 %v9121_v55, %s8742_s18  ;;  %607 = vmatprep.mubr.f32.mxu0 %v15217_v61 }
 0x20d   : > { %v10090_v52 = vpop.permute.xlu1 %1619 }
 0x20e   : > { %15228 = vst [vmem:[#allocation171_spill] sm:$0xff] %v10090_v52  ;;  %v10092_v53 = vpop.permute.xlu0 %1617  ;;  %v10109_v52 = vld [vmem:[%s8869_s17 + $0x16e] sm:$0xff] }
 0x20f   : > { %15229 = vst [vmem:[#allocation172_spill] sm:$0xff] %v10092_v53  ;;  %1807 = vrot.lane.b32.xlu1 %v9128_v56, %s8742_s18  ;;  %7823 = vmatmul.mubr.msk.f32.gmra.mxu0 %vm375_vm1, %v10109_v52  ;;  %v7960_v53 = vld [vmem:[%s8869_s17 + $0x2c8] sm:$0xff] }
 0x210   : > { %1805 = vrot.lane.b32.xlu0 %v9131_v57, %s8742_s18  ;;  %613 = vmatprep.mubr.f32.mxu0 %v15217_v61 }
 0x211   : > { %v10104_v54 = vpop.permute.xlu1 %1623 }
 0x212   : > { %15230 = vst [vmem:[#allocation173_spill] sm:$0xff] %v10104_v54  ;;  %v10106_v55 = vpop.permute.xlu0 %1621  ;;  %v10123_v54 = vld [vmem:[%s8869_s17 + $0x186] sm:$0xff] }
 0x213   : > { %15231 = vst [vmem:[#allocation174_spill] sm:$0xff] %v10106_v55  ;;  %1811 = vrot.lane.b32.xlu1 %v9138_v58, %s8742_s18  ;;  %7824 = vmatmul.mubr.msk.f32.gmra.mxu0 %vm375_vm1, %v10123_v54  ;;  %v15241_v55 = vld [vmem:[#allocation135_spill] sm:$0xff] }
 0x214   : > { %1809 = vrot.lane.b32.xlu0 %v9141_v59, %s8742_s18  ;;  %619 = vmatprep.mubr.f32.mxu0 %v15217_v61 }
 0x215   : > { %v10118_v56 = vpop.permute.xlu1 %1627 }
 0x216   : > { %15232 = vst [vmem:[#allocation175_spill] sm:$0xff] %v10118_v56  ;;  %v10120_v57 = vpop.permute.xlu0 %1625  ;;  %v10137_v56 = vld [vmem:[%s8869_s17 + $0x18e] sm:$0xff] }
 0x217   : > { %15233 = vst [vmem:[#allocation176_spill] sm:$0xff] %v10120_v57  ;;  %1815 = vrot.lane.b32.xlu1 %v9152_v62, %s8742_s18  ;;  %7825 = vmatmul.mubr.msk.f32.gmra.mxu0 %vm375_vm1, %v10137_v56  ;;  %v15236_v62 = vld [vmem:[#allocation12_spill] sm:$0xff]  ;;  %v15239_v57 = vld [vmem:[#allocation131_spill] sm:$0xff] }
 0x218   : > { %1813 = vrot.lane.b32.xlu0 %v9155_v63, %s8742_s18  ;;  %625 = vmatprep.mubr.f32.mxu0 %v15217_v61 }
 0x219   : > { %v10132_v58 = vpop.permute.xlu1 %1631 }
 0x21a   : > { %15234 = vst [vmem:[#allocation177_spill] sm:$0xff] %v10132_v58  ;;  %v10134_v59 = vpop.permute.xlu0 %1629 }
 0x21b   : > { %15235 = vst [vmem:[#allocation178_spill] sm:$0xff] %v10134_v59  ;;  %1819 = vrot.lane.b32.xlu1 %v9166_v2, %s8742_s18  ;;  %v10151_v59 = vld [vmem:[%s8869_s17 + $0x1a6] sm:$0xff] }
 0x21c   : > { %1817 = vrot.lane.b32.xlu0 %v15236_v62, %s8742_s18  ;;  %7826 = vmatmul.mubr.msk.f32.gmra.mxu0 %vm375_vm1, %v10151_v59  ;;  %v15240_v2 = vld [vmem:[#allocation132_spill] sm:$0xff] }
 0x21d   : > { %v10146_v63 = vpop.permute.xlu1 %1635  ;;  %631 = vmatprep.mubr.f32.mxu0 %v15217_v61 }
 0x21e   : > { %15237 = vst [vmem:[#allocation12_spill] sm:$0xff] %v10146_v63  ;;  %v10148_v58 = vpop.permute.xlu0 %1633 }
 0x21f   : > { %15238 = vst [vmem:[#allocation179_spill] sm:$0xff] %v10148_v58  ;;  %1823 = vrot.lane.b32.xlu1 %v15239_v57, %s8742_s18  ;;  %v10165_v58 = vld [vmem:[%s8869_s17 + $0x1ae] sm:$0xff]  ;;  %v15242_v57 = vld [vmem:[#allocation136_spill] sm:$0xff] }
 0x220   : > { %1821 = vrot.lane.b32.xlu0 %v15240_v2, %s8742_s18  ;;  %7827 = vmatmul.mubr.msk.f32.gmra.mxu0 %vm375_vm1, %v10165_v58  ;;  %v7961_v2 = vld [vmem:[%s8869_s17 + $0x2d0] sm:$0xff] }
 0x221   : > { %v10160_v62 = vpop.permute.xlu1 %1675  ;;  %637 = vmatprep.mubr.f32.mxu0 %v15217_v61 }
 0x222   : > { %v10162_v63 = vpop.permute.xlu0 %1673 }
 0x223   : > { %1827 = vrot.lane.b32.xlu1 %v15241_v55, %s8742_s18  ;;  %v7963_v55 = vld [vmem:[%s8869_s17 + $0x2f0] sm:$0xff] }
 0x224   : > { %1825 = vrot.lane.b32.xlu0 %v15242_v57, %s8742_s18  ;;  %7828 = vmatmul.mubr.msk.f32.gmra.mxu0 %vm375_vm1, %v10181_v14  ;;  %v7962_v57 = vld [vmem:[%s8869_s17 + $0x2e8] sm:$0xff] }
 0x225   : > { %v10176_v51 = vpop.permute.xlu1 %1679  ;;  %643 = vmatprep.mubr.f32.mxu0 %v15217_v61 }
 0x226   : > { %v10178_v48 = vpop.permute.xlu0 %1677 }
 0x227   : > { %1831 = vrot.lane.b32.xlu1 %v7961_v2, %s8742_s18  ;;  %v8046_v2 = vld [vmem:[%s8869_s17 + $0x46] sm:$0xff] }
 0x228   : > { %1829 = vrot.lane.b32.xlu0 %v7960_v53, %s8742_s18  ;;  %7829 = vmatmul.mubr.msk.f32.gmra.mxu0 %vm375_vm1, %v10195_v46  ;;  %v8047_v53 = vld [vmem:[%s8869_s17 + $0x4e] sm:$0xff] }
 0x229   : > { %v10190_v49 = vpop.permute.xlu1 %1683  ;;  %649 = vmatprep.mubr.f32.mxu0 %v15217_v61 }
 0x22a   : > { %v10192_v15 = vpop.permute.xlu0 %1681 }
 0x22b   : > { %1835 = vrot.lane.b32.xlu1 %v7963_v55, %s8742_s18  ;;  %v8049_v55 = vld [vmem:[%s8869_s17 + $0x6e] sm:$0xff] }
 0x22c   : > { %1833 = vrot.lane.b32.xlu0 %v7962_v57, %s8742_s18  ;;  %7830 = vmatmul.mubr.msk.f32.gmra.mxu0 %vm375_vm1, %v10209_v13  ;;  %v8048_v57 = vld [vmem:[%s8869_s17 + $0x66] sm:$0xff] }
 0x22d   : > { %v10204_v12 = vpop.permute.xlu1 %1687  ;;  %655 = vmatprep.mubr.f32.mxu0 %v15217_v61 }
 0x22e   : > { %v10206_v47 = vpop.permute.xlu0 %1685 }
 0x22f   : > { %3314 = vrot.lane.b32.xlu1 %v8047_v53, %s15006_s15  ;;  %v8051_v53 = vld [vmem:[%s8869_s17 + $0x8e] sm:$0xff] }
 0x230   : > { %3312 = vrot.lane.b32.xlu0 %v8046_v2, %s15006_s15  ;;  %7831 = vmatmul.mubr.msk.f32.gmra.mxu0 %vm375_vm1, %v10223_v45  ;;  %v8050_v2 = vld [vmem:[%s8869_s17 + $0x86] sm:$0xff] }
 0x231   : > { %v10218_v44 = vpop.permute.xlu1 %1691  ;;  %661 = vmatprep.mubr.f32.mxu0 %v15217_v61 }
 0x232   : > { %v10220_v10 = vpop.permute.xlu0 %1689 }
 0x233   : > { %3318 = vrot.lane.b32.xlu1 %v8049_v55, %s15006_s15  ;;  %v8053_v55 = vld [vmem:[%s8869_s17 + $0xae] sm:$0xff] }
 0x234   : > { %3316 = vrot.lane.b32.xlu0 %v8048_v57, %s15006_s15  ;;  %7832 = vmatmul.mubr.msk.f32.gmra.mxu0 %vm375_vm1, %v10237_v8  ;;  %v8052_v57 = vld [vmem:[%s8869_s17 + $0xa6] sm:$0xff] }
 0x235   : > { %v10232_v11 = vpop.permute.xlu1 %1695  ;;  %667 = vmatprep.mubr.f32.mxu0 %v15217_v61 }
 0x236   : > { %15243 = vst [vmem:[#allocation131_spill] sm:$0xff] %v10232_v11  ;;  %v10234_v42 = vpop.permute.xlu0 %1693  ;;  %v10251_v11 = vld [vmem:[%s8869_s17 + $0x20e] sm:$0xff] }
 0x237   : > { %3322 = vrot.lane.b32.xlu1 %v8051_v53, %s15006_s15 }
 0x238   : > { %3320 = vrot.lane.b32.xlu0 %v8050_v2, %s15006_s15  ;;  %7833 = vmatmul.mubr.msk.f32.gmra.mxu0 %vm375_vm1, %v10251_v11 }
 0x239   : > { %v10246_v43 = vpop.permute.xlu1 %1699  ;;  %673 = vmatprep.mubr.f32.mxu0 %v15217_v61 }
 0x23a   : > { %15244 = vst [vmem:[#allocation132_spill] sm:$0xff] %v10246_v43  ;;  %v10248_v9 = vpop.permute.xlu0 %1697  ;;  %v10263_v43 = vld [vmem:[%s8869_s17 + $0x226] sm:$0xff] }
 0x23b   : > { %3326 = vrot.lane.b32.xlu1 %v8053_v55, %s15006_s15 }
 0x23c   : > { %3324 = vrot.lane.b32.xlu0 %v8052_v57, %s15006_s15  ;;  %7834 = vmatmul.mubr.msk.f32.gmra.mxu0 %vm375_vm1, %v10263_v43 }
 0x23d   : > { %v10258_v53 = vpop.permute.xlu1 %1703  ;;  %679 = vmatprep.mubr.f32.mxu0 %v15217_v61 }
 0x23e   : > { %15245 = vst [vmem:[#allocation135_spill] sm:$0xff] %v10258_v53  ;;  %v10260_v2 = vpop.permute.xlu0 %1701  ;;  %v10277_v53 = vld [vmem:[%s8869_s17 + $0x22e] sm:$0xff] }
 0x23f   : > { %3330 = vrot.lane.b32.xlu1 %v9971_v29, %s15006_s15  ;;  %v7802_v29 = vld [vmem:[%s8869_s17 + $0x246] sm:$0xff] }
 0x240   : > { %3328 = vrot.lane.b32.xlu0 %v9955_v22, %s15006_s15  ;;  %7835 = vmatmul.mubr.msk.f32.gmra.mxu0 %vm375_vm1, %v10277_v53 }
 0x241   : > { %v10272_v55 = vpop.permute.xlu1 %1707  ;;  %685 = vmatprep.mubr.f32.mxu0 %v15217_v61 }
 0x242   : > { %15246 = vst [vmem:[#allocation136_spill] sm:$0xff] %v10272_v55  ;;  %v10274_v57 = vpop.permute.xlu0 %1705 }
 0x243   : > { %15247 = vst [vmem:[#allocation180_spill] sm:$0xff] %v10274_v57  ;;  %3334 = vrot.lane.b32.xlu1 %v9997_v20, %s15006_s15  ;;  %v7803_v20 = vld [vmem:[%s8869_s17 + $0x24e] sm:$0xff] }
 0x244   : > { %3332 = vrot.lane.b32.xlu0 %v9983_v31, %s15006_s15  ;;  %7836 = vmatmul.mubr.msk.f32.gmra.mxu0 %vm375_vm1, %v7802_v29 }
 0x245   : > { %v10287_v22 = vpop.permute.xlu1 %1711  ;;  %691 = vmatprep.mubr.f32.mxu0 %v15217_v61 }
 0x246   : > { %v10289_v55 = vpop.permute.xlu0 %1709 }
 0x247   : > { %3338 = vrot.lane.b32.xlu1 %v10025_v18, %s15006_s15  ;;  %v7804_v18 = vld [vmem:[%s8869_s17 + $0x266] sm:$0xff] }
 0x248   : > { %3336 = vrot.lane.b32.xlu0 %v10011_v21, %s15006_s15  ;;  %7837 = vmatmul.mubr.msk.f32.gmra.mxu0 %vm375_vm1, %v7803_v20 }
 0x249   : > { %v10298_v31 = vpop.permute.xlu1 %1715  ;;  %697 = vmatprep.mubr.f32.mxu0 %v15217_v61 }
 0x24a   : > { %v10300_v57 = vpop.permute.xlu0 %1713 }
 0x24b   : > { %3342 = vrot.lane.b32.xlu1 %v10053_v6, %s15006_s15  ;;  %v7805_v6 = vld [vmem:[%s8869_s17 + $0x26e] sm:$0xff] }
 0x24c   : > { %3340 = vrot.lane.b32.xlu0 %v10039_v19, %s15006_s15  ;;  %7838 = vmatmul.mubr.msk.f32.gmra.mxu0 %vm375_vm1, %v7804_v18 }
 0x24d   : > { %v10309_v21 = vpop.permute.xlu1 %1719  ;;  %703 = vmatprep.mubr.f32.mxu0 %v15217_v61 }
 0x24e   : > { %v10311_v29 = vpop.permute.xlu0 %1717 }
 0x24f   : > { %3346 = vrot.lane.b32.xlu1 %v10081_v17, %s15006_s15  ;;  %v7806_v17 = vld [vmem:[%s8869_s17 + $0x286] sm:$0xff] }
 0x250   : > { %3344 = vrot.lane.b32.xlu0 %v10067_v16, %s15006_s15  ;;  %7839 = vmatmul.mubr.msk.f32.gmra.mxu0 %vm375_vm1, %v7805_v6  ;;  %v7844_v6 = vld [vmem:[%s8869_s17 + $0x84] sm:$0xff] }
 0x251   : > { %v10320_v19 = vpop.permute.xlu1 %1723  ;;  %709 = vmatprep.mubr.f32.mxu0 %v15217_v61 }
 0x252   : > { %15248 = vst [vmem:[#allocation181_spill] sm:$0xff] %v10320_v19  ;;  %v10322_v20 = vpop.permute.xlu0 %1721  ;;  %v15258_v19 = vld [vmem:[#allocation130_spill] sm:$0xff] }
 0x253   : > { %3350 = vrot.lane.b32.xlu1 %v10109_v52, %s15006_s15  ;;  %v7807_v52 = vld [vmem:[%s8869_s17 + $0x28e] sm:$0xff] }
 0x254   : > { %3348 = vrot.lane.b32.xlu0 %v10095_v50, %s15006_s15  ;;  %7840 = vmatmul.mubr.msk.f32.gmra.mxu0 %vm375_vm1, %v7806_v17  ;;  %v15253_v17 = vld [vmem:[#allocation9_spill] sm:$0xff] }
 0x255   : > { %v10331_v16 = vpop.permute.xlu1 %1727  ;;  %715 = vmatprep.mubr.f32.mxu0 %v15217_v61 }
 0x256   : > { %15249 = vst [vmem:[#allocation182_spill] sm:$0xff] %v10331_v16  ;;  %v10333_v18 = vpop.permute.xlu0 %1725 }
 0x257   : > { %15250 = vst [vmem:[#allocation183_spill] sm:$0xff] %v10333_v18  ;;  %3354 = vrot.lane.b32.xlu1 %v10137_v56, %s15006_s15  ;;  %v1869_v18 = vsel %vm375_vm1, %v7844_v6, %v15253_v17  ;;  %v15254_v56 = vld [vmem:[#allocation64_spill] sm:$0xff] }
 0x258   : > { %3352 = vrot.lane.b32.xlu0 %v10123_v54, %s15006_s15  ;;  %7841 = vmatmul.mubr.msk.f32.gmra.mxu0 %vm375_vm1, %v7807_v52  ;;  %v7808_v54 = vld [vmem:[%s8869_s17 + $0x2a6] sm:$0xff]  ;;  %v15255_v52 = vld [vmem:[#allocation98_spill] sm:$0xff] }
 0x259   : > { %v10343_v50 = vpop.permute.xlu1 %1731  ;;  %721 = vmatprep.mubr.f32.mxu0 %v15217_v61 }
 0x25a   : > { %15251 = vst [vmem:[#allocation184_spill] sm:$0xff] %v10343_v50  ;;  %v10345_v16 = vpop.permute.xlu0 %1729  ;;  %v1902_v50 = vsel %vm1901_vm2, %v1869_v18, %v15254_v56  ;;  %v15259_v56 = vld [vmem:[#allocation11_spill] sm:$0xff] }
 0x25b   : > { %15252 = vst [vmem:[#allocation185_spill] sm:$0xff] %v10345_v16  ;;  %3358 = vrot.lane.b32.xlu1 %v10165_v58, %s15006_s15  ;;  %v7845_v16 = vld [vmem:[%s8869_s17 + $0x8c] sm:$0xff]  ;;  %v1935_v6 = vsel %vm1934_vm3, %v1902_v50, %v15255_v52 }
 0x25c   : > { %3356 = vrot.lane.b32.xlu0 %v10151_v59, %s15006_s15  ;;  %v1968_v59 = vsel %vm1967_vm4, %v1935_v6, %v15258_v19  ;;  %7842 = vmatmul.mubr.msk.f32.gmra.mxu0 %vm375_vm1, %v7808_v54  ;;  %v7809_v50 = vld [vmem:[%s8869_s17 + $0x2ae] sm:$0xff]  ;;  %v1870_v52 = vsel %vm375_vm1, %v7845_v16, %v15259_v56  ;;  %v7846_v54 = vld [vmem:[%s8869_s17 + $0xa4] sm:$0xff]  ;;  %v15260_v6 = vld [vmem:[#allocation63_spill] sm:$0xff] }
 0x25d   : > { %v10361_v17 = vpop.permute.xlu1 %1735  ;;  %v2001_v18 = vsel %vm2000_vm5, %v1968_v59, %v9777_v36  ;;  %727 = vmatprep.mubr.f32.mxu0 %v15217_v61  ;;  %v1903_v36 = vsel %vm1901_vm2, %v1870_v52, %v15260_v6 }
 0x25e   : > { %15256 = vst [vmem:[#allocation9_spill] sm:$0xff] %v10361_v17  ;;  %v10363_v58 = vpop.permute.xlu0 %1733  ;;  %v2034_v19 = vsel %vm2033_vm6, %v2001_v18, %v9934_v27  ;;  %v15261_v17 = vld [vmem:[#allocation97_spill] sm:$0xff] }
 0x25f   : > { %15257 = vst [vmem:[#allocation64_spill] sm:$0xff] %v10363_v58  ;;  %3362 = vrot.lane.b32.xlu1 %v10195_v46, %s15006_s15  ;;  %v2067_v46 = vsel %vm2066_vm7, %v2034_v19, %v10162_v63  ;;  %v1936_v58 = vsel %vm1934_vm3, %v1903_v36, %v15261_v17  ;;  %v15262_v27 = vld [vmem:[#allocation129_spill] sm:$0xff]  ;;  %v15263_v63 = vld [vmem:[#allocation8_spill] sm:$0xff] }
 0x260   : > { %3360 = vrot.lane.b32.xlu0 %v10181_v14, %s15006_s15  ;;  %7843 = vmatmul.mubr.msk.f32.gmra.mxu0 %vm375_vm1, %v7809_v50  ;;  %v1969_v18 = vsel %vm1967_vm4, %v1936_v58, %v15262_v27  ;;  %v1871_v56 = vsel %vm375_vm1, %v7846_v54, %v15263_v63  ;;  %v7847_v17 = vld [vmem:[%s8869_s17 + $0xac] sm:$0xff]  ;;  %v15264_v19 = vld [vmem:[#allocation68_spill] sm:$0xff] }
 0x261   : > { %v1776_v59 = vpop.permute.xlu1 %1775  ;;  %v2002_v52 = vsel %vm2000_vm5, %v1969_v18, %v9775_v7  ;;  %v1904_v50 = vsel %vm1901_vm2, %v1871_v56, %v15264_v19  ;;  %v15266_v7 = vld [vmem:[#allocation134_spill] sm:$0xff] }
 0x262   : > { %v1774_v14 = vpop.permute.xlu0 %1773  ;;  %v2035_v58 = vsel %vm2033_vm6, %v2002_v52, %v9932_v24  ;;  %v15267_v24 = vld [vmem:[#allocation10_spill] sm:$0xff]  ;;  %v15270_v52 = vld [vmem:[#allocation133_spill] sm:$0xff] }
 0x263   : > { %v2100_v16 = vsel %vm2099_vm8, %v2067_v46, %v1774_v14  ;;  %3366 = vrot.lane.b32.xlu1 %v10223_v45, %s15006_s15  ;;  %v2068_v54 = vsel %vm2066_vm7, %v2035_v58, %v10160_v62  ;;  %v15268_v62 = vld [vmem:[#allocation67_spill] sm:$0xff] }
 0x264   : > { %3364 = vrot.lane.b32.xlu0 %v10209_v13, %s15006_s15  ;;  %7966 = vmatmul.mubr.msk.f32.vlgmr.msra.gmra.mxu1 %vm2154_vm9, %v2100_v16  ;;  %v15265_v13 = vld [vmem:[#allocation100_spill] sm:$0xff]  ;;  %v2101_v14 = vsel %vm2099_vm8, %v2068_v54, %v1776_v59  ;;  %v1872_v16 = vsel %vm375_vm1, %v7847_v17, %v15267_v24  ;;  %v829_v58 = vld [vmem:[#allocation2 + $0xf8] sm:$0xff] }
 0x265   : > { %v1780_v6 = vpop.permute.xlu1 %1779  ;;  %2327 = vmatprep.mubr.f32.mxu1 %v15217_v61  ;;  %v1937_v36 = vsel %vm1934_vm3, %v1904_v50, %v15265_v13  ;;  %v1905_v18 = vsel %vm1901_vm2, %v1872_v16, %v15268_v62  ;;  %v2610_v50 = vld [vmem:[#allocation2 + $0x2f8] sm:$0xff]  ;;  %v8358_v13 = vld [vmem:[%s8869_s17 + $0xc4] sm:$0xff]  ;;  %2900 = vmatprep.subr.mxu1 %v829_v58 }
 0x266   : > { %v1778_v45 = vpop.permute.xlu0 %1777  ;;  %v1970_v46 = vsel %vm1967_vm4, %v1937_v36, %v15266_v7  ;;  %v15271_v36 = vld [vmem:[#allocation14_spill] sm:$0xff]  ;;  %2643 = vmatprep.subr.mxu0 %v2610_v50 }
 0x267   : > { %3370 = vrot.lane.b32.xlu1 %v10251_v11, %s15006_s15  ;;  %v2003_v27 = vsel %vm2000_vm5, %v1970_v46, %v9787_v39  ;;  %v1873_v54 = vsel %vm375_vm1, %v8358_v13, %v15271_v36  ;;  %v7999_v7 = vld [vmem:[%s8869_s17 + $0x4a] sm:$0xff]  ;;  %v8095_v58 = vld [vmem:[%s8869_s17 + $0x72] sm:$0xff] }
 0x268   : > { %3368 = vrot.lane.b32.xlu0 %v10237_v8, %s15006_s15  ;;  %7967 = vmatmul.mubr.msk.f32.gmra.mxu1 %vm2154_vm9, %v2101_v14  ;;  %v2036_v59 = vsel %vm2033_vm6, %v2003_v27, %v9952_v25  ;;  %v15269_v8 = vld [vmem:[#allocation99_spill] sm:$0xff]  ;;  %v828_v46 = vld [vmem:[#allocation2 + $0xf0] sm:$0xff]  ;;  %v15276_v36 = vld [vmem:[#allocation69_spill] sm:$0xff] }
 0x269   : > { %v10426_v11 = vpop.permute.xlu1 %1783  ;;  %2333 = vmatprep.mubr.f32.mxu1 %v15217_v61  ;;  %v1938_v56 = vsel %vm1934_vm3, %v1905_v18, %v15269_v8  ;;  %v2069_v39 = vsel %vm2066_vm7, %v2036_v59, %v10178_v48  ;;  %v8094_v25 = vld [vmem:[%s8869_s17 + $0x52] sm:$0xff]  ;;  %2901 = vmatpush1.msra.mxu1 %v828_v46  ;;  %v8001_v13 = vld [vmem:[%s8869_s17 + $0x6a] sm:$0xff] }
 0x26a   : > { %v1782_v63 = vpop.permute.xlu0 %1781  ;;  %v1971_v17 = vsel %vm1967_vm4, %v1938_v56, %v15270_v52  ;;  %v2102_v19 = vsel %vm2099_vm8, %v2069_v39, %v1778_v45  ;;  %v2609_v45 = vld [vmem:[#allocation2 + $0x2f0] sm:$0xff]  ;;  %v2607_v39 = vld [vmem:[#allocation2 + $0x2e0] sm:$0xff] }
 0x26b   : > { %3374 = vrot.lane.b32.xlu1 %v10277_v53, %s15006_s15  ;;  %v2004_v48 = vsel %vm2000_vm5, %v1971_v17, %v9785_v38  ;;  %v15272_v53 = vld [vmem:[#allocation70_spill] sm:$0xff]  ;;  %v2608_v38 = vld [vmem:[#allocation2 + $0x2e8] sm:$0xff]  ;;  %2644 = vmatpush1.msra.mxu0 %v2609_v45  ;;  %v826_v52 = vld [vmem:[#allocation2 + $0xe0] sm:$0xff] }
 0x26c   : > { %3372 = vrot.lane.b32.xlu0 %v10263_v43, %s15006_s15  ;;  %7968 = vmatmul.mubr.msk.f32.gmra.mxu1 %vm2154_vm9, %v2102_v19  ;;  %v1906_v14 = vsel %vm1901_vm2, %v1873_v54, %v15272_v53  ;;  %v2037_v43 = vsel %vm2033_vm6, %v2004_v48, %v9950_v28  ;;  %v15273_v27 = vld [vmem:[#allocation102_spill] sm:$0xff]  ;;  %v827_v28 = vld [vmem:[#allocation2 + $0xe8] sm:$0xff] }
 0x26d   : > { %v10452_v24 = vpop.permute.xlu1 %1787  ;;  %2339 = vmatprep.mubr.f32.mxu1 %v15217_v61  ;;  %v1939_v62 = vsel %vm1934_vm3, %v1906_v14, %v15273_v27  ;;  %v2070_v18 = vsel %vm2066_vm7, %v2037_v43, %v10176_v51  ;;  %v15274_v59 = vld [vmem:[#allocation138_spill] sm:$0xff]  ;;  %v15275_v19 = vld [vmem:[#allocation13_spill] sm:$0xff]  ;;  %2645 = vmatprep.subr.mxu0 %v2608_v38 }
 0x26e   : > { %v10454_v16 = vpop.permute.xlu0 %1785  ;;  %v1972_v8 = vsel %vm1967_vm4, %v1939_v62, %v15274_v59  ;;  %v2103_v56 = vsel %vm2099_vm8, %v2070_v18, %v1780_v6  ;;  %v8359_v17 = vld [vmem:[%s8869_s17 + $0xcc] sm:$0xff]  ;;  %2902 = vmatprep.subr.mxu1 %v827_v28  ;;  %2646 = vmatpush1.msra.mxu0 %v2607_v39  ;;  %v8360_v62 = vld [vmem:[%s8869_s17 + $0xe4] sm:$0xff] }
 0x26f   : > { %3442 = vrot.lane.b32.xlu1 %v8094_v25, %s15004_s16  ;;  %v1874_v50 = vsel %vm375_vm1, %v8359_v17, %v15275_v19  ;;  %v2005_v51 = vsel %vm2000_vm5, %v1972_v8, %v9795_v3  ;;  %v2606_v3 = vld [vmem:[#allocation2 + $0x2d8] sm:$0xff]  ;;  %2903 = vmatpush1.msra.mxu1 %v826_v52  ;;  %v15278_v53 = vld [vmem:[#allocation137_spill] sm:$0xff]  ;;  %v2605_v38 = vld [vmem:[#allocation2 + $0x2d0] sm:$0xff] }
 0x270   : > { %3440 = vrot.lane.b32.xlu0 %v7999_v7, %s15004_s16  ;;  %7969 = vmatmul.mubr.msk.f32.gmra.mxu1 %vm2154_vm9, %v2103_v56  ;;  %v1907_v6 = vsel %vm1901_vm2, %v1874_v50, %v15276_v36  ;;  %v2038_v25 = vsel %vm2033_vm6, %v2005_v51, %v9968_v23  ;;  %v15277_v7 = vld [vmem:[#allocation101_spill] sm:$0xff]  ;;  %v825_v23 = vld [vmem:[#allocation2 + $0xd8] sm:$0xff]  ;;  %v824_v27 = vld [vmem:[#allocation2 + $0xd0] sm:$0xff] }
 0x271   : > { %v10478_v54 = vpop.permute.xlu1 %1791  ;;  %2345 = vmatprep.mubr.f32.mxu1 %v15217_v61  ;;  %v1940_v45 = vsel %vm1934_vm3, %v1907_v6, %v15277_v7  ;;  %v2071_v46 = vsel %vm2066_vm7, %v2038_v25, %v10192_v15  ;;  %v15279_v18 = vld [vmem:[#allocation16_spill] sm:$0xff]  ;;  %v8096_v59 = vld [vmem:[%s8869_s17 + $0x92] sm:$0xff]  ;;  %v8003_v8 = vld [vmem:[%s8869_s17 + $0x8a] sm:$0xff]  ;;  %2647 = vmatprep.subr.mxu0 %v2606_v3 }
 0x272   : > { %v10480_v48 = vpop.permute.xlu0 %1789  ;;  %v1973_v14 = vsel %vm1967_vm4, %v1940_v45, %v15278_v53  ;;  %v2104_v43 = vsel %vm2099_vm8, %v2071_v46, %v1782_v63  ;;  %v1875_v28 = vsel %vm375_vm1, %v8360_v62, %v15279_v18  ;;  %v15280_v56 = vld [vmem:[#allocation72_spill] sm:$0xff]  ;;  %2904 = vmatprep.subr.mxu1 %v825_v23  ;;  %2648 = vmatpush1.msra.mxu0 %v2605_v38  ;;  %v8361_v3 = vld [vmem:[%s8869_s17 + $0xec] sm:$0xff]  ;;  %v15283_v7 = vld [vmem:[#allocation15_spill] sm:$0xff] }
 0x273   : > { %3446 = vrot.lane.b32.xlu1 %v8095_v58, %s15004_s16  ;;  %v2006_v15 = vsel %vm2000_vm5, %v1973_v14, %v9793_v33  ;;  %v1908_v63 = vsel %vm1901_vm2, %v1875_v28, %v15280_v56  ;;  %v2604_v33 = vld [vmem:[#allocation2 + $0x2c8] sm:$0xff]  ;;  %v15281_v19 = vld [vmem:[#allocation104_spill] sm:$0xff]  ;;  %2905 = vmatpush1.msra.mxu1 %v824_v27  ;;  %v1876_v45 = vsel %vm375_vm1, %v8361_v3, %v15283_v7  ;;  %v8097_v46 = vld [vmem:[%s8869_s17 + $0xb2] sm:$0xff] }
 0x274   : > { %3444 = vrot.lane.b32.xlu0 %v8001_v13, %s15004_s16  ;;  %7970 = vmatmul.mubr.msk.f32.gmra.mxu1 %vm2154_vm9, %v2104_v43  ;;  %v2039_v39 = vsel %vm2033_vm6, %v2006_v15, %v9966_v5  ;;  %v1941_v50 = vsel %vm1934_vm3, %v1908_v63, %v15281_v19  ;;  %v823_v5 = vld [vmem:[#allocation2 + $0xc8] sm:$0xff]  ;;  %v15282_v58 = vld [vmem:[#allocation140_spill] sm:$0xff]  ;;  %v15284_v53 = vld [vmem:[#allocation71_spill] sm:$0xff] }
 0x275   : > { %v10504_v52 = vpop.permute.xlu1 %1795  ;;  %2351 = vmatprep.mubr.f32.mxu1 %v15217_v61  ;;  %v2072_v51 = vsel %vm2066_vm7, %v2039_v39, %v10190_v49  ;;  %v1974_v13 = vsel %vm1967_vm4, %v1941_v50, %v15282_v58  ;;  %v2603_v6 = vld [vmem:[#allocation2 + $0x2c0] sm:$0xff]  ;;  %v8005_v23 = vld [vmem:[%s8869_s17 + $0xaa] sm:$0xff]  ;;  %2649 = vmatprep.subr.mxu0 %v2604_v33  ;;  %v15285_v27 = vld [vmem:[#allocation103_spill] sm:$0xff] }
 0x276   : > { %v10506_v17 = vpop.permute.xlu0 %1793  ;;  %v2105_v36 = vsel %vm2099_vm8, %v2072_v51, %v10426_v11  ;;  %v822_v25 = vld [vmem:[#allocation2 + $0xc0] sm:$0xff]  ;;  %v2007_v49 = vsel %vm2000_vm5, %v1974_v13, %v9801_v1  ;;  %v1909_v11 = vsel %vm1901_vm2, %v1876_v45, %v15284_v53  ;;  %2906 = vmatprep.subr.mxu1 %v823_v5  ;;  %v2602_v1 = vld [vmem:[#allocation2 + $0x2b8] sm:$0xff]  ;;  %2650 = vmatpush1.msra.mxu0 %v2603_v6  ;;  %v820_v56 = vld [vmem:[#allocation2 + $0xb0] sm:$0xff] }
 0x277   : > { %3450 = vrot.lane.b32.xlu1 %v8096_v59, %s15004_s16  ;;  %v2040_v14 = vsel %vm2033_vm6, %v2007_v49, %v9980_v30  ;;  %v1942_v62 = vsel %vm1934_vm3, %v1909_v11, %v15285_v27  ;;  %2907 = vmatpush1.msra.mxu1 %v822_v25  ;;  %v821_v30 = vld [vmem:[#allocation2 + $0xb8] sm:$0xff]  ;;  %v8362_v63 = vld [vmem:[%s8869_s17 + $0x104] sm:$0xff]  ;;  %v15287_v39 = vld [vmem:[#allocation18_spill] sm:$0xff] }
 0x278   : > { %3448 = vrot.lane.b32.xlu0 %v8003_v8, %s15004_s16  ;;  %7971 = vmatmul.mubr.msk.f32.gmra.mxu1 %vm2154_vm9, %v2105_v36  ;;  %v2073_v18 = vsel %vm2066_vm7, %v2040_v14, %v10206_v47  ;;  %v15286_v28 = vld [vmem:[#allocation139_spill] sm:$0xff]  ;;  %v2601_v8 = vld [vmem:[#allocation2 + $0x2b0] sm:$0xff]  ;;  %v1877_v33 = vsel %vm375_vm1, %v8362_v63, %v15287_v39  ;;  %v2599_v49 = vld [vmem:[#allocation2 + $0x2a0] sm:$0xff] }
 0x279   : > { %v10531_v43 = vpop.permute.xlu1 %1799  ;;  %2357 = vmatprep.mubr.f32.mxu1 %v15217_v61  ;;  %v1975_v15 = vsel %vm1967_vm4, %v1942_v62, %v15286_v28  ;;  %v2106_v59 = vsel %vm2099_vm8, %v2073_v18, %v10454_v16  ;;  %v8098_v19 = vld [vmem:[%s8869_s17 + $0xd2] sm:$0xff]  ;;  %v10554_v50 = vld [vmem:[%s8869_s17 + $0xca] sm:$0xff]  ;;  %2651 = vmatprep.subr.mxu0 %v2602_v1 }
 0x27a   : > { %v10533_v38 = vpop.permute.xlu0 %1797  ;;  %v2008_v47 = vsel %vm2000_vm5, %v1975_v15, %v9799_v32  ;;  %v15288_v16 = vld [vmem:[#allocation74_spill] sm:$0xff]  ;;  %2908 = vmatprep.subr.mxu1 %v821_v30  ;;  %v2600_v32 = vld [vmem:[#allocation2 + $0x2a8] sm:$0xff]  ;;  %2652 = vmatpush1.msra.mxu0 %v2601_v8 }
 0x27b   : > { %3454 = vrot.lane.b32.xlu1 %v8097_v46, %s15004_s16  ;;  %v1910_v51 = vsel %vm1901_vm2, %v1877_v33, %v15288_v16  ;;  %v2041_v5 = vsel %vm2033_vm6, %v2008_v47, %v9978_v26  ;;  %v15289_v36 = vld [vmem:[#allocation106_spill] sm:$0xff]  ;;  %2909 = vmatpush1.msra.mxu1 %v820_v56  ;;  %v819_v26 = vld [vmem:[#allocation2 + $0xa8] sm:$0xff]  ;;  %v818_v46 = vld [vmem:[#allocation2 + $0xa0] sm:$0xff] }
 0x27c   : > { %3452 = vrot.lane.b32.xlu0 %v8005_v23, %s15004_s16  ;;  %7972 = vmatmul.mubr.msk.f32.gmra.mxu1 %vm2154_vm9, %v2106_v59  ;;  %v1943_v6 = vsel %vm1934_vm3, %v1910_v51, %v15289_v36  ;;  %v2074_v25 = vsel %vm2066_vm7, %v2041_v5, %v10204_v12  ;;  %v15290_v3 = vld [vmem:[#allocation22_spill] sm:$0xff]  ;;  %v15291_v53 = vld [vmem:[#allocation17_spill] sm:$0xff] }
 0x27d   : > { %v10560_v58 = vpop.permute.xlu1 %1803  ;;  %2363 = vmatprep.mubr.f32.mxu1 %v15217_v61  ;;  %v1976_v7 = vsel %vm1967_vm4, %v1943_v6, %v15290_v3  ;;  %v2107_v45 = vsel %vm2099_vm8, %v2074_v25, %v10452_v24  ;;  %v8363_v23 = vld [vmem:[%s8869_s17 + $0x10c] sm:$0xff]  ;;  %2653 = vmatprep.subr.mxu0 %v2600_v32  ;;  %v8364_v47 = vld [vmem:[%s8869_s17 + $0x124] sm:$0xff] }
 0x27e   : > { %v10562_v13 = vpop.permute.xlu0 %1801  ;;  %v1878_v12 = vsel %vm375_vm1, %v8363_v23, %v15291_v53  ;;  %v2009_v11 = vsel %vm2000_vm5, %v1976_v7, %v9809_v37  ;;  %v8099_v14 = vld [vmem:[%s8869_s17 + $0xf2] sm:$0xff]  ;;  %v10584_v1 = vld [vmem:[%s8869_s17 + $0xea] sm:$0xff]  ;;  %2910 = vmatprep.subr.mxu1 %v819_v26  ;;  %2654 = vmatpush1.msra.mxu0 %v2599_v49  ;;  %v15297_v26 = vld [vmem:[#allocation108_spill] sm:$0xff] }
 0x27f   : > { %3458 = vrot.lane.b32.xlu1 %v8098_v19, %s15004_s16  ;;  %v15292_v24 = vld [vmem:[#allocation73_spill] sm:$0xff]  ;;  %v2042_v62 = vsel %vm2033_vm6, %v2009_v11, %v9994_v0  ;;  %v2598_v37 = vld [vmem:[#allocation2 + $0x298] sm:$0xff]  ;;  %2911 = vmatpush1.msra.mxu1 %v818_v46  ;;  %v2597_v39 = vld [vmem:[#allocation2 + $0x290] sm:$0xff] }
 0x280   : > { %3456 = vrot.lane.b32.xlu0 %v10554_v50, %s15004_s16  ;;  %7973 = vmatmul.mubr.msk.f32.gmra.mxu1 %vm2154_vm9, %v2107_v45  ;;  %v1911_v27 = vsel %vm1901_vm2, %v1878_v12, %v15292_v24  ;;  %v15293_v28 = vld [vmem:[#allocation105_spill] sm:$0xff]  ;;  %v2075_v59 = vsel %vm2066_vm7, %v2042_v62, %v10220_v10  ;;  %v817_v0 = vld [vmem:[#allocation2 + $0x98] sm:$0xff]  ;;  %v816_v33 = vld [vmem:[#allocation2 + $0x90] sm:$0xff] }
 0x281   : > { %v10590_v18 = vpop.permute.xlu1 %1807  ;;  %2369 = vmatprep.mubr.f32.mxu1 %v15217_v61  ;;  %v1944_v15 = vsel %vm1934_vm3, %v1911_v27, %v15293_v28  ;;  %v15294_v8 = vld [vmem:[#allocation21_spill] sm:$0xff]  ;;  %v2108_v63 = vsel %vm2099_vm8, %v2075_v59, %v10480_v48  ;;  %v15295_v19 = vld [vmem:[#allocation20_spill] sm:$0xff]  ;;  %v8100_v51 = vld [vmem:[%s8869_s17 + $0x112] sm:$0xff]  ;;  %2655 = vmatprep.subr.mxu0 %v2598_v37 }
 0x282   : > { %v10592_v30 = vpop.permute.xlu0 %1805  ;;  %v1977_v56 = vsel %vm1967_vm4, %v1944_v15, %v15294_v8  ;;  %v1879_v10 = vsel %vm375_vm1, %v8364_v47, %v15295_v19  ;;  %v10614_v5 = vld [vmem:[%s8869_s17 + $0x10a] sm:$0xff]  ;;  %v15296_v48 = vld [vmem:[#allocation76_spill] sm:$0xff]  ;;  %2912 = vmatprep.subr.mxu1 %v817_v0  ;;  %2656 = vmatpush1.msra.mxu0 %v2597_v39  ;;  %v15299_v11 = vld [vmem:[#allocation19_spill] sm:$0xff] }
 0x283   : > { %3462 = vrot.lane.b32.xlu1 %v8099_v14, %s15004_s16  ;;  %v2010_v16 = vsel %vm2000_vm5, %v1977_v56, %v9807_v4  ;;  %v1912_v32 = vsel %vm1901_vm2, %v1879_v10, %v15296_v48  ;;  %v2596_v4 = vld [vmem:[#allocation2 + $0x288] sm:$0xff]  ;;  %2913 = vmatpush1.msra.mxu1 %v816_v33  ;;  %v15298_v45 = vld [vmem:[#allocation26_spill] sm:$0xff]  ;;  %v2595_v23 = vld [vmem:[#allocation2 + $0x280] sm:$0xff] }
 0x284   : > { %3460 = vrot.lane.b32.xlu0 %v10584_v1, %s15004_s16  ;;  %7974 = vmatmul.mubr.msk.f32.gmra.mxu1 %vm2154_vm9, %v2108_v63  ;;  %v2043_v36 = vsel %vm2033_vm6, %v2010_v16, %v9992_v34  ;;  %v1945_v3 = vsel %vm1934_vm3, %v1912_v32, %v15297_v26  ;;  %v815_v34 = vld [vmem:[#allocation2 + $0x88] sm:$0xff]  ;;  %v814_v53 = vld [vmem:[#allocation2 + $0x80] sm:$0xff]  ;;  %v8101_v24 = vld [vmem:[%s8869_s17 + $0x132] sm:$0xff] }
 0x285   : > { %v10620_v6 = vpop.permute.xlu1 %1811  ;;  %2375 = vmatprep.mubr.f32.mxu1 %v15217_v61  ;;  %v2076_v7 = vsel %vm2066_vm7, %v2043_v36, %v10218_v44  ;;  %v1978_v49 = vsel %vm1967_vm4, %v1945_v3, %v15298_v45  ;;  %v8365_v12 = vld [vmem:[%s8869_s17 + $0x12c] sm:$0xff]  ;;  %2657 = vmatprep.subr.mxu0 %v2596_v4  ;;  %v15301_v59 = vld [vmem:[#allocation107_spill] sm:$0xff]  ;;  %v8366_v19 = vld [vmem:[%s8869_s17 + $0x144] sm:$0xff] }
 0x286   : > { %v10622_v25 = vpop.permute.xlu0 %1809  ;;  %v2109_v46 = vsel %vm2099_vm8, %v2076_v7, %v10478_v54  ;;  %v1880_v44 = vsel %vm375_vm1, %v8365_v12, %v15299_v11  ;;  %v2011_v14 = vsel %vm2000_vm5, %v1978_v49, %v9817_v60  ;;  %v10644_v27 = vld [vmem:[%s8869_s17 + $0x12a] sm:$0xff]  ;;  %v15300_v54 = vld [vmem:[#allocation75_spill] sm:$0xff]  ;;  %2914 = vmatprep.subr.mxu1 %v815_v34  ;;  %2658 = vmatpush1.msra.mxu0 %v2595_v23  ;;  %v15303_v10 = vld [vmem:[#allocation24_spill] sm:$0xff] }
 0x287   : > { %3466 = vrot.lane.b32.xlu1 %v8100_v51, %s15004_s16  ;;  %v1913_v62 = vsel %vm1901_vm2, %v1880_v44, %v15300_v54  ;;  %v2044_v37 = vsel %vm2033_vm6, %v2011_v14, %v10008_v41  ;;  %v2594_v60 = vld [vmem:[#allocation2 + $0x278] sm:$0xff]  ;;  %2915 = vmatpush1.msra.mxu1 %v814_v53  ;;  %v15302_v56 = vld [vmem:[#allocation25_spill] sm:$0xff]  ;;  %v2593_v33 = vld [vmem:[#allocation2 + $0x270] sm:$0xff] }
 0x288   : > { %3464 = vrot.lane.b32.xlu0 %v10614_v5, %s15004_s16  ;;  %7975 = vmatmul.mubr.msk.f32.gmra.mxu1 %vm2154_vm9, %v2109_v46  ;;  %v1946_v0 = vsel %vm1934_vm3, %v1913_v62, %v15301_v59  ;;  %v2077_v8 = vsel %vm2066_vm7, %v2044_v37, %v10234_v42  ;;  %v813_v41 = vld [vmem:[#allocation2 + $0x78] sm:$0xff]  ;;  %v812_v47 = vld [vmem:[#allocation2 + $0x70] sm:$0xff]  ;;  %v1881_v42 = vsel %vm375_vm1, %v8366_v19, %v15303_v10  ;;  %v2591_v53 = vld [vmem:[#allocation2 + $0x260] sm:$0xff] }
 0x289   : > { %v10650_v28 = vpop.permute.xlu1 %1815  ;;  %2381 = vmatprep.mubr.f32.mxu1 %v15217_v61  ;;  %v1979_v63 = vsel %vm1967_vm4, %v1946_v0, %v15302_v56  ;;  %v2110_v39 = vsel %vm2099_vm8, %v2077_v8, %v10506_v17  ;;  %v8102_v51 = vld [vmem:[%s8869_s17 + $0x152] sm:$0xff]  ;;  %v10674_v48 = vld [vmem:[%s8869_s17 + $0x14a] sm:$0xff]  ;;  %2659 = vmatprep.subr.mxu0 %v2594_v60  ;;  %v810_v12 = vld [vmem:[#allocation2 + $0x60] sm:$0xff] }
 0x28a   : > { %v10652_v15 = vpop.permute.xlu0 %1813  ;;  %v2012_v16 = vsel %vm2000_vm5, %v1979_v63, %v9815_v35  ;;  %v15304_v17 = vld [vmem:[#allocation78_spill] sm:$0xff]  ;;  %2916 = vmatprep.subr.mxu1 %v813_v41  ;;  %v2592_v35 = vld [vmem:[#allocation2 + $0x268] sm:$0xff]  ;;  %v15306_v34 = vld [vmem:[#allocation131_spill] sm:$0xff]  ;;  %2660 = vmatpush1.msra.mxu0 %v2593_v33 }
 0x28b   : > { %3470 = vrot.lane.b32.xlu1 %v8101_v24, %s15004_s16  ;;  %v1914_v32 = vsel %vm1901_vm2, %v1881_v42, %v15304_v17  ;;  %v2045_v36 = vsel %vm2033_vm6, %v2012_v16, %v10006_v40  ;;  %v15305_v3 = vld [vmem:[#allocation110_spill] sm:$0xff]  ;;  %2917 = vmatpush1.msra.mxu1 %v812_v47  ;;  %v811_v40 = vld [vmem:[#allocation2 + $0x68] sm:$0xff]  ;;  %v15308_v44 = vld [vmem:[#allocation23_spill] sm:$0xff] }
 0x28c   : > { %3468 = vrot.lane.b32.xlu0 %v10644_v27, %s15004_s16  ;;  %7976 = vmatmul.mubr.msk.f32.gmra.mxu1 %vm2154_vm9, %v2110_v39  ;;  %v1947_v7 = vsel %vm1934_vm3, %v1914_v32, %v15305_v3  ;;  %v2078_v45 = vsel %vm2066_vm7, %v2045_v36, %v15306_v34  ;;  %v15307_v49 = vld [vmem:[#allocation30_spill] sm:$0xff]  ;;  %v2590_v56 = vld [vmem:[#allocation2 + $0x258] sm:$0xff]  ;;  %v15312_v63 = vld [vmem:[#allocation109_spill] sm:$0xff] }
 0x28d   : > { %v10680_v4 = vpop.permute.xlu1 %1819  ;;  %2387 = vmatprep.mubr.f32.mxu1 %v15217_v61  ;;  %v1980_v46 = vsel %vm1967_vm4, %v1947_v7, %v15307_v49  ;;  %v2111_v23 = vsel %vm2099_vm8, %v2078_v45, %v10504_v52  ;;  %v8367_v11 = vld [vmem:[%s8869_s17 + $0x14c] sm:$0xff]  ;;  %2661 = vmatprep.subr.mxu0 %v2592_v35  ;;  %v809_v47 = vld [vmem:[#allocation2 + $0x58] sm:$0xff]  ;;  %v8368_v17 = vld [vmem:[%s8869_s17 + $0x164] sm:$0xff] }
 0x28e   : > { %v10682_v26 = vpop.permute.xlu0 %1817  ;;  %v1882_v14 = vsel %vm375_vm1, %v8367_v11, %v15308_v44  ;;  %v15309_v24 = vld [vmem:[#allocation142_spill] sm:$0xff]  ;;  %v15310_v52 = vld [vmem:[#allocation77_spill] sm:$0xff]  ;;  %2918 = vmatprep.subr.mxu1 %v811_v40  ;;  %2662 = vmatpush1.msra.mxu0 %v2591_v53  ;;  %v15314_v32 = vld [vmem:[#allocation28_spill] sm:$0xff] }
 0x28f   : > { %3474 = vrot.lane.b32.xlu1 %v8102_v51, %s15004_s16  ;;  %v2013_v54 = vsel %vm2000_vm5, %v1980_v46, %v15309_v24  ;;  %v8103_v62 = vld [vmem:[%s8869_s17 + $0x172] sm:$0xff]  ;;  %v10704_v37 = vld [vmem:[%s8869_s17 + $0x16a] sm:$0xff]  ;;  %v1915_v60 = vsel %vm1901_vm2, %v1882_v14, %v15310_v52  ;;  %2919 = vmatpush1.msra.mxu1 %v810_v12  ;;  %v15318_v53 = vld [vmem:[#allocation112_spill] sm:$0xff] }
 0x290   : > { %3472 = vrot.lane.b32.xlu0 %v10674_v48, %s15004_s16  ;;  %7977 = vmatmul.mubr.msk.f32.gmra.mxu1 %vm2154_vm9, %v2111_v23  ;;  %v15311_v59 = vld [vmem:[#allocation162_spill] sm:$0xff]  ;;  %v1948_v39 = vsel %vm1934_vm3, %v1915_v60, %v15312_v63  ;;  %v15313_v19 = vld [vmem:[#allocation29_spill] sm:$0xff]  ;;  %v15319_v11 = vld [vmem:[#allocation132_spill] sm:$0xff] }
 0x291   : > { %v2046_v0 = vsel %vm2033_vm6, %v2013_v54, %v15311_v59  ;;  %v10710_v8 = vpop.permute.xlu1 %1823  ;;  %2393 = vmatprep.mubr.f32.mxu1 %v15217_v61  ;;  %v1981_v10 = vsel %vm1967_vm4, %v1948_v39, %v15313_v19  ;;  %v2589_v16 = vld [vmem:[#allocation2 + $0x250] sm:$0xff]  ;;  %v15315_v36 = vld [vmem:[#allocation141_spill] sm:$0xff]  ;;  %2663 = vmatprep.subr.mxu0 %v2590_v56  ;;  %v2587_v52 = vld [vmem:[#allocation2 + $0x240] sm:$0xff] }
 0x292   : > { %v10712_v41 = vpop.permute.xlu0 %1821  ;;  %v2079_v33 = vsel %vm2066_vm7, %v2046_v0, %v10248_v9  ;;  %v808_v51 = vld [vmem:[#allocation2 + $0x50] sm:$0xff]  ;;  %v1883_v9 = vsel %vm375_vm1, %v8368_v17, %v15314_v32  ;;  %v2014_v35 = vsel %vm2000_vm5, %v1981_v10, %v15315_v36  ;;  %v15317_v45 = vld [vmem:[#allocation161_spill] sm:$0xff]  ;;  %2920 = vmatprep.subr.mxu1 %v809_v47  ;;  %2664 = vmatpush1.msra.mxu0 %v2589_v16  ;;  %v806_v60 = vld [vmem:[#allocation2 + $0x40] sm:$0xff] }
 0x293   : > { %v2112_v42 = vsel %vm2099_vm8, %v2079_v33, %v10533_v38  ;;  %3478 = vrot.lane.b32.xlu1 %v8103_v62, %s15004_s16  ;;  %v8104_v3 = vld [vmem:[%s8869_s17 + $0x192] sm:$0xff]  ;;  %v10734_v7 = vld [vmem:[%s8869_s17 + $0x18a] sm:$0xff]  ;;  %v15316_v38 = vld [vmem:[#allocation80_spill] sm:$0xff]  ;;  %v2047_v40 = vsel %vm2033_vm6, %v2014_v35, %v15317_v45  ;;  %2921 = vmatpush1.msra.mxu1 %v808_v51 }
 0x294   : > { %3476 = vrot.lane.b32.xlu0 %v10704_v37, %s15004_s16  ;;  %7978 = vmatmul.mubr.msk.f32.gmra.mxu1 %vm2154_vm9, %v2112_v42  ;;  %v1916_v34 = vsel %vm1901_vm2, %v1883_v9, %v15316_v38  ;;  %v2588_v23 = vld [vmem:[#allocation2 + $0x248] sm:$0xff]  ;;  %v2080_v44 = vsel %vm2066_vm7, %v2047_v40, %v15319_v11  ;;  %v15320_v24 = vld [vmem:[#allocation34_spill] sm:$0xff]  ;;  %v15321_v0 = vld [vmem:[#allocation27_spill] sm:$0xff] }
 0x295   : > { %v10740_v49 = vpop.permute.xlu1 %1827  ;;  %2399 = vmatprep.mubr.f32.mxu1 %v15217_v61  ;;  %v1949_v12 = vsel %vm1934_vm3, %v1916_v34, %v15318_v53  ;;  %v807_v14 = vld [vmem:[#allocation2 + $0x48] sm:$0xff]  ;;  %v2113_v62 = vsel %vm2099_vm8, %v2080_v44, %v10531_v43  ;;  %v15322_v63 = vld [vmem:[#allocation144_spill] sm:$0xff]  ;;  %v8105_v33 = vld [vmem:[%s8869_s17 + $0x1b2] sm:$0xff]  ;;  %2665 = vmatprep.subr.mxu0 %v2588_v23 }
 0x296   : > { %v10742_v46 = vpop.permute.xlu0 %1825  ;;  %v1982_v54 = vsel %vm1967_vm4, %v1949_v12, %v15320_v24  ;;  %v8369_v59 = vld [vmem:[%s8869_s17 + $0x16c] sm:$0xff]  ;;  %v15323_v43 = vld [vmem:[#allocation79_spill] sm:$0xff]  ;;  %v15324_v10 = vld [vmem:[#allocation164_spill] sm:$0xff]  ;;  %2922 = vmatprep.subr.mxu1 %v807_v14  ;;  %2666 = vmatpush1.msra.mxu0 %v2587_v52 }
 0x297   : > { %3482 = vrot.lane.b32.xlu1 %v8104_v3, %s15004_s16  ;;  %v1884_v56 = vsel %vm375_vm1, %v8369_v59, %v15321_v0  ;;  %v2015_v39 = vsel %vm2000_vm5, %v1982_v54, %v15322_v63  ;;  %v10764_v47 = vld [vmem:[%s8869_s17 + $0x1aa] sm:$0xff]  ;;  %v2586_v17 = vld [vmem:[#allocation2 + $0x238] sm:$0xff]  ;;  %2923 = vmatpush1.msra.mxu1 %v806_v60  ;;  %v15327_v53 = vld [vmem:[#allocation32_spill] sm:$0xff] }
 0x298   : > { %3480 = vrot.lane.b32.xlu0 %v10734_v7, %s15004_s16  ;;  %7979 = vmatmul.mubr.msk.f32.gmra.mxu1 %vm2154_vm9, %v2113_v62  ;;  %v1917_v19 = vsel %vm1901_vm2, %v1884_v56, %v15323_v43  ;;  %v2048_v42 = vsel %vm2033_vm6, %v2015_v39, %v15324_v10  ;;  %v15325_v32 = vld [vmem:[#allocation111_spill] sm:$0xff]  ;;  %v15326_v3 = vld [vmem:[#allocation33_spill] sm:$0xff]  ;;  %v2585_v45 = vld [vmem:[#allocation2 + $0x230] sm:$0xff] }
 0x299   : > { %v10770_v16 = vpop.permute.xlu1 %1831  ;;  %2405 = vmatprep.mubr.f32.mxu1 %v15217_v61  ;;  %v1950_v9 = vsel %vm1934_vm3, %v1917_v19, %v15325_v32  ;;  %v2081_v36 = vsel %vm2066_vm7, %v2048_v42, %v10260_v2  ;;  %v805_v35 = vld [vmem:[#allocation2 + $0x38] sm:$0xff]  ;;  %v804_v40 = vld [vmem:[#allocation2 + $0x30] sm:$0xff]  ;;  %v8370_v23 = vld [vmem:[%s8869_s17 + $0x184] sm:$0xff]  ;;  %2667 = vmatprep.subr.mxu0 %v2586_v17 }
 0x29a   : > { %v10772_v51 = vpop.permute.xlu0 %1829  ;;  %v1983_v38 = vsel %vm1967_vm4, %v1950_v9, %v15326_v3  ;;  %v2114_v34 = vsel %vm2099_vm8, %v2081_v36, %v10562_v13  ;;  %v1885_v2 = vsel %vm375_vm1, %v8370_v23, %v15327_v53  ;;  %v15328_v12 = vld [vmem:[#allocation143_spill] sm:$0xff]  ;;  %v10794_v14 = vld [vmem:[%s8869_s17 + $0x1ca] sm:$0xff]  ;;  %2924 = vmatprep.subr.mxu1 %v805_v35  ;;  %2668 = vmatpush1.msra.mxu0 %v2585_v45  ;;  %v2583_v42 = vld [vmem:[#allocation2 + $0x220] sm:$0xff] }
 0x29b   : > { %3486 = vrot.lane.b32.xlu1 %v8105_v33, %s15004_s16  ;;  %v2016_v11 = vsel %vm2000_vm5, %v1983_v38, %v15328_v12  ;;  %v8106_v44 = vld [vmem:[%s8869_s17 + $0x1d2] sm:$0xff]  ;;  %v2584_v59 = vld [vmem:[#allocation2 + $0x228] sm:$0xff]  ;;  %2925 = vmatpush1.msra.mxu1 %v804_v40  ;;  %v802_v17 = vld [vmem:[#allocation2 + $0x20] sm:$0xff] }
 0x29c   : > { %3484 = vrot.lane.b32.xlu0 %v10764_v47, %s15004_s16  ;;  %7980 = vmatmul.mubr.msk.f32.gmra.mxu1 %vm2154_vm9, %v2114_v34  ;;  %v15329_v13 = vld [vmem:[#allocation82_spill] sm:$0xff]  ;;  %v15330_v54 = vld [vmem:[#allocation163_spill] sm:$0xff]  ;;  %v803_v33 = vld [vmem:[#allocation2 + $0x28] sm:$0xff] }
 0x29d   : > { %v1918_v24 = vsel %vm1901_vm2, %v1885_v2, %v15329_v13  ;;  %v2049_v62 = vsel %vm2033_vm6, %v2016_v11, %v15330_v54  ;;  %v10800_v52 = vpop.permute.xlu1 %1835  ;;  %2411 = vmatprep.mubr.f32.mxu1 %v15217_v61  ;;  %v15331_v0 = vld [vmem:[#allocation114_spill] sm:$0xff]  ;;  %v15332_v63 = vld [vmem:[#allocation135_spill] sm:$0xff]  ;;  %2669 = vmatprep.subr.mxu0 %v2584_v59  ;;  %v15338_v11 = vld [vmem:[#allocation113_spill] sm:$0xff] }
 0x29e   : > { %v10802_v60 = vpop.permute.xlu0 %1833  ;;  %v1951_v56 = vsel %vm1934_vm3, %v1918_v24, %v15331_v0  ;;  %v2082_v39 = vsel %vm2066_vm7, %v2049_v62, %v15332_v63  ;;  %v15333_v43 = vld [vmem:[#allocation38_spill] sm:$0xff]  ;;  %v15334_v9 = vld [vmem:[#allocation31_spill] sm:$0xff]  ;;  %2926 = vmatprep.subr.mxu1 %v803_v33  ;;  %v15339_v13 = vld [vmem:[#allocation180_spill] sm:$0xff]  ;;  %2670 = vmatpush1.msra.mxu0 %v2583_v42 }
 0x29f   : > { %v1984_v19 = vsel %vm1967_vm4, %v1951_v56, %v15333_v43  ;;  %v2115_v10 = vsel %vm2099_vm8, %v2082_v39, %v10560_v58  ;;  %3490 = vrot.lane.b32.xlu1 %v8106_v44, %s15004_s16  ;;  %v8371_v32 = vld [vmem:[%s8869_s17 + $0x18c] sm:$0xff]  ;;  %v2582_v12 = vld [vmem:[#allocation2 + $0x218] sm:$0xff]  ;;  %2927 = vmatpush1.msra.mxu1 %v802_v17  ;;  %v8372_v39 = vld [vmem:[%s8869_s17 + $0x1a4] sm:$0xff] }
 0x2a0   : > { %3488 = vrot.lane.b32.xlu0 %v10794_v14, %s15004_s16  ;;  %v1886_v36 = vsel %vm375_vm1, %v8371_v32, %v15334_v9  ;;  %v15335_v35 = vld [vmem:[#allocation146_spill] sm:$0xff]  ;;  %7981 = vmatmul.mubr.msk.f32.gmra.mxu1 %vm2154_vm9, %v2115_v10  ;;  %v15336_v58 = vld [vmem:[#allocation81_spill] sm:$0xff]  ;;  %v801_v54 = vld [vmem:[#allocation2 + $0x18] sm:$0xff] }
 0x2a1   : > { %v2017_v3 = vsel %vm2000_vm5, %v1984_v19, %v15335_v35  ;;  %v8107_v38 = vld [vmem:[%s8869_s17 + $0x1f2] sm:$0xff]  ;;  %v10824_v34 = vld [vmem:[%s8869_s17 + $0x1ea] sm:$0xff]  ;;  %v1919_v45 = vsel %vm1901_vm2, %v1886_v36, %v15336_v58  ;;  %v10830_v53 = vpop.permute.xlu1 %3314  ;;  %2417 = vmatprep.mubr.f32.mxu1 %v15217_v61  ;;  %v15341_v33 = vld [vmem:[#allocation36_spill] sm:$0xff]  ;;  %2671 = vmatprep.subr.mxu0 %v2582_v12 }
 0x2a2   : > { %v15337_v40 = vld [vmem:[#allocation166_spill] sm:$0xff]  ;;  %v10832_v2 = vpop.permute.xlu0 %3312  ;;  %v1952_v44 = vsel %vm1934_vm3, %v1919_v45, %v15338_v11  ;;  %v15340_v62 = vld [vmem:[#allocation37_spill] sm:$0xff]  ;;  %v1887_v43 = vsel %vm375_vm1, %v8372_v39, %v15341_v33  ;;  %2928 = vmatprep.subr.mxu1 %v801_v54  ;;  %v15345_v58 = vld [vmem:[#allocation116_spill] sm:$0xff] }
 0x2a3   : > { %v2050_v23 = vsel %vm2033_vm6, %v2017_v3, %v15337_v40  ;;  %v1985_v59 = vsel %vm1967_vm4, %v1952_v44, %v15340_v62  ;;  %3494 = vrot.lane.b32.xlu1 %v8107_v38, %s15004_s16  ;;  %v2581_v56 = vld [vmem:[#allocation2 + $0x210] sm:$0xff]  ;;  %v15342_v19 = vld [vmem:[#allocation145_spill] sm:$0xff]  ;;  %v15346_v40 = vld [vmem:[#allocation136_spill] sm:$0xff]  ;;  %v10869_v11 = vpop.f32.mrf.mxu0 }
 0x2a4   : > { %v2083_v24 = vsel %vm2066_vm7, %v2050_v23, %v15339_v13  ;;  %3492 = vrot.lane.b32.xlu0 %v10824_v34, %s15004_s16  ;;  %v800_v63 = vld [vmem:[#allocation2 + $0x10] sm:$0xff]  ;;  %v2018_v10 = vsel %vm2000_vm5, %v1985_v59, %v15342_v19  ;;  %v15344_v9 = vld [vmem:[#allocation165_spill] sm:$0xff]  ;;  %2672 = vmatpush1.msra.mxu0 %v2581_v56  ;;  %v2579_v54 = vld [vmem:[#allocation2 + $0x200] sm:$0xff] }
 0x2a5   : > { %v2116_v0 = vsel %vm2099_vm8, %v2083_v24, %v10592_v30  ;;  %v8108_v42 = vld [vmem:[%s8869_s17 + $0x212] sm:$0xff]  ;;  %v10854_v17 = vld [vmem:[%s8869_s17 + $0x20a] sm:$0xff]  ;;  %v15343_v30 = vld [vmem:[#allocation84_spill] sm:$0xff]  ;;  %v2051_v36 = vsel %vm2033_vm6, %v2018_v10, %v15344_v9  ;;  %v10860_v35 = vpop.permute.xlu1 %3318  ;;  %2929 = vmatpush1.msra.mxu1 %v800_v63 }
 0x2a6   : > { %7982 = vmatmul.mubr.msk.f32.gmra.mxu1 %vm2154_vm9, %v2116_v0  ;;  %v1920_v32 = vsel %vm1901_vm2, %v1887_v43, %v15343_v30  ;;  %v10862_v3 = vpop.permute.xlu0 %3316  ;;  %v2580_v38 = vld [vmem:[#allocation2 + $0x208] sm:$0xff]  ;;  %v2084_v23 = vsel %vm2066_vm7, %v2051_v36, %v15346_v40  ;;  %v15347_v44 = vld [vmem:[#allocation42_spill] sm:$0xff]  ;;  %v798_v62 = vld [vmem:[#allocation2] sm:$0xff] }
 0x2a7   : > { %2423 = vmatprep.mubr.f32.mxu1 %v15217_v61  ;;  %v1953_v45 = vsel %vm1934_vm3, %v1920_v32, %v15345_v58  ;;  %v799_v12 = vld [vmem:[#allocation2 + $0x8] sm:$0xff]  ;;  %v2117_v24 = vsel %vm2099_vm8, %v2084_v23, %v10590_v18  ;;  %3498 = vrot.lane.b32.xlu1 %v8108_v42, %s15004_s16  ;;  %v15348_v0 = vld [vmem:[#allocation35_spill] sm:$0xff]  ;;  %v15349_v63 = vld [vmem:[#allocation148_spill] sm:$0xff]  ;;  %v10888_v18 = vpop.f32.mrf.mxu0 }
 0x2a8   : > { %v1986_v13 = vsel %vm1967_vm4, %v1953_v45, %v15347_v44  ;;  %3496 = vrot.lane.b32.xlu0 %v10854_v17, %s15004_s16  ;;  %v8373_v59 = vld [vmem:[%s8869_s17 + $0x1ac] sm:$0xff]  ;;  %2673 = vmatprep.subr.mxu0 %v2580_v38  ;;  %v15350_v19 = vld [vmem:[#allocation83_spill] sm:$0xff]  ;;  %v15351_v42 = vld [vmem:[#allocation168_spill] sm:$0xff] }
 0x2a9   : > { %v1888_v56 = vsel %vm375_vm1, %v8373_v59, %v15348_v0  ;;  %v2019_v39 = vsel %vm2000_vm5, %v1986_v13, %v15349_v63  ;;  %v8109_v33 = vld [vmem:[%s8869_s17 + $0x232] sm:$0xff]  ;;  %v10886_v43 = vld [vmem:[%s8869_s17 + $0x22a] sm:$0xff]  ;;  %v10894_v32 = vpop.permute.xlu1 %3322  ;;  %2930 = vmatprep.subr.mxu1 %v799_v12  ;;  %2674 = vmatpush1.msra.mxu0 %v2579_v54  ;;  %v10903_v23 = vpop.f32.mrf.mxu0  ;;  %v8006_v63 = vld [vmem:[%s8869_s17 + $0xc2] sm:$0xff] }
 0x2aa   : > { %7983 = vmatmul.mubr.msk.f32.gmra.mxu1 %vm2154_vm9, %v2117_v24  ;;  %v1921_v10 = vsel %vm1901_vm2, %v1888_v56, %v15350_v19  ;;  %v2052_v30 = vsel %vm2033_vm6, %v2019_v39, %v15351_v42  ;;  %v10896_v9 = vpop.permute.xlu0 %3320  ;;  %v2642_v36 = vld [vmem:[#allocation2 + $0x3f8] sm:$0xff]  ;;  %v15353_v44 = vld [vmem:[#allocation41_spill] sm:$0xff]  ;;  %v2641_v12 = vld [vmem:[#allocation2 + $0x3f0] sm:$0xff] }
 0x2ab   : > { %2429 = vmatprep.mubr.f32.mxu1 %v15217_v61  ;;  %v15352_v58 = vld [vmem:[#allocation115_spill] sm:$0xff]  ;;  %v2085_v45 = vsel %vm2066_vm7, %v2052_v30, %v10289_v55  ;;  %2931 = vmatpush1.msra.mxu1 %v798_v62  ;;  %v860_v59 = vld [vmem:[#allocation2 + $0x1f0] sm:$0xff]  ;;  %v8374_v0 = vld [vmem:[%s8869_s17 + $0x1c4] sm:$0xff]  ;;  %v10919_v39 = vpop.f32.mrf.mxu0 }
 0x2ac   : > { %v1954_v38 = vsel %vm1934_vm3, %v1921_v10, %v15352_v58  ;;  %v861_v40 = vld [vmem:[#allocation2 + $0x1f8] sm:$0xff]  ;;  %v2118_v24 = vsel %vm2099_vm8, %v2085_v45, %v10622_v25  ;;  %3502 = vrot.lane.b32.xlu1 %v8109_v33, %s15004_s16  ;;  %3500 = vrot.lane.b32.xlu0 %v10886_v43, %s15004_s16  ;;  %v15354_v55 = vld [vmem:[#allocation40_spill] sm:$0xff]  ;;  %v15356_v25 = vld [vmem:[#allocation86_spill] sm:$0xff]  ;;  %s15595_s16 = smov 8  }
 0x2ad   : > { %v1987_v13 = vsel %vm1967_vm4, %v1954_v38, %v15353_v44  ;;  %v1889_v54 = vsel %vm375_vm1, %v8374_v0, %v15354_v55  ;;  %v15355_v62 = vld [vmem:[#allocation147_spill] sm:$0xff]  ;;  %2675 = vmatprep.subr.mxu0 %v2642_v36  ;;  %v10925_v42 = vpop.permute.xlu1 %3326  ;;  %2932 = vmatprep.subr.mxu1 %v861_v40  ;;  %v2640_v58 = vld [vmem:[#allocation2 + $0x3e8] sm:$0xff]  ;;  %v15360_v38 = vld [vmem:[#allocation118_spill] sm:$0xff] }
 0x2ae   : > { %v2020_v56 = vsel %vm2000_vm5, %v1987_v13, %v15355_v62  ;;  %7984 = vmatmul.mubr.msk.f32.gmra.mxu1 %vm2154_vm9, %v2118_v24  ;;  %v1922_v33 = vsel %vm1901_vm2, %v1889_v54, %v15356_v25  ;;  %v15357_v19 = vld [vmem:[#allocation167_spill] sm:$0xff]  ;;  %15358 = vst [vmem:[#allocation98_spill] sm:$0xff] %v10925_v42  ;;  %v10927_v30 = vpop.permute.xlu0 %3324  ;;  %2676 = vmatpush2.msra.mxu0 %v2641_v12  ;;  %v859_v44 = vld [vmem:[#allocation2 + $0x1e8] sm:$0xff]  ;;  %v10934_v13 = vpop.f32.mrf.mxu0  ;;  %v15361_v24 = vld [vmem:[#allocation46_spill] sm:$0xff] }
 0x2af   : > { %v2053_v10 = vsel %vm2033_vm6, %v2020_v56, %v15357_v19  ;;  %15359 = vst [vmem:[#allocation130_spill] sm:$0xff] %v10927_v30  ;;  %2435 = vmatprep.mubr.f32.mxu1 %v15217_v61  ;;  %v1955_v36 = vsel %vm1934_vm3, %v1922_v33, %v15360_v38  ;;  %2933 = vmatpush2.msra.mxu1 %v860_v59  ;;  %v2639_v40 = vld [vmem:[#allocation2 + $0x3e0] sm:$0xff]  ;;  %v8375_v62 = vld [vmem:[%s8869_s17 + $0x1cc] sm:$0xff] }
 0x2b0   : > { %v2086_v45 = vsel %vm2066_vm7, %v2053_v10, %v10287_v22  ;;  %v1988_v0 = vsel %vm1967_vm4, %v1955_v36, %v15361_v24  ;;  %3558 = vrot.lane.b32.xlu1 %v10554_v50, %s15362_s19  ;;  %3556 = vrot.lane.b32.xlu0 %v8006_v63, %s15362_s19  ;;  %v858_v54 = vld [vmem:[#allocation2 + $0x1e0] sm:$0xff]  ;;  %v15363_v22 = vld [vmem:[#allocation39_spill] sm:$0xff]  ;;  %v15364_v59 = vld [vmem:[#allocation150_spill] sm:$0xff]  ;;  %v10950_v33 = vpop.f32.mrf.mxu0 }
 0x2b1   : > { %v2119_v55 = vsel %vm2099_vm8, %v2086_v45, %v10620_v6  ;;  %v1890_v12 = vsel %vm375_vm1, %v8375_v62, %v15363_v22  ;;  %v2021_v56 = vsel %vm2000_vm5, %v1988_v0, %v15364_v59  ;;  %v8008_v25 = vld [vmem:[%s8869_s17 + $0xe2] sm:$0xff]  ;;  %2677 = vmatprep.subr.mxu0 %v2640_v58  ;;  %v15366_v19 = vld [vmem:[#allocation170_spill] sm:$0xff]  ;;  %v10956_v10 = vpop.permute.xlu1 %3330  ;;  %2934 = vmatprep.subr.mxu1 %v859_v44  ;;  %v2638_v36 = vld [vmem:[#allocation2 + $0x3d8] sm:$0xff] }
 0x2b2   : > { %7985 = vmatmul.mubr.msk.f32.gmra.mxu1 %vm2154_vm9, %v2119_v55  ;;  %v15365_v6 = vld [vmem:[#allocation85_spill] sm:$0xff]  ;;  %v2054_v63 = vsel %vm2033_vm6, %v2021_v56, %v15366_v19  ;;  %15367 = vst [vmem:[#allocation11_spill] sm:$0xff] %v10956_v10  ;;  %v10958_v38 = vpop.permute.xlu0 %3328  ;;  %2678 = vmatpush2.msra.mxu0 %v2639_v40  ;;  %v857_v0 = vld [vmem:[#allocation2 + $0x1d8] sm:$0xff]  ;;  %v10965_v55 = vpop.f32.mrf.mxu0  ;;  %v2637_v44 = vld [vmem:[#allocation2 + $0x3d0] sm:$0xff] }
 0x2b3   : > { %v1923_v50 = vsel %vm1901_vm2, %v1890_v12, %v15365_v6  ;;  %15368 = vst [vmem:[#allocation63_spill] sm:$0xff] %v10958_v38  ;;  %2441 = vmatprep.mubr.f32.mxu1 %v15217_v61  ;;  %v15369_v45 = vld [vmem:[#allocation117_spill] sm:$0xff]  ;;  %v2087_v24 = vsel %vm2066_vm7, %v2054_v63, %v10300_v57  ;;  %2935 = vmatpush2.msra.mxu1 %v858_v54  ;;  %v856_v59 = vld [vmem:[#allocation2 + $0x1d0] sm:$0xff]  ;;  %v15371_v57 = vld [vmem:[#allocation44_spill] sm:$0xff] }
 0x2b4   : > { %v1956_v58 = vsel %vm1934_vm3, %v1923_v50, %v15369_v45  ;;  %v15370_v62 = vld [vmem:[#allocation45_spill] sm:$0xff]  ;;  %v2120_v12 = vsel %vm2099_vm8, %v2087_v24, %v10652_v15  ;;  %3562 = vrot.lane.b32.xlu1 %v10584_v1, %s15362_s19  ;;  %3560 = vrot.lane.b32.xlu0 %v8008_v25, %s15362_s19  ;;  %v10981_v19 = vpop.f32.mrf.mxu0  ;;  %v15373_v15 = vld [vmem:[#allocation88_spill] sm:$0xff] }
 0x2b5   : > { %v1989_v22 = vsel %vm1967_vm4, %v1956_v58, %v15370_v62  ;;  %v8376_v56 = vld [vmem:[%s8869_s17 + $0x1e4] sm:$0xff]  ;;  %2679 = vmatprep.subr.mxu0 %v2638_v36  ;;  %v10987_v45 = vpop.permute.xlu1 %3334  ;;  %2936 = vmatprep.subr.mxu1 %v857_v0 }
 0x2b6   : > { %v1891_v40 = vsel %vm375_vm1, %v8376_v56, %v15371_v57  ;;  %v15372_v54 = vld [vmem:[#allocation149_spill] sm:$0xff]  ;;  %7986 = vmatmul.mubr.msk.f32.gmra.mxu1 %vm2154_vm9, %v2120_v12  ;;  %15375 = vst [vmem:[#allocation97_spill] sm:$0xff] %v10987_v45  ;;  %v10989_v58 = vpop.permute.xlu0 %3332  ;;  %v15377_v62 = vld [vmem:[#allocation120_spill] sm:$0xff]  ;;  %2680 = vmatpush2.msra.mxu0 %v2637_v44  ;;  %v10996_v56 = vpop.f32.mrf.mxu0  ;;  %v15378_v57 = vld [vmem:[#allocation50_spill] sm:$0xff] }
 0x2b7   : > { %v2022_v6 = vsel %vm2000_vm5, %v1989_v22, %v15372_v54  ;;  %v8010_v50 = vld [vmem:[%s8869_s17 + $0x102] sm:$0xff]  ;;  %v1924_v1 = vsel %vm1901_vm2, %v1891_v40, %v15373_v15  ;;  %15376 = vst [vmem:[#allocation129_spill] sm:$0xff] %v10989_v58  ;;  %2447 = vmatprep.mubr.f32.mxu1 %v15217_v61  ;;  %2937 = vmatpush2.msra.mxu1 %v856_v59  ;;  %v8377_v15 = vld [vmem:[%s8869_s17 + $0x1ec] sm:$0xff] }
 0x2b8   : > { %v15374_v63 = vld [vmem:[#allocation169_spill] sm:$0xff]  ;;  %v1957_v36 = vsel %vm1934_vm3, %v1924_v1, %v15377_v62  ;;  %3566 = vrot.lane.b32.xlu1 %v10614_v5, %s15362_s19  ;;  %3564 = vrot.lane.b32.xlu0 %v8010_v50, %s15362_s19  ;;  %v2635_v0 = vld [vmem:[#allocation2 + $0x3c0] sm:$0xff] }
 0x2b9   : > { %v2055_v25 = vsel %vm2033_vm6, %v2022_v6, %v15374_v63  ;;  %v2636_v24 = vld [vmem:[#allocation2 + $0x3c8] sm:$0xff]  ;;  %v1990_v40 = vsel %vm1967_vm4, %v1957_v36, %v15378_v57  ;;  %v854_v6 = vld [vmem:[#allocation2 + $0x1c0] sm:$0xff]  ;;  %v11018_v36 = vpop.permute.xlu1 %3338  ;;  %v2634_v57 = vld [vmem:[#allocation2 + $0x3b8] sm:$0xff] }
 0x2ba   : > { %v2088_v22 = vsel %vm2066_vm7, %v2055_v25, %v10298_v31  ;;  %v855_v12 = vld [vmem:[#allocation2 + $0x1c8] sm:$0xff]  ;;  %v15379_v31 = vld [vmem:[#allocation43_spill] sm:$0xff]  ;;  %v15380_v59 = vld [vmem:[#allocation152_spill] sm:$0xff]  ;;  %2681 = vmatprep.subr.mxu0 %v2636_v24  ;;  %v11012_v25 = vpop.f32.mrf.mxu0  ;;  %15383 = vst [vmem:[#allocation8_spill] sm:$0xff] %v11018_v36 }
 0x2bb   : > { %v2121_v54 = vsel %vm2099_vm8, %v2088_v22, %v10650_v28  ;;  %v1892_v44 = vsel %vm375_vm1, %v8377_v15, %v15379_v31  ;;  %v2023_v1 = vsel %vm2000_vm5, %v1990_v40, %v15380_v59  ;;  %v8012_v63 = vld [vmem:[%s8869_s17 + $0x122] sm:$0xff]  ;;  %v15381_v28 = vld [vmem:[#allocation87_spill] sm:$0xff]  ;;  %v11020_v22 = vpop.permute.xlu0 %3336  ;;  %2938 = vmatprep.subr.mxu1 %v855_v12  ;;  %2682 = vmatpush2.msra.mxu0 %v2635_v0  ;;  %v2633_v12 = vld [vmem:[#allocation2 + $0x3b0] sm:$0xff] }
 0x2bc   : > { %7987 = vmatmul.mubr.msk.f32.gmra.mxu1 %vm2154_vm9, %v2121_v54  ;;  %v1925_v5 = vsel %vm1901_vm2, %v1892_v44, %v15381_v28  ;;  %v15382_v62 = vld [vmem:[#allocation172_spill] sm:$0xff]  ;;  %15384 = vst [vmem:[#allocation68_spill] sm:$0xff] %v11020_v22  ;;  %v15385_v40 = vld [vmem:[#allocation119_spill] sm:$0xff]  ;;  %v11027_v31 = vpop.f32.mrf.mxu0  ;;  %v15386_v44 = vld [vmem:[#allocation49_spill] sm:$0xff]  ;;  %3570 = vrot.lane.b32.xlu1 %v10644_v27, %s15362_s19 }
 0x2bd   : > { %v2056_v50 = vsel %vm2033_vm6, %v2023_v1, %v15382_v62  ;;  %2453 = vmatprep.mubr.f32.mxu1 %v15217_v61  ;;  %v1958_v24 = vsel %vm1934_vm3, %v1925_v5, %v15385_v40  ;;  %2939 = vmatpush2.msra.mxu1 %v854_v6  ;;  %v853_v15 = vld [vmem:[#allocation2 + $0x1b8] sm:$0xff]  ;;  %v852_v28 = vld [vmem:[#allocation2 + $0x1b0] sm:$0xff]  ;;  %v8378_v5 = vld [vmem:[%s8869_s17 + $0x204] sm:$0xff] }
 0x2be   : > { %v2089_v54 = vsel %vm2066_vm7, %v2056_v50, %v10311_v29  ;;  %v1991_v59 = vsel %vm1967_vm4, %v1958_v24, %v15386_v44  ;;  %3568 = vrot.lane.b32.xlu0 %v8012_v63, %s15362_s19  ;;  %v15387_v29 = vld [vmem:[#allocation48_spill] sm:$0xff]  ;;  %v15388_v6 = vld [vmem:[#allocation151_spill] sm:$0xff]  ;;  %2683 = vmatprep.subr.mxu0 %v2634_v57  ;;  %v11043_v40 = vpop.f32.mrf.mxu0  ;;  %v831_v36 = vld [vmem:[#allocation2 + $0x108] sm:$0xff] }
 0x2bf   : > { %v2122_v1 = vsel %vm2099_vm8, %v2089_v54, %v10682_v26  ;;  %v1893_v0 = vsel %vm375_vm1, %v8378_v5, %v15387_v29  ;;  %v2024_v62 = vsel %vm2000_vm5, %v1991_v59, %v15388_v6  ;;  %v8014_v50 = vld [vmem:[%s8869_s17 + $0x142] sm:$0xff]  ;;  %v15389_v26 = vld [vmem:[#allocation90_spill] sm:$0xff]  ;;  %v15390_v24 = vld [vmem:[#allocation171_spill] sm:$0xff]  ;;  %v11049_v54 = vpop.permute.xlu1 %3342  ;;  %v11051_v44 = vpop.permute.xlu0 %3340  ;;  %2940 = vmatprep.subr.mxu1 %v853_v15  ;;  %2684 = vmatpush2.msra.mxu0 %v2633_v12 }
 0x2c0   : > { %7988 = vmatmul.mubr.msk.f32.gmra.mxu1 %vm2154_vm9, %v2122_v1  ;;  %v1926_v27 = vsel %vm1901_vm2, %v1893_v0, %v15389_v26  ;;  %v2057_v63 = vsel %vm2033_vm6, %v2024_v62, %v15390_v24  ;;  %15391 = vst [vmem:[#allocation100_spill] sm:$0xff] %v11049_v54  ;;  %15392 = vst [vmem:[#allocation134_spill] sm:$0xff] %v11051_v44  ;;  %v2632_v59 = vld [vmem:[#allocation2 + $0x3a8] sm:$0xff]  ;;  %v15393_v1 = vld [vmem:[#allocation122_spill] sm:$0xff]  ;;  %v11058_v0 = vpop.f32.mrf.mxu0  ;;  %3574 = vrot.lane.b32.xlu1 %v10674_v48, %s15362_s19 }
 0x2c1   : > { %2459 = vmatprep.mubr.f32.mxu1 %v15217_v61  ;;  %v1959_v57 = vsel %vm1934_vm3, %v1926_v27, %v15393_v1  ;;  %v2090_v5 = vsel %vm2066_vm7, %v2057_v63, %v10309_v21  ;;  %2941 = vmatpush2.msra.mxu1 %v852_v28  ;;  %v851_v29 = vld [vmem:[#allocation2 + $0x1a8] sm:$0xff]  ;;  %v15394_v6 = vld [vmem:[#allocation54_spill] sm:$0xff]  ;;  %v2631_v15 = vld [vmem:[#allocation2 + $0x3a0] sm:$0xff] }
 0x2c2   : > { %v1992_v62 = vsel %vm1967_vm4, %v1959_v57, %v15394_v6  ;;  %v2123_v26 = vsel %vm2099_vm8, %v2090_v5, %v10680_v4  ;;  %3572 = vrot.lane.b32.xlu0 %v8014_v50, %s15362_s19  ;;  %v850_v27 = vld [vmem:[#allocation2 + $0x1a0] sm:$0xff]  ;;  %v8379_v24 = vld [vmem:[%s8869_s17 + $0x20c] sm:$0xff]  ;;  %v15395_v21 = vld [vmem:[#allocation47_spill] sm:$0xff]  ;;  %2685 = vmatprep.subr.mxu0 %v2632_v59  ;;  %v11074_v57 = vpop.f32.mrf.mxu0 }
 0x2c3   : > { %v1894_v12 = vsel %vm375_vm1, %v8379_v24, %v15395_v21  ;;  %v15396_v28 = vld [vmem:[#allocation154_spill] sm:$0xff]  ;;  %v8016_v1 = vld [vmem:[%s8869_s17 + $0x162] sm:$0xff]  ;;  %v11080_v6 = vpop.permute.xlu1 %3346  ;;  %v11082_v54 = vpop.permute.xlu0 %3344  ;;  %2942 = vmatprep.subr.mxu1 %v851_v29  ;;  %2686 = vmatpush2.msra.mxu0 %v2631_v15  ;;  %v849_v21 = vld [vmem:[#allocation2 + $0x198] sm:$0xff] }
 0x2c4   : > { %v2025_v63 = vsel %vm2000_vm5, %v1992_v62, %v15396_v28  ;;  %7989 = vmatmul.mubr.msk.f32.gmra.mxu1 %vm2154_vm9, %v2123_v26  ;;  %v15397_v4 = vld [vmem:[#allocation89_spill] sm:$0xff]  ;;  %v15398_v5 = vld [vmem:[#allocation174_spill] sm:$0xff]  ;;  %15399 = vst [vmem:[#allocation10_spill] sm:$0xff] %v11080_v6  ;;  %15400 = vst [vmem:[#allocation67_spill] sm:$0xff] %v11082_v54  ;;  %3578 = vrot.lane.b32.xlu1 %v10704_v37, %s15362_s19 }
 0x2c5   : > { %v1927_v48 = vsel %vm1901_vm2, %v1894_v12, %v15397_v4  ;;  %v2058_v50 = vsel %vm2033_vm6, %v2025_v63, %v15398_v5  ;;  %2465 = vmatprep.mubr.f32.mxu1 %v15217_v61  ;;  %v2630_v62 = vld [vmem:[#allocation2 + $0x398] sm:$0xff]  ;;  %v15401_v26 = vld [vmem:[#allocation121_spill] sm:$0xff]  ;;  %2943 = vmatpush2.msra.mxu1 %v850_v27  ;;  %v11089_v12 = vpop.f32.mrf.mxu0  ;;  %v2629_v29 = vld [vmem:[#allocation2 + $0x390] sm:$0xff] }
 0x2c6   : > { %v1960_v59 = vsel %vm1934_vm3, %v1927_v48, %v15401_v26  ;;  %v2091_v24 = vsel %vm2066_vm7, %v2058_v50, %v10322_v20  ;;  %v15402_v28 = vld [vmem:[#allocation53_spill] sm:$0xff]  ;;  %3576 = vrot.lane.b32.xlu0 %v8016_v1, %s15362_s19  ;;  %v848_v48 = vld [vmem:[#allocation2 + $0x190] sm:$0xff]  ;;  %v15403_v20 = vld [vmem:[#allocation52_spill] sm:$0xff]  ;;  %2687 = vmatprep.subr.mxu0 %v2630_v62 }
 0x2c7   : > { %v1993_v63 = vsel %vm1967_vm4, %v1960_v59, %v15402_v28  ;;  %v2124_v4 = vsel %vm2099_vm8, %v2091_v24, %v10712_v41  ;;  %v8380_v5 = vld [vmem:[%s8869_s17 + $0x224] sm:$0xff]  ;;  %v11105_v59 = vpop.f32.mrf.mxu0  ;;  %v11111_v28 = vpop.permute.xlu1 %3350  ;;  %2944 = vmatprep.subr.mxu1 %v849_v21  ;;  %2688 = vmatpush2.msra.mxu0 %v2629_v29 }
 0x2c8   : > { %v1895_v15 = vsel %vm375_vm1, %v8380_v5, %v15403_v20  ;;  %v15404_v27 = vld [vmem:[#allocation153_spill] sm:$0xff]  ;;  %7990 = vmatmul.mubr.msk.f32.gmra.mxu1 %vm2154_vm9, %v2124_v4  ;;  %v15405_v41 = vld [vmem:[#allocation92_spill] sm:$0xff]  ;;  %15407 = vst [vmem:[#allocation99_spill] sm:$0xff] %v11111_v28  ;;  %v11113_v6 = vpop.permute.xlu0 %3348  ;;  %3582 = vrot.lane.b32.xlu1 %v10734_v7, %s15362_s19 }
 0x2c9   : > { %v2026_v50 = vsel %vm2000_vm5, %v1993_v63, %v15404_v27  ;;  %v8018_v26 = vld [vmem:[%s8869_s17 + $0x182] sm:$0xff]  ;;  %v1928_v37 = vsel %vm1901_vm2, %v1895_v15, %v15405_v41  ;;  %15408 = vst [vmem:[#allocation133_spill] sm:$0xff] %v11113_v6  ;;  %2471 = vmatprep.mubr.f32.mxu1 %v15217_v61  ;;  %2945 = vmatpush2.msra.mxu1 %v848_v48  ;;  %v11120_v27 = vpop.f32.mrf.mxu0  ;;  %v8035_v22 = vld [vmem:[%s8869_s17 + $0x28a] sm:$0xff] }
 0x2ca   : > { %v15406_v24 = vld [vmem:[#allocation173_spill] sm:$0xff]  ;;  %v15409_v4 = vld [vmem:[#allocation124_spill] sm:$0xff]  ;;  %3580 = vrot.lane.b32.xlu0 %v8018_v26, %s15362_s19 }
 0x2cb   : > { %v2059_v1 = vsel %vm2033_vm6, %v2026_v50, %v15406_v24  ;;  %v2628_v63 = vld [vmem:[#allocation2 + $0x388] sm:$0xff]  ;;  %v1961_v62 = vsel %vm1934_vm3, %v1928_v37, %v15409_v4  ;;  %v15411_v50 = vld [vmem:[#allocation58_spill] sm:$0xff]  ;;  %v2627_v21 = vld [vmem:[#allocation2 + $0x380] sm:$0xff]  ;;  %v11142_v28 = vpop.permute.xlu1 %3354 }
 0x2cc   : > { %v15410_v5 = vld [vmem:[#allocation181_spill] sm:$0xff]  ;;  %v1994_v41 = vsel %vm1967_vm4, %v1961_v62, %v15411_v50  ;;  %v846_v37 = vld [vmem:[#allocation2 + $0x180] sm:$0xff]  ;;  %2689 = vmatprep.subr.mxu0 %v2628_v63  ;;  %v11136_v50 = vpop.f32.mrf.mxu0  ;;  %15416 = vst [vmem:[#allocation14_spill] sm:$0xff] %v11142_v28  ;;  %v11144_v6 = vpop.permute.xlu0 %3352  ;;  %3586 = vrot.lane.b32.xlu1 %v10764_v47, %s15362_s19 }
 0x2cd   : > { %v2092_v20 = vsel %vm2066_vm7, %v2059_v1, %v15410_v5  ;;  %v847_v15 = vld [vmem:[#allocation2 + $0x188] sm:$0xff]  ;;  %v15412_v1 = vld [vmem:[#allocation51_spill] sm:$0xff]  ;;  %v15413_v48 = vld [vmem:[#allocation156_spill] sm:$0xff]  ;;  %15417 = vst [vmem:[#allocation70_spill] sm:$0xff] %v11144_v6  ;;  %2690 = vmatpush2.msra.mxu0 %v2627_v21 }
 0x2ce   : > { %v2125_v24 = vsel %vm2099_vm8, %v2092_v20, %v10710_v8  ;;  %v8381_v4 = vld [vmem:[%s8869_s17 + $0x22c] sm:$0xff]  ;;  %v2027_v5 = vsel %vm2000_vm5, %v1994_v41, %v15413_v48  ;;  %v8020_v62 = vld [vmem:[%s8869_s17 + $0x1a2] sm:$0xff]  ;;  %v15414_v8 = vld [vmem:[#allocation91_spill] sm:$0xff]  ;;  %2946 = vmatprep.subr.mxu1 %v847_v15  ;;  %v11151_v48 = vpop.f32.mrf.mxu0 }
 0x2cf   : > { %v1896_v29 = vsel %vm375_vm1, %v8381_v4, %v15412_v1  ;;  %7991 = vmatmul.mubr.msk.f32.gmra.mxu1 %vm2154_vm9, %v2125_v24  ;;  %v15415_v20 = vld [vmem:[#allocation176_spill] sm:$0xff]  ;;  %v2626_v41 = vld [vmem:[#allocation2 + $0x378] sm:$0xff]  ;;  %3584 = vrot.lane.b32.xlu0 %v8020_v62, %s15362_s19  ;;  %v2625_v15 = vld [vmem:[#allocation2 + $0x370] sm:$0xff]  ;;  %v11173_v28 = vpop.permute.xlu1 %3358 }
 0x2d0   : > { %v1929_v7 = vsel %vm1901_vm2, %v1896_v29, %v15414_v8  ;;  %v2060_v26 = vsel %vm2033_vm6, %v2027_v5, %v15415_v20  ;;  %2477 = vmatprep.mubr.f32.mxu1 %v15217_v61  ;;  %v15418_v24 = vld [vmem:[#allocation123_spill] sm:$0xff]  ;;  %2947 = vmatpush2.msra.mxu1 %v846_v37  ;;  %v15420_v5 = vld [vmem:[#allocation57_spill] sm:$0xff]  ;;  %15425 = vst [vmem:[#allocation102_spill] sm:$0xff] %v11173_v28  ;;  %v11175_v6 = vpop.permute.xlu0 %3356 }
 0x2d1   : > { %v1962_v63 = vsel %vm1934_vm3, %v1929_v7, %v15418_v24  ;;  %v15419_v4 = vld [vmem:[#allocation183_spill] sm:$0xff]  ;;  %v844_v7 = vld [vmem:[#allocation2 + $0x170] sm:$0xff]  ;;  %v8382_v24 = vld [vmem:[%s8869_s17 + $0x244] sm:$0xff]  ;;  %2691 = vmatprep.subr.mxu0 %v2626_v41  ;;  %15426 = vst [vmem:[#allocation138_spill] sm:$0xff] %v11175_v6  ;;  %3590 = vrot.lane.b32.xlu1 %v10794_v14, %s15362_s19 }
 0x2d2   : > { %v2093_v1 = vsel %vm2066_vm7, %v2060_v26, %v15419_v4  ;;  %v845_v29 = vld [vmem:[#allocation2 + $0x178] sm:$0xff]  ;;  %v1995_v8 = vsel %vm1967_vm4, %v1962_v63, %v15420_v5  ;;  %v15421_v26 = vld [vmem:[#allocation56_spill] sm:$0xff]  ;;  %v11167_v5 = vpop.f32.mrf.mxu0  ;;  %2692 = vmatpush2.msra.mxu0 %v2625_v15 }
 0x2d3   : > { %v2126_v20 = vsel %vm2099_vm8, %v2093_v1, %v10742_v46  ;;  %v1897_v21 = vsel %vm375_vm1, %v8382_v24, %v15421_v26  ;;  %v15422_v37 = vld [vmem:[#allocation155_spill] sm:$0xff]  ;;  %v8022_v63 = vld [vmem:[%s8869_s17 + $0x1c2] sm:$0xff]  ;;  %v15423_v46 = vld [vmem:[#allocation94_spill] sm:$0xff]  ;;  %2948 = vmatprep.subr.mxu1 %v845_v29  ;;  %v11204_v28 = vpop.permute.xlu1 %3362 }
 0x2d4   : > { %v2028_v4 = vsel %vm2000_vm5, %v1995_v8, %v15422_v37  ;;  %7992 = vmatmul.mubr.msk.f32.gmra.mxu1 %vm2154_vm9, %v2126_v20  ;;  %v1930_v47 = vsel %vm1901_vm2, %v1897_v21, %v15423_v46  ;;  %v15424_v1 = vld [vmem:[#allocation175_spill] sm:$0xff]  ;;  %v2624_v8 = vld [vmem:[#allocation2 + $0x368] sm:$0xff]  ;;  %v15427_v20 = vld [vmem:[#allocation126_spill] sm:$0xff]  ;;  %v11182_v37 = vpop.f32.mrf.mxu0  ;;  %3588 = vrot.lane.b32.xlu0 %v8022_v63, %s15362_s19  ;;  %15434 = vst [vmem:[#allocation13_spill] sm:$0xff] %v11204_v28  ;;  %v11206_v6 = vpop.permute.xlu0 %3360 }
 0x2d5   : > { %v2061_v62 = vsel %vm2033_vm6, %v2028_v4, %v15424_v1  ;;  %2483 = vmatprep.mubr.f32.mxu1 %v15217_v61  ;;  %v1963_v41 = vsel %vm1934_vm3, %v1930_v47, %v15427_v20  ;;  %v15428_v24 = vld [vmem:[#allocation182_spill] sm:$0xff]  ;;  %2949 = vmatpush2.msra.mxu1 %v844_v7  ;;  %v843_v21 = vld [vmem:[#allocation2 + $0x168] sm:$0xff]  ;;  %v2623_v29 = vld [vmem:[#allocation2 + $0x360] sm:$0xff]  ;;  %15435 = vst [vmem:[#allocation69_spill] sm:$0xff] %v11206_v6 }
 0x2d6   : > { %v2094_v26 = vsel %vm2066_vm7, %v2061_v62, %v15428_v24  ;;  %v15429_v4 = vld [vmem:[#allocation62_spill] sm:$0xff]  ;;  %v842_v47 = vld [vmem:[#allocation2 + $0x160] sm:$0xff]  ;;  %v15430_v62 = vld [vmem:[#allocation55_spill] sm:$0xff]  ;;  %2693 = vmatprep.subr.mxu0 %v2624_v8  ;;  %2950 = vmatprep.subr.mxu1 %v843_v21 }
 0x2d7   : > { %v1996_v46 = vsel %vm1967_vm4, %v1963_v41, %v15429_v4  ;;  %v2127_v1 = vsel %vm2099_vm8, %v2094_v26, %v10740_v49  ;;  %v8383_v20 = vld [vmem:[%s8869_s17 + $0x24c] sm:$0xff]  ;;  %v8024_v41 = vld [vmem:[%s8869_s17 + $0x1e2] sm:$0xff]  ;;  %v11198_v4 = vpop.f32.mrf.mxu0  ;;  %2694 = vmatpush2.msra.mxu0 %v2623_v29  ;;  %2951 = vmatpush2.msra.mxu1 %v842_v47  ;;  %v11235_v6 = vpop.permute.xlu1 %3366 }
 0x2d8   : > { %v1898_v15 = vsel %vm375_vm1, %v8383_v20, %v15430_v62  ;;  %v15431_v7 = vld [vmem:[#allocation158_spill] sm:$0xff]  ;;  %7993 = vmatmul.mubr.msk.f32.gmra.mxu1 %vm2154_vm9, %v2127_v1  ;;  %v15432_v49 = vld [vmem:[#allocation93_spill] sm:$0xff]  ;;  %3594 = vrot.lane.b32.xlu1 %v10824_v34, %s15362_s19  ;;  %v15439_v29 = vld [vmem:[#allocation60_spill] sm:$0xff]  ;;  %15443 = vst [vmem:[#allocation101_spill] sm:$0xff] %v11235_v6  ;;  %v11237_v54 = vpop.permute.xlu0 %3364 }
 0x2d9   : > { %v2029_v24 = vsel %vm2000_vm5, %v1996_v46, %v15431_v7  ;;  %v1931_v14 = vsel %vm1901_vm2, %v1898_v15, %v15432_v49  ;;  %v15433_v26 = vld [vmem:[#allocation178_spill] sm:$0xff]  ;;  %2489 = vmatprep.mubr.f32.mxu1 %v15217_v61  ;;  %v2622_v46 = vld [vmem:[#allocation2 + $0x358] sm:$0xff]  ;;  %v15436_v1 = vld [vmem:[#allocation125_spill] sm:$0xff]  ;;  %v363_v7 = vlaneseq  ;;  %3592 = vrot.lane.b32.xlu0 %v8024_v41, %s15362_s19  ;;  %15444 = vst [vmem:[#allocation137_spill] sm:$0xff] %v11237_v54 }
 0x2da   : > { %v2062_v63 = vsel %vm2033_vm6, %v2029_v24, %v15433_v26  ;;  %v1964_v8 = vsel %vm1934_vm3, %v1931_v14, %v15436_v1  ;;  %v15437_v20 = vld [vmem:[#allocation185_spill] sm:$0xff]  ;;  %v841_v15 = vld [vmem:[#allocation2 + $0x158] sm:$0xff]  ;;  %v11213_v24 = vpop.f32.mrf.mxu0  ;;  %v2621_v14 = vld [vmem:[#allocation2 + $0x350] sm:$0xff]  ;;  %2695 = vmatprep.subr.mxu0 %v2622_v46 }
 0x2db   : > { %v2095_v62 = vsel %vm2066_vm7, %v2062_v63, %v15437_v20  ;;  %v15438_v49 = vld [vmem:[#allocation61_spill] sm:$0xff]  ;;  %v840_v63 = vld [vmem:[#allocation2 + $0x150] sm:$0xff]  ;;  %2952 = vmatprep.subr.mxu1 %v841_v15  ;;  %2696 = vmatpush2.msra.mxu0 %v2621_v14  ;;  %v15448_v14 = vld [vmem:[#allocation59_spill] sm:$0xff]  ;;  %v11268_v54 = vpop.permute.xlu1 %3370 }
 0x2dc   : > { %v1997_v26 = vsel %vm1967_vm4, %v1964_v8, %v15438_v49  ;;  %v2128_v21 = vsel %vm2099_vm8, %v2095_v62, %v10772_v51  ;;  %v8384_v1 = vld [vmem:[%s8869_s17 + $0x264] sm:$0xff]  ;;  %v11229_v49 = vpop.f32.mrf.mxu0  ;;  %2953 = vmatpush2.msra.mxu1 %v840_v63  ;;  %3598 = vrot.lane.b32.xlu1 %v10854_v17, %s15362_s19  ;;  %v15451_v17 = vld [vmem:[#allocation95_spill] sm:$0xff]  ;;  %15453 = vst [vmem:[#allocation72_spill] sm:$0xff] %v11268_v54 }
 0x2dd   : > { %v1899_v47 = vsel %vm375_vm1, %v8384_v1, %v15439_v29  ;;  %v15440_v20 = vld [vmem:[#allocation157_spill] sm:$0xff]  ;;  %7994 = vmatmul.mubr.msk.f32.gmra.mxu1 %vm2154_vm9, %v2128_v21  ;;  %v15441_v51 = vld [vmem:[#allocation96_spill] sm:$0xff] }
 0x2de   : > { %v2030_v28 = vsel %vm2000_vm5, %v1997_v26, %v15440_v20  ;;  %v8026_v8 = vld [vmem:[%s8869_s17 + $0x202] sm:$0xff]  ;;  %v1932_v34 = vsel %vm1901_vm2, %v1899_v47, %v15441_v51  ;;  %2495 = vmatprep.mubr.f32.mxu1 %v15217_v61  ;;  %v11244_v20 = vpop.f32.mrf.mxu0  ;;  %v15447_v51 = vld [vmem:[#allocation66_spill] sm:$0xff] }
 0x2df   : > { %v15442_v62 = vld [vmem:[#allocation177_spill] sm:$0xff]  ;;  %v15445_v21 = vld [vmem:[#allocation128_spill] sm:$0xff]  ;;  %3596 = vrot.lane.b32.xlu0 %v8026_v8, %s15362_s19 }
 0x2e0   : > { %v2063_v41 = vsel %vm2033_vm6, %v2030_v28, %v15442_v62  ;;  %v2620_v26 = vld [vmem:[#allocation2 + $0x348] sm:$0xff]  ;;  %v1965_v46 = vsel %vm1934_vm3, %v1932_v34, %v15445_v21  ;;  %v15446_v1 = vld [vmem:[#allocation184_spill] sm:$0xff]  ;;  %v364_v28 = vshrl.u32 %v363_v7, 7  ;;  %3602 = vrot.lane.b32.xlu1 %v10886_v43, %s15362_s19 }
 0x2e1   : > { %v2096_v29 = vsel %vm2066_vm7, %v2063_v41, %v15446_v1  ;;  %v839_v47 = vld [vmem:[#allocation2 + $0x148] sm:$0xff]  ;;  %v1998_v62 = vsel %vm1967_vm4, %v1965_v46, %v15447_v51  ;;  %v2619_v34 = vld [vmem:[#allocation2 + $0x340] sm:$0xff]  ;;  %2697 = vmatprep.subr.mxu0 %v2620_v26 }
 0x2e2   : > { %v2129_v15 = vsel %vm2099_vm8, %v2096_v29, %v10770_v16  ;;  %v838_v41 = vld [vmem:[#allocation2 + $0x140] sm:$0xff]  ;;  %v8385_v21 = vld [vmem:[%s8869_s17 + $0x26c] sm:$0xff]  ;;  %v11260_v51 = vsub.s32 1, %v364_v28  ;;  %v11262_v16 = vpop.f32.mrf.mxu0  ;;  %v15452_v29 = vld [vmem:[#allocation179_spill] sm:$0xff]  ;;  %2954 = vmatprep.subr.mxu1 %v839_v47  ;;  %2698 = vmatpush2.msra.mxu0 %v2619_v34 }
 0x2e3   : > { %v1900_v63 = vsel %vm375_vm1, %v8385_v21, %v15448_v14  ;;  %v15449_v7 = vld [vmem:[#allocation160_spill] sm:$0xff]  ;;  %7995 = vmatmul.mubr.msk.f32.gmra.mxu1 %vm2154_vm9, %v2129_v15  ;;  %v11270_v21 = vpop.permute.xlu0 %3368  ;;  %v15455_v15 = vld [vmem:[#allocation127_spill] sm:$0xff] }
 0x2e4   : > { %v2031_v1 = vsel %vm2000_vm5, %v1998_v62, %v15449_v7  ;;  %v8028_v46 = vld [vmem:[%s8869_s17 + $0x222] sm:$0xff]  ;;  %15450 = vst [vmem:[#allocation16_spill] sm:$0xff] %v11260_v51  ;;  %v1933_v8 = vsel %vm1901_vm2, %v1900_v63, %v15451_v17  ;;  %15454 = vst [vmem:[#allocation104_spill] sm:$0xff] %v11270_v21  ;;  %2501 = vmatprep.mubr.f32.mxu1 %v15217_v61  ;;  %v361_v26 = vld [vmem:[%s14955_s2] sm:$0x3]  ;;  %2955 = vmatpush2.msra.mxu1 %v838_v41  ;;  %v11280_v17 = vpop.f32.mrf.mxu0 }
 0x2e5   : > { %v2064_v6 = vsel %vm2033_vm6, %v2031_v1, %v15452_v29  ;;  %v2618_v62 = vld [vmem:[#allocation2 + $0x338] sm:$0xff]  ;;  %v1966_v14 = vsel %vm1934_vm3, %v1933_v8, %v15455_v15  ;;  %v15456_v63 = vld [vmem:[#allocation64_spill] sm:$0xff]  ;;  %v15457_v29 = vld [vmem:[#allocation65_spill] sm:$0xff]  ;;  %3600 = vrot.lane.b32.xlu0 %v8028_v46, %s15362_s19  ;;  %v11289_v8 = vsub.s32 0, %v364_v28  ;;  %v11303_v28 = vpop.permute.xlu1 %3374 }
 0x2e6   : > { %v2097_v7 = vsel %vm2066_vm7, %v2064_v6, %v15456_v63  ;;  %v837_v1 = vld [vmem:[#allocation2 + $0x138] sm:$0xff]  ;;  %v1999_v47 = vsel %vm1967_vm4, %v1966_v14, %v15457_v29  ;;  %v2617_v15 = vld [vmem:[#allocation2 + $0x330] sm:$0xff]  ;;  %v8030_v21 = vld [vmem:[%s8869_s17 + $0x242] sm:$0xff]  ;;  %2699 = vmatprep.subr.mxu0 %v2618_v62  ;;  %v11297_v14 = vrot.slane %v361_v26, %v11260_v51  ;;  %15461 = vst [vmem:[#allocation15_spill] sm:$0xff] %v11303_v28 }
 0x2e7   : > { %v2130_v54 = vsel %vm2099_vm8, %v2097_v7, %v10802_v60  ;;  %15458 = vst [vmem:[#allocation140_spill] sm:$0xff] %v11289_v8  ;;  %v836_v6 = vld [vmem:[#allocation2 + $0x130] sm:$0xff]  ;;  %v15459_v34 = vld [vmem:[#allocation159_spill] sm:$0xff]  ;;  %v11299_v60 = vpop.f32.mrf.mxu0  ;;  %v15460_v43 = vld [vmem:[#allocation12_spill] sm:$0xff]  ;;  %v11305_v7 = vpop.permute.xlu0 %3372  ;;  %2956 = vmatprep.subr.mxu1 %v837_v1  ;;  %2700 = vmatpush2.msra.mxu0 %v2617_v15 }
 0x2e8   : > { %v2032_v41 = vsel %vm2000_vm5, %v1999_v47, %v15459_v34  ;;  %7996 = vmatmul.mubr.msk.f32.gmra.mxu1 %vm2154_vm9, %v2130_v54  ;;  %v8031_v63 = vld [vmem:[%s8869_s17 + $0x24a] sm:$0xff]  ;;  %15462 = vst [vmem:[#allocation71_spill] sm:$0xff] %v11305_v7  ;;  %v11309_v54 = vrot.slane %v361_v26, %v11289_v8  ;;  %v834_v26 = vld [vmem:[#allocation2 + $0x120] sm:$0xff]  ;;  %v2614_v7 = vld [vmem:[#allocation2 + $0x318] sm:$0xff]  ;;  %v546_v15 = vadd.f32 %v10888_v18, %v11297_v14 }
 0x2e9   : > { %v2065_v46 = vsel %vm2033_vm6, %v2032_v41, %v15460_v43  ;;  %2507 = vmatprep.mubr.f32.mxu1 %v15217_v61  ;;  %v2616_v62 = vld [vmem:[#allocation2 + $0x328] sm:$0xff]  ;;  %2957 = vmatpush2.msra.mxu1 %v836_v6  ;;  %v2615_v41 = vld [vmem:[#allocation2 + $0x320] sm:$0xff]  ;;  %v11313_v43 = vpop.f32.mrf.mxu0  ;;  %v552_v18 = vadd.f32 %v10919_v39, %v11297_v14 }
 0x2ea   : > { %v15463_v29 = vld [vmem:[#allocation9_spill] sm:$0xff]  ;;  %3606 = vrot.lane.b32.xlu1 %v8031_v63, %s15362_s19  ;;  %3604 = vrot.lane.b32.xlu0 %v8030_v21, %s15362_s19  ;;  %v833_v21 = vld [vmem:[#allocation2 + $0x118] sm:$0xff]  ;;  %v2613_v63 = vld [vmem:[#allocation2 + $0x310] sm:$0xff] }
 0x2eb   : > { %v2098_v47 = vsel %vm2066_vm7, %v2065_v46, %v15463_v29  ;;  %v835_v34 = vld [vmem:[#allocation2 + $0x128] sm:$0xff]  ;;  %2701 = vmatprep.subr.mxu0 %v2616_v62  ;;  %v11324_v6 = vpop.f32.mrf.mxu0  ;;  %v11326_v46 = vpop.permute.xlu1 %3442  ;;  %v737_v58 = vmax.f32 %v552_v18, 0.0 }
 0x2ec   : > { %v2131_v28 = vsel %vm2099_vm8, %v2098_v47, %v10800_v52  ;;  %v8033_v1 = vld [vmem:[%s8869_s17 + $0x26a] sm:$0xff]  ;;  %v8032_v44 = vld [vmem:[%s8869_s17 + $0x262] sm:$0xff]  ;;  %v11328_v29 = vpop.permute.xlu0 %3440  ;;  %v544_v52 = vadd.f32 %v10869_v11, %v11309_v54  ;;  %2958 = vmatprep.subr.mxu1 %v835_v34  ;;  %2702 = vmatpush2.msra.mxu0 %v2615_v41  ;;  %v735_v41 = vmax.f32 %v546_v15, 0.0  ;;  %v558_v15 = vadd.f32 %v10950_v33, %v11297_v14 }
 0x2ed   : > { %7997 = vmatmul.mubr.msk.f32.gmra.mxu1 %vm2154_vm9, %v2131_v28  ;;  %2703 = vmatprep.subr.mxu0 %v2614_v7  ;;  %v832_v28 = vld [vmem:[#allocation2 + $0x110] sm:$0xff]  ;;  %v2612_v62 = vld [vmem:[#allocation2 + $0x308] sm:$0xff]  ;;  %v11334_v47 = vpop.f32.mrf.mxu0  ;;  %v2611_v11 = vld [vmem:[#allocation2 + $0x300] sm:$0xff]  ;;  %v556_v33 = vadd.f32 %v10934_v13, %v11309_v54 }
 0x2ee   : > { %2959 = vmatpush2.msra.mxu1 %v834_v26  ;;  %3610 = vrot.lane.b32.xlu1 %v8033_v1, %s15362_s19  ;;  %v8034_v34 = vld [vmem:[%s8869_s17 + $0x282] sm:$0xff]  ;;  %v734_v45 = vmax.f32 %v544_v52, 0.0  ;;  %v550_v1 = vadd.f32 %v10903_v23, %v11309_v54 }
 0x2ef   : > { %3608 = vrot.lane.b32.xlu0 %v8032_v44, %s15362_s19  ;;  %2960 = vmatprep.subr.mxu1 %v833_v21  ;;  %v11340_v7 = vpop.f32.mrf.mxu0  ;;  %v11342_v26 = vpop.permute.xlu1 %3446  ;;  %v830_v44 = vld [vmem:[#allocation2 + $0x100] sm:$0xff]  ;;  %v738_v13 = vmax.f32 %v556_v33, 0.0 }
 0x2f0   : > { %2704 = vmatpush2.msra.mxu0 %v2613_v63  ;;  %v11344_v39 = vpop.permute.xlu0 %3444  ;;  %2961 = vmatpush2.msra.mxu1 %v832_v28  ;;  %v8037_v63 = vld [vmem:[%s8869_s17 + $0x2aa] sm:$0xff]  ;;  %v8036_v52 = vld [vmem:[%s8869_s17 + $0x2a2] sm:$0xff] }
 0x2f1   : > { %2705 = vmatprep.subr.mxu0 %v2612_v62  ;;  %2962 = vmatprep.subr.mxu1 %v831_v36  ;;  %v11350_v21 = vpop.f32.mrf.mxu0  ;;  %v736_v36 = vmax.f32 %v550_v1, 0.0  ;;  %v739_v62 = vmax.f32 %v558_v15, 0.0  ;;  %v8386_v15 = vld [vmem:[%s8869_s17 + $0xce] sm:$0xff]  ;;  %v8417_v42 = vld [vmem:[%s8869_s17 + $0x2a6] sm:$0xff] }
 0x2f2   : > { %2706 = vmatpush2.msra.mxu0 %v2611_v11  ;;  %3614 = vrot.lane.b32.xlu1 %v8035_v22, %s15362_s19  ;;  %v564_v22 = vadd.f32 %v10981_v19, %v11297_v14  ;;  %v570_v19 = vadd.f32 %v11012_v25, %v11297_v14 }
 0x2f3   : > { %3612 = vrot.lane.b32.xlu0 %v8034_v34, %s15362_s19  ;;  %2963 = vmatpush2.msra.mxu1 %v830_v44  ;;  %v11356_v23 = vpop.f32.mrf.mxu0  ;;  %v11358_v28 = vpop.permute.xlu1 %3450 }
 0x2f4   : > { %2964 = vmatprep.mubr.f32.mxu1 %v735_v41  ;;  %15464 = vst [vmem:[#allocation103_spill] sm:$0xff] %v11358_v28  ;;  %v11360_v18 = vpop.permute.xlu0 %3448  ;;  %v743_v25 = vmax.f32 %v570_v19, 0.0  ;;  %v8390_v19 = vld [vmem:[%s8869_s17 + $0x10e] sm:$0xff] }
 0x2f5   : > { %2965 = vmatmul.mubr.f32.vlgmr.msra.gmra.mxu1 %v734_v45  ;;  %v11366_v11 = vpop.f32.mrf.mxu0  ;;  %v562_v45 = vadd.f32 %v10965_v55, %v11309_v54 }
 0x2f6   : > { %2970 = vmatprep.mubr.f32.mxu1 %v737_v58  ;;  %3618 = vrot.lane.b32.xlu1 %v8037_v63, %s15362_s19  ;;  %v741_v58 = vmax.f32 %v564_v22, 0.0  ;;  %v8387_v63 = vld [vmem:[%s8869_s17 + $0xc6] sm:$0xff]  ;;  %v576_v22 = vadd.f32 %v11043_v40, %v11297_v14  ;;  %v582_v40 = vadd.f32 %v11074_v57, %v11297_v14  ;;  %v588_v57 = vadd.f32 %v11105_v59, %v11297_v14 }
 0x2f7   : > { %3616 = vrot.lane.b32.xlu0 %v8036_v52, %s15362_s19  ;;  %v11370_v34 = vpop.f32.mrf.mxu0  ;;  %v11372_v41 = vpop.permute.xlu1 %3454  ;;  %v594_v59 = vadd.f32 %v11136_v50, %v11297_v14  ;;  %v592_v50 = vadd.f32 %v11120_v27, %v11309_v54 }
 0x2f8   : > { %15465 = vst [vmem:[#allocation139_spill] sm:$0xff] %v11372_v41  ;;  %v11374_v1 = vpop.permute.xlu0 %3452  ;;  %v8416_v41 = vld [vmem:[%s8869_s17 + $0x2ae] sm:$0xff] }
 0x2f9   : > { %15466 = vst [vmem:[#allocation18_spill] sm:$0xff] %v11374_v1  ;;  %2971 = vmatmul.mubr.f32.gmra.mxu1 %v736_v36  ;;  %v11380_v44 = vpop.f32.mrf.mxu0  ;;  %v740_v36 = vmax.f32 %v562_v45, 0.0 }
 0x2fa   : > { %2976 = vmatprep.mubr.f32.mxu1 %v739_v62  ;;  %3662 = vrot.lane.b32.xlu1 %v8386_v15, %s15467_s20  ;;  %v568_v62 = vadd.f32 %v10996_v56, %v11309_v54  ;;  %v8388_v15 = vld [vmem:[%s8869_s17 + $0xee] sm:$0xff] }
 0x2fb   : > { %3660 = vrot.lane.b32.xlu0 %v8387_v63, %s15467_s20  ;;  %v11386_v52 = vpop.f32.mrf.mxu0  ;;  %v11388_v33 = vpop.permute.xlu1 %3458  ;;  %v8389_v63 = vld [vmem:[%s8869_s17 + $0xe6] sm:$0xff] }
 0x2fc   : > { %15468 = vst [vmem:[#allocation74_spill] sm:$0xff] %v11388_v33  ;;  %v11390_v55 = vpop.permute.xlu0 %3456  ;;  %v742_v56 = vmax.f32 %v568_v62, 0.0 }
 0x2fd   : > { %15469 = vst [vmem:[#allocation106_spill] sm:$0xff] %v11390_v55  ;;  %2977 = vmatmul.mubr.f32.gmra.mxu1 %v738_v13  ;;  %v11400_v33 = vpop.f32.mrf.mxu0  ;;  %v574_v13 = vadd.f32 %v11027_v31, %v11309_v54 }
 0x2fe   : > { %2982 = vmatprep.mubr.f32.mxu1 %v741_v58  ;;  %3666 = vrot.lane.b32.xlu1 %v8388_v15, %s15467_s20  ;;  %v745_v58 = vmax.f32 %v576_v22, 0.0  ;;  %v8391_v15 = vld [vmem:[%s8869_s17 + $0x106] sm:$0xff]  ;;  %v8392_v22 = vld [vmem:[%s8869_s17 + $0x12e] sm:$0xff] }
 0x2ff   : > { %3664 = vrot.lane.b32.xlu0 %v8389_v63, %s15467_s20  ;;  %v11402_v45 = vpop.permute.xlu1 %3462  ;;  %v11414_v63 = vpop.f32.mrf.mxu0  ;;  %v744_v31 = vmax.f32 %v574_v13, 0.0 }
 0x300   : > { %15470 = vst [vmem:[#allocation22_spill] sm:$0xff] %v11402_v45  ;;  %v11404_v10 = vpop.permute.xlu0 %3460  ;;  %v660_v38 = vadd.f32 %v11414_v63, %v11297_v14 }
 0x301   : > { %15471 = vst [vmem:[#allocation17_spill] sm:$0xff] %v11404_v10  ;;  %2983 = vmatmul.mubr.f32.gmra.mxu1 %v740_v36  ;;  %v580_v36 = vadd.f32 %v11058_v0, %v11309_v54  ;;  %v11501_v10 = vld [vmem:[%s8869_s17 + $0x1a6] sm:$0xff] }
 0x302   : > { %2988 = vmatprep.mubr.f32.mxu1 %v743_v25  ;;  %3670 = vrot.lane.b32.xlu1 %v8390_v19, %s15467_s20  ;;  %v747_v25 = vmax.f32 %v582_v40, 0.0  ;;  %v8393_v19 = vld [vmem:[%s8869_s17 + $0x126] sm:$0xff]  ;;  %v11439_v40 = vld [vmem:[%s8869_s17 + $0x14e] sm:$0xff] }
 0x303   : > { %3668 = vrot.lane.b32.xlu0 %v8391_v15, %s15467_s20  ;;  %v11416_v62 = vpop.permute.xlu1 %3466  ;;  %v11428_v15 = vpop.f32.mrf.mxu0  ;;  %v746_v0 = vmax.f32 %v580_v36, 0.0 }
 0x304   : > { %15472 = vst [vmem:[#allocation73_spill] sm:$0xff] %v11416_v62  ;;  %v11418_v45 = vpop.permute.xlu0 %3464 }
 0x305   : > { %15473 = vst [vmem:[#allocation105_spill] sm:$0xff] %v11418_v45  ;;  %2989 = vmatmul.mubr.f32.gmra.mxu1 %v742_v56  ;;  %v586_v56 = vadd.f32 %v11089_v12, %v11309_v54  ;;  %v11448_v36 = vpop.f32.mrf.mxu0  ;;  %v8400_v45 = vld [vmem:[%s8869_s17 + $0x1ae] sm:$0xff] }
 0x306   : > { %2994 = vmatprep.mubr.f32.mxu1 %v745_v58  ;;  %3674 = vrot.lane.b32.xlu1 %v8392_v22, %s15467_s20  ;;  %v749_v58 = vmax.f32 %v588_v57, 0.0  ;;  %v11444_v22 = vld [vmem:[%s8869_s17 + $0x146] sm:$0xff]  ;;  %v751_v57 = vmax.f32 %v594_v59, 0.0 }
 0x307   : > { %3672 = vrot.lane.b32.xlu0 %v8393_v19, %s15467_s20  ;;  %v11430_v13 = vpop.permute.xlu1 %3470  ;;  %v600_v19 = vadd.f32 %v11167_v5, %v11297_v14  ;;  %v598_v5 = vadd.f32 %v11151_v48, %v11309_v54 }
 0x308   : > { %15474 = vst [vmem:[#allocation21_spill] sm:$0xff] %v11430_v13  ;;  %v11432_v62 = vpop.permute.xlu0 %3468  ;;  %v11459_v13 = vld [vmem:[%s8869_s17 + $0x16e] sm:$0xff] }
 0x309   : > { %15475 = vst [vmem:[#allocation20_spill] sm:$0xff] %v11432_v62  ;;  %2995 = vmatmul.mubr.f32.gmra.mxu1 %v744_v31  ;;  %v753_v59 = vmax.f32 %v600_v19, 0.0  ;;  %v11479_v62 = vld [vmem:[%s8869_s17 + $0x18e] sm:$0xff] }
 0x30a   : > { %3000 = vmatprep.mubr.f32.mxu1 %v747_v25  ;;  %3678 = vrot.lane.b32.xlu1 %v11439_v40, %s15467_s20  ;;  %v748_v25 = vmax.f32 %v586_v56, 0.0  ;;  %v11468_v56 = vpop.f32.mrf.mxu0 }
 0x30b   : > { %3676 = vrot.lane.b32.xlu0 %v11444_v22, %s15467_s20  ;;  %v11450_v12 = vpop.permute.xlu1 %3474 }
 0x30c   : > { %15476 = vst [vmem:[#allocation76_spill] sm:$0xff] %v11450_v12  ;;  %v11452_v31 = vpop.permute.xlu0 %3472  ;;  %v11464_v12 = vld [vmem:[%s8869_s17 + $0x166] sm:$0xff] }
 0x30d   : > { %15477 = vst [vmem:[#allocation108_spill] sm:$0xff] %v11452_v31  ;;  %3001 = vmatmul.mubr.f32.gmra.mxu1 %v746_v0  ;;  %v606_v31 = vadd.f32 %v11198_v4, %v11297_v14  ;;  %v604_v4 = vadd.f32 %v11182_v37, %v11309_v54 }
 0x30e   : > { %3006 = vmatprep.mubr.f32.mxu1 %v749_v58  ;;  %3682 = vrot.lane.b32.xlu1 %v11459_v13, %s15467_s20  ;;  %v750_v58 = vmax.f32 %v592_v50, 0.0  ;;  %v11488_v50 = vpop.f32.mrf.mxu0 }
 0x30f   : > { %3680 = vrot.lane.b32.xlu0 %v11464_v12, %s15467_s20  ;;  %v11470_v27 = vpop.permute.xlu1 %3478  ;;  %v755_v19 = vmax.f32 %v606_v31, 0.0  ;;  %v754_v31 = vmax.f32 %v604_v4, 0.0 }
 0x310   : > { %15478 = vst [vmem:[#allocation26_spill] sm:$0xff] %v11470_v27  ;;  %v11472_v0 = vpop.permute.xlu0 %3476  ;;  %v11484_v27 = vld [vmem:[%s8869_s17 + $0x186] sm:$0xff] }
 0x311   : > { %15479 = vst [vmem:[#allocation19_spill] sm:$0xff] %v11472_v0  ;;  %3007 = vmatmul.mubr.f32.gmra.mxu1 %v748_v25  ;;  %v612_v0 = vadd.f32 %v11229_v49, %v11297_v14 }
 0x312   : > { %3012 = vmatprep.mubr.f32.mxu1 %v751_v57  ;;  %3686 = vrot.lane.b32.xlu1 %v11479_v62, %s15467_s20  ;;  %v752_v57 = vmax.f32 %v598_v5, 0.0  ;;  %v11505_v5 = vpop.f32.mrf.mxu0 }
 0x313   : > { %3684 = vrot.lane.b32.xlu0 %v11484_v27, %s15467_s20  ;;  %v11490_v48 = vpop.permute.xlu1 %3482  ;;  %v757_v49 = vmax.f32 %v612_v0, 0.0  ;;  %v616_v0 = vadd.f32 %v11244_v20, %v11309_v54 }
 0x314   : > { %15480 = vst [vmem:[#allocation75_spill] sm:$0xff] %v11490_v48  ;;  %v11492_v25 = vpop.permute.xlu0 %3480 }
 0x315   : > { %15481 = vst [vmem:[#allocation107_spill] sm:$0xff] %v11492_v25  ;;  %3013 = vmatmul.mubr.f32.gmra.mxu1 %v750_v58  ;;  %v610_v58 = vadd.f32 %v11213_v24, %v11309_v54  ;;  %v8403_v25 = vld [vmem:[%s8869_s17 + $0x1c6] sm:$0xff]  ;;  %v758_v20 = vmax.f32 %v616_v0, 0.0 }
 0x316   : > { %3018 = vmatprep.mubr.f32.mxu1 %v753_v59  ;;  %3690 = vrot.lane.b32.xlu1 %v8400_v45, %s15467_s20  ;;  %v618_v45 = vadd.f32 %v11262_v16, %v11297_v14  ;;  %v8402_v59 = vld [vmem:[%s8869_s17 + $0x1ce] sm:$0xff]  ;;  %v624_v16 = vadd.f32 %v11299_v60, %v11297_v14  ;;  %v630_v60 = vadd.f32 %v11324_v6, %v11297_v14 }
 0x317   : > { %3688 = vrot.lane.b32.xlu0 %v11501_v10, %s15467_s20  ;;  %v11507_v48 = vpop.permute.xlu1 %3486  ;;  %v756_v24 = vmax.f32 %v610_v58, 0.0  ;;  %v636_v6 = vadd.f32 %v11340_v7, %v11297_v14  ;;  %v642_v7 = vadd.f32 %v11356_v23, %v11297_v14  ;;  %v640_v23 = vadd.f32 %v11350_v21, %v11309_v54 }
 0x318   : > { %15482 = vst [vmem:[#allocation25_spill] sm:$0xff] %v11507_v48  ;;  %v11509_v37 = vpop.permute.xlu0 %3484  ;;  %v11519_v48 = vpop.f32.mrf.mxu0 }
 0x319   : > { %15483 = vst [vmem:[#allocation24_spill] sm:$0xff] %v11509_v37  ;;  %3019 = vmatmul.mubr.f32.gmra.mxu1 %v752_v57  ;;  %v759_v57 = vmax.f32 %v618_v45, 0.0  ;;  %v8406_v45 = vld [vmem:[%s8869_s17 + $0x20e] sm:$0xff] }
 0x31a   : > { %3024 = vmatprep.mubr.f32.mxu1 %v755_v19  ;;  %3694 = vrot.lane.b32.xlu1 %v8402_v59, %s15467_s20  ;;  %v8404_v19 = vld [vmem:[%s8869_s17 + $0x1ee] sm:$0xff]  ;;  %v11533_v59 = vpop.f32.mrf.mxu0 }
 0x31b   : > { %3692 = vrot.lane.b32.xlu0 %v8403_v25, %s15467_s20  ;;  %v11521_v4 = vpop.permute.xlu1 %3490  ;;  %v8405_v25 = vld [vmem:[%s8869_s17 + $0x1e6] sm:$0xff] }
 0x31c   : > { %15484 = vst [vmem:[#allocation78_spill] sm:$0xff] %v11521_v4  ;;  %v11523_v37 = vpop.permute.xlu0 %3488 }
 0x31d   : > { %15485 = vst [vmem:[#allocation110_spill] sm:$0xff] %v11523_v37  ;;  %3025 = vmatmul.mubr.f32.gmra.mxu1 %v754_v31  ;;  %v622_v31 = vadd.f32 %v11280_v17, %v11309_v54  ;;  %v8415_v37 = vld [vmem:[%s8869_s17 + $0x286] sm:$0xff] }
 0x31e   : > { %3030 = vmatprep.mubr.f32.mxu1 %v757_v49  ;;  %3698 = vrot.lane.b32.xlu1 %v8404_v19, %s15467_s20  ;;  %v761_v49 = vmax.f32 %v624_v16, 0.0  ;;  %v8407_v19 = vld [vmem:[%s8869_s17 + $0x206] sm:$0xff]  ;;  %v8408_v16 = vld [vmem:[%s8869_s17 + $0x22e] sm:$0xff] }
 0x31f   : > { %3696 = vrot.lane.b32.xlu0 %v8405_v25, %s15467_s20  ;;  %v11535_v58 = vpop.permute.xlu1 %3494  ;;  %v11547_v25 = vpop.f32.mrf.mxu0  ;;  %v760_v17 = vmax.f32 %v622_v31, 0.0 }
 0x320   : > { %15486 = vst [vmem:[#allocation131_spill] sm:$0xff] %v11535_v58  ;;  %v11537_v4 = vpop.permute.xlu0 %3492 }
 0x321   : > { %15487 = vst [vmem:[#allocation30_spill] sm:$0xff] %v11537_v4  ;;  %3031 = vmatmul.mubr.f32.gmra.mxu1 %v756_v24  ;;  %v628_v24 = vadd.f32 %v11313_v43, %v11309_v54  ;;  %v8414_v4 = vld [vmem:[%s8869_s17 + $0x28e] sm:$0xff] }
 0x322   : > { %3036 = vmatprep.mubr.f32.mxu1 %v759_v57  ;;  %3702 = vrot.lane.b32.xlu1 %v8406_v45, %s15467_s20  ;;  %v763_v57 = vmax.f32 %v630_v60, 0.0  ;;  %v8409_v45 = vld [vmem:[%s8869_s17 + $0x226] sm:$0xff]  ;;  %v8410_v60 = vld [vmem:[%s8869_s17 + $0x24e] sm:$0xff] }
 0x323   : > { %3700 = vrot.lane.b32.xlu0 %v8407_v19, %s15467_s20  ;;  %v11549_v0 = vpop.permute.xlu1 %3498  ;;  %v11561_v19 = vpop.f32.mrf.mxu0  ;;  %v762_v43 = vmax.f32 %v628_v24, 0.0  ;;  %v2142_v24 = vld [vmem:[%s14957_s4] ss:$4 sm:$0x3] }
 0x324   : > { %15488 = vst [vmem:[#allocation23_spill] sm:$0xff] %v11549_v0  ;;  %v11551_v58 = vpop.permute.xlu0 %3496 }
 0x325   : > { %15489 = vst [vmem:[#allocation142_spill] sm:$0xff] %v11551_v58  ;;  %3037 = vmatmul.mubr.f32.gmra.mxu1 %v758_v20  ;;  %v634_v20 = vadd.f32 %v11334_v47, %v11309_v54 }
 0x326   : > { %3042 = vmatprep.mubr.f32.mxu1 %v761_v49  ;;  %3706 = vrot.lane.b32.xlu1 %v8408_v16, %s15467_s20  ;;  %v765_v49 = vmax.f32 %v636_v6, 0.0  ;;  %v8411_v16 = vld [vmem:[%s8869_s17 + $0x246] sm:$0xff]  ;;  %v11587_v6 = vrot.slane %v2142_v24, %v11289_v8 }
 0x327   : > { %3704 = vrot.lane.b32.xlu0 %v8409_v45, %s15467_s20  ;;  %v11563_v31 = vpop.permute.xlu1 %3502  ;;  %v11578_v45 = vpop.f32.mrf.mxu0 }
 0x328   : > { %15490 = vst [vmem:[#allocation77_spill] sm:$0xff] %v11563_v31  ;;  %v11565_v0 = vpop.permute.xlu0 %3500  ;;  %v8412_v31 = vld [vmem:[%s8869_s17 + $0x26e] sm:$0xff] }
 0x329   : > { %15491 = vst [vmem:[#allocation162_spill] sm:$0xff] %v11565_v0  ;;  %3043 = vmatmul.mubr.f32.gmra.mxu1 %v760_v17  ;;  %v8413_v0 = vld [vmem:[%s8869_s17 + $0x266] sm:$0xff]  ;;  %v11598_v21 = vpop.f32.mrf.mxu0 }
 0x32a   : > { %3048 = vmatprep.mubr.f32.mxu1 %v763_v57  ;;  %3710 = vrot.lane.b32.xlu1 %v8410_v60, %s15467_s20  ;;  %v764_v57 = vmax.f32 %v634_v20, 0.0  ;;  %v767_v60 = vmax.f32 %v642_v7, 0.0  ;;  %v11596_v20 = vrot.slane %v2142_v24, %v11260_v51  ;;  %v766_v7 = vmax.f32 %v640_v23, 0.0 }
 0x32b   : > { %3708 = vrot.lane.b32.xlu0 %v8411_v16, %s15467_s20  ;;  %v11580_v47 = vpop.permute.xlu1 %3558  ;;  %v648_v16 = vadd.f32 %v11370_v34, %v11297_v14  ;;  %v646_v34 = vadd.f32 %v11366_v11, %v11309_v54  ;;  %v654_v24 = vadd.f32 %v11386_v52, %v11297_v14  ;;  %v11614_v23 = vpop.f32.mrf.mxu0  ;;  %v652_v52 = vadd.f32 %v11380_v44, %v11309_v54 }
 0x32c   : > { %v11582_v17 = vpop.permute.xlu0 %3556 }
 0x32d   : > { %3049 = vmatmul.mubr.f32.gmra.mxu1 %v762_v43  ;;  %v2323_v43 = vpop.f32.mrf.mxu1  ;;  %v770_v63 = vmax.f32 %v652_v52, 0.0 }
 0x32e   : > { %3054 = vmatprep.mubr.f32.mxu1 %v765_v49  ;;  %3714 = vrot.lane.b32.xlu1 %v8412_v31, %s15467_s20  ;;  %v2324_v31 = vadd.f32 %v2323_v43, %v11587_v6 }
 0x32f   : > { %3712 = vrot.lane.b32.xlu0 %v8413_v0, %s15467_s20  ;;  %v11600_v8 = vpop.permute.xlu1 %3562  ;;  %v2325_v58 = vpop.f32.mrf.mxu1  ;;  %v769_v0 = vmax.f32 %v648_v16, 0.0  ;;  %v768_v16 = vmax.f32 %v646_v34, 0.0 }
 0x330   : > { %v11602_v49 = vpop.permute.xlu0 %3560  ;;  %v2326_v51 = vadd.f32 %v2325_v58, %v11596_v20  ;;  %v2514_v58 = vmax.f32 %v2324_v31, 0.0  ;;  %v11628_v34 = vpop.f32.mrf.mxu0 }
 0x331   : > { %3055 = vmatmul.mubr.f32.gmra.mxu1 %v764_v57  ;;  %v2329_v11 = vpop.f32.mrf.mxu1 }
 0x332   : > { %3060 = vmatprep.mubr.f32.mxu1 %v767_v60  ;;  %3718 = vrot.lane.b32.xlu1 %v8414_v4, %s15467_s20  ;;  %v2515_v57 = vmax.f32 %v2326_v51, 0.0  ;;  %v2330_v4 = vadd.f32 %v2329_v11, %v11587_v6  ;;  %v11644_v52 = vpop.f32.mrf.mxu0 }
 0x333   : > { %3716 = vrot.lane.b32.xlu0 %v8415_v37, %s15467_s20  ;;  %v11616_v43 = vpop.permute.xlu1 %3566  ;;  %v2331_v55 = vpop.f32.mrf.mxu1  ;;  %v771_v37 = vmax.f32 %v654_v24, 0.0 }
 0x334   : > { %15492 = vst [vmem:[#allocation109_spill] sm:$0xff] %v11616_v43  ;;  %v11618_v60 = vpop.permute.xlu0 %3564  ;;  %v2332_v51 = vadd.f32 %v2331_v55, %v11596_v20  ;;  %2707 = vmatprep.mubr.f32.mxu0 %v2515_v57  ;;  %v658_v55 = vadd.f32 %v11400_v33, %v11309_v54  ;;  %v773_v57 = vmax.f32 %v660_v38, 0.0 }
 0x335   : > { %3061 = vmatmul.mubr.f32.gmra.mxu1 %v766_v7  ;;  %v2335_v44 = vpop.f32.mrf.mxu1  ;;  %2708 = vmatmul.mubr.f32.vlgmr.msra.gmra.mxu0 %v2514_v58 }
 0x336   : > { %3066 = vmatprep.mubr.f32.mxu1 %v769_v0  ;;  %3722 = vrot.lane.b32.xlu1 %v8416_v41, %s15467_s20  ;;  %v2517_v7 = vmax.f32 %v2332_v51, 0.0  ;;  %v2516_v41 = vmax.f32 %v2330_v4, 0.0  ;;  %v2336_v24 = vadd.f32 %v2335_v44, %v11587_v6  ;;  %v8418_v51 = vld [vmem:[%s8869_s17 + $0xd2] sm:$0xff] }
 0x337   : > { %3720 = vrot.lane.b32.xlu0 %v8417_v42, %s15467_s20  ;;  %v11632_v31 = vpop.permute.xlu1 %3570  ;;  %v2337_v11 = vpop.f32.mrf.mxu1  ;;  %v666_v42 = vadd.f32 %v11448_v36, %v11297_v14  ;;  %v772_v36 = vmax.f32 %v658_v55, 0.0 }
 0x338   : > { %15493 = vst [vmem:[#allocation29_spill] sm:$0xff] %v11632_v31  ;;  %v11634_v0 = vpop.permute.xlu0 %3568  ;;  %v2338_v58 = vadd.f32 %v2337_v11, %v11596_v20  ;;  %2713 = vmatprep.mubr.f32.mxu0 %v2517_v7  ;;  %v8419_v31 = vld [vmem:[%s8869_s17 + $0xca] sm:$0xff]  ;;  %v2518_v44 = vmax.f32 %v2336_v24, 0.0  ;;  %v11660_v55 = vpop.f32.mrf.mxu0 }
 0x339   : > { %15494 = vst [vmem:[#allocation28_spill] sm:$0xff] %v11634_v0  ;;  %3067 = vmatmul.mubr.f32.gmra.mxu1 %v768_v16  ;;  %v2341_v33 = vpop.f32.mrf.mxu1  ;;  %2714 = vmatmul.mubr.f32.gmra.mxu0 %v2516_v41 }
 0x33a   : > { %3072 = vmatprep.mubr.f32.mxu1 %v771_v37  ;;  %3762 = vrot.lane.b32.xlu1 %v8418_v51, %s15495_s12  ;;  %v2519_v16 = vmax.f32 %v2338_v58, 0.0  ;;  %v664_v37 = vadd.f32 %v11428_v15, %v11309_v54  ;;  %v2342_v7 = vadd.f32 %v2341_v33, %v11587_v6  ;;  %v775_v51 = vmax.f32 %v666_v42, 0.0  ;;  %v8420_v58 = vld [vmem:[%s8869_s17 + $0xf2] sm:$0xff] }
 0x33b   : > { %3760 = vrot.lane.b32.xlu0 %v8419_v31, %s15495_s12  ;;  %v11648_v38 = vpop.permute.xlu1 %3574  ;;  %v2343_v11 = vpop.f32.mrf.mxu1  ;;  %v672_v31 = vadd.f32 %v11488_v50, %v11297_v14  ;;  %v670_v42 = vadd.f32 %v11468_v56, %v11309_v54 }
 0x33c   : > { %15496 = vst [vmem:[#allocation141_spill] sm:$0xff] %v11648_v38  ;;  %v11650_v4 = vpop.permute.xlu0 %3572  ;;  %v2344_v41 = vadd.f32 %v2343_v11, %v11596_v20  ;;  %2719 = vmatprep.mubr.f32.mxu0 %v2519_v16  ;;  %v8421_v38 = vld [vmem:[%s8869_s17 + $0xea] sm:$0xff]  ;;  %v774_v50 = vmax.f32 %v664_v37, 0.0  ;;  %v2520_v33 = vmax.f32 %v2342_v7, 0.0  ;;  %v11676_v37 = vpop.f32.mrf.mxu0 }
 0x33d   : > { %15497 = vst [vmem:[#allocation80_spill] sm:$0xff] %v11650_v4  ;;  %3073 = vmatmul.mubr.f32.gmra.mxu1 %v770_v63  ;;  %v2347_v15 = vpop.f32.mrf.mxu1  ;;  %2720 = vmatmul.mubr.f32.gmra.mxu0 %v2518_v44 }
 0x33e   : > { %3078 = vmatprep.mubr.f32.mxu1 %v773_v57  ;;  %3766 = vrot.lane.b32.xlu1 %v8420_v58, %s15495_s12  ;;  %v2521_v63 = vmax.f32 %v2344_v41, 0.0  ;;  %v2348_v16 = vadd.f32 %v2347_v15, %v11587_v6  ;;  %v777_v58 = vmax.f32 %v672_v31, 0.0  ;;  %v8422_v41 = vld [vmem:[%s8869_s17 + $0x112] sm:$0xff]  ;;  %v676_v31 = vadd.f32 %v11505_v5, %v11309_v54 }
 0x33f   : > { %3764 = vrot.lane.b32.xlu0 %v8421_v38, %s15495_s12  ;;  %v11664_v24 = vpop.permute.xlu1 %3578  ;;  %v2349_v11 = vpop.f32.mrf.mxu1  ;;  %v678_v38 = vadd.f32 %v11519_v48, %v11297_v14  ;;  %v776_v48 = vmax.f32 %v670_v42, 0.0 }
 0x340   : > { %15498 = vst [vmem:[#allocation161_spill] sm:$0xff] %v11664_v24  ;;  %v11666_v57 = vpop.permute.xlu0 %3576  ;;  %v2350_v44 = vadd.f32 %v2349_v11, %v11596_v20  ;;  %2725 = vmatprep.mubr.f32.mxu0 %v2521_v63  ;;  %v8423_v24 = vld [vmem:[%s8869_s17 + $0x10a] sm:$0xff]  ;;  %v2522_v15 = vmax.f32 %v2348_v16, 0.0  ;;  %v11692_v42 = vpop.f32.mrf.mxu0 }
 0x341   : > { %15499 = vst [vmem:[#allocation112_spill] sm:$0xff] %v11666_v57  ;;  %3079 = vmatmul.mubr.f32.gmra.mxu1 %v772_v36  ;;  %v2353_v56 = vpop.f32.mrf.mxu1  ;;  %2726 = vmatmul.mubr.f32.gmra.mxu0 %v2520_v33 }
 0x342   : > { %3084 = vmatprep.mubr.f32.mxu1 %v775_v51  ;;  %3770 = vrot.lane.b32.xlu1 %v8422_v41, %s15495_s12  ;;  %v2523_v36 = vmax.f32 %v2350_v44, 0.0  ;;  %v2354_v63 = vadd.f32 %v2353_v56, %v11587_v6  ;;  %v779_v41 = vmax.f32 %v678_v38, 0.0  ;;  %v8424_v44 = vld [vmem:[%s8869_s17 + $0x132] sm:$0xff]  ;;  %v682_v38 = vadd.f32 %v11533_v59, %v11309_v54  ;;  %v11714_v59 = vld [vmem:[%s8869_s17 + $0x14a] sm:$0xff] }
 0x343   : > { %3768 = vrot.lane.b32.xlu0 %v8423_v24, %s15495_s12  ;;  %v11680_v7 = vpop.permute.xlu1 %3582  ;;  %v2355_v11 = vpop.f32.mrf.mxu1  ;;  %v684_v24 = vadd.f32 %v11547_v25, %v11297_v14  ;;  %v778_v25 = vmax.f32 %v676_v31, 0.0 }
 0x344   : > { %15500 = vst [vmem:[#allocation132_spill] sm:$0xff] %v11680_v7  ;;  %v11682_v51 = vpop.permute.xlu0 %3580  ;;  %v2356_v33 = vadd.f32 %v2355_v11, %v11596_v20  ;;  %2731 = vmatprep.mubr.f32.mxu0 %v2523_v36  ;;  %v8425_v7 = vld [vmem:[%s8869_s17 + $0x12a] sm:$0xff]  ;;  %v2524_v56 = vmax.f32 %v2354_v63, 0.0  ;;  %v11711_v31 = vpop.f32.mrf.mxu0 }
 0x345   : > { %15501 = vst [vmem:[#allocation34_spill] sm:$0xff] %v11682_v51  ;;  %3085 = vmatmul.mubr.f32.gmra.mxu1 %v774_v50  ;;  %v2359_v5 = vpop.f32.mrf.mxu1  ;;  %2732 = vmatmul.mubr.f32.gmra.mxu0 %v2522_v15 }
 0x346   : > { %3090 = vmatprep.mubr.f32.mxu1 %v777_v58  ;;  %3774 = vrot.lane.b32.xlu1 %v8424_v44, %s15495_s12  ;;  %v2525_v50 = vmax.f32 %v2356_v33, 0.0  ;;  %v2360_v36 = vadd.f32 %v2359_v5, %v11587_v6  ;;  %v781_v44 = vmax.f32 %v684_v24, 0.0  ;;  %v11707_v33 = vld [vmem:[%s8869_s17 + $0x152] sm:$0xff]  ;;  %v780_v24 = vmax.f32 %v682_v38, 0.0  ;;  %v11733_v38 = vpop.f32.mrf.mxu0 }
 0x347   : > { %3772 = vrot.lane.b32.xlu0 %v8425_v7, %s15495_s12  ;;  %v11696_v16 = vpop.permute.xlu1 %3586  ;;  %v2361_v11 = vpop.f32.mrf.mxu1  ;;  %v690_v7 = vadd.f32 %v11578_v45, %v11297_v14  ;;  %v688_v5 = vadd.f32 %v11561_v19, %v11309_v54  ;;  %v11736_v19 = vld [vmem:[%s8869_s17 + $0x16a] sm:$0xff] }
 0x348   : > { %15502 = vst [vmem:[#allocation27_spill] sm:$0xff] %v11696_v16  ;;  %v11698_v58 = vpop.permute.xlu0 %3584  ;;  %v2362_v15 = vadd.f32 %v2361_v11, %v11596_v20  ;;  %2737 = vmatprep.mubr.f32.mxu0 %v2525_v50  ;;  %v2526_v50 = vmax.f32 %v2360_v36, 0.0 }
 0x349   : > { %15503 = vst [vmem:[#allocation144_spill] sm:$0xff] %v11698_v58  ;;  %3091 = vmatmul.mubr.f32.gmra.mxu1 %v776_v48  ;;  %v2365_v48 = vpop.f32.mrf.mxu1  ;;  %2738 = vmatmul.mubr.f32.gmra.mxu0 %v2524_v56  ;;  %v783_v58 = vmax.f32 %v690_v7, 0.0  ;;  %v696_v56 = vadd.f32 %v11614_v23, %v11297_v14  ;;  %v694_v7 = vadd.f32 %v11598_v21, %v11309_v54  ;;  %v11756_v21 = vld [vmem:[%s8869_s17 + $0x18a] sm:$0xff] }
 0x34a   : > { %3096 = vmatprep.mubr.f32.mxu1 %v779_v41  ;;  %3778 = vrot.lane.b32.xlu1 %v11707_v33, %s15495_s12  ;;  %v2527_v63 = vmax.f32 %v2362_v15, 0.0  ;;  %v2366_v11 = vadd.f32 %v2365_v48, %v11587_v6 }
 0x34b   : > { %3776 = vrot.lane.b32.xlu0 %v11714_v59, %s15495_s12  ;;  %v11718_v45 = vpop.permute.xlu1 %3590  ;;  %v2367_v16 = vpop.f32.mrf.mxu1  ;;  %v785_v51 = vmax.f32 %v696_v56, 0.0  ;;  %v700_v56 = vadd.f32 %v11628_v34, %v11309_v54  ;;  %v11778_v34 = vld [vmem:[%s8869_s17 + $0x1aa] sm:$0xff] }
 0x34c   : > { %15504 = vst [vmem:[#allocation79_spill] sm:$0xff] %v11718_v45  ;;  %v11720_v41 = vpop.permute.xlu0 %3588  ;;  %v2368_v15 = vadd.f32 %v2367_v16, %v11596_v20  ;;  %2743 = vmatprep.mubr.f32.mxu0 %v2527_v63  ;;  %v11729_v45 = vld [vmem:[%s8869_s17 + $0x172] sm:$0xff]  ;;  %v2528_v48 = vmax.f32 %v2366_v11, 0.0 }
 0x34d   : > { %15505 = vst [vmem:[#allocation164_spill] sm:$0xff] %v11720_v41  ;;  %3097 = vmatmul.mubr.f32.gmra.mxu1 %v778_v25  ;;  %v2371_v25 = vpop.f32.mrf.mxu1  ;;  %2744 = vmatmul.mubr.f32.gmra.mxu0 %v2526_v50  ;;  %v702_v50 = vadd.f32 %v11644_v52, %v11297_v14 }
 0x34e   : > { %3102 = vmatprep.mubr.f32.mxu1 %v781_v44  ;;  %3782 = vrot.lane.b32.xlu1 %v11729_v45, %s15495_s12  ;;  %v2529_v36 = vmax.f32 %v2368_v15, 0.0  ;;  %v782_v44 = vmax.f32 %v688_v5, 0.0  ;;  %v2372_v63 = vadd.f32 %v2371_v25, %v11587_v6  ;;  %v719_v5 = vpop.f32.mrf.mxu0 }
 0x34f   : > { %3780 = vrot.lane.b32.xlu0 %v11736_v19, %s15495_s12  ;;  %v11740_v23 = vpop.permute.xlu1 %3594  ;;  %v2373_v41 = vpop.f32.mrf.mxu1  ;;  %v787_v57 = vmax.f32 %v702_v50, 0.0  ;;  %v706_v50 = vadd.f32 %v11660_v55, %v11309_v54  ;;  %v11798_v55 = vld [vmem:[%s8869_s17 + $0x1ca] sm:$0xff] }
 0x350   : > { %15506 = vst [vmem:[#allocation111_spill] sm:$0xff] %v11740_v23  ;;  %v11742_v16 = vpop.permute.xlu0 %3592  ;;  %v2374_v15 = vadd.f32 %v2373_v41, %v11596_v20  ;;  %2749 = vmatprep.mubr.f32.mxu0 %v2529_v36  ;;  %v11751_v23 = vld [vmem:[%s8869_s17 + $0x192] sm:$0xff]  ;;  %v784_v41 = vmax.f32 %v694_v7, 0.0  ;;  %v2530_v25 = vmax.f32 %v2372_v63, 0.0  ;;  %v11775_v7 = vpop.f32.mrf.mxu0  ;;  %v786_v63 = vmax.f32 %v700_v56, 0.0 }
 0x351   : > { %15507 = vst [vmem:[#allocation33_spill] sm:$0xff] %v11742_v16  ;;  %3103 = vmatmul.mubr.f32.gmra.mxu1 %v780_v24  ;;  %v2377_v24 = vpop.f32.mrf.mxu1  ;;  %2750 = vmatmul.mubr.f32.gmra.mxu0 %v2528_v48  ;;  %v708_v48 = vadd.f32 %v11676_v37, %v11297_v14 }
 0x352   : > { %3108 = vmatprep.mubr.f32.mxu1 %v783_v58  ;;  %3786 = vrot.lane.b32.xlu1 %v11751_v23, %s15495_s12  ;;  %v2531_v58 = vmax.f32 %v2374_v15, 0.0  ;;  %v2378_v36 = vadd.f32 %v2377_v24, %v11587_v6  ;;  %v725_v56 = vpop.f32.mrf.mxu0 }
 0x353   : > { %3784 = vrot.lane.b32.xlu0 %v11756_v21, %s15495_s12  ;;  %v11760_v11 = vpop.permute.xlu1 %3598  ;;  %v2379_v16 = vpop.f32.mrf.mxu1  ;;  %v789_v4 = vmax.f32 %v708_v48, 0.0  ;;  %v712_v48 = vadd.f32 %v11692_v42, %v11309_v54 }
 0x354   : > { %15508 = vst [vmem:[#allocation32_spill] sm:$0xff] %v11760_v11  ;;  %v11762_v52 = vpop.permute.xlu0 %3596  ;;  %v2380_v15 = vadd.f32 %v2379_v16, %v11596_v20  ;;  %2755 = vmatprep.mubr.f32.mxu0 %v2531_v58  ;;  %v11771_v11 = vld [vmem:[%s8869_s17 + $0x1b2] sm:$0xff]  ;;  %v2532_v24 = vmax.f32 %v2378_v36, 0.0  ;;  %v729_v42 = vpop.f32.mrf.mxu0 }
 0x355   : > { %15509 = vst [vmem:[#allocation143_spill] sm:$0xff] %v11762_v52  ;;  %3109 = vmatmul.mubr.f32.gmra.mxu1 %v782_v44  ;;  %v2383_v44 = vpop.f32.mrf.mxu1  ;;  %2756 = vmatmul.mubr.f32.gmra.mxu0 %v2530_v25  ;;  %v714_v25 = vadd.f32 %v11711_v31, %v11297_v14 }
 0x356   : > { %3114 = vmatprep.mubr.f32.mxu1 %v785_v51  ;;  %3790 = vrot.lane.b32.xlu1 %v11771_v11, %s15495_s12  ;;  %v2533_v51 = vmax.f32 %v2380_v15, 0.0  ;;  %v2384_v58 = vadd.f32 %v2383_v44, %v11587_v6 }
 0x357   : > { %3788 = vrot.lane.b32.xlu0 %v11778_v34, %s15495_s12  ;;  %v11782_v37 = vpop.permute.xlu1 %3602  ;;  %v2385_v52 = vpop.f32.mrf.mxu1  ;;  %v791_v0 = vmax.f32 %v714_v25, 0.0 }
 0x358   : > { %15510 = vst [vmem:[#allocation82_spill] sm:$0xff] %v11782_v37  ;;  %v11784_v16 = vpop.permute.xlu0 %3600  ;;  %v2386_v15 = vadd.f32 %v2385_v52, %v11596_v20  ;;  %2761 = vmatprep.mubr.f32.mxu0 %v2533_v51  ;;  %v11793_v37 = vld [vmem:[%s8869_s17 + $0x1d2] sm:$0xff]  ;;  %v788_v52 = vmax.f32 %v706_v50, 0.0  ;;  %v2534_v44 = vmax.f32 %v2384_v58, 0.0 }
 0x359   : > { %15511 = vst [vmem:[#allocation163_spill] sm:$0xff] %v11784_v16  ;;  %3115 = vmatmul.mubr.f32.gmra.mxu1 %v784_v41  ;;  %v2389_v41 = vpop.f32.mrf.mxu1  ;;  %2762 = vmatmul.mubr.f32.gmra.mxu0 %v2532_v24  ;;  %v720_v24 = vadd.f32 %v719_v5, %v11297_v14  ;;  %v11815_v50 = vld [vmem:[%s8869_s17 + $0x1f2] sm:$0xff] }
 0x35a   : > { %3120 = vmatprep.mubr.f32.mxu1 %v787_v57  ;;  %3794 = vrot.lane.b32.xlu1 %v11793_v37, %s15495_s12  ;;  %v2535_v57 = vmax.f32 %v2386_v15, 0.0  ;;  %v2390_v51 = vadd.f32 %v2389_v41, %v11587_v6  ;;  %v8127_v15 = vld [vmem:[%s14956_s3 + $0x98] sm:$0xf]  ;;  %v790_v41 = vmax.f32 %v712_v48, 0.0  ;;  %v8125_v48 = vld [vmem:[%s14956_s3 + $0x88] sm:$0xff] }
 0x35b   : > { %3792 = vrot.lane.b32.xlu0 %v11798_v55, %s15495_s12  ;;  %v2391_v16 = vpop.f32.mrf.mxu1  ;;  %8129 = vmatprep.subr.msk.mxu0 %vm472_vm0, %v8127_v15  ;;  %v793_v43 = vmax.f32 %v720_v24, 0.0 }
 0x35c   : > { %v11802_v36 = vpop.permute.xlu1 %3606  ;;  %v11804_v31 = vpop.permute.xlu0 %3604  ;;  %2767 = vmatprep.mubr.f32.mxu0 %v2535_v57  ;;  %v718_v57 = vadd.f32 %v11733_v38, %v11309_v54 }
 0x35d   : > { %15512 = vst [vmem:[#allocation114_spill] sm:$0xff] %v11802_v36  ;;  %15513 = vst [vmem:[#allocation135_spill] sm:$0xff] %v11804_v31  ;;  %3121 = vmatmul.mubr.f32.gmra.mxu1 %v786_v63  ;;  %v2392_v36 = vadd.f32 %v2391_v16, %v11596_v20  ;;  %v8126_v63 = vld [vmem:[%s14956_s3 + $0x90] sm:$0xf]  ;;  %v2395_v5 = vpop.f32.mrf.mxu1  ;;  %2768 = vmatmul.mubr.f32.gmra.mxu0 %v2534_v44  ;;  %v2536_v31 = vmax.f32 %v2390_v51, 0.0  ;;  %v731_v44 = vpop.f32.mrf.mxu0 }
 0x35e   : > { %3126 = vmatprep.mubr.f32.mxu1 %v789_v4  ;;  %3798 = vrot.lane.b32.xlu1 %v11815_v50, %s15495_s12  ;;  %v11823_v4 = vld [vmem:[%s8869_s17 + $0x1ea] sm:$0xff]  ;;  %v2396_v1 = vadd.f32 %v2395_v5, %v11587_v6  ;;  %v724_v5 = vadd.f32 %v11775_v7, %v11309_v54  ;;  %v11867_v7 = vld [vmem:[%s8869_s17 + $0x232] sm:$0xff] }
 0x35f   : > { %3796 = vrot.lane.b32.xlu0 %v11823_v4, %s15495_s12  ;;  %v2537_v58 = vmax.f32 %v2392_v36, 0.0  ;;  %v2397_v30 = vpop.f32.mrf.mxu1  ;;  %v726_v36 = vadd.f32 %v725_v56, %v11297_v14  ;;  %8130 = vmatpush1.msk.msra.mxu0 %vm472_vm0, %v8126_v63  ;;  %v11850_v56 = vld [vmem:[%s8869_s17 + $0x20a] sm:$0xff]  ;;  %v792_v63 = vmax.f32 %v718_v57, 0.0  ;;  %v8123_v57 = vld [vmem:[%s14956_s3 + $0x78] sm:$0xff] }
 0x360   : > { %v11827_v16 = vpop.permute.xlu1 %3610  ;;  %v2398_v38 = vadd.f32 %v2397_v30, %v11596_v20  ;;  %4570 = vmatprep.subr.mxu0 %v8125_v48 }
 0x361   : > { %15514 = vst [vmem:[#allocation38_spill] sm:$0xff] %v11827_v16  ;;  %v11829_v25 = vpop.permute.xlu0 %3608  ;;  %3127 = vmatmul.mubr.f32.gmra.mxu1 %v788_v52  ;;  %2773 = vmatprep.mubr.f32.mxu0 %v2537_v58  ;;  %v11842_v52 = vld [vmem:[%s8869_s17 + $0x212] sm:$0xff]  ;;  %v2401_v51 = vpop.f32.mrf.mxu1  ;;  %v2538_v58 = vmax.f32 %v2396_v1, 0.0  ;;  %v795_v28 = vmax.f32 %v726_v36, 0.0 }
 0x362   : > { %15515 = vst [vmem:[#allocation31_spill] sm:$0xff] %v11829_v25  ;;  %3132 = vmatprep.mubr.f32.mxu1 %v791_v0  ;;  %3802 = vrot.lane.b32.xlu1 %v11842_v52, %s15495_s12  ;;  %v8124_v0 = vld [vmem:[%s14956_s3 + $0x80] sm:$0xff]  ;;  %v2539_v24 = vmax.f32 %v2398_v38, 0.0  ;;  %v2402_v16 = vadd.f32 %v2401_v51, %v11587_v6  ;;  %v8122_v1 = vld [vmem:[%s14956_s3 + $0x70] sm:$0xff] }
 0x363   : > { %3800 = vrot.lane.b32.xlu0 %v11850_v56, %s15495_s12  ;;  %2774 = vmatmul.mubr.f32.gmra.mxu0 %v2536_v31  ;;  %v2403_v25 = vpop.f32.mrf.mxu1  ;;  %v732_v31 = vadd.f32 %v731_v44, %v11297_v14  ;;  %v794_v44 = vmax.f32 %v724_v5, 0.0 }
 0x364   : > { %v11854_v30 = vpop.permute.xlu1 %3614  ;;  %4571 = vmatpush1.msra.mxu0 %v8124_v0  ;;  %v2404_v38 = vadd.f32 %v2403_v25, %v11596_v20  ;;  %2779 = vmatprep.mubr.f32.mxu0 %v2539_v24  ;;  %v730_v0 = vadd.f32 %v729_v42, %v11309_v54  ;;  %v2540_v51 = vmax.f32 %v2402_v16, 0.0  ;;  %v8120_v54 = vld [vmem:[%s14956_s3 + $0x60] sm:$0xff]  ;;  %v11898_v42 = vld [vmem:[%s8869_s17 + $0x24a] sm:$0xff] }
 0x365   : > { %15516 = vst [vmem:[#allocation146_spill] sm:$0xff] %v11854_v30  ;;  %v11856_v15 = vpop.permute.xlu0 %3612  ;;  %3133 = vmatmul.mubr.f32.gmra.mxu1 %v790_v41  ;;  %v2407_v14 = vpop.f32.mrf.mxu1  ;;  %v11880_v41 = vld [vmem:[%s8869_s17 + $0x252] sm:$0xff]  ;;  %4572 = vmatprep.subr.mxu0 %v8123_v57 }
 0x366   : > { %15517 = vst [vmem:[#allocation81_spill] sm:$0xff] %v11856_v15  ;;  %3138 = vmatprep.mubr.f32.mxu1 %v793_v43  ;;  %3806 = vrot.lane.b32.xlu1 %v11867_v7, %s15495_s12  ;;  %v11875_v43 = vld [vmem:[%s8869_s17 + $0x22a] sm:$0xff]  ;;  %v2541_v25 = vmax.f32 %v2404_v38, 0.0  ;;  %v2408_v24 = vadd.f32 %v2407_v14, %v11587_v6  ;;  %v797_v15 = vmax.f32 %v732_v31, 0.0  ;;  %v796_v5 = vmax.f32 %v730_v0, 0.0  ;;  %v8119_v14 = vld [vmem:[%s14956_s3 + $0x58] sm:$0xff] }
 0x367   : > { %3804 = vrot.lane.b32.xlu0 %v11875_v43, %s15495_s12  ;;  %2780 = vmatmul.mubr.f32.gmra.mxu0 %v2538_v58  ;;  %v2409_v30 = vpop.f32.mrf.mxu1  ;;  %v8121_v58 = vld [vmem:[%s14956_s3 + $0x68] sm:$0xff] }
 0x368   : > { %v11882_v36 = vpop.permute.xlu1 %3618  ;;  %4573 = vmatpush1.msra.mxu0 %v8122_v1  ;;  %v2410_v38 = vadd.f32 %v2409_v30, %v11596_v20  ;;  %2785 = vmatprep.mubr.f32.mxu0 %v2541_v25  ;;  %v2542_v31 = vmax.f32 %v2408_v24, 0.0  ;;  %v11917_v0 = vld [vmem:[%s8869_s17 + $0x26a] sm:$0xff] }
 0x369   : > { %15518 = vst [vmem:[#allocation166_spill] sm:$0xff] %v11882_v36  ;;  %v11884_v48 = vpop.permute.xlu0 %3616  ;;  %3139 = vmatmul.mubr.f32.gmra.mxu1 %v792_v63  ;;  %4574 = vmatprep.subr.mxu0 %v8121_v58 }
 0x36a   : > { %15519 = vst [vmem:[#allocation113_spill] sm:$0xff] %v11884_v48  ;;  %3144 = vmatprep.mubr.f32.mxu1 %v795_v28  ;;  %3810 = vrot.lane.b32.xlu1 %v11880_v41, %s15495_s12  ;;  %v2413_v28 = vpop.f32.mrf.mxu1  ;;  %v2543_v16 = vmax.f32 %v2410_v38, 0.0 }
 0x36b   : > { %3808 = vrot.lane.b32.xlu0 %v11898_v42, %s15495_s12  ;;  %2786 = vmatmul.mubr.f32.gmra.mxu0 %v2540_v51  ;;  %v2414_v57 = vadd.f32 %v2413_v28, %v11587_v6  ;;  %v8443_v51 = vld [vmem:[%s8869_s17 + $0x142] sm:$0xff] }
 0x36c   : > { %v11902_v63 = vpop.permute.xlu1 %3662  ;;  %v2415_v1 = vpop.f32.mrf.mxu1  ;;  %4575 = vmatpush1.msra.mxu0 %v8120_v54  ;;  %2791 = vmatprep.mubr.f32.mxu0 %v2543_v16 }
 0x36d   : > { %v11904_v30 = vpop.permute.xlu0 %3660  ;;  %3145 = vmatmul.mubr.f32.gmra.mxu1 %v794_v44  ;;  %v2416_v25 = vadd.f32 %v2415_v1, %v11596_v20  ;;  %v8118_v44 = vld [vmem:[%s14956_s3 + $0x50] sm:$0xff]  ;;  %4576 = vmatprep.subr.mxu0 %v8119_v14  ;;  %v2544_v54 = vmax.f32 %v2414_v57, 0.0 }
 0x36e   : > { %3150 = vmatprep.mubr.f32.mxu1 %v797_v15  ;;  %3864 = vrot.lane.b32.xlu1 %v8443_v51, %s15520_s21  ;;  %v2419_v15 = vpop.f32.mrf.mxu1 }
 0x36f   : > { %3812 = vrot.lane.b32.xlu0 %v11917_v0, %s15495_s12  ;;  %2792 = vmatmul.mubr.f32.gmra.mxu0 %v2542_v31  ;;  %v2545_v24 = vmax.f32 %v2416_v25, 0.0  ;;  %v2420_v28 = vadd.f32 %v2419_v15, %v11587_v6 }
 0x370   : > { %v11921_v58 = vpop.permute.xlu1 %3666  ;;  %v2421_v16 = vpop.f32.mrf.mxu1  ;;  %4577 = vmatpush1.msra.mxu0 %v8118_v44 }
 0x371   : > { %v11923_v38 = vpop.permute.xlu0 %3664  ;;  %3151 = vmatmul.mubr.f32.gmra.mxu1 %v796_v5  ;;  %v2422_v1 = vadd.f32 %v2421_v16, %v11596_v20  ;;  %2797 = vmatprep.mubr.f32.mxu0 %v2545_v24  ;;  %v2546_v57 = vmax.f32 %v2420_v28, 0.0 }
 0x372   : > { %4068 = vrot.lane.b32.xlu1 %v11714_v59, %s8742_s18  ;;  %v2425_v31 = vpop.f32.mrf.mxu1 }
 0x373   : > { %3968 = vrot.lane.b32.xlu0 %v11444_v22, %s15008_s22  ;;  %2798 = vmatmul.mubr.f32.gmra.mxu0 %v2544_v54  ;;  %v2547_v25 = vmax.f32 %v2422_v1, 0.0  ;;  %v2426_v14 = vadd.f32 %v2425_v31, %v11587_v6 }
 0x374   : > { %v11931_v51 = vpop.permute.xlu1 %3670  ;;  %v2427_v44 = vpop.f32.mrf.mxu1 }
 0x375   : > { %v11933_v5 = vpop.permute.xlu0 %3668  ;;  %v2428_v15 = vadd.f32 %v2427_v44, %v11596_v20  ;;  %2803 = vmatprep.mubr.f32.mxu0 %v2547_v25  ;;  %v2548_v28 = vmax.f32 %v2426_v14, 0.0  ;;  %v8445_v25 = vld [vmem:[%s8869_s17 + $0x162] sm:$0xff] }
 0x376   : > { %3970 = vrot.lane.b32.xlu1 %v11439_v40, %s15008_s22  ;;  %v2431_v22 = vpop.f32.mrf.mxu1 }
 0x377   : > { %3866 = vrot.lane.b32.xlu0 %v11714_v59, %s15520_s21  ;;  %2804 = vmatmul.mubr.f32.gmra.mxu0 %v2546_v57  ;;  %v2549_v24 = vmax.f32 %v2428_v15, 0.0  ;;  %v2432_v1 = vadd.f32 %v2431_v22, %v11587_v6 }
 0x378   : > { %v11941_v54 = vpop.permute.xlu1 %3674  ;;  %v2433_v31 = vpop.f32.mrf.mxu1 }
 0x379   : > { %v11943_v16 = vpop.permute.xlu0 %3672  ;;  %v2434_v44 = vadd.f32 %v2433_v31, %v11596_v20  ;;  %2809 = vmatprep.mubr.f32.mxu0 %v2549_v24  ;;  %v2550_v14 = vmax.f32 %v2432_v1, 0.0 }
 0x37a   : > { %3868 = vrot.lane.b32.xlu1 %v8445_v25, %s15520_s21  ;;  %v2437_v40 = vpop.f32.mrf.mxu1 }
 0x37b   : > { %4070 = vrot.lane.b32.xlu0 %v11707_v33, %s8742_s18  ;;  %2810 = vmatmul.mubr.f32.gmra.mxu0 %v2548_v28  ;;  %v2551_v59 = vmax.f32 %v2434_v44, 0.0  ;;  %v2438_v22 = vadd.f32 %v2437_v40, %v11587_v6 }
 0x37c   : > { %v11951_v57 = vpop.permute.xlu1 %3678  ;;  %v2439_v36 = vpop.f32.mrf.mxu1 }
 0x37d   : > { %v11953_v15 = vpop.permute.xlu0 %3676  ;;  %v2440_v31 = vadd.f32 %v2439_v36, %v11596_v20  ;;  %2815 = vmatprep.mubr.f32.mxu0 %v2551_v59  ;;  %v2552_v1 = vmax.f32 %v2438_v22, 0.0 }
 0x37e   : > { %4072 = vrot.lane.b32.xlu1 %v11736_v19, %s8742_s18  ;;  %v2443_v33 = vpop.f32.mrf.mxu1 }
 0x37f   : > { %3972 = vrot.lane.b32.xlu0 %v11464_v12, %s15008_s22  ;;  %2816 = vmatmul.mubr.f32.gmra.mxu0 %v2550_v14  ;;  %v2553_v24 = vmax.f32 %v2440_v31, 0.0  ;;  %v2444_v25 = vadd.f32 %v2443_v33, %v11587_v6 }
 0x380   : > { %v11961_v28 = vpop.permute.xlu1 %3682  ;;  %v2445_v40 = vpop.f32.mrf.mxu1 }
 0x381   : > { %v11963_v44 = vpop.permute.xlu0 %3680  ;;  %v2446_v36 = vadd.f32 %v2445_v40, %v11596_v20  ;;  %2821 = vmatprep.mubr.f32.mxu0 %v2553_v24  ;;  %v2554_v22 = vmax.f32 %v2444_v25, 0.0  ;;  %v8446_v24 = vld [vmem:[%s8869_s17 + $0x182] sm:$0xff] }
 0x382   : > { %3974 = vrot.lane.b32.xlu1 %v11459_v13, %s15008_s22  ;;  %v2449_v12 = vpop.f32.mrf.mxu1 }
 0x383   : > { %3870 = vrot.lane.b32.xlu0 %v11736_v19, %s15520_s21  ;;  %2822 = vmatmul.mubr.f32.gmra.mxu0 %v2552_v1  ;;  %v2555_v59 = vmax.f32 %v2446_v36, 0.0  ;;  %v2450_v33 = vadd.f32 %v2449_v12, %v11587_v6 }
 0x384   : > { %v11971_v14 = vpop.permute.xlu1 %3686  ;;  %v2451_v48 = vpop.f32.mrf.mxu1 }
 0x385   : > { %15521 = vst [vmem:[#allocation180_spill] sm:$0xff] %v11971_v14  ;;  %v11973_v31 = vpop.permute.xlu0 %3684  ;;  %v2452_v40 = vadd.f32 %v2451_v48, %v11596_v20  ;;  %2827 = vmatprep.mubr.f32.mxu0 %v2555_v59  ;;  %v2556_v25 = vmax.f32 %v2450_v33, 0.0 }
 0x386   : > { %3872 = vrot.lane.b32.xlu1 %v8446_v24, %s15520_s21  ;;  %v2455_v13 = vpop.f32.mrf.mxu1 }
 0x387   : > { %4074 = vrot.lane.b32.xlu0 %v11729_v45, %s8742_s18  ;;  %2828 = vmatmul.mubr.f32.gmra.mxu0 %v2554_v22  ;;  %v2557_v19 = vmax.f32 %v2452_v40, 0.0  ;;  %v2456_v12 = vadd.f32 %v2455_v13, %v11587_v6 }
 0x388   : > { %v11981_v1 = vpop.permute.xlu1 %3690  ;;  %v2457_v14 = vpop.f32.mrf.mxu1 }
 0x389   : > { %v11983_v36 = vpop.permute.xlu0 %3688  ;;  %v2458_v48 = vadd.f32 %v2457_v14, %v11596_v20  ;;  %2833 = vmatprep.mubr.f32.mxu0 %v2557_v19  ;;  %v2558_v33 = vmax.f32 %v2456_v12, 0.0 }
 0x38a   : > { %4076 = vrot.lane.b32.xlu1 %v11756_v21, %s8742_s18  ;;  %v2461_v45 = vpop.f32.mrf.mxu1 }
 0x38b   : > { %3976 = vrot.lane.b32.xlu0 %v11484_v27, %s15008_s22  ;;  %2834 = vmatmul.mubr.f32.gmra.mxu0 %v2556_v25  ;;  %v2559_v59 = vmax.f32 %v2458_v48, 0.0  ;;  %v2462_v24 = vadd.f32 %v2461_v45, %v11587_v6 }
 0x38c   : > { %v11991_v22 = vpop.permute.xlu1 %3694  ;;  %v2463_v13 = vpop.f32.mrf.mxu1 }
 0x38d   : > { %15522 = vst [vmem:[#allocation37_spill] sm:$0xff] %v11991_v22  ;;  %v11993_v40 = vpop.permute.xlu0 %3692  ;;  %v2464_v14 = vadd.f32 %v2463_v13, %v11596_v20  ;;  %2839 = vmatprep.mubr.f32.mxu0 %v2559_v59  ;;  %v2560_v12 = vmax.f32 %v2462_v24, 0.0  ;;  %v8447_v59 = vld [vmem:[%s8869_s17 + $0x1a2] sm:$0xff] }
 0x38e   : > { %3978 = vrot.lane.b32.xlu1 %v11479_v62, %s15008_s22  ;;  %v2467_v27 = vpop.f32.mrf.mxu1 }
 0x38f   : > { %3874 = vrot.lane.b32.xlu0 %v11756_v21, %s15520_s21  ;;  %2840 = vmatmul.mubr.f32.gmra.mxu0 %v2558_v33  ;;  %v2561_v19 = vmax.f32 %v2464_v14, 0.0  ;;  %v2468_v45 = vadd.f32 %v2467_v27, %v11587_v6 }
 0x390   : > { %v12001_v25 = vpop.permute.xlu1 %3698  ;;  %v2469_v22 = vpop.f32.mrf.mxu1 }
 0x391   : > { %15523 = vst [vmem:[#allocation36_spill] sm:$0xff] %v12001_v25  ;;  %v12003_v48 = vpop.permute.xlu0 %3696  ;;  %v2470_v13 = vadd.f32 %v2469_v22, %v11596_v20  ;;  %2845 = vmatprep.mubr.f32.mxu0 %v2561_v19  ;;  %v2562_v24 = vmax.f32 %v2468_v45, 0.0 }
 0x392   : > { %3876 = vrot.lane.b32.xlu1 %v8447_v59, %s15520_s21  ;;  %v2473_v62 = vpop.f32.mrf.mxu1 }
 0x393   : > { %4078 = vrot.lane.b32.xlu0 %v11751_v23, %s8742_s18  ;;  %2846 = vmatmul.mubr.f32.gmra.mxu0 %v2560_v12  ;;  %v2563_v21 = vmax.f32 %v2470_v13, 0.0  ;;  %v2474_v27 = vadd.f32 %v2473_v62, %v11587_v6 }
 0x394   : > { %v12011_v33 = vpop.permute.xlu1 %3702  ;;  %v2475_v25 = vpop.f32.mrf.mxu1 }
 0x395   : > { %15524 = vst [vmem:[#allocation145_spill] sm:$0xff] %v12011_v33  ;;  %v12013_v14 = vpop.permute.xlu0 %3700  ;;  %v2476_v22 = vadd.f32 %v2475_v25, %v11596_v20  ;;  %2851 = vmatprep.mubr.f32.mxu0 %v2563_v21  ;;  %v2564_v45 = vmax.f32 %v2474_v27, 0.0  ;;  %v8448_v21 = vld [vmem:[%s8869_s17 + $0x1ae] sm:$0xff] }
 0x396   : > { %15525 = vst [vmem:[#allocation84_spill] sm:$0xff] %v12013_v14  ;;  %4080 = vrot.lane.b32.xlu1 %v11778_v34, %s8742_s18  ;;  %v2479_v23 = vpop.f32.mrf.mxu1  ;;  %v8464_v14 = vld [vmem:[%s8869_s17 + $0x262] sm:$0xff] }
 0x397   : > { %3980 = vrot.lane.b32.xlu0 %v11501_v10, %s15008_s22  ;;  %2852 = vmatmul.mubr.f32.gmra.mxu0 %v2562_v24  ;;  %v2565_v19 = vmax.f32 %v2476_v22, 0.0  ;;  %v2480_v59 = vadd.f32 %v2479_v23, %v11587_v6 }
 0x398   : > { %v12021_v12 = vpop.permute.xlu1 %3706  ;;  %v2481_v62 = vpop.f32.mrf.mxu1 }
 0x399   : > { %15526 = vst [vmem:[#allocation165_spill] sm:$0xff] %v12021_v12  ;;  %v12023_v13 = vpop.permute.xlu0 %3704  ;;  %v2482_v25 = vadd.f32 %v2481_v62, %v11596_v20  ;;  %2857 = vmatprep.mubr.f32.mxu0 %v2565_v19  ;;  %v2566_v27 = vmax.f32 %v2480_v59, 0.0  ;;  %v8449_v19 = vld [vmem:[%s8869_s17 + $0x1c2] sm:$0xff] }
 0x39a   : > { %15527 = vst [vmem:[#allocation116_spill] sm:$0xff] %v12023_v13  ;;  %3982 = vrot.lane.b32.xlu1 %v8448_v21, %s15008_s22  ;;  %v2485_v10 = vpop.f32.mrf.mxu1 }
 0x39b   : > { %3878 = vrot.lane.b32.xlu0 %v11778_v34, %s15520_s21  ;;  %2858 = vmatmul.mubr.f32.gmra.mxu0 %v2564_v45  ;;  %v2567_v24 = vmax.f32 %v2482_v25, 0.0  ;;  %v2486_v23 = vadd.f32 %v2485_v10, %v11587_v6 }
 0x39c   : > { %v12031_v22 = vpop.permute.xlu1 %3710  ;;  %v2487_v13 = vpop.f32.mrf.mxu1 }
 0x39d   : > { %15528 = vst [vmem:[#allocation136_spill] sm:$0xff] %v12031_v22  ;;  %v12033_v12 = vpop.permute.xlu0 %3708  ;;  %v2488_v62 = vadd.f32 %v2487_v13, %v11596_v20  ;;  %2863 = vmatprep.mubr.f32.mxu0 %v2567_v24  ;;  %v2568_v59 = vmax.f32 %v2486_v23, 0.0  ;;  %v8450_v24 = vld [vmem:[%s8869_s17 + $0x1c6] sm:$0xff] }
 0x39e   : > { %15529 = vst [vmem:[#allocation42_spill] sm:$0xff] %v12033_v12  ;;  %3880 = vrot.lane.b32.xlu1 %v8449_v19, %s15520_s21  ;;  %v2491_v34 = vpop.f32.mrf.mxu1 }
 0x39f   : > { %4082 = vrot.lane.b32.xlu0 %v11771_v11, %s8742_s18  ;;  %2864 = vmatmul.mubr.f32.gmra.mxu0 %v2566_v27  ;;  %v2569_v45 = vmax.f32 %v2488_v62, 0.0  ;;  %v2492_v10 = vadd.f32 %v2491_v34, %v11587_v6 }
 0x3a0   : > { %v12041_v25 = vpop.permute.xlu1 %3714  ;;  %v2493_v22 = vpop.f32.mrf.mxu1 }
 0x3a1   : > { %15530 = vst [vmem:[#allocation35_spill] sm:$0xff] %v12041_v25  ;;  %v12043_v21 = vpop.permute.xlu0 %3712  ;;  %v2494_v13 = vadd.f32 %v2493_v22, %v11596_v20  ;;  %2869 = vmatprep.mubr.f32.mxu0 %v2569_v45  ;;  %v2570_v23 = vmax.f32 %v2492_v10, 0.0  ;;  %v8451_v45 = vld [vmem:[%s8869_s17 + $0x1ce] sm:$0xff] }
 0x3a2   : > { %15531 = vst [vmem:[#allocation148_spill] sm:$0xff] %v12043_v21  ;;  %4084 = vrot.lane.b32.xlu1 %v11798_v55, %s8742_s18 }
 0x3a3   : > { %3984 = vrot.lane.b32.xlu0 %v8450_v24, %s15008_s22  ;;  %v2497_v11 = vpop.f32.mrf.mxu1  ;;  %2870 = vmatmul.mubr.f32.gmra.mxu0 %v2568_v59  ;;  %v2571_v27 = vmax.f32 %v2494_v13, 0.0 }
 0x3a4   : > { %v12051_v62 = vpop.permute.xlu1 %3718  ;;  %v2498_v34 = vadd.f32 %v2497_v11, %v11587_v6 }
 0x3a5   : > { %15532 = vst [vmem:[#allocation83_spill] sm:$0xff] %v12051_v62  ;;  %v12053_v19 = vpop.permute.xlu0 %3716  ;;  %v2499_v25 = vpop.f32.mrf.mxu1  ;;  %2875 = vmatprep.mubr.f32.mxu0 %v2571_v27  ;;  %v8452_v27 = vld [vmem:[%s8869_s17 + $0x1e2] sm:$0xff] }
 0x3a6   : > { %15533 = vst [vmem:[#allocation168_spill] sm:$0xff] %v12053_v19  ;;  %v2500_v22 = vadd.f32 %v2499_v25, %v11596_v20  ;;  %3986 = vrot.lane.b32.xlu1 %v8451_v45, %s15008_s22  ;;  %v2572_v62 = vmax.f32 %v2498_v34, 0.0 }
 0x3a7   : > { %3882 = vrot.lane.b32.xlu0 %v11798_v55, %s15520_s21  ;;  %2876 = vmatmul.mubr.f32.gmra.mxu0 %v2570_v23 }
 0x3a8   : > { %v2503_v59 = vpop.f32.mrf.mxu1  ;;  %v2573_v13 = vmax.f32 %v2500_v22, 0.0  ;;  %v12061_v24 = vpop.permute.xlu1 %3722 }
 0x3a9   : > { %15534 = vst [vmem:[#allocation115_spill] sm:$0xff] %v12061_v24  ;;  %v2504_v10 = vadd.f32 %v2503_v59, %v11587_v6  ;;  %v12064_v11 = vpop.permute.xlu0 %3720 }
 0x3aa   : > { %15535 = vst [vmem:[#allocation41_spill] sm:$0xff] %v12064_v11  ;;  %v2505_v19 = vpop.f32.mrf.mxu1  ;;  %2881 = vmatprep.mubr.f32.mxu0 %v2573_v13  ;;  %3884 = vrot.lane.b32.xlu1 %v8452_v27, %s15520_s21  ;;  %v8454_v27 = vld [vmem:[%s8869_s17 + $0x1ee] sm:$0xff]  ;;  %v8461_v11 = vld [vmem:[%s8869_s17 + $0x242] sm:$0xff] }
 0x3ab   : > { %v2506_v25 = vadd.f32 %v2505_v19, %v11596_v20  ;;  %4086 = vrot.lane.b32.xlu0 %v11793_v37, %s8742_s18  ;;  %2882 = vmatmul.mubr.f32.gmra.mxu0 %v2572_v62  ;;  %v2574_v34 = vmax.f32 %v2504_v10, 0.0  ;;  %v8453_v37 = vld [vmem:[%s8869_s17 + $0x1e6] sm:$0xff] }
 0x3ac   : > { %v12071_v22 = vpop.permute.xlu1 %3762 }
 0x3ad   : > { %v2509_v55 = vpop.f32.mrf.mxu1  ;;  %v2575_v23 = vmax.f32 %v2506_v25, 0.0  ;;  %v12074_v59 = vpop.permute.xlu0 %3760 }
 0x3ae   : > { %v2510_v45 = vadd.f32 %v2509_v55, %v11587_v6  ;;  %4088 = vrot.lane.b32.xlu1 %v11823_v4, %s8742_s18 }
 0x3af   : > { %v2511_v19 = vpop.f32.mrf.mxu1  ;;  %2887 = vmatprep.mubr.f32.mxu0 %v2575_v23  ;;  %3988 = vrot.lane.b32.xlu0 %v8453_v37, %s15008_s22  ;;  %v8455_v23 = vld [vmem:[%s8869_s17 + $0x202] sm:$0xff]  ;;  %v8457_v37 = vld [vmem:[%s8869_s17 + $0x20e] sm:$0xff] }
 0x3b0   : > { %v2512_v13 = vadd.f32 %v2511_v19, %v11596_v20  ;;  %2888 = vmatmul.mubr.f32.gmra.mxu0 %v2574_v34  ;;  %v12081_v25 = vpop.permute.xlu1 %3766  ;;  %v2576_v10 = vmax.f32 %v2510_v45, 0.0 }
 0x3b1   : > { %v12083_v6 = vpop.permute.xlu0 %3764 }
 0x3b2   : > { %v2577_v62 = vmax.f32 %v2512_v13, 0.0  ;;  %3990 = vrot.lane.b32.xlu1 %v8454_v27, %s15008_s22 }
 0x3b3   : > { %3886 = vrot.lane.b32.xlu0 %v11823_v4, %s15520_s21  ;;  %v8456_v4 = vld [vmem:[%s8869_s17 + $0x206] sm:$0xff] }
 0x3b4   : > { %2893 = vmatprep.mubr.f32.mxu0 %v2577_v62  ;;  %v12089_v20 = vpop.permute.xlu1 %3770 }
 0x3b5   : > { %2894 = vmatmul.mubr.f32.gmra.mxu0 %v2576_v10  ;;  %v12092_v55 = vpop.permute.xlu0 %3768  ;;  %v8458_v10 = vld [vmem:[%s8869_s17 + $0x222] sm:$0xff] }
 0x3b6   : > { %4610 = vmatprep.mubr.f32.mxu0 %v15217_v61  ;;  %3888 = vrot.lane.b32.xlu1 %v8455_v23, %s15520_s21 }
 0x3b7   : > { %4090 = vrot.lane.b32.xlu0 %v11815_v50, %s8742_s18 }
 0x3b8   : > { %v12098_v34 = vpop.permute.xlu1 %3774 }
 0x3b9   : > { %v12100_v45 = vpop.permute.xlu0 %3772 }
 0x3ba   : > { %4092 = vrot.lane.b32.xlu1 %v11850_v56, %s8742_s18 }
 0x3bb   : > { %3992 = vrot.lane.b32.xlu0 %v8456_v4, %s15008_s22 }
 0x3bc   : > { %v12106_v19 = vpop.permute.xlu1 %3778 }
 0x3bd   : > { %v12108_v13 = vpop.permute.xlu0 %3776 }
 0x3be   : > { %3994 = vrot.lane.b32.xlu1 %v8457_v37, %s15008_s22 }
 0x3bf   : > { %3890 = vrot.lane.b32.xlu0 %v11850_v56, %s15520_s21  ;;  %v8459_v56 = vld [vmem:[%s8869_s17 + $0x226] sm:$0xff] }
 0x3c0   : > { %v12114_v50 = vpop.permute.xlu1 %3782 }
 0x3c1   : > { %v12116_v62 = vpop.permute.xlu0 %3780 }
 0x3c2   : > { %3892 = vrot.lane.b32.xlu1 %v8458_v10, %s15520_s21  ;;  %v8460_v10 = vld [vmem:[%s8869_s17 + $0x22e] sm:$0xff] }
 0x3c3   : > { %4094 = vrot.lane.b32.xlu0 %v11842_v52, %s8742_s18 }
 0x3c4   : > { %v12122_v27 = vpop.permute.xlu1 %3786 }
 0x3c5   : > { %v12124_v23 = vpop.permute.xlu0 %3784 }
 0x3c6   : > { %4096 = vrot.lane.b32.xlu1 %v11875_v43, %s8742_s18 }
 0x3c7   : > { %3996 = vrot.lane.b32.xlu0 %v8459_v56, %s15008_s22 }
 0x3c8   : > { %v12130_v4 = vpop.permute.xlu1 %3790 }
 0x3c9   : > { %v12132_v37 = vpop.permute.xlu0 %3788 }
 0x3ca   : > { %3998 = vrot.lane.b32.xlu1 %v8460_v10, %s15008_s22 }
 0x3cb   : > { %3894 = vrot.lane.b32.xlu0 %v11875_v43, %s15520_s21  ;;  %v8462_v43 = vld [vmem:[%s8869_s17 + $0x246] sm:$0xff] }
 0x3cc   : > { %v12138_v52 = vpop.permute.xlu1 %3794 }
 0x3cd   : > { %v12140_v24 = vpop.permute.xlu0 %3792 }
 0x3ce   : > { %3896 = vrot.lane.b32.xlu1 %v8461_v11, %s15520_s21  ;;  %v8463_v11 = vld [vmem:[%s8869_s17 + $0x24e] sm:$0xff] }
 0x3cf   : > { %4098 = vrot.lane.b32.xlu0 %v11867_v7, %s8742_s18 }
 0x3d0   : > { %v12146_v56 = vpop.permute.xlu1 %3798 }
 0x3d1   : > { %v12148_v21 = vpop.permute.xlu0 %3796 }
 0x3d2   : > { %4100 = vrot.lane.b32.xlu1 %v11898_v42, %s8742_s18 }
 0x3d3   : > { %4000 = vrot.lane.b32.xlu0 %v8462_v43, %s15008_s22 }
 0x3d4   : > { %v12154_v10 = vpop.permute.xlu1 %3802 }
 0x3d5   : > { %15536 = vst [vmem:[#allocation40_spill] sm:$0xff] %v12154_v10  ;;  %v12156_v12 = vpop.permute.xlu0 %3800  ;;  %v7998_v10 = vld [vmem:[%s8869_s17 + $0x42] sm:$0xff] }
 0x3d6   : > { %15537 = vst [vmem:[#allocation147_spill] sm:$0xff] %v12156_v12  ;;  %4002 = vrot.lane.b32.xlu1 %v8463_v11, %s15008_s22  ;;  %v4164_v11 = vsel %vm375_vm1, %v7998_v10, %v10832_v2 }
 0x3d7   : > { %3898 = vrot.lane.b32.xlu0 %v11898_v42, %s15520_s21  ;;  %v8465_v42 = vld [vmem:[%s8869_s17 + $0x266] sm:$0xff] }
 0x3d8   : > { %v12162_v7 = vpop.permute.xlu1 %3806 }
 0x3d9   : > { %15538 = vst [vmem:[#allocation86_spill] sm:$0xff] %v12162_v7  ;;  %v12164_v33 = vpop.permute.xlu0 %3804  ;;  %v8466_v7 = vld [vmem:[%s8869_s17 + $0x26e] sm:$0xff] }
 0x3da   : > { %15539 = vst [vmem:[#allocation167_spill] sm:$0xff] %v12164_v33  ;;  %3900 = vrot.lane.b32.xlu1 %v8464_v14, %s15520_s21 }
 0x3db   : > { %4102 = vrot.lane.b32.xlu0 %v11880_v41, %s8742_s18  ;;  %v4196_v41 = vsel %vm1901_vm2, %v4164_v11, %v11328_v29  ;;  %v12196_v29 = vld [vmem:[%s8869_s17 + $0x272] sm:$0xff] }
 0x3dc   : > { %v12170_v43 = vpop.permute.xlu1 %3810 }
 0x3dd   : > { %15540 = vst [vmem:[#allocation118_spill] sm:$0xff] %v12170_v43  ;;  %v12173_v12 = vpop.permute.xlu0 %3808 }
 0x3de   : > { %15541 = vst [vmem:[#allocation46_spill] sm:$0xff] %v12173_v12  ;;  %4104 = vrot.lane.b32.xlu1 %v11917_v0, %s8742_s18  ;;  %v4228_v12 = vsel %vm1934_vm3, %v4196_v41, %v11582_v17 }
 0x3df   : > { %4004 = vrot.lane.b32.xlu0 %v8465_v42, %s15008_s22  ;;  %v4260_v33 = vsel %vm1967_vm4, %v4228_v12, %v11904_v30  ;;  %v8467_v42 = vld [vmem:[%s8869_s17 + $0x4a] sm:$0xff]  ;;  %v8468_v12 = vld [vmem:[%s8869_s17 + $0x282] sm:$0xff] }
 0x3e0   : > { %v3865_v14 = vpop.permute.xlu1 %3864  ;;  %v4292_v2 = vsel %vm2000_vm5, %v4260_v33, %v12074_v59  ;;  %v4165_v17 = vsel %vm375_vm1, %v8467_v42, %v10830_v53  ;;  %v8470_v42 = vld [vmem:[%s8869_s17 + $0x286] sm:$0xff] }
 0x3e1   : > { %v12183_v43 = vpop.permute.xlu0 %3812  ;;  %v4324_v11 = vsel %vm2033_vm6, %v4292_v2, %v3865_v14  ;;  %v4197_v30 = vsel %vm1901_vm2, %v4165_v17, %v11326_v46  ;;  %v8000_v14 = vld [vmem:[%s8869_s17 + $0x62] sm:$0xff] }
 0x3e2   : > { %4006 = vrot.lane.b32.xlu1 %v8466_v7, %s15008_s22  ;;  %v4229_v33 = vsel %vm1934_vm3, %v4197_v30, %v11580_v47 }
 0x3e3   : > { %3902 = vrot.lane.b32.xlu0 %v11917_v0, %s15520_s21  ;;  %v4261_v53 = vsel %vm1967_vm4, %v4229_v33, %v11902_v63  ;;  %v4166_v63 = vsel %vm375_vm1, %v8000_v14, %v10862_v3  ;;  %v4899_v3 = vld [vmem:[#allocation2 + $0x4f8] sm:$0xff] }
 0x3e4   : > { %v4069_v10 = vpop.permute.xlu1 %4068  ;;  %v4293_v41 = vsel %vm2000_vm5, %v4261_v53, %v12071_v22  ;;  %v4198_v22 = vsel %vm1901_vm2, %v4166_v63, %v11344_v39  ;;  %4932 = vmatprep.subr.mxu1 %v4899_v3  ;;  %v4898_v53 = vld [vmem:[#allocation2 + $0x4f0] sm:$0xff]  ;;  %v4896_v63 = vld [vmem:[#allocation2 + $0x4e0] sm:$0xff] }
 0x3e5   : > { %v3969_v7 = vpop.permute.xlu0 %3968  ;;  %v4230_v30 = vsel %vm1934_vm3, %v4198_v22, %v11602_v49  ;;  %v12245_v49 = vld [vmem:[%s8869_s17 + $0x292] sm:$0xff]  ;;  %4933 = vmatpush1.msra.mxu1 %v4898_v53  ;;  %v12271_v3 = vld [vmem:[%s8869_s17 + $0x2aa] sm:$0xff] }
 0x3e6   : > { %v4356_v0 = vsel %vm2066_vm7, %v4324_v11, %v3969_v7  ;;  %3904 = vrot.lane.b32.xlu1 %v8468_v12, %s15520_s21  ;;  %v8471_v12 = vld [vmem:[%s8869_s17 + $0x28e] sm:$0xff]  ;;  %v4262_v33 = vsel %vm1967_vm4, %v4230_v30, %v11923_v38  ;;  %v8002_v30 = vld [vmem:[%s8869_s17 + $0x82] sm:$0xff] }
 0x3e7   : > { %v4388_v59 = vsel %vm2099_vm8, %v4356_v0, %v4069_v10  ;;  %4106 = vrot.lane.b32.xlu0 %v12196_v29, %s8742_s18  ;;  %v12221_v10 = vld [vmem:[%s8869_s17 + $0x28a] sm:$0xff]  ;;  %v4294_v39 = vsel %vm2000_vm5, %v4262_v33, %v12083_v6  ;;  %v4168_v53 = vsel %vm375_vm1, %v8002_v30, %v10896_v9 }
 0x3e8   : > { %8131 = vmatmul.mubr.msk.f32.vlgmr.msra.gmra.mxu0 %vm2154_vm9, %v4388_v59  ;;  %v3971_v46 = vpop.permute.xlu1 %3970  ;;  %v4886_v30 = vld [vmem:[#allocation2 + $0x490] sm:$0xff] }
 0x3e9   : > { %v3867_v2 = vpop.permute.xlu0 %3866  ;;  %4616 = vmatprep.mubr.f32.mxu0 %v15217_v61 }
 0x3ea   : > { %v4325_v47 = vsel %vm2033_vm6, %v4293_v41, %v3867_v2  ;;  %4108 = vrot.lane.b32.xlu1 %v12221_v10, %s8742_s18  ;;  %v4897_v2 = vld [vmem:[#allocation2 + $0x4e8] sm:$0xff] }
 0x3eb   : > { %4008 = vrot.lane.b32.xlu0 %v8470_v42, %s15008_s22  ;;  %v4357_v11 = vsel %vm2066_vm7, %v4325_v47, %v3971_v46  ;;  %v8472_v46 = vld [vmem:[%s8869_s17 + $0x6a] sm:$0xff]  ;;  %v8473_v42 = vld [vmem:[%s8869_s17 + $0x2a2] sm:$0xff]  ;;  %4934 = vmatprep.subr.mxu1 %v4897_v2 }
 0x3ec   : > { %v3869_v17 = vpop.permute.xlu1 %3868  ;;  %v4167_v38 = vsel %vm375_vm1, %v8472_v46, %v10860_v35  ;;  %4935 = vmatpush1.msra.mxu1 %v4896_v63  ;;  %v8476_v63 = vld [vmem:[%s8869_s17 + $0x2ae] sm:$0xff] }
 0x3ed   : > { %v4071_v7 = vpop.permute.xlu0 %4070  ;;  %v4326_v14 = vsel %vm2033_vm6, %v4294_v39, %v3869_v17  ;;  %v4199_v47 = vsel %vm1901_vm2, %v4167_v38, %v11342_v26  ;;  %v4895_v17 = vld [vmem:[#allocation2 + $0x4d8] sm:$0xff]  ;;  %v8475_v39 = vld [vmem:[%s8869_s17 + $0x2a6] sm:$0xff]  ;;  %v4890_v38 = vld [vmem:[#allocation2 + $0x4b0] sm:$0xff] }
 0x3ee   : > { %v4389_v0 = vsel %vm2099_vm8, %v4357_v11, %v4071_v7  ;;  %4010 = vrot.lane.b32.xlu1 %v8471_v12, %s15008_s22  ;;  %v4231_v22 = vsel %vm1934_vm3, %v4199_v47, %v11600_v8  ;;  %4936 = vmatprep.subr.mxu1 %v4895_v17  ;;  %v4894_v7 = vld [vmem:[#allocation2 + $0x4d0] sm:$0xff]  ;;  %v4893_v12 = vld [vmem:[#allocation2 + $0x4c8] sm:$0xff] }
 0x3ef   : > { %3906 = vrot.lane.b32.xlu0 %v12221_v10, %s15520_s21  ;;  %8132 = vmatmul.mubr.msk.f32.gmra.mxu0 %vm2154_vm9, %v4389_v0  ;;  %v4263_v26 = vsel %vm1967_vm4, %v4231_v22, %v11921_v58  ;;  %v4892_v58 = vld [vmem:[#allocation2 + $0x4c0] sm:$0xff] }
 0x3f0   : > { %v4073_v59 = vpop.permute.xlu1 %4072  ;;  %4622 = vmatprep.mubr.f32.mxu0 %v15217_v61  ;;  %v4295_v8 = vsel %vm2000_vm5, %v4263_v26, %v12081_v25  ;;  %4937 = vmatpush1.msra.mxu1 %v4894_v7  ;;  %v4891_v25 = vld [vmem:[#allocation2 + $0x4b8] sm:$0xff]  ;;  %v8038_v17 = vld [vmem:[%s8869_s17 + $0x2c2] sm:$0xff] }
 0x3f1   : > { %v3973_v41 = vpop.permute.xlu0 %3972  ;;  %4938 = vmatprep.subr.mxu1 %v4893_v12  ;;  %v12302_v7 = vld [vmem:[%s8869_s17 + $0x2b2] sm:$0xff] }
 0x3f2   : > { %v4358_v6 = vsel %vm2066_vm7, %v4326_v14, %v3973_v41  ;;  %3908 = vrot.lane.b32.xlu1 %v8473_v42, %s15520_s21  ;;  %4939 = vmatpush1.msra.mxu1 %v4892_v58  ;;  %v4200_v14 = vsel %vm1901_vm2, %v4168_v53, %v11360_v18  ;;  %v4888_v18 = vld [vmem:[#allocation2 + $0x4a0] sm:$0xff]  ;;  %v4885_v58 = vld [vmem:[#allocation2 + $0x488] sm:$0xff] }
 0x3f3   : > { %v4390_v35 = vsel %vm2099_vm8, %v4358_v6, %v4073_v59  ;;  %4110 = vrot.lane.b32.xlu0 %v12245_v49, %s8742_s18  ;;  %4940 = vmatprep.subr.mxu1 %v4891_v25  ;;  %v4889_v6 = vld [vmem:[#allocation2 + $0x4a8] sm:$0xff]  ;;  %v4232_v42 = vsel %vm1934_vm3, %v4200_v14, %v11618_v60  ;;  %v4887_v60 = vld [vmem:[#allocation2 + $0x498] sm:$0xff]  ;;  %v4884_v53 = vld [vmem:[#allocation2 + $0x480] sm:$0xff] }
 0x3f4   : > { %8133 = vmatmul.mubr.msk.f32.gmra.mxu0 %vm2154_vm9, %v4390_v35  ;;  %v3975_v11 = vpop.permute.xlu1 %3974  ;;  %4941 = vmatpush1.msra.mxu1 %v4890_v38  ;;  %v4264_v22 = vsel %vm1967_vm4, %v4232_v42, %v11933_v5  ;;  %v8477_v5 = vld [vmem:[%s8869_s17 + $0x8a] sm:$0xff] }
 0x3f5   : > { %v3871_v0 = vpop.permute.xlu0 %3870  ;;  %4628 = vmatprep.mubr.f32.mxu0 %v15217_v61  ;;  %v12277_v59 = vpop.f32.mrf.mxu0  ;;  %4942 = vmatprep.subr.mxu1 %v4889_v6  ;;  %v4296_v26 = vsel %vm2000_vm5, %v4264_v22, %v12092_v55  ;;  %v15544_v55 = vld [vmem:[#allocation103_spill] sm:$0xff]  ;;  %v15545_v38 = vld [vmem:[#allocation109_spill] sm:$0xff] }
 0x3f6   : > { %v4327_v33 = vsel %vm2033_vm6, %v4295_v8, %v3871_v0  ;;  %4112 = vrot.lane.b32.xlu1 %v12271_v3, %s8742_s18  ;;  %4943 = vmatpush1.msra.mxu1 %v4888_v18  ;;  %v4169_v8 = vsel %vm375_vm1, %v8477_v5, %v10894_v32  ;;  %v8004_v18 = vld [vmem:[%s8869_s17 + $0xa2] sm:$0xff]  ;;  %v8087_v5 = vld [vmem:[%s8869_s17 + $0x2ce] sm:$0xff] }
 0x3f7   : > { %4012 = vrot.lane.b32.xlu0 %v8475_v39, %s15008_s22  ;;  %v4359_v41 = vsel %vm2066_vm7, %v4327_v33, %v3975_v11  ;;  %v12284_v47 = vpop.f32.mrf.mxu0  ;;  %4944 = vmatprep.subr.mxu1 %v4887_v60  ;;  %v4201_v39 = vsel %vm1901_vm2, %v4169_v8, %v15544_v55  ;;  %v15547_v8 = vld [vmem:[#allocation130_spill] sm:$0xff] }
 0x3f8   : > { %v3873_v46 = vpop.permute.xlu1 %3872  ;;  %15542 = vst [vmem:[#allocation39_spill] sm:$0xff] %v12284_v47  ;;  %4945 = vmatpush1.msra.mxu1 %v4886_v30  ;;  %v4233_v32 = vsel %vm1934_vm3, %v4201_v39, %v15545_v38  ;;  %v15548_v55 = vld [vmem:[#allocation18_spill] sm:$0xff] }
 0x3f9   : > { %v4075_v2 = vpop.permute.xlu0 %4074  ;;  %v12295_v35 = vpop.f32.mrf.mxu0  ;;  %v4328_v0 = vsel %vm2033_vm6, %v4296_v26, %v3873_v46  ;;  %4946 = vmatprep.subr.mxu1 %v4885_v58  ;;  %v4265_v6 = vsel %vm1967_vm4, %v4233_v32, %v11931_v51  ;;  %v4881_v26 = vld [vmem:[#allocation2 + $0x468] sm:$0xff]  ;;  %v4878_v58 = vld [vmem:[#allocation2 + $0x450] sm:$0xff] }
 0x3fa   : > { %v4391_v9 = vsel %vm2099_vm8, %v4359_v41, %v4075_v2  ;;  %4014 = vrot.lane.b32.xlu1 %v8476_v63, %s15008_s22  ;;  %v8039_v41 = vld [vmem:[%s8869_s17 + $0x2ca] sm:$0xff]  ;;  %v4883_v2 = vld [vmem:[#allocation2 + $0x478] sm:$0xff]  ;;  %4947 = vmatpush1.msra.mxu1 %v4884_v53  ;;  %v4297_v22 = vsel %vm2000_vm5, %v4265_v6, %v12089_v20 }
 0x3fb   : > { %3910 = vrot.lane.b32.xlu0 %v12271_v3, %s15520_s21  ;;  %8134 = vmatmul.mubr.msk.f32.gmra.mxu0 %vm2154_vm9, %v4391_v9  ;;  %v12309_v33 = vpop.f32.mrf.mxu0  ;;  %v8086_v9 = vld [vmem:[%s8869_s17 + $0x2c6] sm:$0xff]  ;;  %v4882_v63 = vld [vmem:[#allocation2 + $0x470] sm:$0xff]  ;;  %v4879_v20 = vld [vmem:[#allocation2 + $0x458] sm:$0xff] }
 0x3fc   : > { %v4077_v11 = vpop.permute.xlu1 %4076  ;;  %4634 = vmatprep.mubr.f32.mxu0 %v15217_v61  ;;  %15543 = vst [vmem:[#allocation150_spill] sm:$0xff] %v12309_v33  ;;  %4948 = vmatprep.subr.mxu1 %v4883_v2  ;;  %v4877_v32 = vld [vmem:[#allocation2 + $0x448] sm:$0xff]  ;;  %v15708_v33 = vld [vmem:[#allocation166_spill] sm:$0xff] }
 0x3fd   : > { %v3977_v12 = vpop.permute.xlu0 %3976  ;;  %v12320_v14 = vpop.f32.mrf.mxu0  ;;  %4949 = vmatpush1.msra.mxu1 %v4882_v63 }
 0x3fe   : > { %v4360_v25 = vsel %vm2066_vm7, %v4328_v0, %v3977_v12  ;;  %3912 = vrot.lane.b32.xlu1 %v8038_v17, %s15520_s21  ;;  %4950 = vmatprep.subr.mxu1 %v4881_v26  ;;  %v4170_v0 = vsel %vm375_vm1, %v8004_v18, %v15547_v8  ;;  %v8040_v18 = vld [vmem:[%s8869_s17 + $0x2e2] sm:$0xff] }
 0x3ff   : > { %v4392_v46 = vsel %vm2099_vm8, %v4360_v25, %v4077_v11  ;;  %4114 = vrot.lane.b32.xlu0 %v12302_v7, %s8742_s18  ;;  %v12330_v60 = vpop.f32.mrf.mxu0  ;;  %v4880_v11 = vld [vmem:[#allocation2 + $0x460] sm:$0xff]  ;;  %v4202_v39 = vsel %vm1901_vm2, %v4170_v0, %v15548_v55  ;;  %v15553_v55 = vld [vmem:[#allocation139_spill] sm:$0xff] }
 0x400   : > { %8135 = vmatmul.mubr.msk.f32.gmra.mxu0 %vm2154_vm9, %v4392_v46  ;;  %v3979_v42 = vpop.permute.xlu1 %3978  ;;  %15546 = vst [vmem:[#allocation85_spill] sm:$0xff] %v12330_v60  ;;  %4951 = vmatpush1.msra.mxu1 %v4880_v11  ;;  %v15550_v46 = vld [vmem:[#allocation28_spill] sm:$0xff]  ;;  %v4874_v11 = vld [vmem:[#allocation2 + $0x430] sm:$0xff] }
 0x401   : > { %v3875_v17 = vpop.permute.xlu0 %3874  ;;  %4640 = vmatprep.mubr.f32.mxu0 %v15217_v61  ;;  %v12336_v30 = vpop.f32.mrf.mxu0  ;;  %4952 = vmatprep.subr.mxu1 %v4879_v20  ;;  %v4234_v2 = vsel %vm1934_vm3, %v4202_v39, %v15550_v46  ;;  %v15551_v20 = vld [vmem:[#allocation98_spill] sm:$0xff] }
 0x402   : > { %v4329_v51 = vsel %vm2033_vm6, %v4297_v22, %v3875_v17  ;;  %4116 = vrot.lane.b32.xlu1 %v8039_v41, %s8742_s18  ;;  %4953 = vmatpush1.msra.mxu1 %v4878_v58  ;;  %v4266_v63 = vsel %vm1967_vm4, %v4234_v2, %v11943_v16  ;;  %v4875_v22 = vld [vmem:[#allocation2 + $0x438] sm:$0xff]  ;;  %v4873_v58 = vld [vmem:[#allocation2 + $0x428] sm:$0xff] }
 0x403   : > { %4016 = vrot.lane.b32.xlu0 %v8086_v9, %s15008_s22  ;;  %v4361_v25 = vsel %vm2066_vm7, %v4329_v51, %v3979_v42  ;;  %v12344_v38 = vpop.f32.mrf.mxu0  ;;  %v4876_v9 = vld [vmem:[#allocation2 + $0x440] sm:$0xff]  ;;  %v4298_v17 = vsel %vm2000_vm5, %v4266_v63, %v12100_v45  ;;  %v8114_v51 = vld [vmem:[%s8869_s17 + $0x2d2] sm:$0xff]  ;;  %4954 = vmatprep.subr.mxu1 %v4877_v32  ;;  %v8041_v2 = vld [vmem:[%s8869_s17 + $0x2ea] sm:$0xff] }
 0x404   : > { %v3877_v12 = vpop.permute.xlu1 %3876  ;;  %15549 = vst [vmem:[#allocation170_spill] sm:$0xff] %v12344_v38  ;;  %4955 = vmatpush1.msra.mxu1 %v4876_v9  ;;  %v15707_v38 = vld [vmem:[#allocation77_spill] sm:$0xff] }
 0x405   : > { %v4079_v53 = vpop.permute.xlu0 %4078  ;;  %v12353_v42 = vpop.f32.mrf.mxu0  ;;  %4956 = vmatprep.subr.mxu1 %v4875_v22  ;;  %v4870_v22 = vld [vmem:[#allocation2 + $0x410] sm:$0xff] }
 0x406   : > { %v4393_v6 = vsel %vm2099_vm8, %v4361_v25, %v4079_v53  ;;  %4018 = vrot.lane.b32.xlu1 %v8087_v5, %s15008_s22  ;;  %v8478_v5 = vld [vmem:[%s8869_s17 + $0xaa] sm:$0xff]  ;;  %v4872_v25 = vld [vmem:[#allocation2 + $0x420] sm:$0xff]  ;;  %4957 = vmatpush1.msra.mxu1 %v4874_v11 }
 0x407   : > { %3914 = vrot.lane.b32.xlu0 %v8039_v41, %s15520_s21  ;;  %8136 = vmatmul.mubr.msk.f32.gmra.mxu0 %vm2154_vm9, %v4393_v6  ;;  %v4171_v16 = vsel %vm375_vm1, %v8478_v5, %v15551_v20  ;;  %v4330_v41 = vsel %vm2033_vm6, %v4298_v17, %v3877_v12  ;;  %v12365_v0 = vpop.f32.mrf.mxu0  ;;  %v15554_v53 = vld [vmem:[#allocation29_spill] sm:$0xff]  ;;  %v4871_v6 = vld [vmem:[#allocation2 + $0x418] sm:$0xff] }
 0x408   : > { %v4081_v26 = vpop.permute.xlu1 %4080  ;;  %4646 = vmatprep.mubr.f32.mxu0 %v15217_v61  ;;  %15552 = vst [vmem:[#allocation117_spill] sm:$0xff] %v12365_v0  ;;  %v4203_v45 = vsel %vm1901_vm2, %v4171_v16, %v15553_v55  ;;  %4958 = vmatprep.subr.mxu1 %v4873_v58  ;;  %v4869_v11 = vld [vmem:[#allocation2 + $0x408] sm:$0xff]  ;;  %v4931_v16 = vld [vmem:[#allocation2 + $0x5f8] sm:$0xff]  ;;  %v15557_v55 = vld [vmem:[#allocation106_spill] sm:$0xff] }
 0x409   : > { %v3981_v8 = vpop.permute.xlu0 %3980  ;;  %v4235_v32 = vsel %vm1934_vm3, %v4203_v45, %v15554_v53  ;;  %v12375_v46 = vpop.f32.mrf.mxu0  ;;  %4959 = vmatpush1.msra.mxu1 %v4872_v25  ;;  %v15706_v0 = vld [vmem:[#allocation15_spill] sm:$0xff] }
 0x40a   : > { %v4362_v39 = vsel %vm2066_vm7, %v4330_v41, %v3981_v8  ;;  %3916 = vrot.lane.b32.xlu1 %v8040_v18, %s15520_s21  ;;  %v4267_v9 = vsel %vm1967_vm4, %v4235_v32, %v11941_v54  ;;  %v8088_v18 = vld [vmem:[%s8869_s17 + $0x2e6] sm:$0xff]  ;;  %4960 = vmatprep.subr.mxu1 %v4871_v6  ;;  %v15556_v41 = vld [vmem:[#allocation63_spill] sm:$0xff]  ;;  %v4930_v32 = vld [vmem:[#allocation2 + $0x5f0] sm:$0xff] }
 0x40b   : > { %v4394_v12 = vsel %vm2099_vm8, %v4362_v39, %v4081_v26  ;;  %4118 = vrot.lane.b32.xlu0 %v8114_v51, %s8742_s18  ;;  %v4299_v17 = vsel %vm2000_vm5, %v4267_v9, %v12098_v34  ;;  %v12384_v51 = vpop.f32.mrf.mxu0  ;;  %v4868_v54 = vld [vmem:[#allocation2 + $0x400] sm:$0xff]  ;;  %4961 = vmatpush1.msra.mxu1 %v4870_v22 }
 0x40c   : > { %8137 = vmatmul.mubr.msk.f32.gmra.mxu0 %vm2154_vm9, %v4394_v12  ;;  %v3983_v63 = vpop.permute.xlu1 %3982  ;;  %15555 = vst [vmem:[#allocation45_spill] sm:$0xff] %v12384_v51  ;;  %v8479_v34 = vld [vmem:[%s8869_s17 + $0xc2] sm:$0xff]  ;;  %4962 = vmatprep.subr.mxu1 %v4869_v11 }
 0x40d   : > { %v3879_v26 = vpop.permute.xlu0 %3878  ;;  %4652 = vmatprep.mubr.f32.mxu0 %v15217_v61  ;;  %v12390_v20 = vpop.f32.mrf.mxu0  ;;  %v4172_v8 = vsel %vm375_vm1, %v8479_v34, %v15556_v41  ;;  %4963 = vmatpush1.msra.mxu1 %v4868_v54  ;;  %v15559_v12 = vld [vmem:[#allocation80_spill] sm:$0xff]  ;;  %v8089_v54 = vld [vmem:[%s8869_s17 + $0x2ee] sm:$0xff] }
 0x40e   : > { %v4331_v5 = vsel %vm2033_vm6, %v4299_v17, %v3879_v26  ;;  %4120 = vrot.lane.b32.xlu1 %v8041_v2, %s8742_s18  ;;  %v4204_v45 = vsel %vm1901_vm2, %v4172_v8, %v15557_v55  ;;  %4964 = vmatprep.subr.mxu1 %v4931_v16  ;;  %v8115_v17 = vld [vmem:[%s8869_s17 + $0x2f2] sm:$0xff]  ;;  %v4928_v26 = vld [vmem:[#allocation2 + $0x5e0] sm:$0xff]  ;;  %v8480_v16 = vld [vmem:[%s8869_s17 + $0xca] sm:$0xff] }
 0x40f   : > { %4020 = vrot.lane.b32.xlu0 %v8088_v18, %s15008_s22  ;;  %v4363_v39 = vsel %vm2066_vm7, %v4331_v5, %v3983_v63  ;;  %v12398_v53 = vpop.f32.mrf.mxu0  ;;  %v4236_v6 = vsel %vm1934_vm3, %v4204_v45, %v15559_v12  ;;  %v4929_v18 = vld [vmem:[#allocation2 + $0x5e8] sm:$0xff]  ;;  %4965 = vmatpush2.msra.mxu1 %v4930_v32  ;;  %v4926_v55 = vld [vmem:[#allocation2 + $0x5d0] sm:$0xff] }
 0x410   : > { %v3881_v58 = vpop.permute.xlu1 %3880  ;;  %15558 = vst [vmem:[#allocation44_spill] sm:$0xff] %v12398_v53  ;;  %v4268_v22 = vsel %vm1967_vm4, %v4236_v6, %v11953_v15  ;;  %v15560_v15 = vld [vmem:[#allocation11_spill] sm:$0xff]  ;;  %4966 = vmatprep.subr.mxu1 %v4929_v18  ;;  %v15562_v45 = vld [vmem:[#allocation74_spill] sm:$0xff]  ;;  %v15563_v32 = vld [vmem:[#allocation141_spill] sm:$0xff] }
 0x411   : > { %v4083_v25 = vpop.permute.xlu0 %4082  ;;  %v12408_v63 = vpop.f32.mrf.mxu0  ;;  %v4300_v11 = vsel %vm2000_vm5, %v4268_v22, %v12108_v13  ;;  %4967 = vmatpush2.msra.mxu1 %v4928_v26  ;;  %v4924_v18 = vld [vmem:[#allocation2 + $0x5c0] sm:$0xff]  ;;  %v4923_v26 = vld [vmem:[#allocation2 + $0x5b8] sm:$0xff] }
 0x412   : > { %v4395_v9 = vsel %vm2099_vm8, %v4363_v39, %v4083_v25  ;;  %3918 = vrot.lane.b32.xlu1 %v8041_v2, %s15520_s21  ;;  %v4927_v2 = vld [vmem:[#allocation2 + $0x5d8] sm:$0xff]  ;;  %v4332_v34 = vsel %vm2033_vm6, %v4300_v11, %v3881_v58  ;;  %v4925_v25 = vld [vmem:[#allocation2 + $0x5c8] sm:$0xff] }
 0x413   : > { %3814 = vrot.lane.b32.xlu0 %v12196_v29, %s15495_s12  ;;  %8138 = vmatmul.mubr.msk.f32.gmra.mxu0 %vm2154_vm9, %v4395_v9  ;;  %v4173_v29 = vsel %vm375_vm1, %v8480_v16, %v15560_v15  ;;  %v12420_v8 = vpop.f32.mrf.mxu0  ;;  %v8042_v9 = vld [vmem:[%s8869_s17 + $0x302] sm:$0xff] }
 0x414   : > { %v4085_v5 = vpop.permute.xlu1 %4084  ;;  %4658 = vmatprep.mubr.f32.mxu0 %v15217_v61  ;;  %15561 = vst [vmem:[#allocation149_spill] sm:$0xff] %v12420_v8  ;;  %v4205_v13 = vsel %vm1901_vm2, %v4173_v29, %v15562_v45  ;;  %4968 = vmatprep.subr.mxu1 %v4927_v2  ;;  %v4922_v2 = vld [vmem:[#allocation2 + $0x5b0] sm:$0xff]  ;;  %v4921_v16 = vld [vmem:[#allocation2 + $0x5a8] sm:$0xff]  ;;  %v4920_v29 = vld [vmem:[#allocation2 + $0x5a0] sm:$0xff] }
 0x415   : > { %v3985_v41 = vpop.permute.xlu0 %3984  ;;  %v4237_v12 = vsel %vm1934_vm3, %v4205_v13, %v15563_v32  ;;  %v12430_v58 = vpop.f32.mrf.mxu0  ;;  %4969 = vmatpush2.msra.mxu1 %v4926_v55  ;;  %v8090_v13 = vld [vmem:[%s8869_s17 + $0x306] sm:$0xff] }
 0x416   : > { %v4364_v39 = vsel %vm2066_vm7, %v4332_v34, %v3985_v41  ;;  %4122 = vrot.lane.b32.xlu1 %v8115_v17, %s8742_s18  ;;  %v4269_v22 = vsel %vm1967_vm4, %v4237_v12, %v11951_v57  ;;  %4970 = vmatprep.subr.mxu1 %v4925_v25  ;;  %v8481_v34 = vld [vmem:[%s8869_s17 + $0xe2] sm:$0xff] }
 0x417   : > { %v4396_v6 = vsel %vm2099_vm8, %v4364_v39, %v4085_v5  ;;  %4022 = vrot.lane.b32.xlu0 %v8089_v54, %s15008_s22  ;;  %v4301_v11 = vsel %vm2000_vm5, %v4269_v22, %v12106_v19  ;;  %v12438_v54 = vpop.f32.mrf.mxu0  ;;  %4971 = vmatpush2.msra.mxu1 %v4924_v18  ;;  %v8043_v19 = vld [vmem:[%s8869_s17 + $0x30a] sm:$0xff] }
 0x418   : > { %8139 = vmatmul.mubr.msk.f32.gmra.mxu0 %vm2154_vm9, %v4396_v6  ;;  %v3987_v17 = vpop.permute.xlu1 %3986  ;;  %15564 = vst [vmem:[#allocation88_spill] sm:$0xff] %v12438_v54  ;;  %4972 = vmatprep.subr.mxu1 %v4923_v26  ;;  %v15566_v41 = vld [vmem:[#allocation129_spill] sm:$0xff]  ;;  %v4918_v26 = vld [vmem:[#allocation2 + $0x590] sm:$0xff] }
 0x419   : > { %v3883_v5 = vpop.permute.xlu0 %3882  ;;  %4664 = vmatprep.mubr.f32.mxu0 %v15217_v61  ;;  %v12445_v15 = vpop.f32.mrf.mxu0  ;;  %v4174_v55 = vsel %vm375_vm1, %v8481_v34, %v15566_v41  ;;  %4973 = vmatpush2.msra.mxu1 %v4922_v2  ;;  %v15567_v39 = vld [vmem:[#allocation17_spill] sm:$0xff] }
 0x41a   : > { %v4333_v57 = vsel %vm2033_vm6, %v4301_v11, %v3883_v5  ;;  %3920 = vrot.lane.b32.xlu1 %v8042_v9, %s15520_s21  ;;  %15565 = vst [vmem:[#allocation169_spill] sm:$0xff] %v12445_v15  ;;  %v4206_v25 = vsel %vm1901_vm2, %v4174_v55, %v15567_v39  ;;  %4974 = vmatprep.subr.mxu1 %v4921_v16  ;;  %v15569_v9 = vld [vmem:[#allocation112_spill] sm:$0xff]  ;;  %v4917_v5 = vld [vmem:[#allocation2 + $0x588] sm:$0xff]  ;;  %v4915_v39 = vld [vmem:[#allocation2 + $0x578] sm:$0xff] }
 0x41b   : > { %3816 = vrot.lane.b32.xlu0 %v12221_v10, %s15495_s12  ;;  %v4365_v32 = vsel %vm2066_vm7, %v4333_v57, %v3987_v17  ;;  %v12455_v6 = vpop.f32.mrf.mxu0  ;;  %v4919_v10 = vld [vmem:[#allocation2 + $0x598] sm:$0xff]  ;;  %v4238_v18 = vsel %vm1934_vm3, %v4206_v25, %v15569_v9  ;;  %4975 = vmatpush2.msra.mxu1 %v4920_v29  ;;  %v4916_v16 = vld [vmem:[#allocation2 + $0x580] sm:$0xff]  ;;  %v8482_v29 = vld [vmem:[%s8869_s17 + $0xea] sm:$0xff] }
 0x41c   : > { %v3885_v45 = vpop.permute.xlu1 %3884  ;;  %15568 = vst [vmem:[#allocation120_spill] sm:$0xff] %v12455_v6  ;;  %v4270_v11 = vsel %vm1967_vm4, %v4238_v18, %v11963_v44  ;;  %4976 = vmatprep.subr.mxu1 %v4919_v10  ;;  %v15571_v34 = vld [vmem:[#allocation97_spill] sm:$0xff]  ;;  %v15573_v25 = vld [vmem:[#allocation22_spill] sm:$0xff]  ;;  %v8525_v15 = vld [vmem:[%s8869_s17 + $0x1c0] sm:$0xff] }
 0x41d   : > { %v4087_v12 = vpop.permute.xlu0 %4086  ;;  %v12464_v17 = vpop.f32.mrf.mxu0  ;;  %v4302_v2 = vsel %vm2000_vm5, %v4270_v11, %v12116_v62  ;;  %v4175_v44 = vsel %vm375_vm1, %v8482_v29, %v15571_v34  ;;  %4977 = vmatpush2.msra.mxu1 %v4918_v26  ;;  %v15574_v10 = vld [vmem:[#allocation161_spill] sm:$0xff]  ;;  %v4910_v34 = vld [vmem:[#allocation2 + $0x550] sm:$0xff] }
 0x41e   : > { %v4397_v22 = vsel %vm2099_vm8, %v4365_v32, %v4087_v12  ;;  %4124 = vrot.lane.b32.xlu1 %v8043_v19, %s8742_s18  ;;  %15570 = vst [vmem:[#allocation50_spill] sm:$0xff] %v12464_v17  ;;  %v4334_v41 = vsel %vm2033_vm6, %v4302_v2, %v3885_v45  ;;  %v4207_v62 = vsel %vm1901_vm2, %v4175_v44, %v15573_v25  ;;  %v4914_v12 = vld [vmem:[#allocation2 + $0x570] sm:$0xff]  ;;  %v4913_v26 = vld [vmem:[#allocation2 + $0x568] sm:$0xff]  ;;  %v4912_v2 = vld [vmem:[#allocation2 + $0x560] sm:$0xff] }
 0x41f   : > { %4024 = vrot.lane.b32.xlu0 %v8090_v13, %s15008_s22  ;;  %8140 = vmatmul.mubr.msk.f32.gmra.mxu0 %vm2154_vm9, %v4397_v22  ;;  %v12474_v13 = vpop.f32.mrf.mxu0  ;;  %v4239_v9 = vsel %vm1934_vm3, %v4207_v62, %v15574_v10  ;;  %v8116_v22 = vld [vmem:[%s8869_s17 + $0x312] sm:$0xff]  ;;  %v5329_v54 = vld [vmem:[%s8869_s17 + $0x126] sm:$0xff] }
 0x420   : > { %v4089_v57 = vpop.permute.xlu1 %4088  ;;  %4670 = vmatprep.mubr.f32.mxu0 %v15217_v61  ;;  %15572 = vst [vmem:[#allocation43_spill] sm:$0xff] %v12474_v13  ;;  %4978 = vmatprep.subr.mxu1 %v4917_v5  ;;  %v4271_v11 = vsel %vm1967_vm4, %v4239_v9, %v11961_v28  ;;  %v8091_v5 = vld [vmem:[%s8869_s17 + $0x30e] sm:$0xff] }
 0x421   : > { %v3989_v55 = vpop.permute.xlu0 %3988  ;;  %4979 = vmatpush2.msra.mxu1 %v4916_v16  ;;  %v4911_v16 = vld [vmem:[#allocation2 + $0x558] sm:$0xff] }
 0x422   : > { %v4366_v32 = vsel %vm2066_vm7, %v4334_v41, %v3989_v55  ;;  %3922 = vrot.lane.b32.xlu1 %v8043_v19, %s15520_s21  ;;  %4980 = vmatprep.subr.mxu1 %v4915_v39  ;;  %v8044_v41 = vld [vmem:[%s8869_s17 + $0x322] sm:$0xff] }
 0x423   : > { %v4398_v45 = vsel %vm2099_vm8, %v4366_v32, %v4089_v57  ;;  %3818 = vrot.lane.b32.xlu0 %v12245_v49, %s15495_s12  ;;  %v12485_v18 = vpop.f32.mrf.mxu0  ;;  %v4303_v57 = vsel %vm2000_vm5, %v4271_v11, %v12114_v50  ;;  %4981 = vmatpush2.msra.mxu1 %v4914_v12  ;;  %v4909_v50 = vld [vmem:[#allocation2 + $0x548] sm:$0xff]  ;;  %v15578_v39 = vld [vmem:[#allocation68_spill] sm:$0xff] }
 0x424   : > { %15575 = vst [vmem:[#allocation152_spill] sm:$0xff] %v12485_v18  ;;  %8141 = vmatmul.mubr.msk.f32.gmra.mxu0 %vm2154_vm9, %v4398_v45  ;;  %v3991_v19 = vpop.permute.xlu1 %3990  ;;  %4982 = vmatprep.subr.mxu1 %v4913_v26  ;;  %v8483_v55 = vld [vmem:[%s8869_s17 + $0x102] sm:$0xff]  ;;  %v15581_v26 = vld [vmem:[#allocation34_spill] sm:$0xff] }
 0x425   : > { %v3887_v49 = vpop.permute.xlu0 %3886  ;;  %v12494_v29 = vpop.f32.mrf.mxu0  ;;  %4676 = vmatprep.mubr.f32.mxu0 %v15217_v61  ;;  %4983 = vmatpush2.msra.mxu1 %v4912_v2  ;;  %v4176_v25 = vsel %vm375_vm1, %v8483_v55, %v15578_v39  ;;  %v15579_v32 = vld [vmem:[#allocation105_spill] sm:$0xff]  ;;  %v4907_v2 = vld [vmem:[#allocation2 + $0x538] sm:$0xff] }
 0x426   : > { %15576 = vst [vmem:[#allocation87_spill] sm:$0xff] %v12494_v29  ;;  %v4335_v28 = vsel %vm2033_vm6, %v4303_v57, %v3887_v49  ;;  %4126 = vrot.lane.b32.xlu1 %v8116_v22, %s8742_s18  ;;  %4984 = vmatprep.subr.mxu1 %v4911_v16  ;;  %v4208_v12 = vsel %vm1901_vm2, %v4176_v25, %v15579_v32  ;;  %v4908_v22 = vld [vmem:[#allocation2 + $0x540] sm:$0xff]  ;;  %v8045_v49 = vld [vmem:[%s8869_s17 + $0x32a] sm:$0xff] }
 0x427   : > { %4026 = vrot.lane.b32.xlu0 %v8091_v5, %s15008_s22  ;;  %v12500_v44 = vpop.f32.mrf.mxu0  ;;  %v4367_v10 = vsel %vm2066_vm7, %v4335_v28, %v3991_v19  ;;  %4985 = vmatpush2.msra.mxu1 %v4910_v34  ;;  %v4240_v11 = vsel %vm1934_vm3, %v4208_v12, %v15581_v26  ;;  %v4906_v16 = vld [vmem:[#allocation2 + $0x530] sm:$0xff]  ;;  %v8092_v55 = vld [vmem:[%s8869_s17 + $0x326] sm:$0xff] }
 0x428   : > { %15577 = vst [vmem:[#allocation172_spill] sm:$0xff] %v12500_v44  ;;  %v3889_v62 = vpop.permute.xlu1 %3888  ;;  %4986 = vmatprep.subr.mxu1 %v4909_v50  ;;  %v4272_v57 = vsel %vm1967_vm4, %v4240_v11, %v11973_v31  ;;  %v8484_v50 = vld [vmem:[%s8869_s17 + $0x10a] sm:$0xff]  ;;  %v15583_v31 = vld [vmem:[#allocation8_spill] sm:$0xff] }
 0x429   : > { %v4091_v9 = vpop.permute.xlu0 %4090  ;;  %v12509_v45 = vpop.f32.mrf.mxu0  ;;  %v4304_v28 = vsel %vm2000_vm5, %v4272_v57, %v12124_v23  ;;  %4987 = vmatpush2.msra.mxu1 %v4908_v22  ;;  %v4904_v12 = vld [vmem:[#allocation2 + $0x520] sm:$0xff]  ;;  %v4903_v22 = vld [vmem:[#allocation2 + $0x518] sm:$0xff]  ;;  %v4902_v57 = vld [vmem:[#allocation2 + $0x510] sm:$0xff] }
 0x42a   : > { %15580 = vst [vmem:[#allocation119_spill] sm:$0xff] %v12509_v45  ;;  %v4399_v5 = vsel %vm2099_vm8, %v4367_v10, %v4091_v9  ;;  %3924 = vrot.lane.b32.xlu1 %v8044_v41, %s15520_s21  ;;  %v4905_v41 = vld [vmem:[#allocation2 + $0x528] sm:$0xff]  ;;  %v4336_v39 = vsel %vm2033_vm6, %v4304_v28, %v3889_v62  ;;  %4988 = vmatprep.subr.mxu1 %v4907_v2  ;;  %v15586_v26 = vld [vmem:[#allocation132_spill] sm:$0xff] }
 0x42b   : > { %3820 = vrot.lane.b32.xlu0 %v12271_v3, %s15495_s12  ;;  %v12519_v19 = vpop.f32.mrf.mxu0  ;;  %8142 = vmatmul.mubr.msk.f32.gmra.mxu0 %vm2154_vm9, %v4399_v5  ;;  %v4177_v3 = vsel %vm375_vm1, %v8484_v50, %v15583_v31  ;;  %v15585_v10 = vld [vmem:[#allocation73_spill] sm:$0xff]  ;;  %v15588_v28 = vld [vmem:[#allocation180_spill] sm:$0xff] }
 0x42c   : > { %15582 = vst [vmem:[#allocation49_spill] sm:$0xff] %v12519_v19  ;;  %v4093_v34 = vpop.permute.xlu1 %4092  ;;  %4682 = vmatprep.mubr.f32.mxu0 %v15217_v61  ;;  %v4209_v23 = vsel %vm1901_vm2, %v4177_v3, %v15585_v10  ;;  %4989 = vmatpush2.msra.mxu1 %v4906_v16  ;;  %v5311_v2 = vld [vmem:[%s8869_s17 + $0x6] sm:$0xff]  ;;  %v15591_v10 = vld [vmem:[#allocation134_spill] sm:$0xff] }
 0x42d   : > { %v3993_v25 = vpop.permute.xlu0 %3992  ;;  %v12531_v32 = vpop.f32.mrf.mxu0  ;;  %v4241_v11 = vsel %vm1934_vm3, %v4209_v23, %v15586_v26  ;;  %4990 = vmatprep.subr.mxu1 %v4905_v41  ;;  %v4901_v31 = vld [vmem:[#allocation2 + $0x508] sm:$0xff]  ;;  %v4900_v41 = vld [vmem:[#allocation2 + $0x500] sm:$0xff] }
 0x42e   : > { %15584 = vst [vmem:[#allocation48_spill] sm:$0xff] %v12531_v32  ;;  %v4368_v9 = vsel %vm2066_vm7, %v4336_v39, %v3993_v25  ;;  %4128 = vrot.lane.b32.xlu1 %v8045_v49, %s8742_s18  ;;  %v4273_v50 = vsel %vm1967_vm4, %v4241_v11, %v15588_v28  ;;  %4991 = vmatpush2.msra.mxu1 %v4904_v12  ;;  %v5367_v12 = vld [vmem:[%s8869_s17 + $0xc] sm:$0xff] }
 0x42f   : > { %v4400_v5 = vsel %vm2099_vm8, %v4368_v9, %v4093_v34  ;;  %4028 = vrot.lane.b32.xlu0 %v8092_v55, %s15008_s22  ;;  %v12541_v62 = vpop.f32.mrf.mxu0  ;;  %v4305_v34 = vsel %vm2000_vm5, %v4273_v50, %v12122_v27  ;;  %4992 = vmatprep.subr.mxu1 %v4903_v22  ;;  %v8485_v27 = vld [vmem:[%s8869_s17 + $0x122] sm:$0xff]  ;;  %v8521_v18 = vld [vmem:[%s8869_s17 + $0x1ae] sm:$0xff] }
 0x430   : > { %15587 = vst [vmem:[#allocation151_spill] sm:$0xff] %v12541_v62  ;;  %8143 = vmatmul.mubr.msk.f32.gmra.mxu0 %vm2154_vm9, %v4400_v5  ;;  %v3995_v16 = vpop.permute.xlu1 %3994  ;;  %4993 = vmatpush2.msra.mxu1 %v4902_v57  ;;  %v4178_v23 = vsel %vm375_vm1, %v8485_v27, %v15591_v10  ;;  %v15592_v22 = vld [vmem:[#allocation20_spill] sm:$0xff]  ;;  %v8510_v62 = vld [vmem:[%s8869_s17 + $0x188] sm:$0xff] }
 0x431   : > { %v3891_v3 = vpop.permute.xlu0 %3890  ;;  %v12549_v55 = vpop.f32.mrf.mxu0  ;;  %4688 = vmatprep.mubr.f32.mxu0 %v15217_v61  ;;  %4994 = vmatprep.subr.mxu1 %v4901_v31  ;;  %v4210_v26 = vsel %vm1901_vm2, %v4178_v23, %v15592_v22  ;;  %v15599_v22 = vld [vmem:[#allocation21_spill] sm:$0xff] }
 0x432   : > { %15589 = vst [vmem:[#allocation90_spill] sm:$0xff] %v12549_v55  ;;  %v4337_v39 = vsel %vm2033_vm6, %v4305_v34, %v3891_v3  ;;  %5455 = vrot.lane.b32.xlu1 %v5311_v2, %s15006_s15  ;;  %4995 = vmatpush2.msra.mxu1 %v4900_v41  ;;  %v15594_v2 = vld [vmem:[#allocation144_spill] sm:$0xff]  ;;  %v8093_v41 = vld [vmem:[%s8869_s17 + $0x32e] sm:$0xff] }
 0x433   : > { %3822 = vrot.lane.b32.xlu0 %v12302_v7, %s15495_s12  ;;  %v12556_v25 = vpop.f32.mrf.mxu0  ;;  %v4369_v11 = vsel %vm2066_vm7, %v4337_v39, %v3995_v16  ;;  %v4242_v57 = vsel %vm1934_vm3, %v4210_v26, %v15594_v2  ;;  %v5267_v16 = vld [vmem:[%s8869_s17 + $0xc0] sm:$0xff]  ;;  %v8172_v39 = vld [vmem:[%s14956_s3 + $0xe8] sm:$0xf] }
 0x434   : > { %15590 = vst [vmem:[#allocation171_spill] sm:$0xff] %v12556_v25  ;;  %v3893_v9 = vpop.permute.xlu1 %3892  ;;  %v4274_v50 = vsel %vm1967_vm4, %v4242_v57, %v11983_v36  ;;  %v15597_v36 = vld [vmem:[#allocation100_spill] sm:$0xff]  ;;  %8174 = vmatprep.subr.msk.mxu0 %vm472_vm0, %v8172_v39 }
 0x435   : > { %v4095_v5 = vpop.permute.xlu0 %4094  ;;  %v12565_v7 = vpop.f32.mrf.mxu0  ;;  %v4306_v34 = vsel %vm2000_vm5, %v4274_v50, %v12132_v37  ;;  %v8171_v37 = vld [vmem:[%s14956_s3 + $0xe0] sm:$0xf]  ;;  %v5323_v50 = vld [vmem:[%s8869_s17 + $0xc6] sm:$0xff] }
 0x436   : > { %15593 = vst [vmem:[#allocation122_spill] sm:$0xff] %v12565_v7  ;;  %v4401_v28 = vsel %vm2099_vm8, %v4369_v11, %v4095_v5  ;;  %5583 = vrot.lane.b32.xlu1 %v5367_v12, %s15595_s16  ;;  %v8486_v12 = vld [vmem:[%s8869_s17 + $0x12a] sm:$0xff]  ;;  %v4338_v27 = vsel %vm2033_vm6, %v4306_v34, %v3893_v9  ;;  %8175 = vmatpush1.msk.msra.mxu0 %vm472_vm0, %v8171_v37  ;;  %v8170_v9 = vld [vmem:[%s14956_s3 + $0xd8] sm:$0xff] }
 0x437   : > { %3926 = vrot.lane.b32.xlu0 %v8045_v49, %s15520_s21  ;;  %v12574_v31 = vpop.f32.mrf.mxu0  ;;  %8144 = vmatmul.mubr.msk.f32.gmra.mxu0 %vm2154_vm9, %v4401_v28  ;;  %v4179_v49 = vsel %vm375_vm1, %v8486_v12, %v15597_v36  ;;  %v15600_v5 = vld [vmem:[#allocation27_spill] sm:$0xff]  ;;  %v5379_v37 = vld [vmem:[%s8869_s17 + $0xcc] sm:$0xff] }
 0x438   : > { %15596 = vst [vmem:[#allocation54_spill] sm:$0xff] %v12574_v31  ;;  %v4097_v3 = vpop.permute.xlu1 %4096  ;;  %4694 = vmatprep.mubr.f32.mxu0 %v15217_v61  ;;  %v4211_v26 = vsel %vm1901_vm2, %v4179_v49, %v15599_v22  ;;  %6753 = vmatprep.subr.mxu0 %v8170_v9  ;;  %v8117_v12 = vld [vmem:[%s8869_s17 + $0x332] sm:$0xff] }
 0x439   : > { %v3997_v10 = vpop.permute.xlu0 %3996  ;;  %v12589_v23 = vpop.f32.mrf.mxu0  ;;  %v4243_v2 = vsel %vm1934_vm3, %v4211_v26, %v15600_v5  ;;  %v8165_v22 = vld [vmem:[%s14956_s3 + $0xb0] sm:$0xff]  ;;  %v8487_v26 = vld [vmem:[%s8869_s17 + $0x142] sm:$0xff] }
 0x43a   : > { %15598 = vst [vmem:[#allocation47_spill] sm:$0xff] %v12589_v23  ;;  %v4370_v11 = vsel %vm2066_vm7, %v4338_v27, %v3997_v10  ;;  %5711 = vrot.lane.b32.xlu1 %v5267_v16, %s15362_s19  ;;  %v8169_v16 = vld [vmem:[%s14956_s3 + $0xd0] sm:$0xff]  ;;  %v4275_v34 = vsel %vm1967_vm4, %v4243_v2, %v11981_v1  ;;  %v8167_v1 = vld [vmem:[%s14956_s3 + $0xc0] sm:$0xff] }
 0x43b   : > { %v4402_v57 = vsel %vm2099_vm8, %v4370_v11, %v4097_v3  ;;  %4030 = vrot.lane.b32.xlu0 %v8093_v41, %s15008_s22  ;;  %v12607_v28 = vpop.f32.mrf.mxu0  ;;  %v8168_v3 = vld [vmem:[%s14956_s3 + $0xc8] sm:$0xff]  ;;  %v4307_v41 = vsel %vm2000_vm5, %v4275_v34, %v12130_v4  ;;  %6754 = vmatpush1.msra.mxu0 %v8169_v16  ;;  %v8166_v4 = vld [vmem:[%s14956_s3 + $0xb8] sm:$0xff] }
 0x43c   : > { %15601 = vst [vmem:[#allocation154_spill] sm:$0xff] %v12607_v28  ;;  %8145 = vmatmul.mubr.msk.f32.gmra.mxu0 %vm2154_vm9, %v4402_v57  ;;  %v3999_v39 = vpop.permute.xlu1 %3998  ;;  %6755 = vmatprep.subr.mxu0 %v8168_v3  ;;  %v15604_v11 = vld [vmem:[#allocation67_spill] sm:$0xff]  ;;  %v5312_v2 = vld [vmem:[%s8869_s17 + $0xe] sm:$0xff] }
 0x43d   : > { %v3895_v36 = vpop.permute.xlu0 %3894  ;;  %v12622_v49 = vpop.f32.mrf.mxu0  ;;  %4700 = vmatprep.mubr.f32.mxu0 %v15217_v61  ;;  %6756 = vmatpush1.msra.mxu0 %v8167_v1  ;;  %v4180_v9 = vsel %vm375_vm1, %v8487_v26, %v15604_v11  ;;  %v8164_v57 = vld [vmem:[%s14956_s3 + $0xa8] sm:$0xff]  ;;  %v13337_v28 = vld [vmem:[#allocation2 + $0x658] sm:$0xff] }
 0x43e   : > { %15602 = vst [vmem:[#allocation89_spill] sm:$0xff] %v12622_v49  ;;  %v4339_v27 = vsel %vm2033_vm6, %v4307_v41, %v3895_v36  ;;  %5819 = vrot.lane.b32.xlu1 %v5323_v50, %s15467_s20  ;;  %6757 = vmatprep.subr.mxu0 %v8166_v4  ;;  %v15605_v50 = vld [vmem:[#allocation108_spill] sm:$0xff] }
 0x43f   : > { %4130 = vrot.lane.b32.xlu0 %v8117_v12, %s8742_s18  ;;  %v12634_v10 = vpop.f32.mrf.mxu0  ;;  %v4212_v16 = vsel %vm1901_vm2, %v4180_v9, %v15605_v50  ;;  %v4371_v34 = vsel %vm2066_vm7, %v4339_v27, %v3999_v39  ;;  %6758 = vmatpush1.msra.mxu0 %v8165_v22  ;;  %v8163_v41 = vld [vmem:[%s14956_s3 + $0xa0] sm:$0xff]  ;;  %v5368_v9 = vld [vmem:[%s8869_s17 + $0x14] sm:$0xff] }
 0x440   : > { %15603 = vst [vmem:[#allocation174_spill] sm:$0xff] %v12634_v10  ;;  %v3897_v5 = vpop.permute.xlu1 %3896  ;;  %v15607_v36 = vld [vmem:[#allocation164_spill] sm:$0xff]  ;;  %6759 = vmatprep.subr.mxu0 %v8164_v57  ;;  %v15610_v57 = vld [vmem:[#allocation10_spill] sm:$0xff] }
 0x441   : > { %v4099_v12 = vpop.permute.xlu0 %4098  ;;  %v12650_v3 = vpop.f32.mrf.mxu0  ;;  %v4244_v1 = vsel %vm1934_vm3, %v4212_v16, %v15607_v36  ;;  %v5279_v22 = vld [vmem:[%s8869_s17 + $0x180] sm:$0xff]  ;;  %6760 = vmatpush1.msra.mxu0 %v8163_v41  ;;  %v15613_v36 = vld [vmem:[#allocation79_spill] sm:$0xff] }
 0x442   : > { %15606 = vst [vmem:[#allocation121_spill] sm:$0xff] %v12650_v3  ;;  %v4403_v4 = vsel %vm2099_vm8, %v4371_v34, %v4099_v12  ;;  %5927 = vrot.lane.b32.xlu1 %v5379_v37, %s15495_s12  ;;  %v4276_v39 = vsel %vm1967_vm4, %v4244_v1, %v11993_v40  ;;  %v8488_v37 = vld [vmem:[%s8869_s17 + $0x14a] sm:$0xff]  ;;  %v15611_v16 = vld [vmem:[#allocation76_spill] sm:$0xff] }
 0x443   : > { %5457 = vrot.lane.b32.xlu0 %v5312_v2, %s15608_s23  ;;  %v12662_v27 = vpop.f32.mrf.mxu0  ;;  %8146 = vmatmul.mubr.msk.f32.gmra.mxu0 %vm2154_vm9, %v4403_v4  ;;  %v4308_v26 = vsel %vm2000_vm5, %v4276_v39, %v12140_v24  ;;  %v4181_v40 = vsel %vm375_vm1, %v8488_v37, %v15610_v57  ;;  %v15614_v4 = vld [vmem:[#allocation37_spill] sm:$0xff]  ;;  %v13332_v10 = vld [vmem:[#allocation2 + $0x660] sm:$0xff] }
 0x444   : > { %15609 = vst [vmem:[#allocation53_spill] sm:$0xff] %v12662_v27  ;;  %v4101_v11 = vpop.permute.xlu1 %4100  ;;  %4706 = vmatprep.mubr.f32.mxu0 %v15217_v61  ;;  %v4340_v2 = vsel %vm2033_vm6, %v4308_v26, %v3897_v5  ;;  %v4213_v34 = vsel %vm1901_vm2, %v4181_v40, %v15611_v16  ;;  %v5335_v5 = vld [vmem:[%s8869_s17 + $0x186] sm:$0xff] }
 0x445   : > { %v4001_v50 = vpop.permute.xlu0 %4000  ;;  %v12677_v24 = vpop.f32.mrf.mxu0  ;;  %v4245_v41 = vsel %vm1934_vm3, %v4213_v34, %v15613_v36  ;;  %v5268_v37 = vld [vmem:[%s8869_s17 + $0xc8] sm:$0xff] }
 0x446   : > { %v4372_v12 = vsel %vm2066_vm7, %v4340_v2, %v4001_v50  ;;  %15612 = vst [vmem:[#allocation52_spill] sm:$0xff] %v12677_v24  ;;  %6035 = vrot.lane.b32.xlu1 %v5279_v22, %s15520_s21  ;;  %v4277_v39 = vsel %vm1967_vm4, %v4245_v41, %v15614_v4  ;;  %v8489_v2 = vld [vmem:[%s8869_s17 + $0x162] sm:$0xff] }
 0x447   : > { %v4404_v1 = vsel %vm2099_vm8, %v4372_v12, %v4101_v11  ;;  %5585 = vrot.lane.b32.xlu0 %v5368_v9, %s15595_s16  ;;  %v4309_v22 = vsel %vm2000_vm5, %v4277_v39, %v12138_v52  ;;  %v12692_v40 = vpop.f32.mrf.mxu0  ;;  %v5391_v9 = vld [vmem:[%s8869_s17 + $0x18c] sm:$0xff]  ;;  %v15618_v12 = vld [vmem:[#allocation19_spill] sm:$0xff] }
 0x448   : > { %8147 = vmatmul.mubr.msk.f32.gmra.mxu0 %vm2154_vm9, %v4404_v1  ;;  %v4003_v26 = vpop.permute.xlu1 %4002  ;;  %15615 = vst [vmem:[#allocation153_spill] sm:$0xff] %v12692_v40  ;;  %v15617_v50 = vld [vmem:[#allocation133_spill] sm:$0xff] }
 0x449   : > { %v3899_v57 = vpop.permute.xlu0 %3898  ;;  %4712 = vmatprep.mubr.f32.mxu0 %v15217_v61  ;;  %v4182_v16 = vsel %vm375_vm1, %v8489_v2, %v15617_v50  ;;  %v5324_v52 = vld [vmem:[%s8869_s17 + $0xce] sm:$0xff]  ;;  %v12707_v39 = vpop.f32.mrf.mxu0  ;;  %v5313_v2 = vld [vmem:[%s8869_s17 + $0x26] sm:$0xff] }
 0x44a   : > { %v4341_v11 = vsel %vm2033_vm6, %v4309_v22, %v3899_v57  ;;  %6143 = vrot.lane.b32.xlu1 %v5335_v5, %s15616_s8  ;;  %v4214_v36 = vsel %vm1901_vm2, %v4182_v16, %v15618_v12  ;;  %v15619_v4 = vld [vmem:[#allocation33_spill] sm:$0xff]  ;;  %15620 = vst [vmem:[#allocation92_spill] sm:$0xff] %v12707_v39  ;;  %v5380_v57 = vld [vmem:[%s8869_s17 + $0xd4] sm:$0xff] }
 0x44b   : > { %5713 = vrot.lane.b32.xlu0 %v5268_v37, %s15362_s19  ;;  %v4373_v41 = vsel %vm2066_vm7, %v4341_v11, %v4003_v26  ;;  %v4246_v5 = vsel %vm1934_vm3, %v4214_v36, %v15619_v4  ;;  %v8490_v50 = vld [vmem:[%s8869_s17 + $0x16a] sm:$0xff]  ;;  %v15621_v16 = vld [vmem:[#allocation99_spill] sm:$0xff] }
 0x44c   : > { %v3901_v34 = vpop.permute.xlu1 %3900  ;;  %v4278_v22 = vsel %vm1967_vm4, %v4246_v5, %v12003_v48 }
 0x44d   : > { %v4103_v1 = vpop.permute.xlu0 %4102  ;;  %v4310_v26 = vsel %vm2000_vm5, %v4278_v22, %v12148_v21  ;;  %v15624_v21 = vld [vmem:[#allocation111_spill] sm:$0xff] }
 0x44e   : > { %v4405_v37 = vsel %vm2099_vm8, %v4373_v41, %v4103_v1  ;;  %6251 = vrot.lane.b32.xlu1 %v5391_v9, %s8742_s18  ;;  %v4183_v9 = vsel %vm375_vm1, %v8490_v50, %v15621_v16  ;;  %v4342_v48 = vsel %vm2033_vm6, %v4310_v26, %v3901_v34  ;;  %v12726_v41 = vpop.f32.mrf.mxu0  ;;  %v5280_v34 = vld [vmem:[%s8869_s17 + $0x188] sm:$0xff] }
 0x44f   : > { %5821 = vrot.lane.b32.xlu0 %v5324_v52, %s15467_s20  ;;  %8148 = vmatmul.mubr.msk.f32.gmra.mxu0 %vm2154_vm9, %v4405_v37  ;;  %v15622_v52 = vld [vmem:[#allocation26_spill] sm:$0xff]  ;;  %15623 = vst [vmem:[#allocation173_spill] sm:$0xff] %v12726_v41  ;;  %v15625_v37 = vld [vmem:[#allocation36_spill] sm:$0xff]  ;;  %v5278_v41 = vld [vmem:[%s8869_s17 + $0x168] sm:$0xff] }
 0x450   : > { %v4105_v11 = vpop.permute.xlu1 %4104  ;;  %4718 = vmatprep.mubr.f32.mxu0 %v15217_v61  ;;  %v4215_v36 = vsel %vm1901_vm2, %v4183_v9, %v15622_v52  ;;  %v5369_v50 = vld [vmem:[%s8869_s17 + $0x2c] sm:$0xff]  ;;  %v12742_v9 = vpop.f32.mrf.mxu0 }
 0x451   : > { %v4005_v12 = vpop.permute.xlu0 %4004  ;;  %v4247_v4 = vsel %vm1934_vm3, %v4215_v36, %v15624_v21  ;;  %15626 = vst [vmem:[#allocation124_spill] sm:$0xff] %v12742_v9 }
 0x452   : > { %v4374_v1 = vsel %vm2066_vm7, %v4342_v48, %v4005_v12  ;;  %5929 = vrot.lane.b32.xlu1 %v5380_v57, %s15495_s12  ;;  %v4279_v22 = vsel %vm1967_vm4, %v4247_v4, %v15625_v37  ;;  %v8491_v48 = vld [vmem:[%s8869_s17 + $0x182] sm:$0xff]  ;;  %v15627_v12 = vld [vmem:[#allocation70_spill] sm:$0xff]  ;;  %v15629_v37 = vld [vmem:[#allocation143_spill] sm:$0xff] }
 0x453   : > { %v4406_v5 = vsel %vm2099_vm8, %v4374_v1, %v4105_v11  ;;  %5459 = vrot.lane.b32.xlu0 %v5313_v2, %s15608_s23  ;;  %v4311_v57 = vsel %vm2000_vm5, %v4279_v22, %v12146_v56  ;;  %v5336_v2 = vld [vmem:[%s8869_s17 + $0x18e] sm:$0xff]  ;;  %v4184_v52 = vsel %vm375_vm1, %v8491_v48, %v15627_v12  ;;  %v5269_v56 = vld [vmem:[%s8869_s17 + $0xe0] sm:$0xff]  ;;  %v15628_v1 = vld [vmem:[#allocation107_spill] sm:$0xff]  ;;  %v12757_v22 = vpop.f32.mrf.mxu0 }
 0x454   : > { %8149 = vmatmul.mubr.msk.f32.gmra.mxu0 %vm2154_vm9, %v4406_v5  ;;  %v4007_v26 = vpop.permute.xlu1 %4006  ;;  %v4216_v21 = vsel %vm1901_vm2, %v4184_v52, %v15628_v1  ;;  %15630 = vst [vmem:[#allocation181_spill] sm:$0xff] %v12757_v22  ;;  %v5392_v48 = vld [vmem:[%s8869_s17 + $0x194] sm:$0xff]  ;;  %v5325_v52 = vld [vmem:[%s8869_s17 + $0xe6] sm:$0xff] }
 0x455   : > { %v3903_v16 = vpop.permute.xlu0 %3902  ;;  %4724 = vmatprep.mubr.f32.mxu0 %v15217_v61  ;;  %v15632_v12 = vld [vmem:[#allocation147_spill] sm:$0xff]  ;;  %v8492_v1 = vld [vmem:[%s8869_s17 + $0x18a] sm:$0xff] }
 0x456   : > { %v4343_v11 = vsel %vm2033_vm6, %v4311_v57, %v3903_v16  ;;  %6037 = vrot.lane.b32.xlu1 %v5280_v34, %s15520_s21  ;;  %v4248_v34 = vsel %vm1934_vm3, %v4216_v21, %v15629_v37  ;;  %v15631_v57 = vld [vmem:[#allocation84_spill] sm:$0xff]  ;;  %v15633_v21 = vld [vmem:[#allocation14_spill] sm:$0xff] }
 0x457   : > { %5587 = vrot.lane.b32.xlu0 %v5369_v50, %s15595_s16  ;;  %v4375_v4 = vsel %vm2066_vm7, %v4343_v11, %v4007_v26  ;;  %v4280_v16 = vsel %vm1967_vm4, %v4248_v34, %v15631_v57  ;;  %v12776_v34 = vpop.f32.mrf.mxu0  ;;  %v15636_v57 = vld [vmem:[#allocation32_spill] sm:$0xff] }
 0x458   : > { %v3905_v36 = vpop.permute.xlu1 %3904  ;;  %v4312_v26 = vsel %vm2000_vm5, %v4280_v16, %v15632_v12  ;;  %15635 = vst [vmem:[#allocation58_spill] sm:$0xff] %v12776_v34 }
 0x459   : > { %v4107_v5 = vpop.permute.xlu0 %4106 }
 0x45a   : > { %v4407_v50 = vsel %vm2099_vm8, %v4375_v4, %v4107_v5  ;;  %6145 = vrot.lane.b32.xlu1 %v5336_v2, %s15616_s8  ;;  %v4185_v2 = vsel %vm375_vm1, %v8492_v1, %v15633_v21  ;;  %v4344_v4 = vsel %vm2033_vm6, %v4312_v26, %v3905_v36  ;;  %v5381_v36 = vld [vmem:[%s8869_s17 + $0xec] sm:$0xff] }
 0x45b   : > { %5715 = vrot.lane.b32.xlu0 %v5269_v56, %s15362_s19  ;;  %8150 = vmatmul.mubr.msk.f32.gmra.mxu0 %vm2154_vm9, %v4407_v50  ;;  %v15634_v56 = vld [vmem:[#allocation75_spill] sm:$0xff]  ;;  %v15637_v26 = vld [vmem:[#allocation145_spill] sm:$0xff] }
 0x45c   : > { %v4109_v11 = vpop.permute.xlu1 %4108  ;;  %4730 = vmatprep.mubr.f32.mxu0 %v15217_v61  ;;  %v4217_v37 = vsel %vm1901_vm2, %v4185_v2, %v15634_v56  ;;  %v5314_v2 = vld [vmem:[%s8869_s17 + $0x2e] sm:$0xff]  ;;  %v12792_v56 = vpop.f32.mrf.mxu0 }
 0x45d   : > { %v4009_v5 = vpop.permute.xlu0 %4008  ;;  %v4249_v16 = vsel %vm1934_vm3, %v4217_v37, %v15636_v57  ;;  %15639 = vst [vmem:[#allocation51_spill] sm:$0xff] %v12792_v56  ;;  %v8493_v37 = vld [vmem:[%s8869_s17 + $0x1a2] sm:$0xff] }
 0x45e   : > { %v4376_v50 = vsel %vm2066_vm7, %v4344_v4, %v4009_v5  ;;  %6253 = vrot.lane.b32.xlu1 %v5392_v48, %s8742_s18  ;;  %v4281_v1 = vsel %vm1967_vm4, %v4249_v16, %v15637_v26  ;;  %v15638_v4 = vld [vmem:[#allocation40_spill] sm:$0xff] }
 0x45f   : > { %v4408_v12 = vsel %vm2099_vm8, %v4376_v50, %v4109_v11  ;;  %5823 = vrot.lane.b32.xlu0 %v5325_v52, %s15467_s20  ;;  %v4313_v48 = vsel %vm2000_vm5, %v4281_v1, %v15638_v4  ;;  %v5281_v52 = vld [vmem:[%s8869_s17 + $0x1a0] sm:$0xff]  ;;  %v15640_v50 = vld [vmem:[#allocation138_spill] sm:$0xff] }
 0x460   : > { %8151 = vmatmul.mubr.msk.f32.gmra.mxu0 %vm2154_vm9, %v4408_v12  ;;  %v4011_v21 = vpop.permute.xlu1 %4010  ;;  %v4186_v57 = vsel %vm375_vm1, %v8493_v37, %v15640_v50  ;;  %v5370_v12 = vld [vmem:[%s8869_s17 + $0x34] sm:$0xff]  ;;  %v15641_v26 = vld [vmem:[#allocation24_spill] sm:$0xff] }
 0x461   : > { %v3907_v5 = vpop.permute.xlu0 %3906  ;;  %4736 = vmatprep.mubr.f32.mxu0 %v15217_v61  ;;  %v4218_v1 = vsel %vm1901_vm2, %v4186_v57, %v15641_v26  ;;  %v15644_v37 = vld [vmem:[#allocation116_spill] sm:$0xff]  ;;  %v15645_v26 = vld [vmem:[#allocation167_spill] sm:$0xff] }
 0x462   : > { %v4345_v11 = vsel %vm2033_vm6, %v4313_v48, %v3907_v5  ;;  %5931 = vrot.lane.b32.xlu1 %v5381_v36, %s15495_s12  ;;  %v15642_v5 = vld [vmem:[#allocation163_spill] sm:$0xff]  ;;  %v5337_v57 = vld [vmem:[%s8869_s17 + $0x1a6] sm:$0xff] }
 0x463   : > { %5461 = vrot.lane.b32.xlu0 %v5314_v2, %s15608_s23  ;;  %v4377_v4 = vsel %vm2066_vm7, %v4345_v11, %v4011_v21  ;;  %v4250_v36 = vsel %vm1934_vm3, %v4218_v1, %v15642_v5  ;;  %v12807_v2 = vpop.f32.mrf.mxu0  ;;  %v5270_v1 = vld [vmem:[%s8869_s17 + $0xe8] sm:$0xff] }
 0x464   : > { %v3909_v16 = vpop.permute.xlu1 %3908  ;;  %15643 = vst [vmem:[#allocation156_spill] sm:$0xff] %v12807_v2  ;;  %v4282_v50 = vsel %vm1967_vm4, %v4250_v36, %v15644_v37 }
 0x465   : > { %v4111_v48 = vpop.permute.xlu0 %4110  ;;  %v4314_v21 = vsel %vm2000_vm5, %v4282_v50, %v15645_v26  ;;  %v12826_v37 = vpop.f32.mrf.mxu0  ;;  %v15649_v50 = vld [vmem:[#allocation82_spill] sm:$0xff] }
 0x466   : > { %v4409_v34 = vsel %vm2099_vm8, %v4377_v4, %v4111_v48  ;;  %6039 = vrot.lane.b32.xlu1 %v5281_v52, %s15520_s21  ;;  %v8494_v4 = vld [vmem:[%s8869_s17 + $0x1aa] sm:$0xff]  ;;  %v4346_v5 = vsel %vm2033_vm6, %v4314_v21, %v3909_v16  ;;  %15648 = vst [vmem:[#allocation91_spill] sm:$0xff] %v12826_v37 }
 0x467   : > { %5589 = vrot.lane.b32.xlu0 %v5370_v12, %s15595_s16  ;;  %8152 = vmatmul.mubr.msk.f32.gmra.mxu0 %vm2154_vm9, %v4409_v34  ;;  %v15646_v48 = vld [vmem:[#allocation102_spill] sm:$0xff]  ;;  %v15647_v12 = vld [vmem:[#allocation25_spill] sm:$0xff] }
 0x468   : > { %v4113_v11 = vpop.permute.xlu1 %4112  ;;  %4742 = vmatprep.mubr.f32.mxu0 %v15217_v61  ;;  %v4187_v52 = vsel %vm375_vm1, %v8494_v4, %v15646_v48  ;;  %v5393_v16 = vld [vmem:[%s8869_s17 + $0x1ac] sm:$0xff] }
 0x469   : > { %v4013_v36 = vpop.permute.xlu0 %4012  ;;  %v4219_v34 = vsel %vm1901_vm2, %v4187_v52, %v15647_v12  ;;  %v15650_v21 = vld [vmem:[#allocation165_spill] sm:$0xff]  ;;  %v12842_v12 = vpop.f32.mrf.mxu0 }
 0x46a   : > { %v4378_v2 = vsel %vm2066_vm7, %v4346_v5, %v4013_v36  ;;  %6147 = vrot.lane.b32.xlu1 %v5337_v57, %s15616_s8  ;;  %v4251_v26 = vsel %vm1934_vm3, %v4219_v34, %v15649_v50  ;;  %v5326_v52 = vld [vmem:[%s8869_s17 + $0xee] sm:$0xff]  ;;  %15652 = vst [vmem:[#allocation176_spill] sm:$0xff] %v12842_v12 }
 0x46b   : > { %v4410_v9 = vsel %vm2099_vm8, %v4378_v2, %v4113_v11  ;;  %5717 = vrot.lane.b32.xlu0 %v5270_v1, %s15362_s19  ;;  %v4283_v4 = vsel %vm1967_vm4, %v4251_v26, %v15650_v21  ;;  %v15651_v5 = vld [vmem:[#allocation86_spill] sm:$0xff]  ;;  %v8495_v1 = vld [vmem:[%s8869_s17 + $0x1c2] sm:$0xff]  ;;  %v12859_v12 = vpop.f32.mrf.mxu0 }
 0x46c   : > { %8153 = vmatmul.mubr.msk.f32.gmra.mxu0 %vm2154_vm9, %v4410_v9  ;;  %v4015_v48 = vpop.permute.xlu1 %4014  ;;  %v4315_v57 = vsel %vm2000_vm5, %v4283_v4, %v15651_v5  ;;  %v5382_v11 = vld [vmem:[%s8869_s17 + $0xf4] sm:$0xff]  ;;  %v15653_v9 = vld [vmem:[#allocation69_spill] sm:$0xff]  ;;  %15656 = vst [vmem:[#allocation123_spill] sm:$0xff] %v12859_v12 }
 0x46d   : > { %v3911_v36 = vpop.permute.xlu0 %3910  ;;  %4748 = vmatprep.mubr.f32.mxu0 %v15217_v61  ;;  %v4188_v34 = vsel %vm375_vm1, %v8495_v1, %v15653_v9  ;;  %v5315_v26 = vld [vmem:[%s8869_s17 + $0x46] sm:$0xff]  ;;  %v15654_v21 = vld [vmem:[#allocation110_spill] sm:$0xff]  ;;  %v12880_v24 = vpop.f32.mrf.mxu0 }
 0x46e   : > { %v4347_v2 = vsel %vm2033_vm6, %v4315_v57, %v3911_v36  ;;  %6255 = vrot.lane.b32.xlu1 %v5393_v16, %s8742_s18  ;;  %v4220_v4 = vsel %vm1901_vm2, %v4188_v34, %v15654_v21  ;;  %v15655_v36 = vld [vmem:[#allocation135_spill] sm:$0xff]  ;;  %v15657_v1 = vld [vmem:[#allocation42_spill] sm:$0xff]  ;;  %15662 = vst [vmem:[#allocation57_spill] sm:$0xff] %v12880_v24 }
 0x46f   : > { %5825 = vrot.lane.b32.xlu0 %v5326_v52, %s15467_s20  ;;  %v4379_v5 = vsel %vm2066_vm7, %v4347_v2, %v4015_v48  ;;  %v4252_v16 = vsel %vm1934_vm3, %v4220_v4, %v15655_v36  ;;  %v12857_v52 = vpop.f32.mrf.mxu1  ;;  %v5282_v48 = vld [vmem:[%s8869_s17 + $0x1a8] sm:$0xff]  ;;  %v15658_v2 = vld [vmem:[#allocation46_spill] sm:$0xff] }
 0x470   : > { %v3913_v50 = vpop.permute.xlu1 %3912  ;;  %v4284_v9 = vsel %vm1967_vm4, %v4252_v16, %v15657_v1  ;;  %v5371_v4 = vld [vmem:[%s8869_s17 + $0x4c] sm:$0xff] }
 0x471   : > { %v4115_v57 = vpop.permute.xlu0 %4114  ;;  %v4316_v34 = vsel %vm2000_vm5, %v4284_v9, %v15658_v2  ;;  %v8496_v36 = vld [vmem:[%s8869_s17 + $0x1ca] sm:$0xff]  ;;  %v12878_v1 = vpop.f32.mrf.mxu1 }
 0x472   : > { %v4411_v39 = vsel %vm2099_vm8, %v4379_v5, %v4115_v57  ;;  %5933 = vrot.lane.b32.xlu1 %v5382_v11, %s15495_s12  ;;  %v15659_v5 = vld [vmem:[#allocation13_spill] sm:$0xff]  ;;  %v4348_v57 = vsel %vm2033_vm6, %v4316_v34, %v3913_v50  ;;  %15661 = vst [vmem:[#allocation183_spill] sm:$0xff] %v12878_v1  ;;  %v15663_v2 = vld [vmem:[#allocation114_spill] sm:$0xff]  ;;  %v15664_v34 = vld [vmem:[#allocation136_spill] sm:$0xff] }
 0x473   : > { %5463 = vrot.lane.b32.xlu0 %v5315_v26, %s15608_s23  ;;  %8154 = vmatmul.mubr.msk.f32.gmra.mxu0 %vm2154_vm9, %v4411_v39  ;;  %v4189_v11 = vsel %vm375_vm1, %v8496_v36, %v15659_v5  ;;  %v15660_v26 = vld [vmem:[#allocation78_spill] sm:$0xff] }
 0x474   : > { %v4117_v21 = vpop.permute.xlu1 %4116  ;;  %4754 = vmatprep.mubr.f32.mxu0 %v15217_v61  ;;  %v4221_v39 = vsel %vm1901_vm2, %v4189_v11, %v15660_v26  ;;  %v5338_v50 = vld [vmem:[%s8869_s17 + $0x1ae] sm:$0xff] }
 0x475   : > { %v4017_v16 = vpop.permute.xlu0 %4016  ;;  %v4253_v47 = vsel %vm1934_vm3, %v4221_v39, %v15663_v2  ;;  %v12896_v39 = vpop.f32.mrf.mxu1  ;;  %v15667_v2 = vld [vmem:[#allocation137_spill] sm:$0xff] }
 0x476   : > { %v4380_v9 = vsel %vm2066_vm7, %v4348_v57, %v4017_v16  ;;  %6041 = vrot.lane.b32.xlu1 %v5282_v48, %s15520_s21  ;;  %v4285_v5 = vsel %vm1967_vm4, %v4253_v47, %v15664_v34  ;;  %v5271_v57 = vld [vmem:[%s8869_s17 + $0x100] sm:$0xff]  ;;  %v15665_v16 = vld [vmem:[#allocation118_spill] sm:$0xff] }
 0x477   : > { %v4412_v36 = vsel %vm2099_vm8, %v4380_v9, %v4117_v21  ;;  %5591 = vrot.lane.b32.xlu0 %v5371_v4, %s15595_s16  ;;  %v4317_v48 = vsel %vm2000_vm5, %v4285_v5, %v15665_v16  ;;  %v12898_v21 = vpop.f32.mrf.mxu0  ;;  %v5394_v47 = vld [vmem:[%s8869_s17 + $0x1b4] sm:$0xff]  ;;  %v8497_v9 = vld [vmem:[%s8869_s17 + $0x1e2] sm:$0xff] }
 0x478   : > { %8155 = vmatmul.mubr.msk.f32.gmra.mxu0 %vm2154_vm9, %v4412_v36  ;;  %v4019_v11 = vpop.permute.xlu1 %4018  ;;  %15666 = vst [vmem:[#allocation56_spill] sm:$0xff] %v12898_v21  ;;  %v4190_v36 = vsel %vm375_vm1, %v8497_v9, %v15667_v2  ;;  %v5327_v5 = vld [vmem:[%s8869_s17 + $0x106] sm:$0xff]  ;;  %v15668_v16 = vld [vmem:[#allocation30_spill] sm:$0xff] }
 0x479   : > { %v3915_v26 = vpop.permute.xlu0 %3914  ;;  %4760 = vmatprep.mubr.f32.mxu0 %v15217_v61  ;;  %v4222_v24 = vsel %vm1901_vm2, %v4190_v36, %v15668_v16  ;;  %v15672_v9 = vld [vmem:[#allocation148_spill] sm:$0xff]  ;;  %v5316_v36 = vld [vmem:[%s8869_s17 + $0x4e] sm:$0xff] }
 0x47a   : > { %v4349_v4 = vsel %vm2033_vm6, %v4317_v48, %v3915_v26  ;;  %6149 = vrot.lane.b32.xlu1 %v5338_v50, %s15616_s8  ;;  %v15669_v48 = vld [vmem:[#allocation31_spill] sm:$0xff]  ;;  %v12915_v26 = vpop.f32.mrf.mxu0  ;;  %v15673_v16 = vld [vmem:[#allocation101_spill] sm:$0xff] }
 0x47b   : > { %5719 = vrot.lane.b32.xlu0 %v5271_v57, %s15362_s19  ;;  %v4381_v1 = vsel %vm2066_vm7, %v4349_v4, %v4019_v11  ;;  %v4254_v50 = vsel %vm1934_vm3, %v4222_v24, %v15669_v48  ;;  %v12913_v57 = vpop.f32.mrf.mxu1  ;;  %15671 = vst [vmem:[#allocation94_spill] sm:$0xff] %v12915_v26  ;;  %v5383_v11 = vld [vmem:[%s8869_s17 + $0x10c] sm:$0xff] }
 0x47c   : > { %v3917_v34 = vpop.permute.xlu1 %3916  ;;  %15670 = vst [vmem:[#allocation155_spill] sm:$0xff] %v12913_v57  ;;  %v4286_v2 = vsel %vm1967_vm4, %v4254_v50, %v15672_v9  ;;  %v5330_v57 = vld [vmem:[%s8869_s17 + $0x12e] sm:$0xff] }
 0x47d   : > { %v4119_v3 = vpop.permute.xlu0 %4118  ;;  %v4318_v24 = vsel %vm2000_vm5, %v4286_v2, %v12183_v43  ;;  %v15675_v43 = vld [vmem:[#allocation131_spill] sm:$0xff]  ;;  %v5332_v12 = vld [vmem:[%s8869_s17 + $0x14e] sm:$0xff] }
 0x47e   : > { %v4413_v49 = vsel %vm2099_vm8, %v4381_v1, %v4119_v3  ;;  %6257 = vrot.lane.b32.xlu1 %v5394_v47, %s8742_s18  ;;  %v4350_v3 = vsel %vm2033_vm6, %v4318_v24, %v3917_v34  ;;  %v8498_v47 = vld [vmem:[%s8869_s17 + $0x1ea] sm:$0xff]  ;;  %v5283_v34 = vld [vmem:[%s8869_s17 + $0x1c0] sm:$0xff] }
 0x47f   : > { %5827 = vrot.lane.b32.xlu0 %v5327_v5, %s15467_s20  ;;  %8156 = vmatmul.mubr.msk.f32.gmra.mxu0 %vm2154_vm9, %v4413_v49  ;;  %v4191_v48 = vsel %vm375_vm1, %v8498_v47, %v15673_v16  ;;  %v12932_v5 = vpop.f32.mrf.mxu1  ;;  %v12934_v49 = vpop.f32.mrf.mxu0  ;;  %v15676_v24 = vld [vmem:[#allocation38_spill] sm:$0xff] }
 0x480   : > { %v4121_v4 = vpop.permute.xlu1 %4120  ;;  %4766 = vmatprep.mubr.f32.mxu0 %v15217_v61  ;;  %15674 = vst [vmem:[#allocation175_spill] sm:$0xff] %v12934_v49  ;;  %v4223_v9 = vsel %vm1901_vm2, %v4191_v48, %v15675_v43 }
 0x481   : > { %v4021_v1 = vpop.permute.xlu0 %4020  ;;  %v4255_v47 = vsel %vm1934_vm3, %v4223_v9, %v15676_v24  ;;  %v12950_v48 = vpop.f32.mrf.mxu1  ;;  %v5272_v9 = vld [vmem:[%s8869_s17 + $0x108] sm:$0xff] }
 0x482   : > { %v4382_v50 = vsel %vm2066_vm7, %v4350_v3, %v4021_v1  ;;  %5935 = vrot.lane.b32.xlu1 %v5383_v11, %s15495_s12  ;;  %v5372_v3 = vld [vmem:[%s8869_s17 + $0x54] sm:$0xff]  ;;  %15678 = vst [vmem:[#allocation126_spill] sm:$0xff] %v12950_v48 }
 0x483   : > { %v4414_v2 = vsel %vm2099_vm8, %v4382_v50, %v4121_v4  ;;  %5465 = vrot.lane.b32.xlu0 %v5316_v36, %s15608_s23  ;;  %v15677_v1 = vld [vmem:[#allocation35_spill] sm:$0xff]  ;;  %v12952_v4 = vpop.f32.mrf.mxu0  ;;  %v5339_v50 = vld [vmem:[%s8869_s17 + $0x1c6] sm:$0xff]  ;;  %v12963_v7 = vpop.f32.mrf.mxu1 }
 0x484   : > { %8157 = vmatmul.mubr.msk.f32.gmra.mxu0 %vm2154_vm9, %v4414_v2  ;;  %v3919_v16 = vpop.permute.xlu1 %3918  ;;  %v4287_v11 = vsel %vm1967_vm4, %v4255_v47, %v15677_v1  ;;  %15679 = vst [vmem:[#allocation182_spill] sm:$0xff] %v12952_v4  ;;  %v8499_v47 = vld [vmem:[%s8869_s17 + $0x202] sm:$0xff] }
 0x485   : > { %v3815_v26 = vpop.permute.xlu0 %3814  ;;  %4772 = vmatprep.mubr.f32.mxu0 %v15217_v61  ;;  %v15680_v1 = vld [vmem:[#allocation104_spill] sm:$0xff]  ;;  %v12965_v4 = vpop.f32.mrf.mxu0 }
 0x486   : > { %v4319_v36 = vsel %vm2000_vm5, %v4287_v11, %v3815_v26  ;;  %6043 = vrot.lane.b32.xlu1 %v5283_v34, %s15520_s21  ;;  %v4192_v23 = vsel %vm375_vm1, %v8499_v47, %v15680_v1  ;;  %15681 = vst [vmem:[#allocation62_spill] sm:$0xff] %v12965_v4  ;;  %v15682_v34 = vld [vmem:[#allocation142_spill] sm:$0xff]  ;;  %v5331_v4 = vld [vmem:[%s8869_s17 + $0x146] sm:$0xff] }
 0x487   : > { %5593 = vrot.lane.b32.xlu0 %v5372_v3, %s15595_s16  ;;  %v4351_v2 = vsel %vm2033_vm6, %v4319_v36, %v3919_v16  ;;  %v4224_v3 = vsel %vm1901_vm2, %v4192_v23, %v15682_v34  ;;  %v5395_v16 = vld [vmem:[%s8869_s17 + $0x1cc] sm:$0xff]  ;;  %v12981_v23 = vpop.f32.mrf.mxu1 }
 0x488   : > { %v4123_v43 = vpop.permute.xlu1 %4122  ;;  %v15683_v36 = vld [vmem:[#allocation81_spill] sm:$0xff]  ;;  %15685 = vst [vmem:[#allocation55_spill] sm:$0xff] %v12981_v23 }
 0x489   : > { %v4023_v24 = vpop.permute.xlu0 %4022  ;;  %v4256_v47 = vsel %vm1934_vm3, %v4224_v3, %v15683_v36  ;;  %v5317_v3 = vld [vmem:[%s8869_s17 + $0x66] sm:$0xff]  ;;  %v12994_v45 = vpop.f32.mrf.mxu1 }
 0x48a   : > { %v4383_v26 = vsel %vm2066_vm7, %v4351_v2, %v4023_v24  ;;  %6151 = vrot.lane.b32.xlu1 %v5339_v50, %s15616_s8  ;;  %v5328_v2 = vld [vmem:[%s8869_s17 + $0x10e] sm:$0xff]  ;;  %v15684_v24 = vld [vmem:[#allocation168_spill] sm:$0xff] }
 0x48b   : > { %v4415_v11 = vsel %vm2099_vm8, %v4383_v26, %v4123_v43  ;;  %5721 = vrot.lane.b32.xlu0 %v5272_v9, %s15362_s19  ;;  %v4288_v50 = vsel %vm1967_vm4, %v4256_v47, %v15684_v24  ;;  %v12983_v43 = vpop.f32.mrf.mxu0  ;;  %v5384_v26 = vld [vmem:[%s8869_s17 + $0x114] sm:$0xff]  ;;  %v8500_v47 = vld [vmem:[%s8869_s17 + $0x20a] sm:$0xff]  ;;  %v15687_v24 = vld [vmem:[#allocation72_spill] sm:$0xff] }
 0x48c   : > { %8158 = vmatmul.mubr.msk.f32.gmra.mxu0 %vm2154_vm9, %v4415_v11  ;;  %v3921_v1 = vpop.permute.xlu1 %3920  ;;  %15686 = vst [vmem:[#allocation158_spill] sm:$0xff] %v12983_v43  ;;  %v4193_v32 = vsel %vm375_vm1, %v8500_v47, %v15687_v24  ;;  %v5397_v23 = vld [vmem:[%s8869_s17 + $0x1ec] sm:$0xff] }
 0x48d   : > { %v3817_v55 = vpop.permute.xlu0 %3816  ;;  %4778 = vmatprep.mubr.f32.mxu0 %v15217_v61  ;;  %v12996_v43 = vpop.f32.mrf.mxu0 }
 0x48e   : > { %v4320_v9 = vsel %vm2000_vm5, %v4288_v50, %v3817_v55  ;;  %6259 = vrot.lane.b32.xlu1 %v5395_v16, %s8742_s18  ;;  %15688 = vst [vmem:[#allocation93_spill] sm:$0xff] %v12996_v43  ;;  %v15689_v16 = vld [vmem:[#allocation23_spill] sm:$0xff] }
 0x48f   : > { %5829 = vrot.lane.b32.xlu0 %v5328_v2, %s15467_s20  ;;  %v4352_v11 = vsel %vm2033_vm6, %v4320_v9, %v3921_v1  ;;  %v4225_v2 = vsel %vm1901_vm2, %v4193_v32, %v15689_v16  ;;  %v5284_v1 = vld [vmem:[%s8869_s17 + $0x1c8] sm:$0xff]  ;;  %v15690_v9 = vld [vmem:[#allocation146_spill] sm:$0xff]  ;;  %v13012_v32 = vpop.f32.mrf.mxu1 }
 0x490   : > { %v4125_v34 = vpop.permute.xlu1 %4124  ;;  %v4257_v47 = vsel %vm1934_vm3, %v4225_v2, %v15690_v9  ;;  %15692 = vst [vmem:[#allocation178_spill] sm:$0xff] %v13012_v32  ;;  %v5273_v2 = vld [vmem:[%s8869_s17 + $0x120] sm:$0xff]  ;;  %v8502_v32 = vld [vmem:[%s8869_s17 + $0x22a] sm:$0xff] }
 0x491   : > { %v4025_v36 = vpop.permute.xlu0 %4024  ;;  %v13025_v6 = vpop.f32.mrf.mxu1 }
 0x492   : > { %v4384_v55 = vsel %vm2066_vm7, %v4352_v11, %v4025_v36  ;;  %5937 = vrot.lane.b32.xlu1 %v5384_v26, %s15495_s12  ;;  %v5373_v11 = vld [vmem:[%s8869_s17 + $0x6c] sm:$0xff]  ;;  %v15691_v36 = vld [vmem:[#allocation83_spill] sm:$0xff] }
 0x493   : > { %v4416_v50 = vsel %vm2099_vm8, %v4384_v55, %v4125_v34  ;;  %5467 = vrot.lane.b32.xlu0 %v5317_v3, %s15608_s23  ;;  %v4289_v26 = vsel %vm1967_vm4, %v4257_v47, %v15691_v36  ;;  %v13014_v34 = vpop.f32.mrf.mxu0  ;;  %v5340_v55 = vld [vmem:[%s8869_s17 + $0x1ce] sm:$0xff]  ;;  %v8501_v47 = vld [vmem:[%s8869_s17 + $0x222] sm:$0xff]  ;;  %v15694_v36 = vld [vmem:[#allocation71_spill] sm:$0xff] }
 0x494   : > { %8159 = vmatmul.mubr.msk.f32.gmra.mxu0 %vm2154_vm9, %v4416_v50  ;;  %v3923_v24 = vpop.permute.xlu1 %3922  ;;  %15693 = vst [vmem:[#allocation125_spill] sm:$0xff] %v13014_v34  ;;  %v4194_v13 = vsel %vm375_vm1, %v8501_v47, %v15694_v36 }
 0x495   : > { %v3819_v29 = vpop.permute.xlu0 %3818  ;;  %4784 = vmatprep.mubr.f32.mxu0 %v15217_v61  ;;  %v13027_v34 = vpop.f32.mrf.mxu0 }
 0x496   : > { %v4321_v3 = vsel %vm2000_vm5, %v4289_v26, %v3819_v29  ;;  %6045 = vrot.lane.b32.xlu1 %v5284_v1, %s15520_s21  ;;  %15695 = vst [vmem:[#allocation185_spill] sm:$0xff] %v13027_v34  ;;  %v15696_v1 = vld [vmem:[#allocation162_spill] sm:$0xff]  ;;  %v15709_v34 = vld [vmem:[#allocation115_spill] sm:$0xff] }
 0x497   : > { %5595 = vrot.lane.b32.xlu0 %v5373_v11, %s15595_s16  ;;  %v4353_v50 = vsel %vm2033_vm6, %v4321_v3, %v3923_v24  ;;  %v4226_v11 = vsel %vm1901_vm2, %v4194_v13, %v15696_v1  ;;  %v5396_v24 = vld [vmem:[%s8869_s17 + $0x1d4] sm:$0xff]  ;;  %v15697_v3 = vld [vmem:[#allocation113_spill] sm:$0xff]  ;;  %v13043_v13 = vpop.f32.mrf.mxu1 }
 0x498   : > { %v4127_v16 = vpop.permute.xlu1 %4126  ;;  %v4258_v47 = vsel %vm1934_vm3, %v4226_v11, %v15697_v3  ;;  %15699 = vst [vmem:[#allocation61_spill] sm:$0xff] %v13043_v13  ;;  %v5318_v11 = vld [vmem:[%s8869_s17 + $0x6e] sm:$0xff] }
 0x499   : > { %v4027_v9 = vpop.permute.xlu0 %4026  ;;  %v5274_v13 = vld [vmem:[%s8869_s17 + $0x128] sm:$0xff] }
 0x49a   : > { %v4385_v29 = vsel %vm2066_vm7, %v4353_v50, %v4027_v9  ;;  %6153 = vrot.lane.b32.xlu1 %v5340_v55, %s15616_s8  ;;  %v15698_v50 = vld [vmem:[#allocation41_spill] sm:$0xff] }
 0x49b   : > { %v4417_v26 = vsel %vm2099_vm8, %v4385_v29, %v4127_v16  ;;  %5723 = vrot.lane.b32.xlu0 %v5273_v2, %s15362_s19  ;;  %v4290_v55 = vsel %vm1967_vm4, %v4258_v47, %v15698_v50  ;;  %v13045_v16 = vpop.f32.mrf.mxu0  ;;  %v5385_v29 = vld [vmem:[%s8869_s17 + $0x12c] sm:$0xff]  ;;  %v13053_v47 = vpop.f32.mrf.mxu1 }
 0x49c   : > { %8160 = vmatmul.mubr.msk.f32.gmra.mxu0 %vm2154_vm9, %v4417_v26  ;;  %v3925_v36 = vpop.permute.xlu1 %3924  ;;  %15700 = vst [vmem:[#allocation60_spill] sm:$0xff] %v13045_v16 }
 0x49d   : > { %v3821_v9 = vpop.permute.xlu0 %3820  ;;  %4790 = vmatprep.mubr.f32.mxu0 %v15217_v61  ;;  %v13055_v50 = vpop.f32.mrf.mxu0 }
 0x49e   : > { %v4322_v2 = vsel %vm2000_vm5, %v4290_v55, %v3821_v9  ;;  %6261 = vrot.lane.b32.xlu1 %v5396_v24, %s8742_s18  ;;  %15701 = vst [vmem:[#allocation157_spill] sm:$0xff] %v13055_v50  ;;  %v5374_v9 = vld [vmem:[%s8869_s17 + $0x74] sm:$0xff] }
 0x49f   : > { %5831 = vrot.lane.b32.xlu0 %v5329_v54, %s15467_s20  ;;  %v4354_v26 = vsel %vm2033_vm6, %v4322_v2, %v3925_v36  ;;  %v5285_v54 = vld [vmem:[%s8869_s17 + $0x1e0] sm:$0xff] }
 0x4a0   : > { %v4129_v1 = vpop.permute.xlu1 %4128  ;;  %v8128_v36 = vld [vmem:[%s14957_s4 + $0x1] ss:$4 sm:$0x3] }
 0x4a1   : > { %v4029_v3 = vpop.permute.xlu0 %4028 }
 0x4a2   : > { %v4386_v8 = vsel %vm2066_vm7, %v4354_v26, %v4029_v3  ;;  %5939 = vrot.lane.b32.xlu1 %v5385_v29, %s15495_s12  ;;  %v13070_v29 = vpop.f32.mrf.mxu1  ;;  %v15705_v26 = vld [vmem:[#allocation16_spill] sm:$0xff] }
 0x4a3   : > { %v4418_v24 = vsel %vm2099_vm8, %v4386_v8, %v4129_v1  ;;  %5469 = vrot.lane.b32.xlu0 %v5318_v11, %s15608_s23  ;;  %15702 = vst [vmem:[#allocation96_spill] sm:$0xff] %v13070_v29  ;;  %v13072_v8 = vpop.f32.mrf.mxu0  ;;  %v15704_v1 = vld [vmem:[#allocation140_spill] sm:$0xff]  ;;  %v13080_v3 = vrot.slane %v8128_v36, %v15705_v26 }
 0x4a4   : > { %8161 = vmatmul.mubr.msk.f32.gmra.mxu0 %vm2154_vm9, %v4418_v24  ;;  %v13066_v55 = vpop.permute.xlu1 %5455  ;;  %15703 = vst [vmem:[#allocation177_spill] sm:$0xff] %v13072_v8  ;;  %v13076_v11 = vrot.slane %v8128_v36, %v15704_v1  ;;  %v5341_v24 = vld [vmem:[%s8869_s17 + $0x1e6] sm:$0xff]  ;;  %v13086_v51 = vpop.f32.mrf.mxu1 }
 0x4a5   : > { %v3823_v2 = vpop.permute.xlu0 %3822  ;;  %4796 = vmatprep.mubr.f32.mxu0 %v15217_v61 }
 0x4a6   : > { %6047 = vrot.lane.b32.xlu1 %v5285_v54, %s15520_s21 }
 0x4a7   : > { %5597 = vrot.lane.b32.xlu0 %v5374_v9, %s15595_s16  ;;  %v4195_v9 = vsel %vm375_vm1, %v8502_v32, %v15706_v0  ;;  %v13103_v32 = vpop.f32.mrf.mxu1 }
 0x4a8   : > { %v4612_v16 = vpop.f32.mrf.mxu0  ;;  %v13083_v53 = vpop.permute.xlu1 %5583  ;;  %v4227_v48 = vsel %vm1901_vm2, %v4195_v9, %v15707_v38  ;;  %15710 = vst [vmem:[#allocation128_spill] sm:$0xff] %v13103_v32  ;;  %v5386_v9 = vld [vmem:[%s8869_s17 + $0x134] sm:$0xff] }
 0x4a9   : > { %v3927_v29 = vpop.permute.xlu0 %3926  ;;  %v4613_v54 = vadd.f32 %v4612_v16, %v13076_v11  ;;  %v4259_v16 = vsel %vm1934_vm3, %v4227_v48, %v15708_v33  ;;  %v13113_v32 = vpop.f32.mrf.mxu1 }
 0x4aa   : > { %v4614_v8 = vpop.f32.mrf.mxu0  ;;  %6155 = vrot.lane.b32.xlu1 %v5341_v24, %s15616_s8  ;;  %v4291_v0 = vsel %vm1967_vm4, %v4259_v16, %v15709_v34 }
 0x4ab   : > { %v4615_v36 = vadd.f32 %v4614_v8, %v13080_v3  ;;  %5725 = vrot.lane.b32.xlu0 %v5274_v13, %s15362_s19  ;;  %v4803_v8 = vmax.f32 %v4613_v54, 0.0  ;;  %v4323_v13 = vsel %vm2000_vm5, %v4291_v0, %v3823_v2 }
 0x4ac   : > { %v5712_v60 = vpop.permute.xlu1 %5711  ;;  %v4355_v33 = vsel %vm2033_vm6, %v4323_v13, %v3927_v29  ;;  %v5286_v29 = vld [vmem:[%s8869_s17 + $0x1e8] sm:$0xff] }
 0x4ad   : > { %v4804_v24 = vmax.f32 %v4615_v36, 0.0  ;;  %v4031_v50 = vpop.permute.xlu0 %4030  ;;  %v5319_v36 = vld [vmem:[%s8869_s17 + $0x86] sm:$0xff] }
 0x4ae   : > { %6263 = vrot.lane.b32.xlu1 %v5397_v23, %s8742_s18  ;;  %v4387_v34 = vsel %vm2066_vm7, %v4355_v33, %v4031_v50  ;;  %v13125_v33 = vpop.f32.mrf.mxu1 }
 0x4af   : > { %5833 = vrot.lane.b32.xlu0 %v5330_v57, %s15467_s20  ;;  %v4618_v38 = vpop.f32.mrf.mxu0  ;;  %4996 = vmatprep.mubr.f32.mxu1 %v4804_v24  ;;  %15711 = vst [vmem:[#allocation184_spill] sm:$0xff] %v13125_v33 }
 0x4b0   : > { %4997 = vmatmul.mubr.f32.vlgmr.msra.gmra.mxu1 %v4803_v8  ;;  %v5820_v48 = vpop.permute.xlu1 %5819  ;;  %v4619_v54 = vadd.f32 %v4618_v38, %v13076_v11  ;;  %v5375_v8 = vld [vmem:[%s8869_s17 + $0x8c] sm:$0xff]  ;;  %v13136_v33 = vpop.f32.mrf.mxu1 }
 0x4b1   : > { %v4131_v16 = vpop.permute.xlu0 %4130  ;;  %v4620_v23 = vpop.f32.mrf.mxu0  ;;  %15712 = vst [vmem:[#allocation66_spill] sm:$0xff] %v13136_v33 }
 0x4b2   : > { %v4419_v57 = vsel %vm2099_vm8, %v4387_v34, %v4131_v16  ;;  %v4621_v2 = vadd.f32 %v4620_v23, %v13080_v3  ;;  %5941 = vrot.lane.b32.xlu1 %v5386_v9, %s15495_s12  ;;  %v4805_v13 = vmax.f32 %v4619_v54, 0.0  ;;  %v5342_v23 = vld [vmem:[%s8869_s17 + $0x1ee] sm:$0xff]  ;;  %v5275_v54 = vld [vmem:[%s8869_s17 + $0x140] sm:$0xff]  ;;  %v13149_v49 = vpop.f32.mrf.mxu1 }
 0x4b3   : > { %5471 = vrot.lane.b32.xlu0 %v5319_v36, %s15608_s23  ;;  %8162 = vmatmul.mubr.msk.f32.gmra.mxu0 %vm2154_vm9, %v4419_v57  ;;  %v5255_v36 = vld [vmem:[%s8869_s17] sm:$0xff]  ;;  %15713 = vst [vmem:[#allocation59_spill] sm:$0xff] %v13149_v49 }
 0x4b4   : > { %v4806_v24 = vmax.f32 %v4621_v2, 0.0  ;;  %v4624_v50 = vpop.f32.mrf.mxu0  ;;  %v5928_v0 = vpop.permute.xlu1 %5927  ;;  %6793 = vmatprep.mubr.f32.mxu0 %v15217_v61 }
 0x4b5   : > { %v13123_v38 = vpop.permute.xlu0 %5457  ;;  %v4625_v9 = vadd.f32 %v4624_v50, %v13076_v11 }
 0x4b6   : > { %v4626_v34 = vpop.f32.mrf.mxu0  ;;  %5002 = vmatprep.mubr.f32.mxu1 %v4806_v24  ;;  %6049 = vrot.lane.b32.xlu1 %v5286_v29, %s15520_s21  ;;  %v6347_v24 = vsel %vm375_vm1, %v5255_v36, %v13066_v55 }
 0x4b7   : > { %v4627_v16 = vadd.f32 %v4626_v34, %v13080_v3  ;;  %5599 = vrot.lane.b32.xlu0 %v5375_v8, %s15595_s16  ;;  %5003 = vmatmul.mubr.f32.gmra.mxu1 %v4805_v13  ;;  %v4807_v29 = vmax.f32 %v4625_v9, 0.0  ;;  %v6379_v50 = vsel %vm1901_vm2, %v6347_v24, %v13083_v53  ;;  %v5398_v13 = vld [vmem:[%s8869_s17 + $0x1f4] sm:$0xff] }
 0x4b8   : > { %v6036_v57 = vpop.permute.xlu1 %6035  ;;  %v6411_v34 = vsel %vm1934_vm3, %v6379_v50, %v5712_v60 }
 0x4b9   : > { %v4808_v2 = vmax.f32 %v4627_v16, 0.0  ;;  %v13134_v43 = vpop.permute.xlu0 %5585  ;;  %v6443_v55 = vsel %vm1967_vm4, %v6411_v34, %v5820_v48 }
 0x4ba   : > { %6157 = vrot.lane.b32.xlu1 %v5342_v23, %s15616_s8  ;;  %v6475_v53 = vsel %vm2000_vm5, %v6443_v55, %v5928_v0 }
 0x4bb   : > { %5727 = vrot.lane.b32.xlu0 %v5275_v54, %s15362_s19  ;;  %v4630_v8 = vpop.f32.mrf.mxu0  ;;  %5008 = vmatprep.mubr.f32.mxu1 %v4808_v2  ;;  %v6507_v60 = vsel %vm2033_vm6, %v6475_v53, %v6036_v57  ;;  %v5387_v2 = vld [vmem:[%s8869_s17 + $0x14c] sm:$0xff]  ;;  %v5376_v53 = vld [vmem:[%s8869_s17 + $0x94] sm:$0xff] }
 0x4bc   : > { %5009 = vmatmul.mubr.f32.gmra.mxu1 %v4807_v29  ;;  %v6144_v16 = vpop.permute.xlu1 %6143  ;;  %v4631_v9 = vadd.f32 %v4630_v8, %v13076_v11  ;;  %v5320_v8 = vld [vmem:[%s8869_s17 + $0x8e] sm:$0xff] }
 0x4bd   : > { %v5714_v36 = vpop.permute.xlu0 %5713  ;;  %v4632_v23 = vpop.f32.mrf.mxu0  ;;  %v6539_v24 = vsel %vm2066_vm7, %v6507_v60, %v6144_v16  ;;  %v5287_v16 = vld [vmem:[%s8869_s17 + $0x200] sm:$0xff] }
 0x4be   : > { %v4633_v54 = vadd.f32 %v4632_v23, %v13080_v3  ;;  %6265 = vrot.lane.b32.xlu1 %v5398_v13, %s8742_s18  ;;  %v4809_v34 = vmax.f32 %v4631_v9, 0.0  ;;  %v13160_v23 = vpop.f32.mrf.mxu1 }
 0x4bf   : > { %5835 = vrot.lane.b32.xlu0 %v5331_v4, %s15467_s20  ;;  %15714 = vst [vmem:[#allocation160_spill] sm:$0xff] %v13160_v23 }
 0x4c0   : > { %v4810_v48 = vmax.f32 %v4633_v54, 0.0  ;;  %v4636_v29 = vpop.f32.mrf.mxu0  ;;  %v6252_v50 = vpop.permute.xlu1 %6251 }
 0x4c1   : > { %v6571_v0 = vsel %vm2099_vm8, %v6539_v24, %v6252_v50  ;;  %v5822_v55 = vpop.permute.xlu0 %5821  ;;  %v4637_v13 = vadd.f32 %v4636_v29, %v13076_v11  ;;  %v13172_v24 = vpop.f32.mrf.mxu1  ;;  %v5343_v50 = vld [vmem:[%s8869_s17 + $0x206] sm:$0xff] }
 0x4c2   : > { %v4638_v57 = vpop.f32.mrf.mxu0  ;;  %5014 = vmatprep.mubr.f32.mxu1 %v4810_v48  ;;  %5943 = vrot.lane.b32.xlu1 %v5387_v2, %s15495_s12  ;;  %15715 = vst [vmem:[#allocation95_spill] sm:$0xff] %v13172_v24  ;;  %v5256_v48 = vld [vmem:[%s8869_s17 + $0x8] sm:$0xff] }
 0x4c3   : > { %v4639_v4 = vadd.f32 %v4638_v57, %v13080_v3  ;;  %5473 = vrot.lane.b32.xlu0 %v5320_v8, %s15608_s23  ;;  %5015 = vmatmul.mubr.f32.gmra.mxu1 %v4809_v34  ;;  %v4811_v2 = vmax.f32 %v4637_v13, 0.0  ;;  %v5276_v34 = vld [vmem:[%s8869_s17 + $0x148] sm:$0xff]  ;;  %v13182_v24 = vpop.f32.mrf.mxu1  ;;  %v6348_v13 = vsel %vm375_vm1, %v5256_v48, %v13123_v38 }
 0x4c4   : > { %8176 = vmatmul.mubr.msk.f32.vlgmr.msra.gmra.mxu0 %vm2154_vm9, %v6571_v0  ;;  %v5930_v9 = vpop.permute.xlu1 %5929  ;;  %15716 = vst [vmem:[#allocation179_spill] sm:$0xff] %v13182_v24  ;;  %v8520_v24 = vld [vmem:[%s8869_s17 + $0x1a8] sm:$0xff] }
 0x4c5   : > { %v4812_v54 = vmax.f32 %v4639_v4, 0.0  ;;  %v13169_v60 = vpop.permute.xlu0 %5459  ;;  %6799 = vmatprep.mubr.f32.mxu0 %v15217_v61 }
 0x4c6   : > { %6051 = vrot.lane.b32.xlu1 %v5287_v16, %s15520_s21 }
 0x4c7   : > { %5601 = vrot.lane.b32.xlu0 %v5376_v53, %s15595_s16  ;;  %v4642_v29 = vpop.f32.mrf.mxu0  ;;  %5020 = vmatprep.mubr.f32.mxu1 %v4812_v54  ;;  %v6380_v53 = vsel %vm1901_vm2, %v6348_v13, %v13134_v43  ;;  %v5399_v54 = vld [vmem:[%s8869_s17 + $0x20c] sm:$0xff] }
 0x4c8   : > { %5021 = vmatmul.mubr.f32.gmra.mxu1 %v4811_v2  ;;  %v6038_v8 = vpop.permute.xlu1 %6037  ;;  %v4643_v0 = vadd.f32 %v4642_v29, %v13076_v11  ;;  %v6412_v2 = vsel %vm1934_vm3, %v6380_v53, %v5714_v36 }
 0x4c9   : > { %v13180_v57 = vpop.permute.xlu0 %5587  ;;  %v4644_v4 = vpop.f32.mrf.mxu0  ;;  %v6444_v37 = vsel %vm1967_vm4, %v6412_v2, %v5822_v55  ;;  %v5388_v55 = vld [vmem:[%s8869_s17 + $0x154] sm:$0xff] }
 0x4ca   : > { %v4645_v16 = vadd.f32 %v4644_v4, %v13080_v3  ;;  %6159 = vrot.lane.b32.xlu1 %v5343_v50, %s15616_s8  ;;  %v4813_v38 = vmax.f32 %v4643_v0, 0.0  ;;  %v13195_v4 = vpop.f32.mrf.mxu1  ;;  %v6476_v50 = vsel %vm2000_vm5, %v6444_v37, %v5930_v9  ;;  %v5321_v37 = vld [vmem:[%s8869_s17 + $0xa6] sm:$0xff] }
 0x4cb   : > { %5729 = vrot.lane.b32.xlu0 %v5276_v34, %s15362_s19  ;;  %15717 = vst [vmem:[#allocation127_spill] sm:$0xff] %v13195_v4  ;;  %v6508_v36 = vsel %vm2033_vm6, %v6476_v50, %v6038_v8  ;;  %v7082_v4 = vld [vmem:[#allocation2 + $0x6f8] sm:$0xff] }
 0x4cc   : > { %v4814_v29 = vmax.f32 %v4645_v16, 0.0  ;;  %v4648_v49 = vpop.f32.mrf.mxu0  ;;  %v6146_v21 = vpop.permute.xlu1 %6145  ;;  %8214 = vmatprep.subr.mxu1 %v7082_v4  ;;  %7115 = vmatprep.subr.mxu0 %v7082_v4 }
 0x4cd   : > { %v5716_v48 = vpop.permute.xlu0 %5715  ;;  %v4649_v43 = vadd.f32 %v4648_v49, %v13076_v11  ;;  %v6540_v0 = vsel %vm2066_vm7, %v6508_v36, %v6146_v21  ;;  %v13207_v2 = vpop.f32.mrf.mxu1  ;;  %v5288_v21 = vld [vmem:[%s8869_s17 + $0x208] sm:$0xff] }
 0x4ce   : > { %v4650_v34 = vpop.f32.mrf.mxu0  ;;  %5026 = vmatprep.mubr.f32.mxu1 %v4814_v29  ;;  %6267 = vrot.lane.b32.xlu1 %v5399_v54, %s8742_s18  ;;  %15718 = vst [vmem:[#allocation64_spill] sm:$0xff] %v13207_v2  ;;  %v5377_v29 = vld [vmem:[%s8869_s17 + $0xac] sm:$0xff] }
 0x4cf   : > { %v4651_v13 = vadd.f32 %v4650_v34, %v13080_v3  ;;  %5837 = vrot.lane.b32.xlu0 %v5332_v12, %s15467_s20  ;;  %5027 = vmatmul.mubr.f32.gmra.mxu1 %v4813_v38  ;;  %v4815_v54 = vmax.f32 %v4649_v43, 0.0  ;;  %v13218_v34 = vpop.f32.mrf.mxu1 }
 0x4d0   : > { %v6254_v16 = vpop.permute.xlu1 %6253  ;;  %15719 = vst [vmem:[#allocation65_spill] sm:$0xff] %v13218_v34 }
 0x4d1   : > { %v4816_v9 = vmax.f32 %v4651_v13, 0.0  ;;  %v6572_v49 = vsel %vm2099_vm8, %v6540_v0, %v6254_v16  ;;  %v5824_v53 = vpop.permute.xlu0 %5823  ;;  %v5257_v13 = vld [vmem:[%s8869_s17 + $0x20] sm:$0xff] }
 0x4d2   : > { %5945 = vrot.lane.b32.xlu1 %v5388_v55, %s15495_s12  ;;  %8177 = vmatmul.mubr.msk.f32.gmra.mxu0 %vm2154_vm9, %v6572_v49  ;;  %v5344_v55 = vld [vmem:[%s8869_s17 + $0x20e] sm:$0xff] }
 0x4d3   : > { %5475 = vrot.lane.b32.xlu0 %v5321_v37, %s15608_s23  ;;  %v4654_v12 = vpop.f32.mrf.mxu0  ;;  %5032 = vmatprep.mubr.f32.mxu1 %v4816_v9  ;;  %v5277_v9 = vld [vmem:[%s8869_s17 + $0x160] sm:$0xff] }
 0x4d4   : > { %5033 = vmatmul.mubr.f32.gmra.mxu1 %v4815_v54  ;;  %v5932_v8 = vpop.permute.xlu1 %5931  ;;  %6805 = vmatprep.mubr.f32.mxu0 %v15217_v61  ;;  %v4655_v38 = vadd.f32 %v4654_v12, %v13076_v11  ;;  %v13228_v12 = vpop.f32.mrf.mxu1 }
 0x4d5   : > { %v13216_v50 = vpop.permute.xlu0 %5461  ;;  %v4656_v43 = vpop.f32.mrf.mxu0  ;;  %15720 = vst [vmem:[#allocation159_spill] sm:$0xff] %v13228_v12  ;;  %v13591_v12 = vld [vmem:[#allocation2 + $0x778] sm:$0xff] }
 0x4d6   : > { %v4657_v36 = vadd.f32 %v4656_v43, %v13080_v3  ;;  %6053 = vrot.lane.b32.xlu1 %v5288_v21, %s15520_s21  ;;  %v4817_v49 = vmax.f32 %v4655_v38, 0.0  ;;  %v6349_v43 = vsel %vm375_vm1, %v5257_v13, %v13169_v60  ;;  %v5400_v38 = vld [vmem:[%s8869_s17 + $0x214] sm:$0xff]  ;;  %v5333_v60 = vld [vmem:[%s8869_s17 + $0x166] sm:$0xff] }
 0x4d7   : > { %5603 = vrot.lane.b32.xlu0 %v5377_v29, %s15595_s16  ;;  %v6381_v29 = vsel %vm1901_vm2, %v6349_v43, %v13180_v57  ;;  %v7081_v13 = vld [vmem:[#allocation2 + $0x6f0] sm:$0xff]  ;;  %v7080_v57 = vld [vmem:[#allocation2 + $0x6e8] sm:$0xff] }
 0x4d8   : > { %v4818_v0 = vmax.f32 %v4657_v36, 0.0  ;;  %v4660_v16 = vpop.f32.mrf.mxu0  ;;  %v6040_v37 = vpop.permute.xlu1 %6039  ;;  %v6413_v56 = vsel %vm1934_vm3, %v6381_v29, %v5716_v48  ;;  %8246 = vmatpush1.msra.mxu1 %v7081_v13  ;;  %7116 = vmatpush1.msra.mxu0 %v7081_v13 }
 0x4d9   : > { %v13226_v54 = vpop.permute.xlu0 %5589  ;;  %v4661_v21 = vadd.f32 %v4660_v16, %v13076_v11  ;;  %8215 = vmatprep.subr.mxu1 %v7080_v57  ;;  %7117 = vmatprep.subr.mxu0 %v7080_v57 }
 0x4da   : > { %v4662_v34 = vpop.f32.mrf.mxu0  ;;  %5038 = vmatprep.mubr.f32.mxu1 %v4818_v0  ;;  %6161 = vrot.lane.b32.xlu1 %v5344_v55, %s15616_s8  ;;  %v6445_v0 = vsel %vm1967_vm4, %v6413_v56, %v5824_v53  ;;  %v5389_v53 = vld [vmem:[%s8869_s17 + $0x16c] sm:$0xff] }
 0x4db   : > { %v4663_v36 = vadd.f32 %v4662_v34, %v13080_v3  ;;  %5731 = vrot.lane.b32.xlu0 %v5277_v9, %s15362_s19  ;;  %5039 = vmatmul.mubr.f32.gmra.mxu1 %v4817_v49  ;;  %v13244_v34 = vpop.f32.mrf.mxu1  ;;  %v6477_v9 = vsel %vm2000_vm5, %v6445_v0, %v5932_v8  ;;  %v4819_v48 = vmax.f32 %v4661_v21, 0.0  ;;  %v7079_v49 = vld [vmem:[#allocation2 + $0x6e0] sm:$0xff]  ;;  %v7077_v0 = vld [vmem:[#allocation2 + $0x6d0] sm:$0xff] }
 0x4dc   : > { %v6148_v22 = vpop.permute.xlu1 %6147  ;;  %15721 = vst [vmem:[#allocation12_spill] sm:$0xff] %v13244_v34  ;;  %v6509_v4 = vsel %vm2033_vm6, %v6477_v9, %v6040_v37  ;;  %8247 = vmatpush1.msra.mxu1 %v7079_v49  ;;  %7118 = vmatpush1.msra.mxu0 %v7079_v49 }
 0x4dd   : > { %v4820_v55 = vmax.f32 %v4663_v36, 0.0  ;;  %v13242_v16 = vpop.permute.xlu0 %5717  ;;  %v6541_v43 = vsel %vm2066_vm7, %v6509_v4, %v6148_v22  ;;  %v5322_v36 = vld [vmem:[%s8869_s17 + $0xae] sm:$0xff]  ;;  %v13257_v13 = vpop.f32.mrf.mxu1 }
 0x4de   : > { %6269 = vrot.lane.b32.xlu1 %v5400_v38, %s8742_s18  ;;  %15722 = vst [vmem:[#allocation9_spill] sm:$0xff] %v13257_v13  ;;  %v5378_v4 = vld [vmem:[%s8869_s17 + $0xb4] sm:$0xff] }
 0x4df   : > { %5839 = vrot.lane.b32.xlu0 %v5333_v60, %s15467_s20  ;;  %v4666_v56 = vpop.f32.mrf.mxu0  ;;  %5044 = vmatprep.mubr.f32.mxu1 %v4820_v55  ;;  %v7078_v60 = vld [vmem:[#allocation2 + $0x6d8] sm:$0xff]  ;;  %v5289_v55 = vld [vmem:[%s8869_s17 + $0x220] sm:$0xff] }
 0x4e0   : > { %5045 = vmatmul.mubr.f32.gmra.mxu1 %v4819_v48  ;;  %v6256_v29 = vpop.permute.xlu1 %6255  ;;  %v4667_v8 = vadd.f32 %v4666_v56, %v13076_v11  ;;  %8216 = vmatprep.subr.mxu1 %v7078_v60 }
 0x4e1   : > { %v6573_v21 = vsel %vm2099_vm8, %v6541_v43, %v6256_v29  ;;  %v13255_v38 = vpop.permute.xlu0 %5825  ;;  %v4668_v37 = vpop.f32.mrf.mxu0  ;;  %7119 = vmatprep.subr.mxu0 %v7078_v60  ;;  %8248 = vmatpush1.msra.mxu1 %v7077_v0 }
 0x4e2   : > { %v4669_v22 = vadd.f32 %v4668_v37, %v13080_v3  ;;  %5947 = vrot.lane.b32.xlu1 %v5389_v53, %s15495_s12  ;;  %8178 = vmatmul.mubr.msk.f32.gmra.mxu0 %vm2154_vm9, %v6573_v21  ;;  %v4821_v49 = vmax.f32 %v4667_v8, 0.0  ;;  %v7076_v53 = vld [vmem:[#allocation2 + $0x6c8] sm:$0xff]  ;;  %v13268_v43 = vpop.f32.mrf.mxu1  ;;  %v7075_v21 = vld [vmem:[#allocation2 + $0x6c0] sm:$0xff] }
 0x4e3   : > { %5477 = vrot.lane.b32.xlu0 %v5322_v36, %s15608_s23  ;;  %6811 = vmatprep.mubr.f32.mxu0 %v15217_v61  ;;  %15723 = vst [vmem:[#allocation103_spill] sm:$0xff] %v13268_v43  ;;  %v5258_v37 = vld [vmem:[%s8869_s17 + $0x28] sm:$0xff] }
 0x4e4   : > { %v4822_v57 = vmax.f32 %v4669_v22, 0.0  ;;  %v4672_v9 = vpop.f32.mrf.mxu0  ;;  %v5934_v48 = vpop.permute.xlu1 %5933  ;;  %7120 = vmatpush1.msra.mxu0 %v7077_v0  ;;  %v5345_v8 = vld [vmem:[%s8869_s17 + $0x226] sm:$0xff]  ;;  %v7074_v22 = vld [vmem:[#allocation2 + $0x6b8] sm:$0xff]  ;;  %8217 = vmatprep.subr.mxu1 %v7076_v53 }
 0x4e5   : > { %v13266_v56 = vpop.permute.xlu0 %5463  ;;  %v4673_v29 = vadd.f32 %v4672_v9, %v13076_v11  ;;  %7121 = vmatprep.subr.mxu0 %v7076_v53  ;;  %8249 = vmatpush1.msra.mxu1 %v7075_v21 }
 0x4e6   : > { %v4674_v36 = vpop.f32.mrf.mxu0  ;;  %5050 = vmatprep.mubr.f32.mxu1 %v4822_v57  ;;  %6055 = vrot.lane.b32.xlu1 %v5289_v55, %s15520_s21  ;;  %v13279_v55 = vpop.f32.mrf.mxu1  ;;  %v6350_v57 = vsel %vm375_vm1, %v5258_v37, %v13216_v50  ;;  %v5334_v50 = vld [vmem:[%s8869_s17 + $0x16e] sm:$0xff] }
 0x4e7   : > { %v4675_v60 = vadd.f32 %v4674_v36, %v13080_v3  ;;  %5605 = vrot.lane.b32.xlu0 %v5378_v4, %s15595_s16  ;;  %5051 = vmatmul.mubr.f32.gmra.mxu1 %v4821_v49  ;;  %15724 = vst [vmem:[#allocation109_spill] sm:$0xff] %v13279_v55  ;;  %v4823_v4 = vmax.f32 %v4673_v29, 0.0  ;;  %v7073_v49 = vld [vmem:[#allocation2 + $0x6b0] sm:$0xff]  ;;  %v6382_v36 = vsel %vm1901_vm2, %v6350_v57, %v13226_v54  ;;  %v7071_v29 = vld [vmem:[#allocation2 + $0x6a0] sm:$0xff] }
 0x4e8   : > { %v6042_v34 = vpop.permute.xlu1 %6041  ;;  %7122 = vmatpush1.msra.mxu0 %v7075_v21  ;;  %8218 = vmatprep.subr.mxu1 %v7074_v22  ;;  %v7072_v21 = vld [vmem:[#allocation2 + $0x6a8] sm:$0xff]  ;;  %v6414_v43 = vsel %vm1934_vm3, %v6382_v36, %v13242_v16  ;;  %v13296_v57 = vpop.f32.mrf.mxu1 }
 0x4e9   : > { %v4824_v0 = vmax.f32 %v4675_v60, 0.0  ;;  %v13277_v9 = vpop.permute.xlu0 %5591  ;;  %v5401_v60 = vld [vmem:[%s8869_s17 + $0x22c] sm:$0xff]  ;;  %7123 = vmatprep.subr.mxu0 %v7074_v22  ;;  %v6446_v37 = vsel %vm1967_vm4, %v6414_v43, %v13255_v38  ;;  %8250 = vmatpush1.msra.mxu1 %v7073_v49  ;;  %15725 = vst [vmem:[#allocation130_spill] sm:$0xff] %v13296_v57  ;;  %v5390_v43 = vld [vmem:[%s8869_s17 + $0x174] sm:$0xff] }
 0x4ea   : > { %6163 = vrot.lane.b32.xlu1 %v5345_v8, %s15616_s8  ;;  %7124 = vmatpush1.msra.mxu0 %v7073_v49  ;;  %v6478_v16 = vsel %vm2000_vm5, %v6446_v37, %v5934_v48  ;;  %v7069_v22 = vld [vmem:[#allocation2 + $0x690] sm:$0xff] }
 0x4eb   : > { %5733 = vrot.lane.b32.xlu0 %v5278_v41, %s15362_s19  ;;  %v4678_v53 = vpop.f32.mrf.mxu0  ;;  %5056 = vmatprep.mubr.f32.mxu1 %v4824_v0  ;;  %v7070_v0 = vld [vmem:[#allocation2 + $0x698] sm:$0xff]  ;;  %v6510_v38 = vsel %vm2033_vm6, %v6478_v16, %v6042_v34  ;;  %v7068_v34 = vld [vmem:[#allocation2 + $0x688] sm:$0xff]  ;;  %v7067_v16 = vld [vmem:[#allocation2 + $0x680] sm:$0xff] }
 0x4ec   : > { %5057 = vmatmul.mubr.f32.gmra.mxu1 %v4823_v4  ;;  %v6150_v40 = vpop.permute.xlu1 %6149  ;;  %v4679_v54 = vadd.f32 %v4678_v53, %v13076_v11  ;;  %8219 = vmatprep.subr.mxu1 %v7072_v21 }
 0x4ed   : > { %v13294_v8 = vpop.permute.xlu0 %5719  ;;  %v4680_v41 = vpop.f32.mrf.mxu0  ;;  %8251 = vmatpush1.msra.mxu1 %v7071_v29  ;;  %v6542_v36 = vsel %vm2066_vm7, %v6510_v38, %v6150_v40  ;;  %7125 = vmatprep.subr.mxu0 %v7072_v21 }
 0x4ee   : > { %v4681_v4 = vadd.f32 %v4680_v41, %v13080_v3  ;;  %6271 = vrot.lane.b32.xlu1 %v5401_v60, %s8742_s18  ;;  %8220 = vmatprep.subr.mxu1 %v7070_v0  ;;  %v4825_v48 = vmax.f32 %v4679_v54, 0.0  ;;  %v8503_v54 = vld [vmem:[%s8869_s17 + $0xc6] sm:$0xff] }
 0x4ef   : > { %5841 = vrot.lane.b32.xlu0 %v5334_v50, %s15467_s20  ;;  %8252 = vmatpush1.msra.mxu1 %v7069_v22  ;;  %v13308_v50 = vpop.f32.mrf.mxu1 }
 0x4f0   : > { %v4826_v53 = vmax.f32 %v4681_v4, 0.0  ;;  %v4684_v49 = vpop.f32.mrf.mxu0  ;;  %v6258_v27 = vpop.permute.xlu1 %6257  ;;  %7126 = vmatpush1.msra.mxu0 %v7071_v29  ;;  %15726 = vst [vmem:[#allocation18_spill] sm:$0xff] %v13308_v50  ;;  %v13316_v4 = vld [vmem:[#allocation2 + $0x678] sm:$0xff]  ;;  %8221 = vmatprep.subr.mxu1 %v7068_v34  ;;  %v8505_v50 = vld [vmem:[%s8869_s17 + $0x180] sm:$0xff] }
 0x4f1   : > { %v6574_v60 = vsel %vm2099_vm8, %v6542_v36, %v6258_v27  ;;  %v13306_v37 = vpop.permute.xlu0 %5827  ;;  %v4685_v41 = vadd.f32 %v4684_v49, %v13076_v11  ;;  %v5290_v27 = vld [vmem:[%s8869_s17 + $0x228] sm:$0xff]  ;;  %8253 = vmatpush1.msra.mxu1 %v7067_v16  ;;  %v7065_v49 = vld [vmem:[#allocation2 + $0x670] sm:$0xff]  ;;  %7127 = vmatprep.subr.mxu0 %v7070_v0 }
 0x4f2   : > { %v4686_v40 = vpop.f32.mrf.mxu0  ;;  %5062 = vmatprep.mubr.f32.mxu1 %v4826_v53  ;;  %5949 = vrot.lane.b32.xlu1 %v5390_v43, %s15495_s12  ;;  %v13322_v43 = vpop.f32.mrf.mxu1  ;;  %v13346_v0 = vld [vmem:[#allocation2 + $0x650] sm:$0xff] }
 0x4f3   : > { %v4687_v21 = vadd.f32 %v4686_v40, %v13080_v3  ;;  %5479 = vrot.lane.b32.xlu0 %v8503_v54, %s15608_s23  ;;  %5063 = vmatmul.mubr.f32.gmra.mxu1 %v4825_v48  ;;  %15727 = vst [vmem:[#allocation28_spill] sm:$0xff] %v13322_v43  ;;  %v4827_v53 = vmax.f32 %v4685_v41, 0.0  ;;  %v5259_v48 = vld [vmem:[%s8869_s17 + $0x40] sm:$0xff]  ;;  %v8504_v40 = vld [vmem:[%s8869_s17 + $0xcc] sm:$0xff] }
 0x4f4   : > { %8179 = vmatmul.mubr.msk.f32.gmra.mxu0 %vm2154_vm9, %v6574_v60  ;;  %v5936_v29 = vpop.permute.xlu1 %5935  ;;  %8222 = vmatprep.subr.mxu1 %v13316_v4  ;;  %v13330_v54 = vld [vmem:[#allocation2 + $0x668] sm:$0xff] }
 0x4f5   : > { %v4828_v38 = vmax.f32 %v4687_v21, 0.0  ;;  %v13319_v36 = vpop.permute.xlu0 %5465  ;;  %6817 = vmatprep.mubr.f32.mxu0 %v15217_v61  ;;  %v5346_v21 = vld [vmem:[%s8869_s17 + $0x22e] sm:$0xff]  ;;  %8254 = vmatpush1.msra.mxu1 %v7065_v49 }
 0x4f6   : > { %6057 = vrot.lane.b32.xlu1 %v5290_v27, %s15520_s21  ;;  %7128 = vmatpush1.msra.mxu0 %v7069_v22  ;;  %v5402_v22 = vld [vmem:[%s8869_s17 + $0x234] sm:$0xff] }
 0x4f7   : > { %5607 = vrot.lane.b32.xlu0 %v8504_v40, %s15595_s16  ;;  %v4690_v60 = vpop.f32.mrf.mxu0  ;;  %5068 = vmatprep.mubr.f32.mxu1 %v4828_v38  ;;  %v13339_v38 = vpop.f32.mrf.mxu1 }
 0x4f8   : > { %5069 = vmatmul.mubr.f32.gmra.mxu1 %v4827_v53  ;;  %v6044_v57 = vpop.permute.xlu1 %6043  ;;  %v4691_v41 = vadd.f32 %v4690_v60, %v13076_v11  ;;  %15728 = vst [vmem:[#allocation98_spill] sm:$0xff] %v13339_v38  ;;  %v6351_v53 = vsel %vm375_vm1, %v5259_v48, %v13266_v56  ;;  %8223 = vmatprep.subr.mxu1 %v13330_v54 }
 0x4f9   : > { %v13335_v27 = vpop.permute.xlu0 %5593  ;;  %v4692_v43 = vpop.f32.mrf.mxu0  ;;  %v6383_v60 = vsel %vm1901_vm2, %v6351_v53, %v13277_v9  ;;  %8255 = vmatpush1.msra.mxu1 %v13332_v10  ;;  %7129 = vmatprep.subr.mxu0 %v7068_v34  ;;  %v13369_v34 = vld [vmem:[#allocation2 + $0x640] sm:$0xff] }
 0x4fa   : > { %v4693_v40 = vadd.f32 %v4692_v43, %v13080_v3  ;;  %6165 = vrot.lane.b32.xlu1 %v5346_v21, %s15616_s8  ;;  %v6415_v56 = vsel %vm1934_vm3, %v6383_v60, %v13294_v8  ;;  %8224 = vmatprep.subr.mxu1 %v13337_v28  ;;  %v4829_v9 = vmax.f32 %v4691_v41, 0.0  ;;  %v13364_v31 = vpop.f32.mrf.mxu1 }
 0x4fb   : > { %5735 = vrot.lane.b32.xlu0 %v8505_v50, %s15362_s19  ;;  %v6447_v21 = vsel %vm1967_vm4, %v6415_v56, %v13306_v37  ;;  %8256 = vmatpush1.msra.mxu1 %v13346_v0  ;;  %v13362_v50 = vld [vmem:[#allocation2 + $0x648] sm:$0xff]  ;;  %15729 = vst [vmem:[#allocation139_spill] sm:$0xff] %v13364_v31 }
 0x4fc   : > { %v4830_v48 = vmax.f32 %v4693_v40, 0.0  ;;  %v4696_v43 = vpop.f32.mrf.mxu0  ;;  %v6152_v38 = vpop.permute.xlu1 %6151  ;;  %7130 = vmatpush1.msra.mxu0 %v7067_v16  ;;  %v6479_v8 = vsel %vm2000_vm5, %v6447_v21, %v5936_v29  ;;  %v8506_v56 = vld [vmem:[%s8869_s17 + $0x186] sm:$0xff]  ;;  %8225 = vmatprep.subr.mxu1 %v13362_v50 }
 0x4fd   : > { %v13359_v53 = vpop.permute.xlu0 %5721  ;;  %v4697_v40 = vadd.f32 %v4696_v43, %v13076_v11  ;;  %v6511_v37 = vsel %vm2033_vm6, %v6479_v8, %v6044_v57  ;;  %7131 = vmatprep.subr.mxu0 %v13316_v4  ;;  %8257 = vmatpush1.msra.mxu1 %v13369_v34  ;;  %v13382_v43 = vpop.f32.mrf.mxu1  ;;  %v8508_v4 = vld [vmem:[%s8869_s17 + $0xce] sm:$0xff] }
 0x4fe   : > { %v4698_v60 = vpop.f32.mrf.mxu0  ;;  %5074 = vmatprep.mubr.f32.mxu1 %v4830_v48  ;;  %6273 = vrot.lane.b32.xlu1 %v5402_v22, %s8742_s18  ;;  %v6543_v16 = vsel %vm2066_vm7, %v6511_v37, %v6152_v38  ;;  %15730 = vst [vmem:[#allocation29_spill] sm:$0xff] %v13382_v43  ;;  %v13387_v38 = vld [vmem:[#allocation2 + $0x638] sm:$0xff]  ;;  %v13392_v37 = vld [vmem:[#allocation2 + $0x630] sm:$0xff] }
 0x4ff   : > { %v4699_v41 = vadd.f32 %v4698_v60, %v13080_v3  ;;  %5843 = vrot.lane.b32.xlu0 %v8506_v56, %s15467_s20  ;;  %5075 = vmatmul.mubr.f32.gmra.mxu1 %v4829_v9  ;;  %v4831_v21 = vmax.f32 %v4697_v40, 0.0  ;;  %v8507_v9 = vld [vmem:[%s8869_s17 + $0x18c] sm:$0xff]  ;;  %v5291_v60 = vld [vmem:[%s8869_s17 + $0x240] sm:$0xff] }
 0x500   : > { %v6260_v29 = vpop.permute.xlu1 %6259  ;;  %7132 = vmatpush1.msra.mxu0 %v7065_v49  ;;  %v13395_v40 = vld [vmem:[#allocation2 + $0x628] sm:$0xff]  ;;  %8226 = vmatprep.subr.mxu1 %v13387_v38 }
 0x501   : > { %v4832_v22 = vmax.f32 %v4699_v41, 0.0  ;;  %v6575_v48 = vsel %vm2099_vm8, %v6543_v16, %v6260_v29  ;;  %v13379_v57 = vpop.permute.xlu0 %5829  ;;  %v13401_v29 = vld [vmem:[#allocation2 + $0x620] sm:$0xff]  ;;  %7133 = vmatprep.subr.mxu0 %v13330_v54  ;;  %8258 = vmatpush1.msra.mxu1 %v13392_v37 }
 0x502   : > { %5951 = vrot.lane.b32.xlu1 %v8507_v9, %s15495_s12  ;;  %8180 = vmatmul.mubr.msk.f32.gmra.mxu0 %vm2154_vm9, %v6575_v48  ;;  %v5260_v9 = vld [vmem:[%s8869_s17 + $0x48] sm:$0xff] }
 0x503   : > { %5481 = vrot.lane.b32.xlu0 %v8508_v4, %s15608_s23  ;;  %v4702_v8 = vpop.f32.mrf.mxu0  ;;  %5080 = vmatprep.mubr.f32.mxu1 %v4832_v22  ;;  %v13404_v22 = vpop.f32.mrf.mxu1  ;;  %v8509_v4 = vld [vmem:[%s8869_s17 + $0xd4] sm:$0xff] }
 0x504   : > { %5081 = vmatmul.mubr.f32.gmra.mxu1 %v4831_v21  ;;  %v5938_v49 = vpop.permute.xlu1 %5937  ;;  %6823 = vmatprep.mubr.f32.mxu0 %v15217_v61  ;;  %v4703_v41 = vadd.f32 %v4702_v8, %v13076_v11  ;;  %15731 = vst [vmem:[#allocation63_spill] sm:$0xff] %v13404_v22  ;;  %v13409_v21 = vld [vmem:[#allocation2 + $0x618] sm:$0xff]  ;;  %v5347_v8 = vld [vmem:[%s8869_s17 + $0x246] sm:$0xff]  ;;  %v13421_v22 = vld [vmem:[#allocation2 + $0x610] sm:$0xff] }
 0x505   : > { %v13398_v56 = vpop.permute.xlu0 %5467  ;;  %v4704_v16 = vpop.f32.mrf.mxu0  ;;  %8227 = vmatprep.subr.mxu1 %v13395_v40  ;;  %7134 = vmatpush1.msra.mxu0 %v13332_v10  ;;  %v13430_v10 = vld [vmem:[#allocation2 + $0x608] sm:$0xff] }
 0x506   : > { %v4705_v48 = vadd.f32 %v4704_v16, %v13080_v3  ;;  %6059 = vrot.lane.b32.xlu1 %v5291_v60, %s15520_s21  ;;  %8259 = vmatpush1.msra.mxu1 %v13401_v29  ;;  %v4833_v60 = vmax.f32 %v4703_v41, 0.0 }
 0x507   : > { %5609 = vrot.lane.b32.xlu0 %v8509_v4, %s15595_s16  ;;  %8228 = vmatprep.subr.mxu1 %v13409_v21  ;;  %v13424_v4 = vpop.f32.mrf.mxu1 }
 0x508   : > { %v4834_v31 = vmax.f32 %v4705_v48, 0.0  ;;  %v4708_v43 = vpop.f32.mrf.mxu0  ;;  %v6046_v54 = vpop.permute.xlu1 %6045  ;;  %7135 = vmatprep.subr.mxu0 %v13337_v28  ;;  %15732 = vst [vmem:[#allocation106_spill] sm:$0xff] %v13424_v4  ;;  %v6352_v48 = vsel %vm375_vm1, %v5260_v9, %v13319_v36  ;;  %v5403_v28 = vld [vmem:[%s8869_s17 + $0x24c] sm:$0xff]  ;;  %v13438_v4 = vld [vmem:[#allocation2 + $0x600] sm:$0xff]  ;;  %8260 = vmatpush1.msra.mxu1 %v13421_v22 }
 0x509   : > { %v13418_v16 = vpop.permute.xlu0 %5595  ;;  %v4709_v55 = vadd.f32 %v4708_v43, %v13076_v11  ;;  %v6384_v41 = vsel %vm1901_vm2, %v6352_v48, %v13335_v27  ;;  %7136 = vmatpush1.msra.mxu0 %v13346_v0  ;;  %8229 = vmatprep.subr.mxu1 %v13430_v10  ;;  %v13452_v9 = vpop.f32.mrf.mxu1  ;;  %v13457_v0 = vld [vmem:[#allocation2 + $0x7f0] sm:$0xff] }
 0x50a   : > { %v4710_v25 = vpop.f32.mrf.mxu0  ;;  %5086 = vmatprep.mubr.f32.mxu1 %v4834_v31  ;;  %6167 = vrot.lane.b32.xlu1 %v5347_v8, %s15616_s8  ;;  %v6416_v36 = vsel %vm1934_vm3, %v6384_v41, %v13359_v53  ;;  %15733 = vst [vmem:[#allocation80_spill] sm:$0xff] %v13452_v9  ;;  %v5348_v9 = vld [vmem:[%s8869_s17 + $0x24e] sm:$0xff] }
 0x50b   : > { %v4711_v13 = vadd.f32 %v4710_v25, %v13080_v3  ;;  %5737 = vrot.lane.b32.xlu0 %v8510_v62, %s15362_s19  ;;  %5087 = vmatmul.mubr.f32.gmra.mxu1 %v4833_v60  ;;  %v6448_v27 = vsel %vm1967_vm4, %v6416_v36, %v13379_v57  ;;  %v13449_v62 = vld [vmem:[#allocation2 + $0x7f8] sm:$0xff]  ;;  %v4835_v8 = vmax.f32 %v4709_v55, 0.0  ;;  %v8511_v57 = vld [vmem:[%s8869_s17 + $0x18e] sm:$0xff]  ;;  %v13472_v36 = vpop.f32.mrf.mxu1 }
 0x50c   : > { %v6154_v31 = vpop.permute.xlu1 %6153  ;;  %7137 = vmatprep.subr.mxu0 %v13362_v50  ;;  %v6480_v53 = vsel %vm2000_vm5, %v6448_v27, %v5938_v49  ;;  %8261 = vmatpush1.msra.mxu1 %v13438_v4  ;;  %15734 = vst [vmem:[#allocation11_spill] sm:$0xff] %v13472_v36  ;;  %v8512_v27 = vld [vmem:[%s8869_s17 + $0x194] sm:$0xff] }
 0x50d   : > { %v4836_v25 = vmax.f32 %v4711_v13, 0.0  ;;  %v13446_v43 = vpop.permute.xlu0 %5723  ;;  %v6512_v13 = vsel %vm2033_vm6, %v6480_v53, %v6046_v54  ;;  %8230 = vmatprep.subr.mxu1 %v13449_v62  ;;  %7138 = vmatpush1.msra.mxu0 %v13369_v34  ;;  %v8513_v53 = vld [vmem:[%s8869_s17 + $0xe6] sm:$0xff] }
 0x50e   : > { %6275 = vrot.lane.b32.xlu1 %v5403_v28, %s8742_s18  ;;  %v6544_v50 = vsel %vm2066_vm7, %v6512_v13, %v6154_v31  ;;  %8262 = vmatpush2.msra.mxu1 %v13457_v0  ;;  %v13469_v28 = vld [vmem:[#allocation2 + $0x7e8] sm:$0xff] }
 0x50f   : > { %5845 = vrot.lane.b32.xlu0 %v8511_v57, %s15467_s20  ;;  %v4714_v60 = vpop.f32.mrf.mxu0  ;;  %5092 = vmatprep.mubr.f32.mxu1 %v4836_v25  ;;  %v13478_v25 = vld [vmem:[#allocation2 + $0x7e0] sm:$0xff] }
 0x510   : > { %5093 = vmatmul.mubr.f32.gmra.mxu1 %v4835_v8  ;;  %v6262_v49 = vpop.permute.xlu1 %6261  ;;  %v4715_v55 = vadd.f32 %v4714_v60, %v13076_v11  ;;  %v5292_v8 = vld [vmem:[%s8869_s17 + $0x248] sm:$0xff]  ;;  %8231 = vmatprep.subr.mxu1 %v13469_v28 }
 0x511   : > { %v6576_v48 = vsel %vm2099_vm8, %v6544_v50, %v6262_v49  ;;  %v13466_v41 = vpop.permute.xlu0 %5831  ;;  %v4716_v54 = vpop.f32.mrf.mxu0  ;;  %7139 = vmatprep.subr.mxu0 %v13387_v38  ;;  %8263 = vmatpush2.msra.mxu1 %v13478_v25  ;;  %v13489_v49 = vld [vmem:[#allocation2 + $0x7d8] sm:$0xff]  ;;  %v5261_v38 = vld [vmem:[%s8869_s17 + $0x60] sm:$0xff] }
 0x512   : > { %v4717_v31 = vadd.f32 %v4716_v54, %v13080_v3  ;;  %5953 = vrot.lane.b32.xlu1 %v8512_v27, %s15495_s12  ;;  %8181 = vmatmul.mubr.msk.f32.gmra.mxu0 %vm2154_vm9, %v6576_v48  ;;  %v4837_v60 = vmax.f32 %v4715_v55, 0.0  ;;  %v13492_v48 = vpop.f32.mrf.mxu1  ;;  %v13496_v27 = vld [vmem:[#allocation2 + $0x7d0] sm:$0xff] }
 0x513   : > { %5483 = vrot.lane.b32.xlu0 %v8513_v53, %s15608_s23  ;;  %6829 = vmatprep.mubr.f32.mxu0 %v15217_v61  ;;  %15735 = vst [vmem:[#allocation74_spill] sm:$0xff] %v13492_v48  ;;  %v8514_v53 = vld [vmem:[%s8869_s17 + $0xec] sm:$0xff] }
 0x514   : > { %v4838_v13 = vmax.f32 %v4717_v31, 0.0  ;;  %v4720_v34 = vpop.f32.mrf.mxu0  ;;  %v5940_v57 = vpop.permute.xlu1 %5939  ;;  %7140 = vmatpush1.msra.mxu0 %v13392_v37  ;;  %v13503_v37 = vld [vmem:[#allocation2 + $0x7c8] sm:$0xff]  ;;  %8232 = vmatprep.subr.mxu1 %v13489_v49 }
 0x515   : > { %v13486_v50 = vpop.permute.xlu0 %5469  ;;  %v4721_v54 = vadd.f32 %v4720_v34, %v13076_v11  ;;  %7141 = vmatprep.subr.mxu0 %v13395_v40  ;;  %8264 = vmatpush2.msra.mxu1 %v13496_v27  ;;  %v13511_v34 = vpop.f32.mrf.mxu1 }
 0x516   : > { %v4722_v31 = vpop.f32.mrf.mxu0  ;;  %5098 = vmatprep.mubr.f32.mxu1 %v4838_v13  ;;  %6061 = vrot.lane.b32.xlu1 %v5292_v8, %s15520_s21  ;;  %15736 = vst [vmem:[#allocation141_spill] sm:$0xff] %v13511_v34  ;;  %v13524_v34 = vld [vmem:[#allocation2 + $0x7b8] sm:$0xff] }
 0x517   : > { %v4723_v55 = vadd.f32 %v4722_v31, %v13080_v3  ;;  %5611 = vrot.lane.b32.xlu0 %v8514_v53, %s15595_s16  ;;  %5099 = vmatmul.mubr.f32.gmra.mxu1 %v4837_v60  ;;  %v6353_v60 = vsel %vm375_vm1, %v5261_v38, %v13398_v56  ;;  %v4839_v31 = vmax.f32 %v4721_v54, 0.0  ;;  %v13517_v53 = vld [vmem:[#allocation2 + $0x7c0] sm:$0xff]  ;;  %v13528_v54 = vld [vmem:[#allocation2 + $0x7b0] sm:$0xff] }
 0x518   : > { %v6048_v48 = vpop.permute.xlu1 %6047  ;;  %7142 = vmatpush1.msra.mxu0 %v13401_v29  ;;  %8233 = vmatprep.subr.mxu1 %v13503_v37  ;;  %v6385_v40 = vsel %vm1901_vm2, %v6353_v60, %v13418_v16  ;;  %v5404_v29 = vld [vmem:[%s8869_s17 + $0x254] sm:$0xff] }
 0x519   : > { %v4840_v8 = vmax.f32 %v4723_v55, 0.0  ;;  %v13507_v13 = vpop.permute.xlu0 %5597  ;;  %v8515_v55 = vld [vmem:[%s8869_s17 + $0x1a0] sm:$0xff]  ;;  %v6417_v56 = vsel %vm1934_vm3, %v6385_v40, %v13446_v43  ;;  %7143 = vmatprep.subr.mxu0 %v13409_v21  ;;  %8265 = vmatpush2.msra.mxu1 %v13517_v53  ;;  %v13540_v43 = vpop.f32.mrf.mxu1 }
 0x51a   : > { %6169 = vrot.lane.b32.xlu1 %v5348_v9, %s15616_s8  ;;  %v6449_v16 = vsel %vm1967_vm4, %v6417_v56, %v13466_v41  ;;  %7144 = vmatpush1.msra.mxu0 %v13421_v22  ;;  %15737 = vst [vmem:[#allocation129_spill] sm:$0xff] %v13540_v43  ;;  %v13546_v41 = vld [vmem:[#allocation2 + $0x7a0] sm:$0xff]  ;;  %v8519_v43 = vld [vmem:[%s8869_s17 + $0xf4] sm:$0xff] }
 0x51b   : > { %5739 = vrot.lane.b32.xlu0 %v8515_v55, %s15362_s19  ;;  %v4726_v36 = vpop.f32.mrf.mxu0  ;;  %5104 = vmatprep.mubr.f32.mxu1 %v4840_v8  ;;  %v13537_v55 = vld [vmem:[#allocation2 + $0x7a8] sm:$0xff] }
 0x51c   : > { %5105 = vmatmul.mubr.f32.gmra.mxu1 %v4839_v31  ;;  %v6156_v9 = vpop.permute.xlu1 %6155  ;;  %v4727_v38 = vadd.f32 %v4726_v36, %v13076_v11  ;;  %v6481_v31 = vsel %vm2000_vm5, %v6449_v16, %v5940_v57  ;;  %8234 = vmatprep.subr.mxu1 %v13524_v34  ;;  %v8516_v40 = vld [vmem:[%s8869_s17 + $0x1a6] sm:$0xff] }
 0x51d   : > { %v13534_v60 = vpop.permute.xlu0 %5725  ;;  %v4728_v8 = vpop.f32.mrf.mxu0  ;;  %v6513_v36 = vsel %vm2033_vm6, %v6481_v31, %v6048_v48  ;;  %8266 = vmatpush2.msra.mxu1 %v13528_v54  ;;  %7145 = vmatprep.subr.mxu0 %v13430_v10  ;;  %v13559_v31 = vld [vmem:[#allocation2 + $0x798] sm:$0xff]  ;;  %v13567_v10 = vld [vmem:[#allocation2 + $0x790] sm:$0xff] }
 0x51e   : > { %v4729_v21 = vadd.f32 %v4728_v8, %v13080_v3  ;;  %6277 = vrot.lane.b32.xlu1 %v5404_v29, %s8742_s18  ;;  %v6545_v22 = vsel %vm2066_vm7, %v6513_v36, %v6156_v9  ;;  %8235 = vmatprep.subr.mxu1 %v13537_v55  ;;  %v4841_v29 = vmax.f32 %v4727_v38, 0.0  ;;  %v13562_v9 = vpop.f32.mrf.mxu1 }
 0x51f   : > { %5847 = vrot.lane.b32.xlu0 %v8516_v40, %s15467_s20  ;;  %8267 = vmatpush2.msra.mxu1 %v13546_v41  ;;  %15738 = vst [vmem:[#allocation17_spill] sm:$0xff] %v13562_v9  ;;  %v8517_v40 = vld [vmem:[%s8869_s17 + $0x1ac] sm:$0xff] }
 0x520   : > { %v4842_v56 = vmax.f32 %v4729_v21, 0.0  ;;  %v4732_v57 = vpop.f32.mrf.mxu0  ;;  %v6264_v16 = vpop.permute.xlu1 %6263  ;;  %7146 = vmatpush1.msra.mxu0 %v13438_v4  ;;  %v5293_v4 = vld [vmem:[%s8869_s17 + $0x260] sm:$0xff]  ;;  %8236 = vmatprep.subr.mxu1 %v13559_v31 }
 0x521   : > { %v6577_v8 = vsel %vm2099_vm8, %v6545_v22, %v6264_v16  ;;  %v13556_v48 = vpop.permute.xlu0 %5833  ;;  %v4733_v21 = vadd.f32 %v4732_v57, %v13076_v11  ;;  %v8518_v22 = vld [vmem:[%s8869_s17 + $0xee] sm:$0xff]  ;;  %8268 = vmatpush2.msra.mxu1 %v13567_v10  ;;  %v5349_v9 = vld [vmem:[%s8869_s17 + $0x266] sm:$0xff]  ;;  %7147 = vmatprep.subr.mxu0 %v13449_v62 }
 0x522   : > { %v4734_v36 = vpop.f32.mrf.mxu0  ;;  %5110 = vmatprep.mubr.f32.mxu1 %v4842_v56  ;;  %5955 = vrot.lane.b32.xlu1 %v8517_v40, %s15495_s12  ;;  %v13573_v16 = vld [vmem:[#allocation2 + $0x788] sm:$0xff]  ;;  %v13610_v62 = vld [vmem:[#allocation2 + $0x760] sm:$0xff] }
 0x523   : > { %v4735_v38 = vadd.f32 %v4734_v36, %v13080_v3  ;;  %5485 = vrot.lane.b32.xlu0 %v8518_v22, %s15608_s23  ;;  %5111 = vmatmul.mubr.f32.gmra.mxu1 %v4841_v29  ;;  %v13581_v36 = vpop.f32.mrf.mxu1  ;;  %v4843_v29 = vmax.f32 %v4733_v21, 0.0  ;;  %v13585_v22 = vld [vmem:[#allocation2 + $0x780] sm:$0xff] }
 0x524   : > { %8182 = vmatmul.mubr.msk.f32.gmra.mxu0 %vm2154_vm9, %v6577_v8  ;;  %v5942_v57 = vpop.permute.xlu1 %5941  ;;  %15739 = vst [vmem:[#allocation112_spill] sm:$0xff] %v13581_v36  ;;  %8237 = vmatprep.subr.mxu1 %v13573_v16  ;;  %v5262_v8 = vld [vmem:[%s8869_s17 + $0x68] sm:$0xff]  ;;  %v13593_v36 = vld [vmem:[#allocation2 + $0x770] sm:$0xff] }
 0x525   : > { %v4844_v56 = vmax.f32 %v4735_v38, 0.0  ;;  %v13577_v40 = vpop.permute.xlu0 %5471  ;;  %6835 = vmatprep.mubr.f32.mxu0 %v15217_v61  ;;  %8269 = vmatpush2.msra.mxu1 %v13585_v22 }
 0x526   : > { %6063 = vrot.lane.b32.xlu1 %v5293_v4, %s15520_s21  ;;  %7148 = vmatpush2.msra.mxu0 %v13457_v0  ;;  %v5405_v0 = vld [vmem:[%s8869_s17 + $0x26c] sm:$0xff] }
 0x527   : > { %5613 = vrot.lane.b32.xlu0 %v8519_v43, %s15595_s16  ;;  %v4738_v38 = vpop.f32.mrf.mxu0  ;;  %5116 = vmatprep.mubr.f32.mxu1 %v4844_v56  ;;  %v13600_v43 = vld [vmem:[#allocation2 + $0x768] sm:$0xff]  ;;  %v13603_v56 = vpop.f32.mrf.mxu1 }
 0x528   : > { %5117 = vmatmul.mubr.f32.gmra.mxu1 %v4843_v29  ;;  %v6050_v19 = vpop.permute.xlu1 %6049  ;;  %v4739_v21 = vadd.f32 %v4738_v38, %v13076_v11  ;;  %15740 = vst [vmem:[#allocation97_spill] sm:$0xff] %v13603_v56  ;;  %v6354_v29 = vsel %vm375_vm1, %v5262_v8, %v13486_v50  ;;  %8238 = vmatprep.subr.mxu1 %v13591_v12 }
 0x529   : > { %v13597_v4 = vpop.permute.xlu0 %5599  ;;  %v4740_v2 = vpop.f32.mrf.mxu0  ;;  %v6386_v38 = vsel %vm1901_vm2, %v6354_v29, %v13507_v13  ;;  %8270 = vmatpush2.msra.mxu1 %v13593_v36  ;;  %7149 = vmatprep.subr.mxu0 %v13469_v28 }
 0x52a   : > { %v4741_v44 = vadd.f32 %v4740_v2, %v13080_v3  ;;  %6171 = vrot.lane.b32.xlu1 %v5349_v9, %s15616_s8  ;;  %v6418_v50 = vsel %vm1934_vm3, %v6386_v38, %v13534_v60  ;;  %8239 = vmatprep.subr.mxu1 %v13600_v43  ;;  %v4845_v9 = vmax.f32 %v4739_v21, 0.0 }
 0x52b   : > { %5741 = vrot.lane.b32.xlu0 %v8520_v24, %s15362_s19  ;;  %v6450_v13 = vsel %vm1967_vm4, %v6418_v50, %v13556_v48  ;;  %8271 = vmatpush2.msra.mxu1 %v13610_v62  ;;  %v13627_v24 = vld [vmem:[#allocation2 + $0x758] sm:$0xff]  ;;  %v13635_v48 = vld [vmem:[#allocation2 + $0x750] sm:$0xff] }
 0x52c   : > { %v4846_v8 = vmax.f32 %v4741_v44, 0.0  ;;  %v4744_v2 = vpop.f32.mrf.mxu0  ;;  %v6158_v56 = vpop.permute.xlu1 %6157  ;;  %7150 = vmatpush2.msra.mxu0 %v13478_v25  ;;  %v6482_v60 = vsel %vm2000_vm5, %v6450_v13, %v5942_v57  ;;  %8240 = vmatprep.subr.mxu1 %v13627_v24  ;;  %v8522_v13 = vld [vmem:[%s8869_s17 + $0x1b4] sm:$0xff] }
 0x52d   : > { %v13624_v29 = vpop.permute.xlu0 %5727  ;;  %v13630_v44 = vpop.f32.mrf.mxu1  ;;  %v4745_v38 = vadd.f32 %v4744_v2, %v13076_v11  ;;  %v6514_v21 = vsel %vm2033_vm6, %v6482_v60, %v6050_v19  ;;  %7151 = vmatprep.subr.mxu0 %v13489_v49  ;;  %8272 = vmatpush2.msra.mxu1 %v13635_v48  ;;  %v8523_v49 = vld [vmem:[%s8869_s17 + $0x106] sm:$0xff] }
 0x52e   : > { %15741 = vst [vmem:[#allocation22_spill] sm:$0xff] %v13630_v44  ;;  %v4746_v28 = vpop.f32.mrf.mxu0  ;;  %5122 = vmatprep.mubr.f32.mxu1 %v4846_v8  ;;  %6279 = vrot.lane.b32.xlu1 %v5405_v0, %s8742_s18  ;;  %v6546_v25 = vsel %vm2066_vm7, %v6514_v21, %v6158_v56  ;;  %v13654_v56 = vld [vmem:[#allocation2 + $0x748] sm:$0xff] }
 0x52f   : > { %v4747_v50 = vadd.f32 %v4746_v28, %v13080_v3  ;;  %5849 = vrot.lane.b32.xlu0 %v8521_v18, %s15467_s20  ;;  %5123 = vmatmul.mubr.f32.gmra.mxu1 %v4845_v9  ;;  %v13649_v18 = vpop.f32.mrf.mxu1  ;;  %v4847_v2 = vmax.f32 %v4745_v38, 0.0  ;;  %v5294_v60 = vld [vmem:[%s8869_s17 + $0x268] sm:$0xff]  ;;  %v13659_v28 = vld [vmem:[#allocation2 + $0x740] sm:$0xff]  ;;  %v13662_v38 = vld [vmem:[#allocation2 + $0x738] sm:$0xff] }
 0x530   : > { %v6266_v57 = vpop.permute.xlu1 %6265  ;;  %7152 = vmatpush2.msra.mxu0 %v13496_v27  ;;  %15742 = vst [vmem:[#allocation161_spill] sm:$0xff] %v13649_v18  ;;  %8241 = vmatprep.subr.mxu1 %v13654_v56 }
 0x531   : > { %v4848_v0 = vmax.f32 %v4747_v50, 0.0  ;;  %v6578_v8 = vsel %vm2099_vm8, %v6546_v25, %v6266_v57  ;;  %v13645_v19 = vpop.permute.xlu0 %5835  ;;  %v13668_v57 = vld [vmem:[#allocation2 + $0x730] sm:$0xff]  ;;  %7153 = vmatprep.subr.mxu0 %v13503_v37  ;;  %8273 = vmatpush2.msra.mxu1 %v13659_v28 }
 0x532   : > { %5957 = vrot.lane.b32.xlu1 %v8522_v13, %s15495_s12  ;;  %8183 = vmatmul.mubr.msk.f32.gmra.mxu0 %vm2154_vm9, %v6578_v8  ;;  %v5263_v13 = vld [vmem:[%s8869_s17 + $0x80] sm:$0xff] }
 0x533   : > { %5487 = vrot.lane.b32.xlu0 %v8523_v49, %s15608_s23  ;;  %v4750_v9 = vpop.f32.mrf.mxu0  ;;  %5128 = vmatprep.mubr.f32.mxu1 %v4848_v0  ;;  %v13671_v0 = vpop.f32.mrf.mxu1  ;;  %v8524_v49 = vld [vmem:[%s8869_s17 + $0x10c] sm:$0xff] }
 0x534   : > { %5129 = vmatmul.mubr.f32.gmra.mxu1 %v4847_v2  ;;  %v5944_v27 = vpop.permute.xlu1 %5943  ;;  %6841 = vmatprep.mubr.f32.mxu0 %v15217_v61  ;;  %v4751_v21 = vadd.f32 %v4750_v9, %v13076_v11  ;;  %15743 = vst [vmem:[#allocation68_spill] sm:$0xff] %v13671_v0  ;;  %v13676_v2 = vld [vmem:[#allocation2 + $0x728] sm:$0xff]  ;;  %v13688_v0 = vld [vmem:[#allocation2 + $0x720] sm:$0xff] }
 0x535   : > { %v13665_v50 = vpop.permute.xlu0 %5473  ;;  %v4752_v25 = vpop.f32.mrf.mxu0  ;;  %v5350_v9 = vld [vmem:[%s8869_s17 + $0x26e] sm:$0xff]  ;;  %8242 = vmatprep.subr.mxu1 %v13662_v38  ;;  %7154 = vmatpush2.msra.mxu0 %v13517_v53  ;;  %v13697_v53 = vld [vmem:[#allocation2 + $0x718] sm:$0xff] }
 0x536   : > { %v4753_v8 = vadd.f32 %v4752_v25, %v13080_v3  ;;  %6065 = vrot.lane.b32.xlu1 %v5294_v60, %s15520_s21  ;;  %8274 = vmatpush2.msra.mxu1 %v13668_v57  ;;  %v4849_v60 = vmax.f32 %v4751_v21, 0.0 }
 0x537   : > { %5615 = vrot.lane.b32.xlu0 %v8524_v49, %s15595_s16  ;;  %8243 = vmatprep.subr.mxu1 %v13676_v2  ;;  %v13691_v49 = vpop.f32.mrf.mxu1 }
 0x538   : > { %v4850_v44 = vmax.f32 %v4753_v8, 0.0  ;;  %v4756_v18 = vpop.f32.mrf.mxu0  ;;  %v6052_v37 = vpop.permute.xlu1 %6051  ;;  %7155 = vmatprep.subr.mxu0 %v13524_v34  ;;  %15744 = vst [vmem:[#allocation105_spill] sm:$0xff] %v13691_v49  ;;  %v6355_v8 = vsel %vm375_vm1, %v5263_v13, %v13577_v40  ;;  %v5406_v34 = vld [vmem:[%s8869_s17 + $0x274] sm:$0xff]  ;;  %8275 = vmatpush2.msra.mxu1 %v13688_v0 }
 0x539   : > { %v13685_v25 = vpop.permute.xlu0 %5601  ;;  %v4757_v23 = vadd.f32 %v4756_v18, %v13076_v11  ;;  %v6387_v21 = vsel %vm1901_vm2, %v6355_v8, %v13597_v4  ;;  %v13705_v49 = vld [vmem:[#allocation2 + $0x710] sm:$0xff]  ;;  %7156 = vmatpush2.msra.mxu0 %v13528_v54  ;;  %8244 = vmatprep.subr.mxu1 %v13697_v53  ;;  %v13719_v13 = vpop.f32.mrf.mxu1  ;;  %v13724_v54 = vld [vmem:[#allocation2 + $0x700] sm:$0xff] }
 0x53a   : > { %v4758_v17 = vpop.f32.mrf.mxu0  ;;  %5134 = vmatprep.mubr.f32.mxu1 %v4850_v44  ;;  %6173 = vrot.lane.b32.xlu1 %v5350_v9, %s15616_s8  ;;  %v6419_v40 = vsel %vm1934_vm3, %v6387_v21, %v13624_v29  ;;  %15745 = vst [vmem:[#allocation34_spill] sm:$0xff] %v13719_v13 }
 0x53b   : > { %v4759_v33 = vadd.f32 %v4758_v17, %v13080_v3  ;;  %5743 = vrot.lane.b32.xlu0 %v8525_v15, %s15362_s19  ;;  %5135 = vmatmul.mubr.f32.gmra.mxu1 %v4849_v60  ;;  %v6451_v4 = vsel %vm1967_vm4, %v6419_v40, %v13645_v19  ;;  %v13716_v15 = vld [vmem:[#allocation2 + $0x708] sm:$0xff]  ;;  %v4851_v9 = vmax.f32 %v4757_v23, 0.0 }
 0x53c   : > { %v6160_v44 = vpop.permute.xlu1 %6159  ;;  %7157 = vmatprep.subr.mxu0 %v13537_v55  ;;  %v6483_v29 = vsel %vm2000_vm5, %v6451_v4, %v5944_v27  ;;  %8276 = vmatpush2.msra.mxu1 %v13705_v49  ;;  %v8526_v19 = vld [vmem:[%s8869_s17 + $0x1c6] sm:$0xff]  ;;  %v8528_v4 = vld [vmem:[%s8869_s17 + $0x10e] sm:$0xff] }
 0x53d   : > { %v4852_v17 = vmax.f32 %v4759_v33, 0.0  ;;  %v13713_v18 = vpop.permute.xlu0 %5729  ;;  %v6515_v33 = vsel %vm2033_vm6, %v6483_v29, %v6052_v37  ;;  %8245 = vmatprep.subr.mxu1 %v13716_v15  ;;  %7158 = vmatpush2.msra.mxu0 %v13546_v41 }
 0x53e   : > { %6281 = vrot.lane.b32.xlu1 %v5406_v34, %s8742_s18  ;;  %v6547_v55 = vsel %vm2066_vm7, %v6515_v33, %v6160_v44  ;;  %8277 = vmatpush2.msra.mxu1 %v13724_v54  ;;  %v13735_v34 = vpop.f32.mrf.mxu1  ;;  %v8527_v44 = vld [vmem:[%s8869_s17 + $0x1cc] sm:$0xff] }
 0x53f   : > { %5851 = vrot.lane.b32.xlu0 %v8526_v19, %s15467_s20  ;;  %v4762_v60 = vpop.f32.mrf.mxu0  ;;  %5140 = vmatprep.mubr.f32.mxu1 %v4852_v17  ;;  %v5295_v17 = vld [vmem:[%s8869_s17 + $0x280] sm:$0xff] }
 0x540   : > { %5141 = vmatmul.mubr.f32.gmra.mxu1 %v4851_v9  ;;  %v6268_v23 = vpop.permute.xlu1 %6267  ;;  %v4763_v27 = vadd.f32 %v4762_v60, %v13076_v11  ;;  %7159 = vmatprep.subr.mxu0 %v13559_v31  ;;  %v13749_v60 = vpop.f32.mrf.mxu1  ;;  %v5351_v31 = vld [vmem:[%s8869_s17 + $0x286] sm:$0xff] }
 0x541   : > { %v6579_v8 = vsel %vm2099_vm8, %v6547_v55, %v6268_v23  ;;  %v5838_v21 = vpop.permute.xlu0 %5837  ;;  %v4764_v37 = vpop.f32.mrf.mxu0  ;;  %7160 = vmatpush2.msra.mxu0 %v13567_v10  ;;  %15746 = vst [vmem:[#allocation8_spill] sm:$0xff] %v13749_v60  ;;  %v8575_v60 = vld [vmem:[%s8869_s17 + $0x108] sm:$0xff] }
 0x542   : > { %v4765_v40 = vadd.f32 %v4764_v37, %v13080_v3  ;;  %5959 = vrot.lane.b32.xlu1 %v8527_v44, %s15495_s12  ;;  %8184 = vmatmul.mubr.msk.f32.gmra.mxu0 %vm2154_vm9, %v6579_v8  ;;  %v4853_v33 = vmax.f32 %v4763_v27, 0.0  ;;  %v5264_v8 = vld [vmem:[%s8869_s17 + $0x88] sm:$0xff] }
 0x543   : > { %5489 = vrot.lane.b32.xlu0 %v8528_v4, %s15608_s23  ;;  %6847 = vmatprep.mubr.f32.mxu0 %v15217_v61  ;;  %v13762_v4 = vpop.f32.mrf.mxu1 }
 0x544   : > { %v4854_v29 = vmax.f32 %v4765_v40, 0.0  ;;  %v4768_v9 = vpop.f32.mrf.mxu0  ;;  %v5946_v41 = vpop.permute.xlu1 %5945  ;;  %v8529_v40 = vld [vmem:[%s8869_s17 + $0x114] sm:$0xff]  ;;  %7161 = vmatprep.subr.mxu0 %v13573_v16  ;;  %v5407_v16 = vld [vmem:[%s8869_s17 + $0x28c] sm:$0xff] }
 0x545   : > { %v13746_v19 = vpop.permute.xlu0 %5475  ;;  %v4769_v55 = vadd.f32 %v4768_v9, %v13076_v11  ;;  %7162 = vmatpush2.msra.mxu0 %v13585_v22 }
 0x546   : > { %v4770_v23 = vpop.f32.mrf.mxu0  ;;  %5146 = vmatprep.mubr.f32.mxu1 %v4854_v29  ;;  %6067 = vrot.lane.b32.xlu1 %v5295_v17, %s15520_s21  ;;  %v6356_v17 = vsel %vm375_vm1, %v5264_v8, %v13665_v50 }
 0x547   : > { %v4771_v37 = vadd.f32 %v4770_v23, %v13080_v3  ;;  %5617 = vrot.lane.b32.xlu0 %v8529_v40, %s15595_s16  ;;  %5147 = vmatmul.mubr.f32.gmra.mxu1 %v4853_v33  ;;  %v4855_v29 = vmax.f32 %v4769_v55, 0.0  ;;  %v6388_v9 = vsel %vm1901_vm2, %v6356_v17, %v13685_v25  ;;  %v8530_v33 = vld [vmem:[%s8869_s17 + $0x1c8] sm:$0xff]  ;;  %v13778_v25 = vpop.f32.mrf.mxu1 }
 0x548   : > { %v6054_v27 = vpop.permute.xlu1 %6053  ;;  %7163 = vmatprep.subr.mxu0 %v13591_v12  ;;  %v6420_v22 = vsel %vm1934_vm3, %v6388_v9, %v13713_v18  ;;  %15747 = vst [vmem:[#allocation73_spill] sm:$0xff] %v13778_v25 }
 0x549   : > { %v4856_v10 = vmax.f32 %v4771_v37, 0.0  ;;  %v13759_v44 = vpop.permute.xlu0 %5603  ;;  %7164 = vmatpush2.msra.mxu0 %v13593_v36  ;;  %v6452_v55 = vsel %vm1967_vm4, %v6420_v22, %v5838_v21  ;;  %v8531_v21 = vld [vmem:[%s8869_s17 + $0x1ce] sm:$0xff] }
 0x54a   : > { %6175 = vrot.lane.b32.xlu1 %v5351_v31, %s15616_s8  ;;  %7165 = vmatprep.subr.mxu0 %v13600_v43  ;;  %v6484_v8 = vsel %vm2000_vm5, %v6452_v55, %v5946_v41 }
 0x54b   : > { %5745 = vrot.lane.b32.xlu0 %v8530_v33, %s15362_s19  ;;  %5152 = vmatprep.mubr.f32.mxu1 %v4856_v10  ;;  %v6516_v18 = vsel %vm2033_vm6, %v6484_v8, %v6054_v27  ;;  %v13793_v27 = vpop.f32.mrf.mxu1  ;;  %v8534_v8 = vld [vmem:[%s8869_s17 + $0x12c] sm:$0xff] }
 0x54c   : > { %v4774_v23 = vpop.f32.mrf.mxu0  ;;  %5153 = vmatmul.mubr.f32.gmra.mxu1 %v4855_v29  ;;  %v6162_v50 = vpop.permute.xlu1 %6161  ;;  %7166 = vmatpush2.msra.mxu0 %v13610_v62  ;;  %v8532_v29 = vld [vmem:[%s8869_s17 + $0x1d4] sm:$0xff] }
 0x54d   : > { %v5732_v12 = vpop.permute.xlu0 %5731  ;;  %v4775_v37 = vadd.f32 %v4774_v23, %v13076_v11  ;;  %7167 = vmatprep.subr.mxu0 %v13627_v24  ;;  %v6548_v43 = vsel %vm2066_vm7, %v6516_v18, %v6162_v50  ;;  %v8533_v24 = vld [vmem:[%s8869_s17 + $0x126] sm:$0xff] }
 0x54e   : > { %v4776_v40 = vpop.f32.mrf.mxu0  ;;  %6283 = vrot.lane.b32.xlu1 %v5407_v16, %s8742_s18  ;;  %7168 = vmatpush2.msra.mxu0 %v13635_v48  ;;  %v5296_v48 = vld [vmem:[%s8869_s17 + $0x288] sm:$0xff]  ;;  %v13805_v16 = vpop.f32.mrf.mxu1  ;;  %v5265_v50 = vld [vmem:[%s8869_s17 + $0xa0] sm:$0xff] }
 0x54f   : > { %v4777_v36 = vadd.f32 %v4776_v40, %v13080_v3  ;;  %5853 = vrot.lane.b32.xlu0 %v8531_v21, %s15467_s20  ;;  %7169 = vmatprep.subr.mxu0 %v13654_v56  ;;  %v4857_v17 = vmax.f32 %v4775_v37, 0.0  ;;  %15748 = vst [vmem:[#allocation132_spill] sm:$0xff] %v13805_v16  ;;  %v5352_v37 = vld [vmem:[%s8869_s17 + $0x28e] sm:$0xff] }
 0x550   : > { %v6270_v41 = vpop.permute.xlu1 %6269  ;;  %7170 = vmatpush2.msra.mxu0 %v13659_v28 }
 0x551   : > { %v4858_v31 = vmax.f32 %v4777_v36, 0.0  ;;  %v6580_v10 = vsel %vm2099_vm8, %v6548_v43, %v6270_v41  ;;  %v5840_v62 = vpop.permute.xlu0 %5839  ;;  %7171 = vmatprep.subr.mxu0 %v13662_v38  ;;  %v13820_v38 = vpop.f32.mrf.mxu1  ;;  %v6357_v36 = vsel %vm375_vm1, %v5265_v50, %v13746_v19  ;;  %v8535_v43 = vld [vmem:[%s8869_s17 + $0x1e0] sm:$0xff]  ;;  %v8537_v50 = vld [vmem:[%s8869_s17 + $0x1ec] sm:$0xff] }
 0x552   : > { %5961 = vrot.lane.b32.xlu1 %v8532_v29, %s15495_s12  ;;  %8185 = vmatmul.mubr.msk.f32.gmra.mxu0 %vm2154_vm9, %v6580_v10 }
 0x553   : > { %5491 = vrot.lane.b32.xlu0 %v8533_v24, %s15608_s23  ;;  %5158 = vmatprep.mubr.f32.mxu1 %v4858_v31 }
 0x554   : > { %v4780_v9 = vpop.f32.mrf.mxu0  ;;  %5159 = vmatmul.mubr.f32.gmra.mxu1 %v4857_v17  ;;  %v5948_v33 = vpop.permute.xlu1 %5947  ;;  %6853 = vmatprep.mubr.f32.mxu0 %v15217_v61 }
 0x555   : > { %v13802_v56 = vpop.permute.xlu0 %5477  ;;  %v4781_v22 = vadd.f32 %v4780_v9, %v13076_v11  ;;  %7172 = vmatpush2.msra.mxu0 %v13668_v57  ;;  %v6389_v57 = vsel %vm1901_vm2, %v6357_v36, %v13759_v44 }
 0x556   : > { %v4782_v23 = vpop.f32.mrf.mxu0  ;;  %6069 = vrot.lane.b32.xlu1 %v5296_v48, %s15520_s21  ;;  %7173 = vmatprep.subr.mxu0 %v13676_v2  ;;  %v5408_v2 = vld [vmem:[%s8869_s17 + $0x294] sm:$0xff] }
 0x557   : > { %v4783_v55 = vadd.f32 %v4782_v23, %v13080_v3  ;;  %5619 = vrot.lane.b32.xlu0 %v8534_v8, %s15595_s16  ;;  %7174 = vmatpush2.msra.mxu0 %v13688_v0  ;;  %v4859_v21 = vmax.f32 %v4781_v22, 0.0  ;;  %v6421_v0 = vsel %vm1934_vm3, %v6389_v57, %v5732_v12  ;;  %v5266_v57 = vld [vmem:[%s8869_s17 + $0xa8] sm:$0xff] }
 0x558   : > { %v6056_v28 = vpop.permute.xlu1 %6055  ;;  %7175 = vmatprep.subr.mxu0 %v13697_v53  ;;  %v6453_v19 = vsel %vm1967_vm4, %v6421_v0, %v5840_v62  ;;  %v13835_v53 = vpop.f32.mrf.mxu1  ;;  %v8536_v62 = vld [vmem:[%s8869_s17 + $0x1e6] sm:$0xff] }
 0x559   : > { %v4860_v40 = vmax.f32 %v4783_v55, 0.0  ;;  %v13817_v18 = vpop.permute.xlu0 %5605  ;;  %7176 = vmatpush2.msra.mxu0 %v13705_v49  ;;  %15749 = vst [vmem:[#allocation180_spill] sm:$0xff] %v13835_v53  ;;  %v6485_v44 = vsel %vm2000_vm5, %v6453_v19, %v5948_v33  ;;  %v5297_v55 = vld [vmem:[%s8869_s17 + $0x2a0] sm:$0xff] }
 0x55a   : > { %6177 = vrot.lane.b32.xlu1 %v5352_v37, %s15616_s8  ;;  %7177 = vmatprep.subr.mxu0 %v13716_v15  ;;  %v6517_v49 = vsel %vm2033_vm6, %v6485_v44, %v6056_v28  ;;  %v13847_v22 = vpop.f32.mrf.mxu1  ;;  %v5353_v0 = vld [vmem:[%s8869_s17 + $0x2a6] sm:$0xff] }
 0x55b   : > { %5747 = vrot.lane.b32.xlu0 %v8535_v43, %s15362_s19  ;;  %5164 = vmatprep.mubr.f32.mxu1 %v4860_v40 }
 0x55c   : > { %v4786_v41 = vpop.f32.mrf.mxu0  ;;  %5165 = vmatmul.mubr.f32.gmra.mxu1 %v4859_v21  ;;  %v6164_v31 = vpop.permute.xlu1 %6163  ;;  %7178 = vmatpush2.msra.mxu0 %v13724_v54  ;;  %v8538_v54 = vld [vmem:[%s8869_s17 + $0x12e] sm:$0xff] }
 0x55d   : > { %v5734_v10 = vpop.permute.xlu0 %5733  ;;  %v4787_v17 = vadd.f32 %v4786_v41, %v13076_v11  ;;  %v6549_v15 = vsel %vm2066_vm7, %v6517_v49, %v6164_v31  ;;  %v13858_v40 = vpop.f32.mrf.mxu1 }
 0x55e   : > { %v4788_v29 = vpop.f32.mrf.mxu0  ;;  %6285 = vrot.lane.b32.xlu1 %v5408_v2, %s8742_s18  ;;  %15750 = vst [vmem:[#allocation134_spill] sm:$0xff] %v13858_v40  ;;  %v8539_v2 = vld [vmem:[%s8869_s17 + $0x134] sm:$0xff] }
 0x55f   : > { %v4789_v12 = vadd.f32 %v4788_v29, %v13080_v3  ;;  %5855 = vrot.lane.b32.xlu0 %v8536_v62, %s15467_s20  ;;  %v4861_v23 = vmax.f32 %v4787_v17, 0.0  ;;  %v13867_v44 = vpop.f32.mrf.mxu1  ;;  %v6358_v17 = vsel %vm375_vm1, %v5266_v57, %v13802_v56  ;;  %v5409_v62 = vld [vmem:[%s8869_s17 + $0x2ac] sm:$0xff] }
 0x560   : > { %v6272_v24 = vpop.permute.xlu1 %6271  ;;  %v6390_v49 = vsel %vm1901_vm2, %v6358_v17, %v13817_v18  ;;  %v2967_v18 = vadd.f32 %v12857_v52, %v12277_v59  ;;  %v8543_v59 = vld [vmem:[%s8869_s17 + $0x146] sm:$0xff]  ;;  %v2973_v17 = vadd.f32 %v12896_v39, %v12295_v35 }
 0x561   : > { %v4862_v48 = vmax.f32 %v4789_v12, 0.0  ;;  %v6581_v9 = vsel %vm2099_vm8, %v6549_v15, %v6272_v24  ;;  %v5842_v33 = vpop.permute.xlu0 %5841  ;;  %v8540_v12 = vld [vmem:[%s8869_s17 + $0x1e8] sm:$0xff]  ;;  %v6422_v15 = vsel %vm1934_vm3, %v6390_v49, %v5734_v10  ;;  %v8545_v35 = vld [vmem:[%s8869_s17 + $0xc0] sm:$0xff] }
 0x562   : > { %5963 = vrot.lane.b32.xlu1 %v8537_v50, %s15495_s12  ;;  %8186 = vmatmul.mubr.msk.f32.gmra.mxu0 %vm2154_vm9, %v6581_v9  ;;  %v13879_v9 = vpop.f32.mrf.mxu1  ;;  %v8541_v10 = vld [vmem:[%s8869_s17 + $0x1ee] sm:$0xff] }
 0x563   : > { %5493 = vrot.lane.b32.xlu0 %v8538_v54, %s15608_s23  ;;  %5170 = vmatprep.mubr.f32.mxu1 %v4862_v48  ;;  %v6454_v48 = vsel %vm1967_vm4, %v6422_v15, %v5842_v33  ;;  %15751 = vst [vmem:[#allocation20_spill] sm:$0xff] %v13879_v9  ;;  %v5298_v57 = vld [vmem:[%s8869_s17 + $0x2a8] sm:$0xff]  ;;  %v8569_v9 = vld [vmem:[%s8869_s17 + $0x100] sm:$0xff] }
 0x564   : > { %v4792_v8 = vpop.f32.mrf.mxu0  ;;  %5171 = vmatmul.mubr.f32.gmra.mxu1 %v4861_v23  ;;  %v5950_v37 = vpop.permute.xlu1 %5949  ;;  %6859 = vmatprep.mubr.f32.mxu0 %v15217_v61  ;;  %v8544_v49 = vld [vmem:[%s8869_s17 + $0x14c] sm:$0xff] }
 0x565   : > { %v13856_v28 = vpop.permute.xlu0 %5479  ;;  %v4793_v36 = vadd.f32 %v4792_v8, %v13076_v11  ;;  %v6486_v23 = vsel %vm2000_vm5, %v6454_v48, %v5950_v37 }
 0x566   : > { %v4794_v21 = vpop.f32.mrf.mxu0  ;;  %6071 = vrot.lane.b32.xlu1 %v5297_v55, %s15520_s21  ;;  %v6359_v39 = vsel %vm375_vm1, %v8545_v35, %v13856_v28 }
 0x567   : > { %v4795_v43 = vadd.f32 %v4794_v21, %v13080_v3  ;;  %5621 = vrot.lane.b32.xlu0 %v8539_v2, %s15595_s16  ;;  %v4863_v29 = vmax.f32 %v4793_v36, 0.0  ;;  %v8542_v21 = vld [vmem:[%s8869_s17 + $0x1f4] sm:$0xff] }
 0x568   : > { %v6058_v41 = vpop.permute.xlu1 %6057 }
 0x569   : > { %v4864_v31 = vmax.f32 %v4795_v43, 0.0  ;;  %v5608_v19 = vpop.permute.xlu0 %5607  ;;  %v6518_v50 = vsel %vm2033_vm6, %v6486_v23, %v6058_v41 }
 0x56a   : > { %6179 = vrot.lane.b32.xlu1 %v5353_v0, %s15616_s8 }
 0x56b   : > { %5749 = vrot.lane.b32.xlu0 %v8540_v12, %s15362_s19  ;;  %5176 = vmatprep.mubr.f32.mxu1 %v4864_v31 }
 0x56c   : > { %5177 = vmatmul.mubr.f32.gmra.mxu1 %v4863_v29  ;;  %v6166_v24 = vpop.permute.xlu1 %6165 }
 0x56d   : > { %v5736_v56 = vpop.permute.xlu0 %5735  ;;  %v6550_v54 = vsel %vm2066_vm7, %v6518_v50, %v6166_v24  ;;  %v6391_v50 = vsel %vm1901_vm2, %v6359_v39, %v5608_v19  ;;  %v8547_v19 = vld [vmem:[%s8869_s17 + $0x206] sm:$0xff] }
 0x56e   : > { %6287 = vrot.lane.b32.xlu1 %v5409_v62, %s8742_s18  ;;  %v5354_v62 = vld [vmem:[%s8869_s17 + $0x2ae] sm:$0xff] }
 0x56f   : > { %5857 = vrot.lane.b32.xlu0 %v8541_v10, %s15467_s20  ;;  %v8546_v10 = vld [vmem:[%s8869_s17 + $0x200] sm:$0xff] }
 0x570   : > { %v4998_v33 = vpop.f32.mrf.mxu1  ;;  %v6274_v55 = vpop.permute.xlu1 %6273 }
 0x571   : > { %v13889_v8 = vadd.f32 %v4998_v33, %v2967_v18  ;;  %v6582_v36 = vsel %vm2099_vm8, %v6550_v54, %v6274_v55  ;;  %v5844_v37 = vpop.permute.xlu0 %5843  ;;  %v5410_v54 = vld [vmem:[%s8869_s17 + $0x2b4] sm:$0xff]  ;;  %v6423_v33 = vsel %vm1934_vm3, %v6391_v50, %v5736_v56 }
 0x572   : > { %5965 = vrot.lane.b32.xlu1 %v8542_v21, %s15495_s12  ;;  %8187 = vmatmul.mubr.msk.f32.gmra.mxu0 %vm2154_vm9, %v6582_v36  ;;  %v13899_v43 = vpop.f32.mrf.mxu1  ;;  %v6455_v28 = vsel %vm1967_vm4, %v6423_v33, %v5844_v37 }
 0x573   : > { %15752 = vst [vmem:[#allocation144_spill] sm:$0xff] %v13889_v8  ;;  %5495 = vrot.lane.b32.xlu0 %v8543_v59, %s15608_s23  ;;  %v4798_v52 = vpop.f32.mrf.mxu0  ;;  %6865 = vmatprep.mubr.f32.mxu0 %v15217_v61  ;;  %15753 = vst [vmem:[#allocation100_spill] sm:$0xff] %v13899_v43 }
 0x574   : > { %v5952_v2 = vpop.permute.xlu1 %5951  ;;  %v4799_v0 = vadd.f32 %v4798_v52, %v13076_v11 }
 0x575   : > { %v13902_v41 = vpop.permute.xlu0 %5481  ;;  %v4800_v31 = vpop.f32.mrf.mxu0 }
 0x576   : > { %v4801_v29 = vadd.f32 %v4800_v31, %v13080_v3  ;;  %6073 = vrot.lane.b32.xlu1 %v5298_v57, %s15520_s21  ;;  %v4865_v48 = vmax.f32 %v4799_v0, 0.0  ;;  %v2979_v3 = vadd.f32 %v12932_v5, %v12320_v14  ;;  %v6487_v14 = vsel %vm2000_vm5, %v6455_v28, %v5952_v2  ;;  %v8548_v31 = vld [vmem:[%s8869_s17 + $0x20c] sm:$0xff] }
 0x577   : > { %5623 = vrot.lane.b32.xlu0 %v8544_v49, %s15595_s16  ;;  %v5004_v12 = vpop.f32.mrf.mxu1  ;;  %v2985_v2 = vadd.f32 %v12963_v7, %v12336_v30  ;;  %v5299_v49 = vld [vmem:[%s8869_s17 + $0x2c0] sm:$0xff]  ;;  %v2991_v7 = vadd.f32 %v12994_v45, %v12353_v42  ;;  %v5411_v42 = vld [vmem:[%s8869_s17 + $0x2cc] sm:$0xff] }
 0x578   : > { %v4866_v15 = vmax.f32 %v4801_v29, 0.0  ;;  %v13911_v11 = vadd.f32 %v5004_v12, %v2973_v17  ;;  %v6060_v24 = vpop.permute.xlu1 %6059  ;;  %v8549_v17 = vld [vmem:[%s8869_s17 + $0x14e] sm:$0xff] }
 0x579   : > { %v5610_v23 = vpop.permute.xlu0 %5609  ;;  %v13913_v18 = vpop.f32.mrf.mxu1  ;;  %v6519_v5 = vsel %vm2033_vm6, %v6487_v14, %v6060_v24  ;;  %v8550_v24 = vld [vmem:[%s8869_s17 + $0x154] sm:$0xff] }
 0x57a   : > { %5182 = vmatprep.mubr.f32.mxu1 %v4866_v15  ;;  %6181 = vrot.lane.b32.xlu1 %v5354_v62, %s15616_s8 }
 0x57b   : > { %5751 = vrot.lane.b32.xlu0 %v8546_v10, %s15362_s19  ;;  %5183 = vmatmul.mubr.f32.gmra.mxu1 %v4865_v48  ;;  %v5355_v48 = vld [vmem:[%s8869_s17 + $0x2c6] sm:$0xff] }
 0x57c   : > { %v5010_v55 = vpop.f32.mrf.mxu1  ;;  %v6168_v36 = vpop.permute.xlu1 %6167  ;;  %v8551_v10 = vld [vmem:[%s8869_s17 + $0xc8] sm:$0xff] }
 0x57d   : > { %v13927_v21 = vadd.f32 %v5010_v55, %v2979_v3  ;;  %v5738_v59 = vpop.permute.xlu0 %5737  ;;  %v6551_v56 = vsel %vm2066_vm7, %v6519_v5, %v6168_v36  ;;  %v8552_v55 = vld [vmem:[%s8869_s17 + $0x208] sm:$0xff] }
 0x57e   : > { %6289 = vrot.lane.b32.xlu1 %v5410_v54, %s8742_s18  ;;  %v13935_v57 = vpop.f32.mrf.mxu1  ;;  %v6360_v54 = vsel %vm375_vm1, %v8551_v10, %v13902_v41  ;;  %v2997_v41 = vadd.f32 %v13025_v6, %v12375_v46 }
 0x57f   : > { %5859 = vrot.lane.b32.xlu0 %v8547_v19, %s15467_s20  ;;  %v6392_v33 = vsel %vm1901_vm2, %v6360_v54, %v5610_v23 }
 0x580   : > { %v6276_v52 = vpop.permute.xlu1 %6275  ;;  %v6424_v45 = vsel %vm1934_vm3, %v6392_v33, %v5738_v59 }
 0x581   : > { %v6583_v37 = vsel %vm2099_vm8, %v6551_v56, %v6276_v52  ;;  %v5846_v0 = vpop.permute.xlu0 %5845  ;;  %v8553_v52 = vld [vmem:[%s8869_s17 + $0x20e] sm:$0xff] }
 0x582   : > { %5967 = vrot.lane.b32.xlu1 %v8548_v31, %s15495_s12  ;;  %8188 = vmatmul.mubr.msk.f32.gmra.mxu0 %vm2154_vm9, %v6583_v37  ;;  %v6456_v14 = vsel %vm1967_vm4, %v6424_v45, %v5846_v0  ;;  %v8173_v37 = vld [vmem:[%s14957_s4 + $0x2] ss:$4 sm:$0x3]  ;;  %v8556_v45 = vld [vmem:[%s8869_s17 + $0x16c] sm:$0xff] }
 0x583   : > { %5497 = vrot.lane.b32.xlu0 %v8549_v17, %s15608_s23  ;;  %v5016_v29 = vpop.f32.mrf.mxu1  ;;  %6871 = vmatprep.mubr.f32.mxu0 %v15217_v61 }
 0x584   : > { %v13947_v12 = vadd.f32 %v5016_v29, %v2985_v2  ;;  %v5954_v62 = vpop.permute.xlu1 %5953  ;;  %v13970_v36 = vpop.f32.mrf.mxu0 }
 0x585   : > { %v13949_v15 = vpop.permute.xlu0 %5483  ;;  %v13951_v30 = vpop.f32.mrf.mxu1  ;;  %v6488_v23 = vsel %vm2000_vm5, %v6456_v14, %v5954_v62 }
 0x586   : > { %6075 = vrot.lane.b32.xlu1 %v5299_v49, %s15520_s21  ;;  %v13985_v0 = vpop.f32.mrf.mxu0  ;;  %v8554_v49 = vld [vmem:[%s8869_s17 + $0x214] sm:$0xff] }
 0x587   : > { %5625 = vrot.lane.b32.xlu0 %v8550_v24, %s15595_s16  ;;  %v13999_v24 = vrot.slane %v8173_v37, %v15704_v1 }
 0x588   : > { %v5022_v35 = vpop.f32.mrf.mxu1  ;;  %v6062_v39 = vpop.permute.xlu1 %6061 }
 0x589   : > { %v13959_v3 = vadd.f32 %v5022_v35, %v2991_v7  ;;  %v5612_v50 = vpop.permute.xlu0 %5611  ;;  %v6520_v56 = vsel %vm2033_vm6, %v6488_v23, %v6062_v39  ;;  %v3003_v7 = vadd.f32 %v13053_v47, %v12390_v20  ;;  %v5300_v35 = vld [vmem:[%s8869_s17 + $0x2c8] sm:$0xff]  ;;  %v14006_v39 = vrot.slane %v8173_v37, %v15705_v26  ;;  %v8557_v37 = vld [vmem:[%s8869_s17 + $0xe0] sm:$0xff] }
 0x58a   : > { %6183 = vrot.lane.b32.xlu1 %v5355_v48, %s15616_s8  ;;  %v13973_v5 = vpop.f32.mrf.mxu1  ;;  %v8555_v48 = vld [vmem:[%s8869_s17 + $0x166] sm:$0xff] }
 0x58b   : > { %5753 = vrot.lane.b32.xlu0 %v8552_v55, %s15362_s19 }
 0x58c   : > { %v6170_v28 = vpop.permute.xlu1 %6169 }
 0x58d   : > { %v5740_v19 = vpop.permute.xlu0 %5739  ;;  %v6552_v46 = vsel %vm2066_vm7, %v6520_v56, %v6170_v28  ;;  %v5356_v28 = vld [vmem:[%s8869_s17 + $0x2ce] sm:$0xff] }
 0x58e   : > { %6291 = vrot.lane.b32.xlu1 %v5411_v42, %s8742_s18 }
 0x58f   : > { %5861 = vrot.lane.b32.xlu0 %v8553_v52, %s15467_s20  ;;  %v5028_v59 = vpop.f32.mrf.mxu1 }
 0x590   : > { %v13988_v6 = vadd.f32 %v5028_v59, %v2997_v41  ;;  %v6278_v2 = vpop.permute.xlu1 %6277  ;;  %v3009_v59 = vadd.f32 %v13086_v51, %v12408_v63 }
 0x591   : > { %v6584_v31 = vsel %vm2099_vm8, %v6552_v46, %v6278_v2  ;;  %v5848_v17 = vpop.permute.xlu0 %5847  ;;  %v13991_v29 = vpop.f32.mrf.mxu1  ;;  %v6361_v46 = vsel %vm375_vm1, %v8557_v37, %v13949_v15 }
 0x592   : > { %5969 = vrot.lane.b32.xlu1 %v8554_v49, %s15495_s12  ;;  %v6801_v62 = vpop.f32.mrf.mxu0  ;;  %8189 = vmatmul.mubr.msk.f32.gmra.mxu0 %vm2154_vm9, %v6584_v31  ;;  %v6393_v2 = vsel %vm1901_vm2, %v6361_v46, %v5612_v50  ;;  %v8558_v31 = vld [vmem:[%s8869_s17 + $0x220] sm:$0xff] }
 0x593   : > { %5499 = vrot.lane.b32.xlu0 %v8555_v48, %s15608_s23  ;;  %6877 = vmatprep.mubr.f32.mxu0 %v15217_v61  ;;  %v6802_v33 = vadd.f32 %v6801_v62, %v13999_v24  ;;  %v5412_v62 = vld [vmem:[%s8869_s17 + $0x2d4] sm:$0xff] }
 0x594   : > { %v5034_v10 = vpop.f32.mrf.mxu1  ;;  %v5956_v54 = vpop.permute.xlu1 %5955 }
 0x595   : > { %v14009_v55 = vadd.f32 %v5034_v10, %v3003_v7  ;;  %v14011_v20 = vpop.permute.xlu0 %5485  ;;  %v6803_v47 = vpop.f32.mrf.mxu0  ;;  %v6988_v23 = vmax.f32 %v6802_v33, 0.0  ;;  %v6425_v7 = vsel %vm1934_vm3, %v6393_v2, %v5740_v19  ;;  %v3015_v10 = vadd.f32 %v13113_v32, %v12430_v58  ;;  %v8559_v33 = vld [vmem:[%s8869_s17 + $0x226] sm:$0xff]  ;;  %v8561_v32 = vld [vmem:[%s8869_s17 + $0x16e] sm:$0xff] }
 0x596   : > { %v6804_v42 = vadd.f32 %v6803_v47, %v14006_v39  ;;  %6077 = vrot.lane.b32.xlu1 %v5300_v35, %s15520_s21  ;;  %v14018_v56 = vpop.f32.mrf.mxu1  ;;  %v6457_v63 = vsel %vm1967_vm4, %v6425_v7, %v5848_v17 }
 0x597   : > { %5627 = vrot.lane.b32.xlu0 %v8556_v45, %s15595_s16  ;;  %v6489_v50 = vsel %vm2000_vm5, %v6457_v63, %v5956_v54  ;;  %v8562_v63 = vld [vmem:[%s8869_s17 + $0x174] sm:$0xff] }
 0x598   : > { %v6989_v14 = vmax.f32 %v6804_v42, 0.0  ;;  %v6064_v41 = vpop.permute.xlu1 %6063 }
 0x599   : > { %v14020_v52 = vpop.permute.xlu0 %5613  ;;  %v6521_v19 = vsel %vm2033_vm6, %v6489_v50, %v6064_v41  ;;  %v5301_v41 = vld [vmem:[%s8869_s17 + $0x2e0] sm:$0xff] }
 0x59a   : > { %7185 = vmatprep.mubr.f32.mxu1 %v6989_v14  ;;  %6185 = vrot.lane.b32.xlu1 %v5356_v28, %s15616_s8  ;;  %v8560_v14 = vld [vmem:[%s8869_s17 + $0x22c] sm:$0xff] }
 0x59b   : > { %5755 = vrot.lane.b32.xlu0 %v8558_v31, %s15362_s19  ;;  %v5040_v49 = vpop.f32.mrf.mxu1  ;;  %7186 = vmatmul.mubr.f32.vlgmr.msra.gmra.mxu1 %v6988_v23 }
 0x59c   : > { %v14033_v48 = vadd.f32 %v5040_v49, %v3009_v59  ;;  %v6172_v51 = vpop.permute.xlu1 %6171  ;;  %v15754_v49 = vld [vmem:[#allocation169_spill] sm:$0xff] }
 0x59d   : > { %v5742_v15 = vpop.permute.xlu0 %5741  ;;  %v14036_v35 = vpop.f32.mrf.mxu1  ;;  %v6553_v47 = vsel %vm2066_vm7, %v6521_v19, %v6172_v51 }
 0x59e   : > { %6293 = vrot.lane.b32.xlu1 %v5412_v62, %s8742_s18  ;;  %v15755_v62 = vld [vmem:[#allocation66_spill] sm:$0xff] }
 0x59f   : > { %5863 = vrot.lane.b32.xlu0 %v8559_v33, %s15467_s20  ;;  %v3021_v7 = vadd.f32 %v15755_v62, %v15754_v49 }
 0x5a0   : > { %v5046_v17 = vpop.f32.mrf.mxu1  ;;  %v6280_v42 = vpop.permute.xlu1 %6279 }
 0x5a1   : > { %v14046_v45 = vadd.f32 %v5046_v17, %v3015_v10  ;;  %v6585_v54 = vsel %vm2099_vm8, %v6553_v47, %v6280_v42  ;;  %v5850_v28 = vpop.permute.xlu0 %5849  ;;  %v5357_v10 = vld [vmem:[%s8869_s17 + $0x2e6] sm:$0xff] }
 0x5a2   : > { %5971 = vrot.lane.b32.xlu1 %v8560_v14, %s15495_s12  ;;  %v6807_v58 = vpop.f32.mrf.mxu0  ;;  %8190 = vmatmul.mubr.msk.f32.gmra.mxu0 %vm2154_vm9, %v6585_v54  ;;  %v14057_v46 = vpop.f32.mrf.mxu1  ;;  %v8563_v54 = vld [vmem:[%s8869_s17 + $0xe8] sm:$0xff] }
 0x5a3   : > { %5501 = vrot.lane.b32.xlu0 %v8561_v32, %s15608_s23  ;;  %6883 = vmatprep.mubr.f32.mxu0 %v15217_v61  ;;  %v6808_v23 = vadd.f32 %v6807_v58, %v13999_v24  ;;  %v6362_v14 = vsel %vm375_vm1, %v8563_v54, %v14011_v20  ;;  %v15756_v58 = vld [vmem:[#allocation50_spill] sm:$0xff]  ;;  %v15757_v32 = vld [vmem:[#allocation160_spill] sm:$0xff] }
 0x5a4   : > { %v5958_v59 = vpop.permute.xlu1 %5957  ;;  %v6809_v37 = vpop.f32.mrf.mxu0 }
 0x5a5   : > { %v14059_v2 = vpop.permute.xlu0 %5487  ;;  %v6810_v31 = vadd.f32 %v6809_v37, %v14006_v39  ;;  %v6990_v19 = vmax.f32 %v6808_v23, 0.0  ;;  %v6394_v23 = vsel %vm1901_vm2, %v6362_v14, %v14020_v52  ;;  %v8564_v37 = vld [vmem:[%s8869_s17 + $0x228] sm:$0xff] }
 0x5a6   : > { %6079 = vrot.lane.b32.xlu1 %v5301_v41, %s15520_s21  ;;  %v3027_v41 = vadd.f32 %v15757_v32, %v15756_v58  ;;  %v6426_v49 = vsel %vm1934_vm3, %v6394_v23, %v5742_v15  ;;  %v15758_v58 = vld [vmem:[#allocation152_spill] sm:$0xff]  ;;  %v15759_v32 = vld [vmem:[#allocation179_spill] sm:$0xff] }
 0x5a7   : > { %v6991_v51 = vmax.f32 %v6810_v31, 0.0  ;;  %5629 = vrot.lane.b32.xlu0 %v8562_v63, %s15595_s16  ;;  %v5052_v50 = vpop.f32.mrf.mxu1  ;;  %v5413_v31 = vld [vmem:[%s8869_s17 + $0x2ec] sm:$0xff]  ;;  %v6458_v20 = vsel %vm1967_vm4, %v6426_v49, %v5850_v28 }
 0x5a8   : > { %v14068_v33 = vadd.f32 %v5052_v50, %v3021_v7  ;;  %v6066_v47 = vpop.permute.xlu1 %6065  ;;  %v6490_v50 = vsel %vm2000_vm5, %v6458_v20, %v5958_v59  ;;  %v8566_v59 = vld [vmem:[%s8869_s17 + $0x234] sm:$0xff] }
 0x5a9   : > { %v5616_v17 = vpop.permute.xlu0 %5615  ;;  %v14070_v42 = vpop.f32.mrf.mxu1  ;;  %7191 = vmatprep.mubr.f32.mxu1 %v6991_v51  ;;  %v6522_v52 = vsel %vm2033_vm6, %v6490_v50, %v6066_v47  ;;  %v8567_v47 = vld [vmem:[%s8869_s17 + $0x186] sm:$0xff] }
 0x5aa   : > { %6187 = vrot.lane.b32.xlu1 %v5357_v10, %s15616_s8  ;;  %7192 = vmatmul.mubr.f32.gmra.mxu1 %v6990_v19  ;;  %v8565_v10 = vld [vmem:[%s8869_s17 + $0x22e] sm:$0xff] }
 0x5ab   : > { %5757 = vrot.lane.b32.xlu0 %v8564_v37, %s15362_s19  ;;  %v5302_v37 = vld [vmem:[%s8869_s17 + $0x2e8] sm:$0xff] }
 0x5ac   : > { %v5058_v62 = vpop.f32.mrf.mxu1  ;;  %v6174_v7 = vpop.permute.xlu1 %6173 }
 0x5ad   : > { %v14085_v51 = vadd.f32 %v5058_v62, %v3027_v41  ;;  %v5744_v63 = vpop.permute.xlu0 %5743  ;;  %v6554_v15 = vsel %vm2066_vm7, %v6522_v52, %v6174_v7  ;;  %v3033_v41 = vadd.f32 %v15759_v32, %v15758_v58  ;;  %v8568_v58 = vld [vmem:[%s8869_s17 + $0x18c] sm:$0xff] }
 0x5ae   : > { %6295 = vrot.lane.b32.xlu1 %v5413_v31, %s8742_s18  ;;  %v14093_v54 = vpop.f32.mrf.mxu1  ;;  %v5358_v32 = vld [vmem:[%s8869_s17 + $0x2ee] sm:$0xff] }
 0x5af   : > { %5865 = vrot.lane.b32.xlu0 %v8565_v10, %s15467_s20  ;;  %v15760_v10 = vld [vmem:[#allocation172_spill] sm:$0xff] }
 0x5b0   : > { %v6282_v19 = vpop.permute.xlu1 %6281 }
 0x5b1   : > { %v6586_v28 = vsel %vm2099_vm8, %v6554_v15, %v6282_v19  ;;  %v5852_v14 = vpop.permute.xlu0 %5851  ;;  %v15761_v15 = vld [vmem:[#allocation64_spill] sm:$0xff] }
 0x5b2   : > { %5973 = vrot.lane.b32.xlu1 %v8566_v59, %s15495_s12  ;;  %8191 = vmatmul.mubr.msk.f32.gmra.mxu0 %vm2154_vm9, %v6586_v28  ;;  %v3039_v19 = vadd.f32 %v15761_v15, %v15760_v10  ;;  %v8570_v10 = vld [vmem:[%s8869_s17 + $0x240] sm:$0xff]  ;;  %v5414_v15 = vld [vmem:[%s8869_s17 + $0x2f4] sm:$0xff] }
 0x5b3   : > { %5503 = vrot.lane.b32.xlu0 %v8567_v47, %s15608_s23  ;;  %v5064_v23 = vpop.f32.mrf.mxu1  ;;  %6889 = vmatprep.mubr.f32.mxu0 %v15217_v61 }
 0x5b4   : > { %v14105_v31 = vadd.f32 %v5064_v23, %v3033_v41  ;;  %v6813_v49 = vpop.f32.mrf.mxu0  ;;  %v5960_v62 = vpop.permute.xlu1 %5959 }
 0x5b5   : > { %v14107_v7 = vpop.permute.xlu0 %5489  ;;  %v14109_v20 = vpop.f32.mrf.mxu1  ;;  %v6814_v50 = vadd.f32 %v6813_v49, %v13999_v24 }
 0x5b6   : > { %v6815_v52 = vpop.f32.mrf.mxu0  ;;  %6081 = vrot.lane.b32.xlu1 %v5302_v37, %s15520_s21  ;;  %v6363_v37 = vsel %vm375_vm1, %v8569_v9, %v14059_v2  ;;  %v15762_v2 = vld [vmem:[#allocation49_spill] sm:$0xff] }
 0x5b7   : > { %v6816_v28 = vadd.f32 %v6815_v52, %v14006_v39  ;;  %5631 = vrot.lane.b32.xlu0 %v8568_v58, %s15595_s16  ;;  %v6992_v40 = vmax.f32 %v6814_v50, 0.0  ;;  %v6395_v52 = vsel %vm1901_vm2, %v6363_v37, %v5616_v17  ;;  %v15763_v50 = vld [vmem:[#allocation159_spill] sm:$0xff]  ;;  %v8571_v37 = vld [vmem:[%s8869_s17 + $0x246] sm:$0xff] }
 0x5b8   : > { %v5070_v41 = vpop.f32.mrf.mxu1  ;;  %v6068_v59 = vpop.permute.xlu1 %6067 }
 0x5b9   : > { %v6993_v47 = vmax.f32 %v6816_v28, 0.0  ;;  %v14119_v23 = vadd.f32 %v5070_v41, %v3039_v19  ;;  %v5618_v49 = vpop.permute.xlu0 %5617  ;;  %v6427_v28 = vsel %vm1934_vm3, %v6395_v52, %v5744_v63 }
 0x5ba   : > { %6189 = vrot.lane.b32.xlu1 %v5358_v32, %s15616_s8  ;;  %v6459_v58 = vsel %vm1967_vm4, %v6427_v28, %v5852_v14  ;;  %v14131_v41 = vpop.f32.mrf.mxu1  ;;  %v3045_v32 = vadd.f32 %v15763_v50, %v15762_v2 }
 0x5bb   : > { %7197 = vmatprep.mubr.f32.mxu1 %v6993_v47  ;;  %5759 = vrot.lane.b32.xlu0 %v8570_v10, %s15362_s19  ;;  %v6491_v17 = vsel %vm2000_vm5, %v6459_v58, %v5960_v62  ;;  %v8572_v62 = vld [vmem:[%s8869_s17 + $0x24c] sm:$0xff] }
 0x5bc   : > { %7198 = vmatmul.mubr.f32.gmra.mxu1 %v6992_v40  ;;  %v6176_v19 = vpop.permute.xlu1 %6175  ;;  %v6523_v47 = vsel %vm2033_vm6, %v6491_v17, %v6068_v59  ;;  %v15765_v58 = vld [vmem:[#allocation9_spill] sm:$0xff] }
 0x5bd   : > { %v5746_v9 = vpop.permute.xlu0 %5745  ;;  %v6555_v63 = vsel %vm2066_vm7, %v6523_v47, %v6176_v19  ;;  %v8573_v19 = vld [vmem:[%s8869_s17 + $0x18e] sm:$0xff] }
 0x5be   : > { %6297 = vrot.lane.b32.xlu1 %v5414_v15, %s8742_s18  ;;  %v15764_v15 = vld [vmem:[#allocation151_spill] sm:$0xff] }
 0x5bf   : > { %5867 = vrot.lane.b32.xlu0 %v8571_v37, %s15467_s20  ;;  %v5076_v40 = vpop.f32.mrf.mxu1  ;;  %v3051_v50 = vadd.f32 %v15765_v58, %v15764_v15  ;;  %v5359_v15 = vld [vmem:[%s8869_s17 + $0x306] sm:$0xff] }
 0x5c0   : > { %v14141_v14 = vadd.f32 %v5076_v40, %v3045_v32  ;;  %v6284_v52 = vpop.permute.xlu1 %6283  ;;  %v5303_v32 = vld [vmem:[%s8869_s17 + $0x300] sm:$0xff] }
 0x5c1   : > { %v6587_v10 = vsel %vm2099_vm8, %v6555_v63, %v6284_v52  ;;  %v5854_v28 = vpop.permute.xlu0 %5853  ;;  %v14144_v2 = vpop.f32.mrf.mxu1 }
 0x5c2   : > { %5975 = vrot.lane.b32.xlu1 %v8572_v62, %s15495_s12  ;;  %v6819_v59 = vpop.f32.mrf.mxu0  ;;  %8192 = vmatmul.mubr.msk.f32.gmra.mxu0 %vm2154_vm9, %v6587_v10  ;;  %v8574_v62 = vld [vmem:[%s8869_s17 + $0x194] sm:$0xff] }
 0x5c3   : > { %5505 = vrot.lane.b32.xlu0 %v8573_v19, %s15608_s23  ;;  %6895 = vmatprep.mubr.f32.mxu0 %v15217_v61  ;;  %v6820_v37 = vadd.f32 %v6819_v59, %v13999_v24 }
 0x5c4   : > { %v5082_v17 = vpop.f32.mrf.mxu1  ;;  %v5962_v47 = vpop.permute.xlu1 %5961 }
 0x5c5   : > { %v14156_v40 = vadd.f32 %v5082_v17, %v3051_v50  ;;  %v14158_v63 = vpop.permute.xlu0 %5491  ;;  %v6821_v52 = vpop.f32.mrf.mxu0  ;;  %v6994_v53 = vmax.f32 %v6820_v37, 0.0  ;;  %v15766_v50 = vld [vmem:[#allocation171_spill] sm:$0xff]  ;;  %v15767_v17 = vld [vmem:[#allocation109_spill] sm:$0xff] }
 0x5c6   : > { %v6822_v10 = vadd.f32 %v6821_v52, %v14006_v39  ;;  %6083 = vrot.lane.b32.xlu1 %v5303_v32, %s15520_s21  ;;  %v14165_v16 = vpop.f32.mrf.mxu1  ;;  %v3057_v25 = vadd.f32 %v15767_v17, %v15766_v50  ;;  %v6364_v52 = vsel %vm375_vm1, %v8575_v60, %v14107_v7  ;;  %v15770_v17 = vld [vmem:[#allocation18_spill] sm:$0xff] }
 0x5c7   : > { %5633 = vrot.lane.b32.xlu0 %v8574_v62, %s15595_s16  ;;  %v6396_v32 = vsel %vm1901_vm2, %v6364_v52, %v5618_v49  ;;  %v5415_v62 = vld [vmem:[%s8869_s17 + $0x30c] sm:$0xff] }
 0x5c8   : > { %v6995_v58 = vmax.f32 %v6822_v10, 0.0  ;;  %v6070_v19 = vpop.permute.xlu1 %6069  ;;  %v8576_v10 = vld [vmem:[%s8869_s17 + $0x248] sm:$0xff]  ;;  %v6428_v13 = vsel %vm1934_vm3, %v6396_v32, %v5746_v9 }
 0x5c9   : > { %v14167_v59 = vpop.permute.xlu0 %5619  ;;  %v6460_v60 = vsel %vm1967_vm4, %v6428_v13, %v5854_v28 }
 0x5ca   : > { %7203 = vmatprep.mubr.f32.mxu1 %v6995_v58  ;;  %6191 = vrot.lane.b32.xlu1 %v5359_v15, %s15616_s8  ;;  %v6492_v49 = vsel %vm2000_vm5, %v6460_v60, %v5962_v47  ;;  %v15769_v15 = vld [vmem:[#allocation54_spill] sm:$0xff]  ;;  %v5304_v60 = vld [vmem:[%s8869_s17 + $0x308] sm:$0xff] }
 0x5cb   : > { %5761 = vrot.lane.b32.xlu0 %v8576_v10, %s15362_s19  ;;  %v5088_v37 = vpop.f32.mrf.mxu1  ;;  %7204 = vmatmul.mubr.f32.gmra.mxu1 %v6994_v53  ;;  %v3063_v53 = vadd.f32 %v15770_v17, %v15769_v15  ;;  %v6524_v9 = vsel %vm2033_vm6, %v6492_v49, %v6070_v19  ;;  %v8579_v19 = vld [vmem:[%s8869_s17 + $0x1a6] sm:$0xff] }
 0x5cc   : > { %v14180_v8 = vadd.f32 %v5088_v37, %v3057_v25  ;;  %v6178_v50 = vpop.permute.xlu1 %6177  ;;  %v8577_v25 = vld [vmem:[%s8869_s17 + $0x24e] sm:$0xff] }
 0x5cd   : > { %v5748_v7 = vpop.permute.xlu0 %5747  ;;  %v14183_v58 = vpop.f32.mrf.mxu1  ;;  %v6556_v52 = vsel %vm2066_vm7, %v6524_v9, %v6178_v50  ;;  %v8578_v37 = vld [vmem:[%s8869_s17 + $0x254] sm:$0xff] }
 0x5ce   : > { %15768 = vst [vmem:[#allocation21_spill] sm:$0xff] %v14180_v8  ;;  %6299 = vrot.lane.b32.xlu1 %v5415_v62, %s8742_s18 }
 0x5cf   : > { %5869 = vrot.lane.b32.xlu0 %v8577_v25, %s15467_s20  ;;  %v15773_v25 = vld [vmem:[#allocation154_spill] sm:$0xff] }
 0x5d0   : > { %v5094_v13 = vpop.f32.mrf.mxu1  ;;  %v6286_v28 = vpop.permute.xlu1 %6285 }
 0x5d1   : > { %v14193_v32 = vadd.f32 %v5094_v13, %v3063_v53  ;;  %v6588_v47 = vsel %vm2099_vm8, %v6556_v52, %v6286_v28  ;;  %v5856_v10 = vpop.permute.xlu0 %5855  ;;  %v15774_v52 = vld [vmem:[#allocation98_spill] sm:$0xff] }
 0x5d2   : > { %5977 = vrot.lane.b32.xlu1 %v8578_v37, %s15495_s12  ;;  %v6825_v62 = vpop.f32.mrf.mxu0  ;;  %8193 = vmatmul.mubr.msk.f32.gmra.mxu0 %vm2154_vm9, %v6588_v47  ;;  %v14204_v17 = vpop.f32.mrf.mxu1  ;;  %v3069_v13 = vadd.f32 %v15774_v52, %v15773_v25  ;;  %v8580_v47 = vld [vmem:[%s8869_s17 + $0x1ac] sm:$0xff] }
 0x5d3   : > { %15771 = vst [vmem:[#allocation27_spill] sm:$0xff] %v14193_v32  ;;  %5507 = vrot.lane.b32.xlu0 %v8579_v19, %s15608_s23  ;;  %6901 = vmatprep.mubr.f32.mxu0 %v15217_v61  ;;  %v6826_v50 = vadd.f32 %v6825_v62, %v13999_v24  ;;  %15772 = vst [vmem:[#allocation67_spill] sm:$0xff] %v14204_v17  ;;  %v5360_v62 = vld [vmem:[%s8869_s17 + $0x30e] sm:$0xff] }
 0x5d4   : > { %v5964_v49 = vpop.permute.xlu1 %5963  ;;  %v6827_v15 = vpop.f32.mrf.mxu0  ;;  %v15778_v25 = vld [vmem:[#allocation29_spill] sm:$0xff] }
 0x5d5   : > { %v14206_v53 = vpop.permute.xlu0 %5493  ;;  %v6828_v9 = vadd.f32 %v6827_v15, %v14006_v39  ;;  %v6996_v19 = vmax.f32 %v6826_v50, 0.0  ;;  %v8581_v15 = vld [vmem:[%s8869_s17 + $0x120] sm:$0xff] }
 0x5d6   : > { %6085 = vrot.lane.b32.xlu1 %v5304_v60, %s15520_s21  ;;  %v6365_v60 = vsel %vm375_vm1, %v8581_v15, %v14158_v63 }
 0x5d7   : > { %v6997_v28 = vmax.f32 %v6828_v9, 0.0  ;;  %5635 = vrot.lane.b32.xlu0 %v8580_v47, %s15595_s16  ;;  %v5100_v37 = vpop.f32.mrf.mxu1  ;;  %v15777_v9 = vld [vmem:[#allocation174_spill] sm:$0xff]  ;;  %v6397_v50 = vsel %vm1901_vm2, %v6365_v60, %v14167_v59  ;;  %v8583_v60 = vld [vmem:[%s8869_s17 + $0x266] sm:$0xff] }
 0x5d8   : > { %v14215_v43 = vadd.f32 %v5100_v37, %v3069_v13  ;;  %v6072_v32 = vpop.permute.xlu1 %6071  ;;  %v3075_v52 = vadd.f32 %v15778_v25, %v15777_v9  ;;  %v8582_v13 = vld [vmem:[%s8869_s17 + $0x260] sm:$0xff]  ;;  %v5416_v47 = vld [vmem:[%s8869_s17 + $0x314] sm:$0xff] }
 0x5d9   : > { %v5622_v17 = vpop.permute.xlu0 %5621  ;;  %v14217_v8 = vpop.f32.mrf.mxu1  ;;  %7209 = vmatprep.mubr.f32.mxu1 %v6997_v28  ;;  %v6429_v28 = vsel %vm1934_vm3, %v6397_v50, %v5748_v7  ;;  %v15781_v50 = vld [vmem:[#allocation53_spill] sm:$0xff] }
 0x5da   : > { %15775 = vst [vmem:[#allocation108_spill] sm:$0xff] %v14215_v43  ;;  %15776 = vst [vmem:[#allocation164_spill] sm:$0xff] %v14217_v8  ;;  %6193 = vrot.lane.b32.xlu1 %v5360_v62, %s15616_s8  ;;  %7210 = vmatmul.mubr.f32.gmra.mxu1 %v6996_v19  ;;  %v6461_v63 = vsel %vm1967_vm4, %v6429_v28, %v5856_v10 }
 0x5db   : > { %5763 = vrot.lane.b32.xlu0 %v8582_v13, %s15362_s19  ;;  %v6493_v15 = vsel %vm2000_vm5, %v6461_v63, %v5964_v49  ;;  %v15782_v13 = vld [vmem:[#allocation106_spill] sm:$0xff] }
 0x5dc   : > { %v5106_v37 = vpop.f32.mrf.mxu1  ;;  %v6180_v43 = vpop.permute.xlu1 %6179  ;;  %v6525_v59 = vsel %vm2033_vm6, %v6493_v15, %v6072_v32  ;;  %v3081_v28 = vadd.f32 %v15782_v13, %v15781_v50  ;;  %v8584_v49 = vld [vmem:[%s8869_s17 + $0x26c] sm:$0xff]  ;;  %v15786_v50 = vld [vmem:[#allocation11_spill] sm:$0xff] }
 0x5dd   : > { %v14232_v62 = vadd.f32 %v5106_v37, %v3075_v52  ;;  %v5750_v19 = vpop.permute.xlu0 %5749  ;;  %v6557_v7 = vsel %vm2066_vm7, %v6525_v59, %v6180_v43  ;;  %v8585_v32 = vld [vmem:[%s8869_s17 + $0x1ae] sm:$0xff] }
 0x5de   : > { %6301 = vrot.lane.b32.xlu1 %v5416_v47, %s8742_s18  ;;  %v14240_v25 = vpop.f32.mrf.mxu1  ;;  %v5305_v47 = vld [vmem:[%s8869_s17 + $0x320] sm:$0xff] }
 0x5df   : > { %15779 = vst [vmem:[#allocation10_spill] sm:$0xff] %v14232_v62  ;;  %5871 = vrot.lane.b32.xlu0 %v8583_v60, %s15467_s20  ;;  %15780 = vst [vmem:[#allocation76_spill] sm:$0xff] %v14240_v25  ;;  %v8587_v25 = vld [vmem:[%s8869_s17 + $0x128] sm:$0xff] }
 0x5e0   : > { %v6288_v9 = vpop.permute.xlu1 %6287 }
 0x5e1   : > { %v6589_v10 = vsel %vm2099_vm8, %v6557_v7, %v6288_v9  ;;  %v5858_v52 = vpop.permute.xlu0 %5857 }
 0x5e2   : > { %5979 = vrot.lane.b32.xlu1 %v8584_v49, %s15495_s12  ;;  %8194 = vmatmul.mubr.msk.f32.gmra.mxu0 %vm2154_vm9, %v6589_v10  ;;  %v15785_v10 = vld [vmem:[#allocation153_spill] sm:$0xff] }
 0x5e3   : > { %5509 = vrot.lane.b32.xlu0 %v8585_v32, %s15608_s23  ;;  %v5112_v43 = vpop.f32.mrf.mxu1  ;;  %6907 = vmatprep.mubr.f32.mxu0 %v15217_v61  ;;  %v3087_v13 = vadd.f32 %v15786_v50, %v15785_v10  ;;  %v5361_v32 = vld [vmem:[%s8869_s17 + $0x326] sm:$0xff] }
 0x5e4   : > { %v14252_v37 = vadd.f32 %v5112_v43, %v3081_v28  ;;  %v6831_v63 = vpop.f32.mrf.mxu0  ;;  %v5966_v15 = vpop.permute.xlu1 %5965  ;;  %v8586_v28 = vld [vmem:[%s8869_s17 + $0x1b4] sm:$0xff]  ;;  %v8588_v10 = vld [vmem:[%s8869_s17 + $0x268] sm:$0xff] }
 0x5e5   : > { %v14254_v59 = vpop.permute.xlu0 %5495  ;;  %v14256_v60 = vpop.f32.mrf.mxu1  ;;  %v6832_v7 = vadd.f32 %v6831_v63, %v13999_v24  ;;  %v5417_v50 = vld [vmem:[%s8869_s17 + $0x32c] sm:$0xff] }
 0x5e6   : > { %15783 = vst [vmem:[#allocation79_spill] sm:$0xff] %v14252_v37  ;;  %15784 = vst [vmem:[#allocation37_spill] sm:$0xff] %v14256_v60  ;;  %v6833_v9 = vpop.f32.mrf.mxu0  ;;  %6087 = vrot.lane.b32.xlu1 %v5305_v47, %s15520_s21  ;;  %v6366_v47 = vsel %vm375_vm1, %v8587_v25, %v14206_v53  ;;  %v15789_v25 = vld [vmem:[#allocation173_spill] sm:$0xff] }
 0x5e7   : > { %v6834_v49 = vadd.f32 %v6833_v9, %v14006_v39  ;;  %5637 = vrot.lane.b32.xlu0 %v8586_v28, %s15595_s16  ;;  %v6998_v8 = vmax.f32 %v6832_v7, 0.0  ;;  %v6398_v9 = vsel %vm1901_vm2, %v6366_v47, %v5622_v17  ;;  %v15790_v7 = vld [vmem:[#allocation141_spill] sm:$0xff] }
 0x5e8   : > { %v5118_v43 = vpop.f32.mrf.mxu1  ;;  %v6074_v37 = vpop.permute.xlu1 %6073  ;;  %v8589_v47 = vld [vmem:[%s8869_s17 + $0x26e] sm:$0xff] }
 0x5e9   : > { %v6999_v62 = vmax.f32 %v6834_v49, 0.0  ;;  %v14266_v60 = vadd.f32 %v5118_v43, %v3087_v13  ;;  %v5624_v63 = vpop.permute.xlu0 %5623  ;;  %v6430_v49 = vsel %vm1934_vm3, %v6398_v9, %v5750_v19 }
 0x5ea   : > { %6195 = vrot.lane.b32.xlu1 %v5361_v32, %s15616_s8  ;;  %v6462_v28 = vsel %vm1967_vm4, %v6430_v49, %v5858_v52  ;;  %v14278_v43 = vpop.f32.mrf.mxu1  ;;  %v3093_v32 = vadd.f32 %v15790_v7, %v15789_v25 }
 0x5eb   : > { %15787 = vst [vmem:[#allocation133_spill] sm:$0xff] %v14266_v60  ;;  %7215 = vmatprep.mubr.f32.mxu1 %v6999_v62  ;;  %5765 = vrot.lane.b32.xlu0 %v8588_v10, %s15362_s19  ;;  %15788 = vst [vmem:[#allocation19_spill] sm:$0xff] %v14278_v43  ;;  %v6494_v17 = vsel %vm2000_vm5, %v6462_v28, %v5966_v15  ;;  %v8590_v15 = vld [vmem:[%s8869_s17 + $0x274] sm:$0xff]  ;;  %v15794_v28 = vld [vmem:[#allocation17_spill] sm:$0xff] }
 0x5ec   : > { %7216 = vmatmul.mubr.f32.gmra.mxu1 %v6998_v8  ;;  %v6182_v13 = vpop.permute.xlu1 %6181  ;;  %v6526_v62 = vsel %vm2033_vm6, %v6494_v17, %v6074_v37  ;;  %v8593_v60 = vld [vmem:[%s8869_s17 + $0x140] sm:$0xff] }
 0x5ed   : > { %v5752_v53 = vpop.permute.xlu0 %5751  ;;  %v6558_v19 = vsel %vm2066_vm7, %v6526_v62, %v6182_v13  ;;  %v8591_v13 = vld [vmem:[%s8869_s17 + $0x1c6] sm:$0xff] }
 0x5ee   : > { %6303 = vrot.lane.b32.xlu1 %v5417_v50, %s8742_s18  ;;  %v15793_v50 = vld [vmem:[#allocation181_spill] sm:$0xff] }
 0x5ef   : > { %5873 = vrot.lane.b32.xlu0 %v8589_v47, %s15467_s20  ;;  %v5124_v8 = vpop.f32.mrf.mxu1  ;;  %v3099_v7 = vadd.f32 %v15794_v28, %v15793_v50  ;;  %v5362_v50 = vld [vmem:[%s8869_s17 + $0x32e] sm:$0xff] }
 0x5f0   : > { %v14288_v52 = vadd.f32 %v5124_v8, %v3093_v32  ;;  %v6290_v9 = vpop.permute.xlu1 %6289  ;;  %v5306_v32 = vld [vmem:[%s8869_s17 + $0x328] sm:$0xff] }
 0x5f1   : > { %v6590_v10 = vsel %vm2099_vm8, %v6558_v19, %v6290_v9  ;;  %v5860_v49 = vpop.permute.xlu0 %5859  ;;  %v14291_v25 = vpop.f32.mrf.mxu1 }
 0x5f2   : > { %15791 = vst [vmem:[#allocation33_spill] sm:$0xff] %v14288_v52  ;;  %15792 = vst [vmem:[#allocation99_spill] sm:$0xff] %v14291_v25  ;;  %5981 = vrot.lane.b32.xlu1 %v8590_v15, %s15495_s12  ;;  %v6837_v37 = vpop.f32.mrf.mxu0  ;;  %8195 = vmatmul.mubr.msk.f32.gmra.mxu0 %vm2154_vm9, %v6590_v10  ;;  %v8592_v15 = vld [vmem:[%s8869_s17 + $0x1cc] sm:$0xff] }
 0x5f3   : > { %5511 = vrot.lane.b32.xlu0 %v8591_v13, %s15608_s23  ;;  %6913 = vmatprep.mubr.f32.mxu0 %v15217_v61  ;;  %v6838_v47 = vadd.f32 %v6837_v37, %v13999_v24 }
 0x5f4   : > { %v5130_v17 = vpop.f32.mrf.mxu1  ;;  %v5968_v62 = vpop.permute.xlu1 %5967 }
 0x5f5   : > { %v14303_v8 = vadd.f32 %v5130_v17, %v3099_v7  ;;  %v14305_v19 = vpop.permute.xlu0 %5497  ;;  %v6839_v9 = vpop.f32.mrf.mxu0  ;;  %v7000_v52 = vmax.f32 %v6838_v47, 0.0  ;;  %v15797_v7 = vld [vmem:[#allocation51_spill] sm:$0xff]  ;;  %v15798_v17 = vld [vmem:[#allocation97_spill] sm:$0xff] }
 0x5f6   : > { %v6840_v10 = vadd.f32 %v6839_v9, %v14006_v39  ;;  %6089 = vrot.lane.b32.xlu1 %v5306_v32, %s15520_s21  ;;  %v14312_v25 = vpop.f32.mrf.mxu1  ;;  %v6367_v9 = vsel %vm375_vm1, %v8593_v60, %v14254_v59 }
 0x5f7   : > { %15795 = vst [vmem:[#allocation26_spill] sm:$0xff] %v14303_v8  ;;  %5639 = vrot.lane.b32.xlu0 %v8592_v15, %s15595_s16  ;;  %15796 = vst [vmem:[#allocation111_spill] sm:$0xff] %v14312_v25  ;;  %v3105_v8 = vadd.f32 %v15798_v17, %v15797_v7  ;;  %v6399_v32 = vsel %vm1901_vm2, %v6367_v9, %v5624_v63  ;;  %v5418_v15 = vld [vmem:[%s8869_s17 + $0x334] sm:$0xff]  ;;  %v15802_v17 = vld [vmem:[#allocation161_spill] sm:$0xff] }
 0x5f8   : > { %v7001_v28 = vmax.f32 %v6840_v10, 0.0  ;;  %v6076_v13 = vpop.permute.xlu1 %6075  ;;  %v8594_v10 = vld [vmem:[%s8869_s17 + $0x280] sm:$0xff]  ;;  %v6431_v25 = vsel %vm1934_vm3, %v6399_v32, %v5752_v53 }
 0x5f9   : > { %v14314_v37 = vpop.permute.xlu0 %5625  ;;  %v6463_v59 = vsel %vm1967_vm4, %v6431_v25, %v5860_v49 }
 0x5fa   : > { %7221 = vmatprep.mubr.f32.mxu1 %v7001_v28  ;;  %6197 = vrot.lane.b32.xlu1 %v5362_v50, %s15616_s8  ;;  %v6495_v63 = vsel %vm2000_vm5, %v6463_v59, %v5968_v62  ;;  %v15801_v50 = vld [vmem:[#allocation91_spill] sm:$0xff]  ;;  %v5307_v59 = vld [vmem:[%s8869_s17 + $0x340] sm:$0xff] }
 0x5fb   : > { %5767 = vrot.lane.b32.xlu0 %v8594_v10, %s15362_s19  ;;  %v5136_v47 = vpop.f32.mrf.mxu1  ;;  %7222 = vmatmul.mubr.f32.gmra.mxu1 %v7000_v52  ;;  %v3111_v52 = vadd.f32 %v15802_v17, %v15801_v50  ;;  %v6527_v53 = vsel %vm2033_vm6, %v6495_v63, %v6076_v13  ;;  %v8597_v13 = vld [vmem:[%s8869_s17 + $0x1ce] sm:$0xff] }
 0x5fc   : > { %v14327_v43 = vadd.f32 %v5136_v47, %v3105_v8  ;;  %v6184_v7 = vpop.permute.xlu1 %6183  ;;  %v8595_v8 = vld [vmem:[%s8869_s17 + $0x286] sm:$0xff] }
 0x5fd   : > { %v5754_v60 = vpop.permute.xlu0 %5753  ;;  %v14330_v28 = vpop.f32.mrf.mxu1  ;;  %v6559_v9 = vsel %vm2066_vm7, %v6527_v53, %v6184_v7  ;;  %v8596_v47 = vld [vmem:[%s8869_s17 + $0x28c] sm:$0xff] }
 0x5fe   : > { %15799 = vst [vmem:[#allocation36_spill] sm:$0xff] %v14327_v43  ;;  %15800 = vst [vmem:[#allocation70_spill] sm:$0xff] %v14330_v28  ;;  %6305 = vrot.lane.b32.xlu1 %v5418_v15, %s8742_s18 }
 0x5ff   : > { %5875 = vrot.lane.b32.xlu0 %v8595_v8, %s15467_s20  ;;  %v15805_v8 = vld [vmem:[#allocation123_spill] sm:$0xff] }
 0x600   : > { %v5142_v49 = vpop.f32.mrf.mxu1  ;;  %v6292_v25 = vpop.permute.xlu1 %6291 }
 0x601   : > { %v14340_v32 = vadd.f32 %v5142_v49, %v3111_v52  ;;  %v6591_v62 = vsel %vm2099_vm8, %v6559_v9, %v6292_v25  ;;  %v5862_v10 = vpop.permute.xlu0 %5861  ;;  %v15806_v9 = vld [vmem:[#allocation105_spill] sm:$0xff] }
 0x602   : > { %5983 = vrot.lane.b32.xlu1 %v8596_v47, %s15495_s12  ;;  %v6843_v15 = vpop.f32.mrf.mxu0  ;;  %8196 = vmatmul.mubr.msk.f32.gmra.mxu0 %vm2154_vm9, %v6591_v62  ;;  %v14351_v17 = vpop.f32.mrf.mxu1  ;;  %v3117_v49 = vadd.f32 %v15806_v9, %v15805_v8  ;;  %v8598_v62 = vld [vmem:[%s8869_s17 + $0x1d4] sm:$0xff]  ;;  %v8600_v9 = vld [vmem:[%s8869_s17 + $0x288] sm:$0xff] }
 0x603   : > { %15803 = vst [vmem:[#allocation107_spill] sm:$0xff] %v14340_v32  ;;  %5513 = vrot.lane.b32.xlu0 %v8597_v13, %s15608_s23  ;;  %6919 = vmatprep.mubr.f32.mxu0 %v15217_v61  ;;  %v6844_v7 = vadd.f32 %v6843_v15, %v13999_v24  ;;  %15804 = vst [vmem:[#allocation143_spill] sm:$0xff] %v14351_v17  ;;  %v5363_v15 = vld [vmem:[%s8869_s17 + $0x346] sm:$0xff] }
 0x604   : > { %v5970_v63 = vpop.permute.xlu1 %5969  ;;  %v6845_v50 = vpop.f32.mrf.mxu0 }
 0x605   : > { %v14353_v52 = vpop.permute.xlu0 %5499  ;;  %v6846_v53 = vadd.f32 %v6845_v50, %v14006_v39  ;;  %v7002_v13 = vmax.f32 %v6844_v7, 0.0  ;;  %v8599_v50 = vld [vmem:[%s8869_s17 + $0x148] sm:$0xff] }
 0x606   : > { %6091 = vrot.lane.b32.xlu1 %v5307_v59, %s15520_s21  ;;  %v6368_v59 = vsel %vm375_vm1, %v8599_v50, %v14305_v19  ;;  %v8601_v50 = vld [vmem:[%s8869_s17 + $0x28e] sm:$0xff] }
 0x607   : > { %v7003_v25 = vmax.f32 %v6846_v53, 0.0  ;;  %5641 = vrot.lane.b32.xlu0 %v8598_v62, %s15595_s16  ;;  %v5148_v47 = vpop.f32.mrf.mxu1  ;;  %v15807_v53 = vld [vmem:[#allocation56_spill] sm:$0xff]  ;;  %v6400_v7 = vsel %vm1901_vm2, %v6368_v59, %v14314_v37 }
 0x608   : > { %v14362_v32 = vadd.f32 %v5148_v47, %v3117_v49  ;;  %v6078_v17 = vpop.permute.xlu1 %6077  ;;  %v3123_v8 = vadd.f32 %v13735_v34, %v15807_v53  ;;  %v5419_v49 = vld [vmem:[%s8869_s17 + $0x34c] sm:$0xff] }
 0x609   : > { %v5628_v43 = vpop.permute.xlu0 %5627  ;;  %v14364_v28 = vpop.f32.mrf.mxu1  ;;  %7227 = vmatprep.mubr.f32.mxu1 %v7003_v25  ;;  %v6432_v25 = vsel %vm1934_vm3, %v6400_v7, %v5754_v60  ;;  %v8602_v7 = vld [vmem:[%s8869_s17 + $0x294] sm:$0xff] }
 0x60a   : > { %6199 = vrot.lane.b32.xlu1 %v5363_v15, %s15616_s8  ;;  %7228 = vmatmul.mubr.f32.gmra.mxu1 %v7002_v13  ;;  %v6464_v19 = vsel %vm1967_vm4, %v6432_v25, %v5862_v10  ;;  %v5308_v25 = vld [vmem:[%s8869_s17 + $0x348] sm:$0xff] }
 0x60b   : > { %5769 = vrot.lane.b32.xlu0 %v8600_v9, %s15362_s19  ;;  %v6496_v34 = vsel %vm2000_vm5, %v6464_v19, %v5970_v63  ;;  %v15808_v9 = vld [vmem:[#allocation175_spill] sm:$0xff] }
 0x60c   : > { %v5154_v62 = vpop.f32.mrf.mxu1  ;;  %v6186_v47 = vpop.permute.xlu1 %6185  ;;  %v6528_v37 = vsel %vm2033_vm6, %v6496_v34, %v6078_v17  ;;  %v3129_v17 = vadd.f32 %v13762_v4, %v15808_v9  ;;  %v8604_v4 = vld [vmem:[%s8869_s17 + $0x1ec] sm:$0xff] }
 0x60d   : > { %v14379_v15 = vadd.f32 %v5154_v62, %v3123_v8  ;;  %v5756_v13 = vpop.permute.xlu0 %5755  ;;  %v6560_v60 = vsel %vm2066_vm7, %v6528_v37, %v6186_v47 }
 0x60e   : > { %6307 = vrot.lane.b32.xlu1 %v5419_v49, %s8742_s18  ;;  %v14388_v8 = vpop.f32.mrf.mxu1  ;;  %v8603_v49 = vld [vmem:[%s8869_s17 + $0x1e6] sm:$0xff] }
 0x60f   : > { %5877 = vrot.lane.b32.xlu0 %v8601_v50, %s15467_s20 }
 0x610   : > { %v6294_v59 = vpop.permute.xlu1 %6293 }
 0x611   : > { %v6592_v53 = vsel %vm2099_vm8, %v6560_v60, %v6294_v59  ;;  %v5864_v10 = vpop.permute.xlu0 %5863  ;;  %v5364_v59 = vld [vmem:[%s8869_s17 + $0x34e] sm:$0xff] }
 0x612   : > { %5985 = vrot.lane.b32.xlu1 %v8602_v7, %s15495_s12  ;;  %v6849_v63 = vpop.f32.mrf.mxu0  ;;  %8197 = vmatmul.mubr.msk.f32.gmra.mxu0 %vm2154_vm9, %v6592_v53 }
 0x613   : > { %5515 = vrot.lane.b32.xlu0 %v8603_v49, %s15608_s23  ;;  %6925 = vmatprep.mubr.f32.mxu0 %v15217_v61  ;;  %v6850_v19 = vadd.f32 %v6849_v63, %v13999_v24  ;;  %v8605_v63 = vld [vmem:[%s8869_s17 + $0x160] sm:$0xff] }
 0x614   : > { %v5160_v62 = vpop.f32.mrf.mxu1  ;;  %v5972_v47 = vpop.permute.xlu1 %5971 }
 0x615   : > { %v14400_v34 = vadd.f32 %v5160_v62, %v3129_v17  ;;  %v14402_v37 = vpop.permute.xlu0 %5501  ;;  %v6851_v50 = vpop.f32.mrf.mxu0  ;;  %v7004_v9 = vmax.f32 %v6850_v19, 0.0  ;;  %v6369_v17 = vsel %vm375_vm1, %v8605_v63, %v14353_v52  ;;  %v5420_v19 = vld [vmem:[%s8869_s17 + $0x354] sm:$0xff] }
 0x616   : > { %v6852_v60 = vadd.f32 %v6851_v50, %v14006_v39  ;;  %6093 = vrot.lane.b32.xlu1 %v5308_v25, %s15520_s21  ;;  %v14412_v62 = vpop.f32.mrf.mxu1  ;;  %v15811_v50 = vld [vmem:[#allocation62_spill] sm:$0xff] }
 0x617   : > { %15809 = vst [vmem:[#allocation84_spill] sm:$0xff] %v14400_v34  ;;  %5643 = vrot.lane.b32.xlu0 %v8604_v4, %s15595_s16  ;;  %15810 = vst [vmem:[#allocation147_spill] sm:$0xff] %v14412_v62  ;;  %v3135_v25 = vadd.f32 %v13793_v27, %v15811_v50  ;;  %v6401_v4 = vsel %vm1901_vm2, %v6369_v17, %v5628_v43  ;;  %v8606_v34 = vld [vmem:[%s8869_s17 + $0x2a0] sm:$0xff] }
 0x618   : > { %v7005_v53 = vmax.f32 %v6852_v60, 0.0  ;;  %v6080_v7 = vpop.permute.xlu1 %6079  ;;  %v6433_v60 = vsel %vm1934_vm3, %v6401_v4, %v5756_v13  ;;  %v15813_v4 = vld [vmem:[#allocation93_spill] sm:$0xff] }
 0x619   : > { %v5630_v49 = vpop.permute.xlu0 %5629 }
 0x61a   : > { %7233 = vmatprep.mubr.f32.mxu1 %v7005_v53  ;;  %6201 = vrot.lane.b32.xlu1 %v5364_v59, %s15616_s8  ;;  %v6465_v53 = vsel %vm1967_vm4, %v6433_v60, %v5864_v10  ;;  %v5309_v60 = vld [vmem:[%s8869_s17 + $0x360] sm:$0xff] }
 0x61b   : > { %5771 = vrot.lane.b32.xlu0 %v8606_v34, %s15362_s19  ;;  %7234 = vmatmul.mubr.f32.gmra.mxu1 %v7004_v9  ;;  %v6497_v27 = vsel %vm2000_vm5, %v6465_v53, %v5972_v47  ;;  %v8607_v34 = vld [vmem:[%s8869_s17 + $0x2a6] sm:$0xff] }
 0x61c   : > { %v5166_v52 = vpop.f32.mrf.mxu1  ;;  %v6188_v63 = vpop.permute.xlu1 %6187  ;;  %v6529_v43 = vsel %vm2033_vm6, %v6497_v27, %v6080_v7  ;;  %v3141_v7 = vadd.f32 %v13820_v38, %v15813_v4  ;;  %v8610_v38 = vld [vmem:[%s8869_s17 + $0x1f4] sm:$0xff] }
 0x61d   : > { %v14423_v62 = vadd.f32 %v5166_v52, %v3135_v25  ;;  %v5758_v59 = vpop.permute.xlu0 %5757  ;;  %v6561_v13 = vsel %vm2066_vm7, %v6529_v43, %v6188_v63  ;;  %v8608_v25 = vld [vmem:[%s8869_s17 + $0x2ac] sm:$0xff] }
 0x61e   : > { %6309 = vrot.lane.b32.xlu1 %v5420_v19, %s8742_s18  ;;  %v14432_v50 = vpop.f32.mrf.mxu1  ;;  %v8609_v19 = vld [vmem:[%s8869_s17 + $0x1ee] sm:$0xff] }
 0x61f   : > { %15812 = vst [vmem:[#allocation14_spill] sm:$0xff] %v14423_v62  ;;  %5879 = vrot.lane.b32.xlu0 %v8607_v34, %s15467_s20  ;;  %v8611_v62 = vld [vmem:[%s8869_s17 + $0x168] sm:$0xff] }
 0x620   : > { %v6296_v9 = vpop.permute.xlu1 %6295 }
 0x621   : > { %v6593_v17 = vsel %vm2099_vm8, %v6561_v13, %v6296_v9  ;;  %v5866_v10 = vpop.permute.xlu0 %5865  ;;  %v5365_v9 = vld [vmem:[%s8869_s17 + $0x366] sm:$0xff] }
 0x622   : > { %5987 = vrot.lane.b32.xlu1 %v8608_v25, %s15495_s12  ;;  %v6855_v47 = vpop.f32.mrf.mxu0  ;;  %8198 = vmatmul.mubr.msk.f32.gmra.mxu0 %vm2154_vm9, %v6593_v17 }
 0x623   : > { %5517 = vrot.lane.b32.xlu0 %v8609_v19, %s15608_s23  ;;  %6931 = vmatprep.mubr.f32.mxu0 %v15217_v61  ;;  %v6856_v53 = vadd.f32 %v6855_v47, %v13999_v24  ;;  %v6370_v47 = vsel %vm375_vm1, %v8611_v62, %v14402_v37 }
 0x624   : > { %v5172_v52 = vpop.f32.mrf.mxu1  ;;  %v5974_v63 = vpop.permute.xlu1 %5973 }
 0x625   : > { %v14444_v27 = vadd.f32 %v5172_v52, %v3141_v7  ;;  %v5504_v43 = vpop.permute.xlu0 %5503  ;;  %v6857_v34 = vpop.f32.mrf.mxu0  ;;  %v7006_v4 = vmax.f32 %v6856_v53, 0.0  ;;  %v15816_v52 = vld [vmem:[#allocation185_spill] sm:$0xff] }
 0x626   : > { %v6858_v13 = vadd.f32 %v6857_v34, %v14006_v39  ;;  %6095 = vrot.lane.b32.xlu1 %v5309_v60, %s15520_s21  ;;  %v14454_v7 = vpop.f32.mrf.mxu1  ;;  %v3147_v60 = vadd.f32 %v13847_v22, %v15816_v52  ;;  %v6402_v34 = vsel %vm1901_vm2, %v6370_v47, %v5630_v49  ;;  %v5421_v53 = vld [vmem:[%s8869_s17 + $0x36c] sm:$0xff] }
 0x627   : > { %15814 = vst [vmem:[#allocation75_spill] sm:$0xff] %v14444_v27  ;;  %5645 = vrot.lane.b32.xlu0 %v8610_v38, %s15595_s16  ;;  %15815 = vst [vmem:[#allocation32_spill] sm:$0xff] %v14454_v7  ;;  %v6434_v38 = vsel %vm1934_vm3, %v6402_v34, %v5758_v59  ;;  %v8613_v47 = vld [vmem:[%s8869_s17 + $0x2ae] sm:$0xff] }
 0x628   : > { %v7007_v17 = vmax.f32 %v6858_v13, 0.0  ;;  %v6082_v25 = vpop.permute.xlu1 %6081  ;;  %v8612_v13 = vld [vmem:[%s8869_s17 + $0x2a8] sm:$0xff] }
 0x629   : > { %v5632_v19 = vpop.permute.xlu0 %5631  ;;  %v5310_v59 = vld [vmem:[%s8869_s17 + $0x368] sm:$0xff] }
 0x62a   : > { %7239 = vmatprep.mubr.f32.mxu1 %v7007_v17  ;;  %6203 = vrot.lane.b32.xlu1 %v5365_v9, %s15616_s8  ;;  %v6466_v17 = vsel %vm1967_vm4, %v6434_v38, %v5866_v10 }
 0x62b   : > { %5773 = vrot.lane.b32.xlu0 %v8612_v13, %s15362_s19  ;;  %7240 = vmatmul.mubr.f32.gmra.mxu1 %v7006_v4  ;;  %v6498_v22 = vsel %vm2000_vm5, %v6466_v17, %v5974_v63  ;;  %v8614_v63 = vld [vmem:[%s8869_s17 + $0x2b4] sm:$0xff] }
 0x62c   : > { %v5178_v37 = vpop.f32.mrf.mxu1  ;;  %v6190_v62 = vpop.permute.xlu1 %6189  ;;  %v6530_v49 = vsel %vm2033_vm6, %v6498_v22, %v6082_v25  ;;  %v5422_v25 = vld [vmem:[%s8869_s17 + $0x374] sm:$0xff] }
 0x62d   : > { %v14465_v9 = vadd.f32 %v5178_v37, %v3147_v60  ;;  %v5760_v27 = vpop.permute.xlu0 %5759  ;;  %v6562_v4 = vsel %vm2066_vm7, %v6530_v49, %v6190_v62  ;;  %v5366_v37 = vld [vmem:[%s8869_s17 + $0x36e] sm:$0xff] }
 0x62e   : > { %6311 = vrot.lane.b32.xlu1 %v5421_v53, %s8742_s18 }
 0x62f   : > { %15817 = vst [vmem:[#allocation145_spill] sm:$0xff] %v14465_v9  ;;  %5881 = vrot.lane.b32.xlu0 %v8613_v47, %s15467_s20 }
 0x630   : > { %v6298_v52 = vpop.permute.xlu1 %6297 }
 0x631   : > { %v6594_v10 = vsel %vm2099_vm8, %v6562_v4, %v6298_v52  ;;  %v5868_v60 = vpop.permute.xlu0 %5867  ;;  %v15819_v52 = vld [vmem:[#allocation157_spill] sm:$0xff] }
 0x632   : > { %v6861_v34 = vpop.f32.mrf.mxu0  ;;  %8199 = vmatmul.mubr.msk.f32.gmra.mxu0 %vm2154_vm9, %v6594_v10  ;;  %6097 = vrot.lane.b32.xlu1 %v5310_v59, %s15520_s21  ;;  %v14486_v59 = vpop.f32.mrf.mxu1  ;;  %v3153_v10 = vadd.f32 %v13867_v44, %v15819_v52 }
 0x633   : > { %5989 = vrot.lane.b32.xlu0 %v8614_v63, %s15495_s12  ;;  %6937 = vmatprep.mubr.f32.mxu0 %v15217_v61  ;;  %v6862_v13 = vadd.f32 %v6861_v34, %v13999_v24  ;;  %15818 = vst [vmem:[#allocation40_spill] sm:$0xff] %v14486_v59  ;;  %v8615_v34 = vld [vmem:[%s8869_s17 + $0x180] sm:$0xff] }
 0x634   : > { %v5976_v53 = vpop.permute.xlu1 %5975  ;;  %v6863_v38 = vpop.f32.mrf.mxu0  ;;  %v6371_v63 = vsel %vm375_vm1, %v8615_v34, %v5504_v43 }
 0x635   : > { %v5506_v62 = vpop.permute.xlu0 %5505  ;;  %v6864_v17 = vadd.f32 %v6863_v38, %v14006_v39  ;;  %v7008_v49 = vmax.f32 %v6862_v13, 0.0  ;;  %v6403_v38 = vsel %vm1901_vm2, %v6371_v63, %v5632_v19 }
 0x636   : > { %6313 = vrot.lane.b32.xlu1 %v5422_v25, %s8742_s18  ;;  %v6435_v25 = vsel %vm1934_vm3, %v6403_v38, %v5760_v27  ;;  %v8616_v38 = vld [vmem:[%s8869_s17 + $0x188] sm:$0xff]  ;;  %s7777_s18 = sshll.u32 %s8863_s30, 1  ;;  %s311_s30 = sand.u32 1, %s8713_s25  }
 0x637   : > { %v7009_v22 = vmax.f32 %v6864_v17, 0.0  ;;  %6205 = vrot.lane.b32.xlu0 %v5366_v37, %s15616_s8  ;;  %v6467_v37 = vsel %vm1967_vm4, %v6435_v25, %v5868_v60  ;;  %v6372_v25 = vsel %vm375_vm1, %v8616_v38, %v5506_v62  ;;  %s322_s21 = scalar_lea.vmem %s14959_s6, %s7777_s18  ;;  %s7775_s16 = sshll.u32 %s311_s30, 9 }
 0x638   : > { %v6084_v47 = vpop.permute.xlu1 %6083  ;;  %v7436_v38 = vld [vmem:[%s322_s21] sm:$0x3]  ;;  %s14548_s23 = scalar_lea.vmem [#allocation5], %s7775_s16  ;;  %s14907_s22 = scalar_lea.sflag [#allocation4], %s311_s30 }
 0x639   : > { %v5634_v4 = vpop.permute.xlu0 %5633  ;;  %7245 = vmatprep.mubr.f32.mxu1 %v7009_v22  ;;  %v6499_v22 = vsel %vm2000_vm5, %v6467_v37, %v5976_v53  ;;  %s7657_s8 = sshll.u32 %s14548_s23, 4  ;;  %s8743_s18 = smov [#allocation5]   ;;  %s14902_s8 = int_to_ptr.vmem [resolvable:$true] %s7657_s8 }
 0x63a   : > { %7246 = vmatmul.mubr.f32.gmra.mxu1 %v7008_v49  ;;  %v6531_v7 = vsel %vm2033_vm6, %v6499_v22, %v6084_v47  ;;  %s8653_s19 = sshll.u32 %s8743_s18, 4  ;;  %s8654_s19 = int_to_ptr.vmem [resolvable:$false] %s8653_s19 }
 0x63b   : > { %v5184_v9 = vpop.f32.mrf.mxu1  ;;  %s8655_s12 = scalar_lea.vmem %s8654_s19, 16384  ;;  %p8656_p0 = scmp.lt.s32.totalorder %s14902_s8, %s8654_s19 }
 0x63c   : > { %v14494_v17 = vadd.f32 %v5184_v9, %v3153_v10  ;;  %v6192_v13 = vpop.permute.xlu1 %6191 }
 0x63d   : > { %v5762_v59 = vpop.permute.xlu0 %5761  ;;  %v6563_v44 = vsel %vm2066_vm7, %v6531_v7, %v6192_v13  ;;  %v6404_v13 = vsel %vm1901_vm2, %v6372_v25, %v5634_v4 }
 0x63e   : > { %15820 = vst [vmem:[#allocation138_spill] sm:$0xff] %v14494_v17  ;;  %v6436_v37 = vsel %vm1934_vm3, %v6404_v13, %v5762_v59 }
 0x640   : > { %v6300_v52 = vpop.permute.xlu1 %6299 }
 0x641   : > { %v6595_v43 = vsel %vm2099_vm8, %v6563_v44, %v6300_v52  ;;  %v5870_v19 = vpop.permute.xlu0 %5869 }
 0x642   : > { %v6867_v49 = vpop.f32.mrf.mxu0  ;;  %8200 = vmatmul.mubr.msk.f32.gmra.mxu0 %vm2154_vm9, %v6595_v43  ;;  %v6468_v44 = vsel %vm1967_vm4, %v6436_v37, %v5870_v19  ;;  %v14522_v37 = vpop.f32.mrf.mxu1 }
 0x643   : > { %6943 = vmatprep.mubr.f32.mxu0 %v15217_v61  ;;  %v6868_v27 = vadd.f32 %v6867_v49, %v13999_v24 }
 0x644   : > { %v5978_v9 = vpop.permute.xlu1 %5977  ;;  %v6869_v60 = vpop.f32.mrf.mxu0 }
 0x645   : > { %v5508_v10 = vpop.permute.xlu0 %5507  ;;  %v6870_v53 = vadd.f32 %v6869_v60, %v14006_v39  ;;  %v7010_v34 = vmax.f32 %v6868_v27, 0.0  ;;  %v6500_v43 = vsel %vm2000_vm5, %v6468_v44, %v5978_v9  ;;  %v15821_v44 = vld [vmem:[#allocation150_spill] sm:$0xff] }
 0x647   : > { %v7011_v47 = vmax.f32 %v6870_v53, 0.0 }
 0x648   : > { %v6086_v7 = vpop.permute.xlu1 %6085 }
 0x649   : > { %v5636_v63 = vpop.permute.xlu0 %5635  ;;  %7251 = vmatprep.mubr.f32.mxu1 %v7011_v47  ;;  %v6532_v49 = vsel %vm2033_vm6, %v6500_v43, %v6086_v7  ;;  %v15822_v43 = vld [vmem:[#allocation155_spill] sm:$0xff] }
 0x64a   : > { %7252 = vmatmul.mubr.f32.gmra.mxu1 %v7010_v34 }
 0x64c   : > { %v6194_v22 = vpop.permute.xlu1 %6193 }
 0x64d   : > { %v5764_v52 = vpop.permute.xlu0 %5763  ;;  %v6564_v27 = vsel %vm2066_vm7, %v6532_v49, %v6194_v22  ;;  %v2975_v49 = vadd.f32 %v15822_v43, %v15821_v44  ;;  %v14539_v44 = vrot.slane %v7436_v38, %v15705_v26 }
 0x650   : > { %v6302_v60 = vpop.permute.xlu1 %6301 }
 0x651   : > { %v6596_v53 = vsel %vm2099_vm8, %v6564_v27, %v6302_v60  ;;  %v5872_v47 = vpop.permute.xlu0 %5871  ;;  %v8617_v27 = vld [vmem:[%s8869_s17 + $0x1a0] sm:$0xff] }
 0x652   : > { %v6873_v62 = vpop.f32.mrf.mxu0  ;;  %8201 = vmatmul.mubr.msk.f32.gmra.mxu0 %vm2154_vm9, %v6596_v53  ;;  %v6373_v60 = vsel %vm375_vm1, %v8617_v27, %v5508_v10  ;;  %v14530_v53 = vrot.slane %v7436_v38, %v15704_v1 }
 0x653   : > { %6949 = vmatprep.mubr.f32.mxu0 %v15217_v61  ;;  %v6874_v59 = vadd.f32 %v6873_v62, %v13999_v24  ;;  %v6405_v62 = vsel %vm1901_vm2, %v6373_v60, %v5636_v63 }
 0x654   : > { %v5980_v4 = vpop.permute.xlu1 %5979  ;;  %v6875_v19 = vpop.f32.mrf.mxu0 }
 0x655   : > { %v5510_v9 = vpop.permute.xlu0 %5509  ;;  %v6876_v34 = vadd.f32 %v6875_v19, %v14006_v39  ;;  %v7012_v25 = vmax.f32 %v6874_v59, 0.0  ;;  %v5192_v59 = vadd.f32 %v13913_v18, %v2975_v49 }
 0x657   : > { %v7013_v7 = vmax.f32 %v6876_v34, 0.0  ;;  %v6437_v34 = vsel %vm1934_vm3, %v6405_v62, %v5764_v52 }
 0x658   : > { %v6088_v13 = vpop.permute.xlu1 %6087  ;;  %v6469_v10 = vsel %vm1967_vm4, %v6437_v34, %v5872_v47 }
 0x659   : > { %v5638_v22 = vpop.permute.xlu0 %5637  ;;  %7257 = vmatprep.mubr.f32.mxu1 %v7013_v7 }
 0x65a   : > { %7258 = vmatmul.mubr.f32.gmra.mxu1 %v7012_v25  ;;  %v6501_v25 = vsel %vm2000_vm5, %v6469_v10, %v5980_v4 }
 0x65b   : > { %v7187_v19 = vpop.f32.mrf.mxu1  ;;  %v6533_v18 = vsel %vm2033_vm6, %v6501_v25, %v6088_v13  ;;  %v15824_v25 = vld [vmem:[#allocation126_spill] sm:$0xff] }
 0x65c   : > { %v7374_v7 = vadd.f32 %v7187_v19, %v13911_v11  ;;  %v6196_v17 = vpop.permute.xlu1 %6195 }
 0x65d   : > { %v5766_v1 = vpop.permute.xlu0 %5765  ;;  %v7189_v43 = vpop.f32.mrf.mxu1  ;;  %v6565_v49 = vsel %vm2066_vm7, %v6533_v18, %v6196_v17  ;;  %v8618_v18 = vld [vmem:[%s8869_s17 + $0x1a8] sm:$0xff] }
 0x65e   : > { %v7450_v63 = vadd.f32 %v14530_v53, %v7374_v7  ;;  %v7375_v27 = vadd.f32 %v7189_v43, %v5192_v59  ;;  %v15823_v43 = vld [vmem:[#allocation85_spill] sm:$0xff] }
 0x660   : > { %v7514_v52 = vmax.f32 %v7450_v63, 0.0  ;;  %v7451_v11 = vadd.f32 %v14539_v44, %v7375_v27  ;;  %v6304_v60 = vpop.permute.xlu1 %6303  ;;  %v2981_v63 = vadd.f32 %v15824_v25, %v15823_v43 }
 0x661   : > { %v6597_v26 = vsel %vm2099_vm8, %v6565_v49, %v6304_v60  ;;  %v5874_v38 = vpop.permute.xlu0 %5873 }
 0x662   : > { %7578 = vst [vmem:[%s14548_s23 + $0x10] sm:$0xff] %v7514_v52  ;;  %v7515_v47 = vmax.f32 %v7451_v11, 0.0  ;;  %v6879_v4 = vpop.f32.mrf.mxu0  ;;  %8202 = vmatmul.mubr.msk.f32.gmra.mxu0 %vm2154_vm9, %v6597_v26  ;;  %v6374_v52 = vsel %vm375_vm1, %v8618_v18, %v5510_v9  ;;  %v5194_v11 = vadd.f32 %v13935_v57, %v2981_v63 }
 0x663   : > { %6955 = vmatprep.mubr.f32.mxu0 %v15217_v61  ;;  %v6880_v17 = vadd.f32 %v6879_v4, %v13999_v24  ;;  %v6406_v60 = vsel %vm1901_vm2, %v6374_v52, %v5638_v22 }
 0x664   : > { %7579 = vst [vmem:[%s14548_s23 + $0x18] sm:$0xff] %v7515_v47  ;;  %v5982_v13 = vpop.permute.xlu1 %5981  ;;  %v6881_v62 = vpop.f32.mrf.mxu0  ;;  %v6438_v47 = vsel %vm1934_vm3, %v6406_v60, %v5766_v1 }
 0x665   : > { %v5512_v19 = vpop.permute.xlu0 %5511  ;;  %v6882_v59 = vadd.f32 %v6881_v62, %v14006_v39  ;;  %v7014_v7 = vmax.f32 %v6880_v17, 0.0  ;;  %v6470_v62 = vsel %vm1967_vm4, %v6438_v47, %v5874_v38 }
 0x667   : > { %v7015_v34 = vmax.f32 %v6882_v59, 0.0 }
 0x668   : > { %v6090_v10 = vpop.permute.xlu1 %6089 }
 0x669   : > { %v5640_v27 = vpop.permute.xlu0 %5639  ;;  %7263 = vmatprep.mubr.f32.mxu1 %v7015_v34 }
 0x66a   : > { %v7193_v49 = vpop.f32.mrf.mxu1  ;;  %7264 = vmatmul.mubr.f32.gmra.mxu1 %v7014_v7  ;;  %v6502_v7 = vsel %vm2000_vm5, %v6470_v62, %v5982_v13 }
 0x66b   : > { %v7376_v26 = vadd.f32 %v7193_v49, %v13927_v21  ;;  %v6534_v57 = vsel %vm2033_vm6, %v6502_v7, %v6090_v10 }
 0x66c   : > { %v6198_v4 = vpop.permute.xlu1 %6197  ;;  %v7195_v17 = vpop.f32.mrf.mxu1 }
 0x66d   : > { %v7452_v59 = vadd.f32 %v14530_v53, %v7376_v26  ;;  %v5768_v34 = vpop.permute.xlu0 %5767  ;;  %v7377_v9 = vadd.f32 %v7195_v17, %v5194_v11  ;;  %v6566_v21 = vsel %vm2066_vm7, %v6534_v57, %v6198_v4  ;;  %v8619_v17 = vld [vmem:[%s8869_s17 + $0x1c0] sm:$0xff] }
 0x66e   : > { %v6375_v62 = vsel %vm375_vm1, %v8619_v17, %v5512_v19 }
 0x66f   : > { %v7516_v43 = vmax.f32 %v7452_v59, 0.0  ;;  %v7453_v22 = vadd.f32 %v14539_v44, %v7377_v9  ;;  %v15825_v59 = vld [vmem:[#allocation170_spill] sm:$0xff]  ;;  %v15826_v9 = vld [vmem:[#allocation55_spill] sm:$0xff]  ;;  %v6407_v57 = vsel %vm1901_vm2, %v6375_v62, %v5640_v27 }
 0x670   : > { %v6306_v25 = vpop.permute.xlu1 %6305  ;;  %v2987_v7 = vadd.f32 %v15826_v9, %v15825_v59 }
 0x671   : > { %7580 = vst [vmem:[%s14548_s23 + $0x20] sm:$0xff] %v7516_v43  ;;  %v7517_v1 = vmax.f32 %v7453_v22, 0.0  ;;  %v6598_v63 = vsel %vm2099_vm8, %v6566_v21, %v6306_v25  ;;  %v5876_v38 = vpop.permute.xlu0 %5875  ;;  %v6439_v43 = vsel %vm1934_vm3, %v6407_v57, %v5768_v34 }
 0x672   : > { %v6885_v18 = vpop.f32.mrf.mxu0  ;;  %8203 = vmatmul.mubr.msk.f32.gmra.mxu0 %vm2154_vm9, %v6598_v63  ;;  %v5196_v25 = vadd.f32 %v13951_v30, %v2987_v7 }
 0x673   : > { %7581 = vst [vmem:[%s14548_s23 + $0x28] sm:$0xff] %v7517_v1  ;;  %6961 = vmatprep.mubr.f32.mxu0 %v15217_v61  ;;  %v6886_v13 = vadd.f32 %v6885_v18, %v13999_v24  ;;  %v6471_v1 = vsel %vm1967_vm4, %v6439_v43, %v5876_v38 }
 0x674   : > { %v5984_v10 = vpop.permute.xlu1 %5983  ;;  %v6887_v52 = vpop.f32.mrf.mxu0 }
 0x675   : > { %v5514_v49 = vpop.permute.xlu0 %5513  ;;  %v6888_v11 = vadd.f32 %v6887_v52, %v14006_v39  ;;  %v7016_v26 = vmax.f32 %v6886_v13, 0.0  ;;  %v6503_v19 = vsel %vm2000_vm5, %v6471_v1, %v5984_v10  ;;  %v15828_v1 = vld [vmem:[#allocation178_spill] sm:$0xff] }
 0x677   : > { %v7017_v60 = vmax.f32 %v6888_v11, 0.0 }
 0x678   : > { %v6092_v47 = vpop.permute.xlu1 %6091 }
 0x679   : > { %v5642_v4 = vpop.permute.xlu0 %5641  ;;  %7269 = vmatprep.mubr.f32.mxu1 %v7017_v60  ;;  %v6535_v52 = vsel %vm2033_vm6, %v6503_v19, %v6092_v47  ;;  %v8620_v19 = vld [vmem:[%s8869_s17 + $0x1c8] sm:$0xff] }
 0x67a   : > { %7270 = vmatmul.mubr.f32.gmra.mxu1 %v7016_v26 }
 0x67c   : > { %v7199_v22 = vpop.f32.mrf.mxu1  ;;  %v6200_v21 = vpop.permute.xlu1 %6199 }
 0x67d   : > { %v7378_v63 = vadd.f32 %v7199_v22, %v13947_v12  ;;  %v5770_v18 = vpop.permute.xlu0 %5769  ;;  %v6567_v34 = vsel %vm2066_vm7, %v6535_v52, %v6200_v21 }
 0x67e   : > { %v7201_v13 = vpop.f32.mrf.mxu1 }
 0x67f   : > { %v7454_v11 = vadd.f32 %v14530_v53, %v7378_v63  ;;  %v7379_v27 = vadd.f32 %v7201_v13, %v5196_v25  ;;  %v15827_v25 = vld [vmem:[#allocation117_spill] sm:$0xff]  ;;  %v6376_v13 = vsel %vm375_vm1, %v8620_v19, %v5514_v49 }
 0x680   : > { %v6308_v60 = vpop.permute.xlu1 %6307  ;;  %v2993_v63 = vadd.f32 %v15828_v1, %v15827_v25  ;;  %v6408_v52 = vsel %vm1901_vm2, %v6376_v13, %v5642_v4 }
 0x681   : > { %v7518_v26 = vmax.f32 %v7454_v11, 0.0  ;;  %v7455_v30 = vadd.f32 %v14539_v44, %v7379_v27  ;;  %v6599_v38 = vsel %vm2099_vm8, %v6567_v34, %v6308_v60  ;;  %v5878_v17 = vpop.permute.xlu0 %5877  ;;  %v6440_v34 = vsel %vm1934_vm3, %v6408_v52, %v5770_v18 }
 0x682   : > { %v6891_v12 = vpop.f32.mrf.mxu0  ;;  %8204 = vmatmul.mubr.msk.f32.gmra.mxu0 %vm2154_vm9, %v6599_v38  ;;  %v5198_v27 = vadd.f32 %v13973_v5, %v2993_v63 }
 0x683   : > { %7582 = vst [vmem:[%s14548_s23 + $0x30] sm:$0xff] %v7518_v26  ;;  %v7519_v10 = vmax.f32 %v7455_v30, 0.0  ;;  %6967 = vmatprep.mubr.f32.mxu0 %v15217_v61  ;;  %v6892_v47 = vadd.f32 %v6891_v12, %v13999_v24  ;;  %v6472_v30 = vsel %vm1967_vm4, %v6440_v34, %v5878_v17 }
 0x684   : > { %v5986_v62 = vpop.permute.xlu1 %5985  ;;  %v6893_v59 = vpop.f32.mrf.mxu0 }
 0x685   : > { %7583 = vst [vmem:[%s14548_s23 + $0x38] sm:$0xff] %v7519_v10  ;;  %v5516_v9 = vpop.permute.xlu0 %5515  ;;  %v6894_v7 = vadd.f32 %v6893_v59, %v14006_v39  ;;  %v7018_v43 = vmax.f32 %v6892_v47, 0.0  ;;  %v6504_v10 = vsel %vm2000_vm5, %v6472_v30, %v5986_v62 }
 0x687   : > { %v7019_v57 = vmax.f32 %v6894_v7, 0.0 }
 0x688   : > { %v6094_v22 = vpop.permute.xlu1 %6093 }
 0x689   : > { %v5644_v21 = vpop.permute.xlu0 %5643  ;;  %7275 = vmatprep.mubr.f32.mxu1 %v7019_v57  ;;  %v6536_v4 = vsel %vm2033_vm6, %v6504_v10, %v6094_v22 }
 0x68a   : > { %7276 = vmatmul.mubr.f32.gmra.mxu1 %v7018_v43 }
 0x68b   : > { %v7205_v11 = vpop.f32.mrf.mxu1 }
 0x68c   : > { %v7380_v60 = vadd.f32 %v7205_v11, %v13959_v3  ;;  %v6202_v26 = vpop.permute.xlu1 %6201  ;;  %v15829_v11 = vld [vmem:[#allocation45_spill] sm:$0xff] }
 0x68d   : > { %v5772_v38 = vpop.permute.xlu0 %5771  ;;  %v7207_v12 = vpop.f32.mrf.mxu1  ;;  %v6568_v5 = vsel %vm2066_vm7, %v6536_v4, %v6202_v26  ;;  %v8621_v26 = vld [vmem:[%s8869_s17 + $0x1e0] sm:$0xff] }
 0x68e   : > { %v7456_v49 = vadd.f32 %v14530_v53, %v7380_v60  ;;  %v7381_v47 = vadd.f32 %v7207_v12, %v5198_v27  ;;  %v15830_v27 = vld [vmem:[#allocation61_spill] sm:$0xff]  ;;  %v6377_v30 = vsel %vm375_vm1, %v8621_v26, %v5516_v9 }
 0x68f   : > { %v2999_v34 = vadd.f32 %v15830_v27, %v15829_v11 }
 0x690   : > { %v7520_v59 = vmax.f32 %v7456_v49, 0.0  ;;  %v7457_v18 = vadd.f32 %v14539_v44, %v7381_v47  ;;  %v6310_v7 = vpop.permute.xlu1 %6309  ;;  %v6409_v49 = vsel %vm1901_vm2, %v6377_v30, %v5644_v21 }
 0x691   : > { %v6600_v3 = vsel %vm2099_vm8, %v6568_v5, %v6310_v7  ;;  %v5880_v57 = vpop.permute.xlu0 %5879  ;;  %v5200_v10 = vadd.f32 %v13991_v29, %v2999_v34  ;;  %v6441_v4 = vsel %vm1934_vm3, %v6409_v49, %v5772_v38 }
 0x692   : > { %7584 = vst [vmem:[%s14548_s23 + $0x40] sm:$0xff] %v7520_v59  ;;  %v7521_v17 = vmax.f32 %v7457_v18, 0.0  ;;  %v6897_v43 = vpop.f32.mrf.mxu0  ;;  %8205 = vmatmul.mubr.msk.f32.gmra.mxu0 %vm2154_vm9, %v6600_v3  ;;  %v6473_v18 = vsel %vm1967_vm4, %v6441_v4, %v5880_v57 }
 0x693   : > { %6973 = vmatprep.mubr.f32.mxu0 %v15217_v61  ;;  %v6898_v62 = vadd.f32 %v6897_v43, %v13999_v24 }
 0x694   : > { %7585 = vst [vmem:[%s14548_s23 + $0x48] sm:$0xff] %v7521_v17  ;;  %v5988_v22 = vpop.permute.xlu1 %5987  ;;  %v6899_v25 = vpop.f32.mrf.mxu0 }
 0x695   : > { %v5518_v1 = vpop.permute.xlu0 %5517  ;;  %v6900_v63 = vadd.f32 %v6899_v25, %v14006_v39  ;;  %v7020_v13 = vmax.f32 %v6898_v62, 0.0  ;;  %v6505_v17 = vsel %vm2000_vm5, %v6473_v18, %v5988_v22  ;;  %v15831_v18 = vld [vmem:[#allocation44_spill] sm:$0xff] }
 0x697   : > { %v7021_v19 = vmax.f32 %v6900_v63, 0.0  ;;  %v8622_v63 = vld [vmem:[%s8869_s17 + $0x1e8] sm:$0xff]  ;;  %s8213_s17 = sshll.u32 %s8721_s27, 13  ;;  %s8649_s27 = scalar_lea.vmem %s14902_s8, 8192 }
 0x698   : > { %v6096_v52 = vpop.permute.xlu1 %6095  ;;  %s14899_s0 = scalar_lea.hbm %s14960_s7, %s8213_s17  ;;  %p8650_p10 = scmp.ne.s32.totalorder %s14902_s8, %s8649_s27 }
 0x699   : > { %v5646_v60 = vpop.permute.xlu0 %5645  ;;  %7281 = vmatprep.mubr.f32.mxu1 %v7021_v19  ;;  %v6537_v29 = vsel %vm2033_vm6, %v6505_v17, %v6096_v52  ;;  %v6378_v19 = vsel %vm375_vm1, %v8622_v63, %v5518_v1  ;;  %p8657_p1 = scmp.lt.s32.totalorder %s8655_s12, %s8649_s27 }
 0x69a   : > { %v7211_v12 = vpop.f32.mrf.mxu1  ;;  %7282 = vmatmul.mubr.f32.gmra.mxu1 %v7020_v13  ;;  %v6410_v22 = vsel %vm1901_vm2, %v6378_v19, %v5646_v60  ;;  %p8651_p11 = pnand %p8650_p10, %p8825_p4 }
 0x69b   : > { %v7382_v47 = vadd.f32 %v7211_v12, %v13988_v6  ;;  %p8658_p2 = por %p8657_p1, %p8656_p0 }
 0x69c   : > { %v6204_v59 = vpop.permute.xlu1 %6203  ;;  %v7213_v5 = vpop.f32.mrf.mxu1  ;;  %p8652_p13 = pneg %p8651_p11 }
 0x69d   : > { %v7458_v7 = vadd.f32 %v14530_v53, %v7382_v47  ;;  %v5774_v3 = vpop.permute.xlu0 %5773  ;;  %v7383_v9 = vadd.f32 %v7213_v5, %v5200_v10  ;;  %v6569_v6 = vsel %vm2066_vm7, %v6537_v29, %v6204_v59  ;;  %v6798_v10 = vadd.f32 %v13985_v0, %v14006_v39 }
 0x69e   : > { %v6442_v52 = vsel %vm1934_vm3, %v6410_v22, %v5774_v3  ;;  %v6796_v59 = vadd.f32 %v13970_v36, %v13999_v24  ;;  %p8659_p3 = pnand %p8658_p2, %p8652_p13 }
 0x69f   : > { %v7522_v43 = vmax.f32 %v7458_v7, 0.0  ;;  %v7459_v21 = vadd.f32 %v14539_v44, %v7383_v9  ;;  %v15832_v7 = vld [vmem:[#allocation96_spill] sm:$0xff]  ;;  %v6987_v9 = vmax.f32 %v6798_v10, 0.0 }
 0x6a0   : > { %v6312_v38 = vpop.permute.xlu1 %6311  ;;  %v3005_v3 = vadd.f32 %v15832_v7, %v15831_v18  ;;  %v6986_v36 = vmax.f32 %v6796_v59, 0.0  ;;  %v15835_v18 = vld [vmem:[#allocation88_spill] sm:$0xff] }
 0x6a1   : > { %7586 = vst [vmem:[%s14548_s23 + $0x50] sm:$0xff] %v7522_v43  ;;  %v7523_v62 = vmax.f32 %v7459_v21, 0.0  ;;  %v6601_v25 = vsel %vm2099_vm8, %v6569_v6, %v6312_v38  ;;  %v5882_v57 = vpop.permute.xlu0 %5881  ;;  %v15836_v7 = vld [vmem:[#allocation184_spill] sm:$0xff] }
 0x6a2   : > { %v6903_v13 = vpop.f32.mrf.mxu0  ;;  %8206 = vmatmul.mubr.msk.f32.gmra.mxu0 %vm2154_vm9, %v6601_v25  ;;  %v6474_v26 = vsel %vm1967_vm4, %v6442_v52, %v5882_v57  ;;  %v5202_v29 = vadd.f32 %v14018_v56, %v3005_v3  ;;  %v15833_v52 = vld [vmem:[#allocation149_spill] sm:$0xff]  ;;  %v3017_v3 = vadd.f32 %v15836_v7, %v15835_v18 }
 0x6a3   : > { %7587 = vst [vmem:[%s14548_s23 + $0x58] sm:$0xff] %v7523_v62  ;;  %6979 = vmatprep.mubr.f32.mxu0 %v15217_v61  ;;  %v6904_v11 = vadd.f32 %v6903_v13, %v13999_v24 }
 0x6a4   : > { %v6905_v27 = vpop.f32.mrf.mxu0  ;;  %v6098_v34 = vpop.permute.xlu1 %6097 }
 0x6a5   : > { %v5990_v30 = vpop.permute.xlu0 %5989  ;;  %v6906_v12 = vadd.f32 %v6905_v27, %v14006_v39  ;;  %v7022_v49 = vmax.f32 %v6904_v11, 0.0  ;;  %v15834_v11 = vld [vmem:[#allocation128_spill] sm:$0xff] }
 0x6a6   : > { %v6506_v1 = vsel %vm2000_vm5, %v6474_v26, %v5990_v30  ;;  %v3011_v27 = vadd.f32 %v15834_v11, %v15833_v52 }
 0x6a7   : > { %v7023_v60 = vmax.f32 %v6906_v12, 0.0  ;;  %v6538_v61 = vsel %vm2033_vm6, %v6506_v1, %v6098_v34 }
 0x6a8   : > { %v6314_v47 = vpop.permute.xlu1 %6313  ;;  %v5204_v26 = vadd.f32 %v14036_v35, %v3011_v27 }
 0x6a9   : > { %v6206_v4 = vpop.permute.xlu0 %6205  ;;  %7287 = vmatprep.mubr.f32.mxu1 %v7023_v60 }
 0x6aa   : > { %v6570_v5 = vsel %vm2066_vm7, %v6538_v61, %v6206_v4  ;;  %7288 = vmatmul.mubr.f32.gmra.mxu1 %v7022_v49 }
 0x6ab   : > { %v6602_v0 = vsel %vm2099_vm8, %v6570_v5, %v6314_v47 }
 0x6ac   : > { %v7217_v17 = vpop.f32.mrf.mxu1  ;;  %8207 = vmatmul.mubr.msk.f32.gmra.mxu0 %vm2154_vm9, %v6602_v0  ;;  %v5206_v0 = vadd.f32 %v14057_v46, %v3017_v3 }
 0x6ad   : > { %v7384_v43 = vadd.f32 %v7217_v17, %v14009_v55  ;;  %7179 = vmatprep.mubr.f32.mxu0 %v6987_v9 }
 0x6ae   : > { %v7219_v21 = vpop.f32.mrf.mxu1 }
 0x6af   : > { %v7460_v6 = vadd.f32 %v14530_v53, %v7384_v43  ;;  %v7385_v38 = vadd.f32 %v7219_v21, %v5202_v29 }
 0x6b0   : > { %7180 = vmatmul.mubr.f32.vlgmr.msra.gmra.mxu0 %v6986_v36 }
 0x6b1   : > { %v7524_v62 = vmax.f32 %v7460_v6, 0.0  ;;  %v7461_v25 = vadd.f32 %v14539_v44, %v7385_v38 }
 0x6b2   : > { %v6909_v57 = vpop.f32.mrf.mxu0 }
 0x6b3   : > { %7588 = vst [vmem:[%s14548_s23 + $0x60] sm:$0xff] %v7524_v62  ;;  %v7525_v63 = vmax.f32 %v7461_v25, 0.0  ;;  %v6910_v19 = vadd.f32 %v6909_v57, %v13999_v24 }
 0x6b4   : > { %v6911_v13 = vpop.f32.mrf.mxu0 }
 0x6b5   : > { %7589 = vst [vmem:[%s14548_s23 + $0x68] sm:$0xff] %v7525_v63  ;;  %v6912_v55 = vadd.f32 %v6911_v13, %v14006_v39  ;;  %v7024_v22 = vmax.f32 %v6910_v19, 0.0  ;;  %v15837_v19 = vld [vmem:[#allocation120_spill] sm:$0xff]  ;;  %v15838_v13 = vld [vmem:[#allocation59_spill] sm:$0xff] }
 0x6b7   : > { %v7025_v56 = vmax.f32 %v6912_v55, 0.0  ;;  %v3023_v55 = vadd.f32 %v15838_v13, %v15837_v19 }
 0x6b9   : > { %7293 = vmatprep.mubr.f32.mxu1 %v7025_v56 }
 0x6ba   : > { %7294 = vmatmul.mubr.f32.gmra.mxu1 %v7024_v22  ;;  %v5208_v22 = vadd.f32 %v14070_v42, %v3023_v55 }
 0x6bb   : > { %v7223_v34 = vpop.f32.mrf.mxu1 }
 0x6bc   : > { %v7386_v30 = vadd.f32 %v7223_v34, %v14033_v48 }
 0x6bd   : > { %v7225_v12 = vpop.f32.mrf.mxu1 }
 0x6be   : > { %v7462_v1 = vadd.f32 %v14530_v53, %v7386_v30  ;;  %v7387_v10 = vadd.f32 %v7225_v12, %v5204_v26 }
 0x6c0   : > { %v7526_v60 = vmax.f32 %v7462_v1, 0.0  ;;  %v7463_v49 = vadd.f32 %v14539_v44, %v7387_v10 }
 0x6c2   : > { %7590 = vst [vmem:[%s14548_s23 + $0x70] sm:$0xff] %v7526_v60  ;;  %v7527_v47 = vmax.f32 %v7463_v49, 0.0  ;;  %v6915_v61 = vpop.f32.mrf.mxu0 }
 0x6c3   : > { %v6916_v4 = vadd.f32 %v6915_v61, %v13999_v24  ;;  %v15840_v61 = vld [vmem:[#allocation95_spill] sm:$0xff] }
 0x6c4   : > { %7591 = vst [vmem:[%s14548_s23 + $0x78] sm:$0xff] %v7527_v47  ;;  %v6917_v59 = vpop.f32.mrf.mxu0  ;;  %v15839_v47 = vld [vmem:[#allocation43_spill] sm:$0xff] }
 0x6c5   : > { %v6918_v5 = vadd.f32 %v6917_v59, %v14006_v39  ;;  %v7026_v48 = vmax.f32 %v6916_v4, 0.0  ;;  %v3029_v4 = vadd.f32 %v15840_v61, %v15839_v47 }
 0x6c7   : > { %v7027_v35 = vmax.f32 %v6918_v5, 0.0  ;;  %v5210_v5 = vadd.f32 %v14093_v54, %v3029_v4 }
 0x6c9   : > { %7299 = vmatprep.mubr.f32.mxu1 %v7027_v35 }
 0x6ca   : > { %v7229_v9 = vpop.f32.mrf.mxu1  ;;  %7300 = vmatmul.mubr.f32.gmra.mxu1 %v7026_v48 }
 0x6cb   : > { %v7388_v17 = vadd.f32 %v7229_v9, %v14046_v45 }
 0x6cc   : > { %v7231_v29 = vpop.f32.mrf.mxu1 }
 0x6cd   : > { %v7464_v43 = vadd.f32 %v14530_v53, %v7388_v17  ;;  %v7389_v36 = vadd.f32 %v7231_v29, %v5206_v0 }
 0x6cf   : > { %v7528_v21 = vmax.f32 %v7464_v43, 0.0  ;;  %v7465_v6 = vadd.f32 %v14539_v44, %v7389_v36 }
 0x6d1   : > { %7592 = vst [vmem:[%s14548_s23 + $0x80] sm:$0xff] %v7528_v21  ;;  %v7529_v38 = vmax.f32 %v7465_v6, 0.0  ;;  %v15841_v21 = vld [vmem:[#allocation87_spill] sm:$0xff] }
 0x6d2   : > { %v6921_v62 = vpop.f32.mrf.mxu0  ;;  %v15842_v6 = vld [vmem:[#allocation127_spill] sm:$0xff] }
 0x6d3   : > { %7593 = vst [vmem:[%s14548_s23 + $0x88] sm:$0xff] %v7529_v38  ;;  %v6922_v25 = vadd.f32 %v6921_v62, %v13999_v24  ;;  %v3035_v38 = vadd.f32 %v15842_v6, %v15841_v21 }
 0x6d4   : > { %v6923_v57 = vpop.f32.mrf.mxu0 }
 0x6d5   : > { %v6924_v63 = vadd.f32 %v6923_v57, %v14006_v39  ;;  %v7028_v45 = vmax.f32 %v6922_v25, 0.0  ;;  %v5212_v25 = vadd.f32 %v14109_v20, %v3035_v38 }
 0x6d7   : > { %v7029_v46 = vmax.f32 %v6924_v63, 0.0 }
 0x6d9   : > { %7305 = vmatprep.mubr.f32.mxu1 %v7029_v46 }
 0x6da   : > { %7306 = vmatmul.mubr.f32.gmra.mxu1 %v7028_v45 }
 0x6db   : > { %v7235_v56 = vpop.f32.mrf.mxu1 }
 0x6dc   : > { %v7390_v52 = vadd.f32 %v7235_v56, %v14068_v33 }
 0x6dd   : > { %v7237_v11 = vpop.f32.mrf.mxu1 }
 0x6de   : > { %v7466_v27 = vadd.f32 %v14530_v53, %v7390_v52  ;;  %v7391_v34 = vadd.f32 %v7237_v11, %v5208_v22 }
 0x6e0   : > { %v7530_v26 = vmax.f32 %v7466_v27, 0.0  ;;  %v7467_v30 = vadd.f32 %v14539_v44, %v7391_v34  ;;  %v15843_v27 = vld [vmem:[#allocation119_spill] sm:$0xff]  ;;  %v15844_v34 = vld [vmem:[#allocation65_spill] sm:$0xff] }
 0x6e2   : > { %7594 = vst [vmem:[%s14548_s23 + $0x90] sm:$0xff] %v7530_v26  ;;  %v7531_v12 = vmax.f32 %v7467_v30, 0.0  ;;  %v6927_v1 = vpop.f32.mrf.mxu0  ;;  %v3041_v26 = vadd.f32 %v15844_v34, %v15843_v27  ;;  %v15849_v34 = vld [vmem:[#allocation122_spill] sm:$0xff] }
 0x6e3   : > { %v6928_v10 = vadd.f32 %v6927_v1, %v13999_v24 }
 0x6e4   : > { %7595 = vst [vmem:[%s14548_s23 + $0x98] sm:$0xff] %v7531_v12  ;;  %v6929_v60 = vpop.f32.mrf.mxu0  ;;  %v5214_v12 = vadd.f32 %v14131_v41, %v3041_v26  ;;  %v15850_v26 = vld [vmem:[#allocation130_spill] sm:$0xff] }
 0x6e5   : > { %v6930_v49 = vadd.f32 %v6929_v60, %v14006_v39  ;;  %v7030_v33 = vmax.f32 %v6928_v10, 0.0 }
 0x6e7   : > { %v7031_v42 = vmax.f32 %v6930_v49, 0.0 }
 0x6e9   : > { %7311 = vmatprep.mubr.f32.mxu1 %v7031_v42 }
 0x6ea   : > { %7312 = vmatmul.mubr.f32.gmra.mxu1 %v7030_v33 }
 0x6eb   : > { %v7241_v59 = vpop.f32.mrf.mxu1 }
 0x6ec   : > { %v7392_v35 = vadd.f32 %v7241_v59, %v14085_v51 }
 0x6ed   : > { %v7243_v48 = vpop.f32.mrf.mxu1 }
 0x6ee   : > { %v7468_v18 = vadd.f32 %v14530_v53, %v7392_v35  ;;  %v7393_v7 = vadd.f32 %v7243_v48, %v5210_v5  ;;  %v15845_v35 = vld [vmem:[#allocation48_spill] sm:$0xff] }
 0x6ef   : > { %v15846_v48 = vld [vmem:[#allocation12_spill] sm:$0xff] }
 0x6f0   : > { %v7532_v3 = vmax.f32 %v7468_v18, 0.0  ;;  %v7469_v9 = vadd.f32 %v14539_v44, %v7393_v7  ;;  %v3047_v18 = vadd.f32 %v15846_v48, %v15845_v35  ;;  %v15852_v48 = vld [vmem:[#allocation47_spill] sm:$0xff] }
 0x6f2   : > { %7596 = vst [vmem:[%s14548_s23 + $0xa0] sm:$0xff] %v7532_v3  ;;  %v7533_v0 = vmax.f32 %v7469_v9, 0.0  ;;  %v6933_v17 = vpop.f32.mrf.mxu0  ;;  %v5216_v3 = vadd.f32 %v14144_v2, %v3047_v18  ;;  %v15853_v18 = vld [vmem:[#allocation28_spill] sm:$0xff] }
 0x6f3   : > { %v6934_v29 = vadd.f32 %v6933_v17, %v13999_v24 }
 0x6f4   : > { %7597 = vst [vmem:[%s14548_s23 + $0xa8] sm:$0xff] %v7533_v0  ;;  %v6935_v43 = vpop.f32.mrf.mxu0 }
 0x6f5   : > { %v6936_v36 = vadd.f32 %v6935_v43, %v14006_v39  ;;  %v7032_v51 = vmax.f32 %v6934_v29, 0.0 }
 0x6f7   : > { %v7033_v54 = vmax.f32 %v6936_v36, 0.0 }
 0x6f9   : > { %7317 = vmatprep.mubr.f32.mxu1 %v7033_v54 }
 0x6fa   : > { %v7247_v62 = vpop.f32.mrf.mxu1  ;;  %7318 = vmatmul.mubr.f32.gmra.mxu1 %v7032_v51 }
 0x6fb   : > { %v7394_v57 = vadd.f32 %v7247_v62, %v14105_v31  ;;  %v15847_v62 = vld [vmem:[#allocation90_spill] sm:$0xff] }
 0x6fc   : > { %v7249_v63 = vpop.f32.mrf.mxu1 }
 0x6fd   : > { %v7470_v46 = vadd.f32 %v14530_v53, %v7394_v57  ;;  %v7395_v45 = vadd.f32 %v7249_v63, %v5212_v25  ;;  %v15848_v25 = vld [vmem:[#allocation103_spill] sm:$0xff] }
 0x6fe   : > { %v3053_v57 = vadd.f32 %v15848_v25, %v15847_v62 }
 0x6ff   : > { %v7534_v19 = vmax.f32 %v7470_v46, 0.0  ;;  %v7471_v13 = vadd.f32 %v14539_v44, %v7395_v45 }
 0x700   : > { %v5218_v46 = vadd.f32 %v14165_v16, %v3053_v57 }
 0x701   : > { %7598 = vst [vmem:[%s14548_s23 + $0xb0] sm:$0xff] %v7534_v19  ;;  %v7535_v55 = vmax.f32 %v7471_v13, 0.0 }
 0x702   : > { %v6939_v56 = vpop.f32.mrf.mxu0 }
 0x703   : > { %7599 = vst [vmem:[%s14548_s23 + $0xb8] sm:$0xff] %v7535_v55  ;;  %v6940_v22 = vadd.f32 %v6939_v56, %v13999_v24 }
 0x704   : > { %v6941_v52 = vpop.f32.mrf.mxu0 }
 0x705   : > { %v6942_v11 = vadd.f32 %v6941_v52, %v14006_v39  ;;  %v7034_v31 = vmax.f32 %v6940_v22, 0.0 }
 0x707   : > { %v7035_v20 = vmax.f32 %v6942_v11, 0.0 }
 0x709   : > { %7323 = vmatprep.mubr.f32.mxu1 %v7035_v20 }
 0x70a   : > { %v7253_v30 = vpop.f32.mrf.mxu1  ;;  %7324 = vmatmul.mubr.f32.gmra.mxu1 %v7034_v31 }
 0x70b   : > { %v7396_v1 = vadd.f32 %v7253_v30, %v14119_v23  ;;  %v3059_v30 = vadd.f32 %v15850_v26, %v15849_v34 }
 0x70c   : > { %v7255_v10 = vpop.f32.mrf.mxu1 }
 0x70d   : > { %v7472_v60 = vadd.f32 %v14530_v53, %v7396_v1  ;;  %v7397_v49 = vadd.f32 %v7255_v10, %v5214_v12  ;;  %v5220_v1 = vadd.f32 %v14183_v58, %v3059_v30  ;;  %v15851_v10 = vld [vmem:[#allocation21_spill] sm:$0xff] }
 0x70f   : > { %v7536_v42 = vmax.f32 %v7472_v60, 0.0  ;;  %v7473_v33 = vadd.f32 %v14539_v44, %v7397_v49 }
 0x711   : > { %7600 = vst [vmem:[%s14548_s23 + $0xc0] sm:$0xff] %v7536_v42  ;;  %v7537_v47 = vmax.f32 %v7473_v33, 0.0 }
 0x712   : > { %v6945_v61 = vpop.f32.mrf.mxu0 }
 0x713   : > { %7601 = vst [vmem:[%s14548_s23 + $0xc8] sm:$0xff] %v7537_v47  ;;  %v6946_v4 = vadd.f32 %v6945_v61, %v13999_v24 }
 0x714   : > { %v6947_v59 = vpop.f32.mrf.mxu0 }
 0x715   : > { %v6948_v5 = vadd.f32 %v6947_v59, %v14006_v39  ;;  %v7036_v23 = vmax.f32 %v6946_v4, 0.0 }
 0x717   : > { %v7037_v41 = vmax.f32 %v6948_v5, 0.0 }
 0x719   : > { %7329 = vmatprep.mubr.f32.mxu1 %v7037_v41 }
 0x71a   : > { %v7259_v7 = vpop.f32.mrf.mxu1  ;;  %7330 = vmatmul.mubr.f32.gmra.mxu1 %v7036_v23 }
 0x71b   : > { %v7398_v9 = vadd.f32 %v7259_v7, %v14141_v14  ;;  %v3065_v7 = vadd.f32 %v15853_v18, %v15852_v48  ;;  %v15864_v48 = vld [vmem:[#allocation39_spill] sm:$0xff] }
 0x71c   : > { %v7261_v0 = vpop.f32.mrf.mxu1  ;;  %v15865_v18 = vld [vmem:[#allocation183_spill] sm:$0xff] }
 0x71d   : > { %v7474_v17 = vadd.f32 %v14530_v53, %v7398_v9  ;;  %v7399_v29 = vadd.f32 %v7261_v0, %v5216_v3  ;;  %v15854_v9 = vld [vmem:[#allocation67_spill] sm:$0xff] }
 0x71e   : > { %v5222_v0 = vadd.f32 %v15854_v9, %v3065_v7  ;;  %v2969_v7 = vadd.f32 %v15865_v18, %v15864_v48 }
 0x71f   : > { %v7538_v43 = vmax.f32 %v7474_v17, 0.0  ;;  %v7475_v36 = vadd.f32 %v14539_v44, %v7399_v29  ;;  %v15855_v17 = vld [vmem:[#allocation27_spill] sm:$0xff] }
 0x721   : > { %7602 = vst [vmem:[%s14548_s23 + $0xd0] sm:$0xff] %v7538_v43  ;;  %v7539_v54 = vmax.f32 %v7475_v36, 0.0 }
 0x722   : > { %v6951_v51 = vpop.f32.mrf.mxu0 }
 0x723   : > { %7603 = vst [vmem:[%s14548_s23 + $0xd8] sm:$0xff] %v7539_v54  ;;  %v6952_v21 = vadd.f32 %v6951_v51, %v13999_v24 }
 0x724   : > { %v6953_v6 = vpop.f32.mrf.mxu0 }
 0x725   : > { %v6954_v38 = vadd.f32 %v6953_v6, %v14006_v39  ;;  %v7038_v14 = vmax.f32 %v6952_v21, 0.0 }
 0x727   : > { %v7039_v2 = vmax.f32 %v6954_v38, 0.0 }
 0x729   : > { %7335 = vmatprep.mubr.f32.mxu1 %v7039_v2 }
 0x72a   : > { %v7265_v63 = vpop.f32.mrf.mxu1  ;;  %7336 = vmatmul.mubr.f32.gmra.mxu1 %v7038_v14 }
 0x72b   : > { %v7400_v45 = vadd.f32 %v7265_v63, %v14156_v40  ;;  %v15856_v63 = vld [vmem:[#allocation89_spill] sm:$0xff] }
 0x72c   : > { %v7267_v19 = vpop.f32.mrf.mxu1 }
 0x72d   : > { %v7476_v13 = vadd.f32 %v14530_v53, %v7400_v45  ;;  %v7401_v55 = vadd.f32 %v7267_v19, %v5218_v46  ;;  %v15857_v46 = vld [vmem:[#allocation139_spill] sm:$0xff] }
 0x72e   : > { %v3071_v45 = vadd.f32 %v15857_v46, %v15856_v63 }
 0x72f   : > { %v7540_v56 = vmax.f32 %v7476_v13, 0.0  ;;  %v7477_v22 = vadd.f32 %v14539_v44, %v7401_v55  ;;  %v15858_v13 = vld [vmem:[#allocation164_spill] sm:$0xff] }
 0x730   : > { %v5224_v55 = vadd.f32 %v15858_v13, %v3071_v45  ;;  %v15870_v45 = vld [vmem:[#allocation37_spill] sm:$0xff]  ;;  %v15871_v13 = vld [vmem:[#allocation79_spill] sm:$0xff] }
 0x731   : > { %7604 = vst [vmem:[%s14548_s23 + $0xe0] sm:$0xff] %v7540_v56  ;;  %v7541_v52 = vmax.f32 %v7477_v22, 0.0  ;;  %v15859_v56 = vld [vmem:[#allocation108_spill] sm:$0xff] }
 0x732   : > { %v6957_v11 = vpop.f32.mrf.mxu0 }
 0x733   : > { %7605 = vst [vmem:[%s14548_s23 + $0xe8] sm:$0xff] %v7541_v52  ;;  %v6958_v20 = vadd.f32 %v6957_v11, %v13999_v24 }
 0x734   : > { %v6959_v31 = vpop.f32.mrf.mxu0 }
 0x735   : > { %v6960_v27 = vadd.f32 %v6959_v31, %v14006_v39  ;;  %v7040_v40 = vmax.f32 %v6958_v20, 0.0 }
 0x737   : > { %v7041_v16 = vmax.f32 %v6960_v27, 0.0 }
 0x739   : > { %7341 = vmatprep.mubr.f32.mxu1 %v7041_v16 }
 0x73a   : > { %v7271_v12 = vpop.f32.mrf.mxu1  ;;  %7342 = vmatmul.mubr.f32.gmra.mxu1 %v7040_v40 }
 0x73b   : > { %v7402_v60 = vadd.f32 %v7271_v12, %v15851_v10  ;;  %v15860_v10 = vld [vmem:[#allocation121_spill] sm:$0xff] }
 0x73c   : > { %v7273_v49 = vpop.f32.mrf.mxu1 }
 0x73d   : > { %v7478_v42 = vadd.f32 %v14530_v53, %v7402_v60  ;;  %v7403_v33 = vadd.f32 %v7273_v49, %v5220_v1  ;;  %v15861_v60 = vld [vmem:[#allocation63_spill] sm:$0xff] }
 0x73e   : > { %v3077_v49 = vadd.f32 %v15861_v60, %v15860_v10 }
 0x73f   : > { %v7542_v47 = vmax.f32 %v7478_v42, 0.0  ;;  %v7479_v61 = vadd.f32 %v14539_v44, %v7403_v33  ;;  %v15862_v33 = vld [vmem:[#allocation76_spill] sm:$0xff] }
 0x741   : > { %7606 = vst [vmem:[%s14548_s23 + $0xf0] sm:$0xff] %v7542_v47  ;;  %v7543_v4 = vmax.f32 %v7479_v61, 0.0  ;;  %v5226_v47 = vadd.f32 %v15862_v33, %v3077_v49  ;;  %v15863_v61 = vld [vmem:[#allocation10_spill] sm:$0xff] }
 0x742   : > { %v6963_v59 = vpop.f32.mrf.mxu0 }
 0x743   : > { %7607 = vst [vmem:[%s14548_s23 + $0xf8] sm:$0xff] %v7543_v4  ;;  %v6964_v5 = vadd.f32 %v6963_v59, %v13999_v24 }
 0x744   : > { %v6965_v41 = vpop.f32.mrf.mxu0 }
 0x745   : > { %v6966_v23 = vadd.f32 %v6965_v41, %v14006_v39  ;;  %v7042_v35 = vmax.f32 %v6964_v5, 0.0 }
 0x747   : > { %v7043_v58 = vmax.f32 %v6966_v23, 0.0 }
 0x749   : > { %7347 = vmatprep.mubr.f32.mxu1 %v7043_v58 }
 0x74a   : > { %v7277_v3 = vpop.f32.mrf.mxu1  ;;  %7348 = vmatmul.mubr.f32.gmra.mxu1 %v7042_v35 }
 0x74b   : > { %v7404_v29 = vadd.f32 %v7277_v3, %v15855_v17 }
 0x74c   : > { %v7279_v43 = vpop.f32.mrf.mxu1 }
 0x74d   : > { %v7480_v36 = vadd.f32 %v14530_v53, %v7404_v29  ;;  %v7405_v54 = vadd.f32 %v7279_v43, %v5222_v0  ;;  %v15866_v29 = vld [vmem:[#allocation100_spill] sm:$0xff] }
 0x74e   : > { %v5190_v43 = vadd.f32 %v15866_v29, %v2969_v7  ;;  %v15881_v29 = vld [vmem:[#allocation112_spill] sm:$0xff] }
 0x74f   : > { %v7544_v51 = vmax.f32 %v7480_v36, 0.0  ;;  %v7481_v21 = vadd.f32 %v14539_v44, %v7405_v54 }
 0x751   : > { %7608 = vst [vmem:[%s14548_s23 + $0x100] sm:$0xff] %v7544_v51  ;;  %v7545_v6 = vmax.f32 %v7481_v21, 0.0  ;;  %v15867_v51 = vld [vmem:[#allocation144_spill] sm:$0xff] }
 0x752   : > { %v6969_v38 = vpop.f32.mrf.mxu0 }
 0x753   : > { %7609 = vst [vmem:[%s14548_s23 + $0x108] sm:$0xff] %v7545_v6  ;;  %v6970_v2 = vadd.f32 %v6969_v38, %v13999_v24 }
 0x754   : > { %v6971_v14 = vpop.f32.mrf.mxu0 }
 0x755   : > { %v6972_v62 = vadd.f32 %v6971_v14, %v14006_v39  ;;  %v7044_v57 = vmax.f32 %v6970_v2, 0.0 }
 0x757   : > { %v7045_v25 = vmax.f32 %v6972_v62, 0.0 }
 0x759   : > { %7353 = vmatprep.mubr.f32.mxu1 %v7045_v25  ;;  %v15868_v25 = vld [vmem:[#allocation52_spill] sm:$0xff] }
 0x75a   : > { %v7283_v19 = vpop.f32.mrf.mxu1  ;;  %7354 = vmatmul.mubr.f32.gmra.mxu1 %v7044_v57  ;;  %v15869_v57 = vld [vmem:[#allocation80_spill] sm:$0xff] }
 0x75b   : > { %v7406_v22 = vadd.f32 %v7283_v19, %v15859_v56  ;;  %v3083_v63 = vadd.f32 %v15869_v57, %v15868_v25  ;;  %v15884_v25 = vld [vmem:[#allocation156_spill] sm:$0xff]  ;;  %v15885_v57 = vld [vmem:[#allocation22_spill] sm:$0xff] }
 0x75c   : > { %v7285_v52 = vpop.f32.mrf.mxu1 }
 0x75d   : > { %v7482_v11 = vadd.f32 %v14530_v53, %v7406_v22  ;;  %v7407_v20 = vadd.f32 %v7285_v52, %v5224_v55  ;;  %v5228_v19 = vadd.f32 %v15870_v45, %v3083_v63  ;;  %v3107_v63 = vadd.f32 %v15885_v57, %v15884_v25  ;;  %v15886_v45 = vld [vmem:[#allocation70_spill] sm:$0xff] }
 0x75f   : > { %v7546_v31 = vmax.f32 %v7482_v11, 0.0  ;;  %v7483_v27 = vadd.f32 %v14539_v44, %v7407_v20 }
 0x761   : > { %7610 = vst [vmem:[%s14548_s23 + $0x110] sm:$0xff] %v7546_v31  ;;  %v7547_v16 = vmax.f32 %v7483_v27, 0.0  ;;  %v15872_v27 = vld [vmem:[#allocation92_spill] sm:$0xff] }
 0x762   : > { %v6975_v40 = vpop.f32.mrf.mxu0 }
 0x763   : > { %7611 = vst [vmem:[%s14548_s23 + $0x118] sm:$0xff] %v7547_v16  ;;  %v6976_v34 = vadd.f32 %v6975_v40, %v13999_v24  ;;  %v15873_v16 = vld [vmem:[#allocation74_spill] sm:$0xff] }
 0x764   : > { %v6977_v26 = vpop.f32.mrf.mxu0  ;;  %v3089_v40 = vadd.f32 %v15873_v16, %v15872_v27  ;;  %v15888_v27 = vld [vmem:[#allocation176_spill] sm:$0xff] }
 0x765   : > { %v6978_v30 = vadd.f32 %v6977_v26, %v14006_v39  ;;  %v7046_v1 = vmax.f32 %v6976_v34, 0.0  ;;  %v15874_v26 = vld [vmem:[#allocation19_spill] sm:$0xff]  ;;  %v15889_v16 = vld [vmem:[#allocation68_spill] sm:$0xff] }
 0x767   : > { %v7047_v12 = vmax.f32 %v6978_v30, 0.0  ;;  %v5230_v30 = vadd.f32 %v15874_v26, %v3089_v40  ;;  %v3113_v40 = vadd.f32 %v15889_v16, %v15888_v27  ;;  %v15890_v26 = vld [vmem:[#allocation143_spill] sm:$0xff] }
 0x769   : > { %7359 = vmatprep.mubr.f32.mxu1 %v7047_v12  ;;  %v15875_v12 = vld [vmem:[#allocation133_spill] sm:$0xff] }
 0x76a   : > { %v7289_v42 = vpop.f32.mrf.mxu1  ;;  %7360 = vmatmul.mubr.f32.gmra.mxu1 %v7046_v1 }
 0x76b   : > { %v7408_v4 = vadd.f32 %v7289_v42, %v15863_v61  ;;  %v15876_v61 = vld [vmem:[#allocation124_spill] sm:$0xff] }
 0x76c   : > { %v6981_v59 = vpop.f32.mrf.mxu0  ;;  %v7291_v5 = vpop.f32.mrf.mxu1 }
 0x76d   : > { %v7484_v41 = vadd.f32 %v14530_v53, %v7408_v4  ;;  %v7409_v23 = vadd.f32 %v7291_v5, %v5226_v47  ;;  %v6982_v58 = vadd.f32 %v6981_v59, %v13999_v24  ;;  %v15877_v4 = vld [vmem:[#allocation129_spill] sm:$0xff] }
 0x76e   : > { %v6983_v35 = vpop.f32.mrf.mxu0  ;;  %v3095_v59 = vadd.f32 %v15877_v4, %v15876_v61  ;;  %v15892_v61 = vld [vmem:[#allocation57_spill] sm:$0xff]  ;;  %v15893_v4 = vld [vmem:[#allocation34_spill] sm:$0xff] }
 0x76f   : > { %v7548_v3 = vmax.f32 %v7484_v41, 0.0  ;;  %v7485_v9 = vadd.f32 %v14539_v44, %v7409_v23  ;;  %v6984_v0 = vadd.f32 %v6983_v35, %v14006_v39  ;;  %v7048_v24 = vmax.f32 %v6982_v58, 0.0  ;;  %v15878_v41 = vld [vmem:[#allocation99_spill] sm:$0xff]  ;;  %v15879_v58 = vld [vmem:[#allocation33_spill] sm:$0xff] }
 0x770   : > { %v7181_v17 = vpop.f32.mrf.mxu0  ;;  %v5232_v23 = vadd.f32 %v15878_v41, %v3095_v59  ;;  %v3119_v59 = vadd.f32 %v15893_v4, %v15892_v61 }
 0x771   : > { %7612 = vst [vmem:[%s14548_s23 + $0x120] sm:$0xff] %v7548_v3  ;;  %v7549_v36 = vmax.f32 %v7485_v9, 0.0  ;;  %v7049_v54 = vmax.f32 %v6984_v0, 0.0  ;;  %v7372_v21 = vadd.f32 %v7181_v17, %v15867_v51  ;;  %v15880_v17 = vld [vmem:[#allocation58_spill] sm:$0xff] }
 0x772   : > { %v7183_v6 = vpop.f32.mrf.mxu0  ;;  %v5240_v41 = vadd.f32 %v14364_v28, %v3119_v59 }
 0x773   : > { %7613 = vst [vmem:[%s14548_s23 + $0x128] sm:$0xff] %v7549_v36  ;;  %v7448_v38 = vadd.f32 %v14530_v53, %v7372_v21  ;;  %v7373_v2 = vadd.f32 %v7183_v6, %v5190_v43  ;;  %7365 = vmatprep.mubr.f32.mxu1 %v7049_v54  ;;  %v3101_v43 = vadd.f32 %v15881_v29, %v15880_v17  ;;  %v15882_v54 = vld [vmem:[#allocation111_spill] sm:$0xff]  ;;  %v15883_v21 = vld [vmem:[#allocation26_spill] sm:$0xff] }
 0x774   : > { %7366 = vmatmul.mubr.f32.gmra.mxu1 %v7048_v24 }
 0x775   : > { %v7512_v39 = vmax.f32 %v7448_v38, 0.0  ;;  %v7449_v14 = vadd.f32 %v14539_v44, %v7373_v2  ;;  %v5234_v51 = vadd.f32 %v15882_v54, %v3101_v43 }
 0x777   : > { %7576 = vst [vmem:[%s14548_s23] sm:$0xff] %v7512_v39  ;;  %v7513_v62 = vmax.f32 %v7449_v14, 0.0 }
 0x779   : > { %7577 = vst [vmem:[%s14548_s23 + $0x8] sm:$0xff] %v7513_v62 }
 0x77a   : > { %v7295_v46 = vpop.f32.mrf.mxu1 }
 0x77b   : > { %v7410_v55 = vadd.f32 %v7295_v46, %v15871_v13  ;;  %v15887_v13 = vld [vmem:[#allocation36_spill] sm:$0xff] }
 0x77c   : > { %v7297_v56 = vpop.f32.mrf.mxu1 }
 0x77d   : > { %v7486_v22 = vadd.f32 %v14530_v53, %v7410_v55  ;;  %v7411_v52 = vadd.f32 %v7297_v56, %v5228_v19  ;;  %v5236_v19 = vadd.f32 %v15886_v45, %v3107_v63 }
 0x77f   : > { %v7550_v11 = vmax.f32 %v7486_v22, 0.0  ;;  %v7487_v20 = vadd.f32 %v14539_v44, %v7411_v52 }
 0x781   : > { %7614 = vst [vmem:[%s14548_s23 + $0x130] sm:$0xff] %v7550_v11  ;;  %v7551_v31 = vmax.f32 %v7487_v20, 0.0 }
 0x783   : > { %7615 = vst [vmem:[%s14548_s23 + $0x138] sm:$0xff] %v7551_v31 }
 0x78a   : > { %v7301_v34 = vpop.f32.mrf.mxu1 }
 0x78b   : > { %v7412_v1 = vadd.f32 %v7301_v34, %v15875_v12  ;;  %v15891_v12 = vld [vmem:[#allocation107_spill] sm:$0xff] }
 0x78c   : > { %v7303_v10 = vpop.f32.mrf.mxu1 }
 0x78d   : > { %v7488_v60 = vadd.f32 %v14530_v53, %v7412_v1  ;;  %v7413_v49 = vadd.f32 %v7303_v10, %v5230_v30  ;;  %v5238_v30 = vadd.f32 %v15890_v26, %v3113_v40 }
 0x78f   : > { %v7552_v42 = vmax.f32 %v7488_v60, 0.0  ;;  %v7489_v33 = vadd.f32 %v14539_v44, %v7413_v49 }
 0x791   : > { %7616 = vst [vmem:[%s14548_s23 + $0x140] sm:$0xff] %v7552_v42  ;;  %v7553_v47 = vmax.f32 %v7489_v33, 0.0 }
 0x793   : > { %7617 = vst [vmem:[%s14548_s23 + $0x148] sm:$0xff] %v7553_v47 }
 0x79a   : > { %v7307_v5 = vpop.f32.mrf.mxu1 }
 0x79b   : > { %v7414_v35 = vadd.f32 %v7307_v5, %v15879_v58 }
 0x79c   : > { %v7309_v48 = vpop.f32.mrf.mxu1 }
 0x79d   : > { %v7490_v18 = vadd.f32 %v14530_v53, %v7414_v35  ;;  %v7415_v7 = vadd.f32 %v7309_v48, %v5232_v23 }
 0x79f   : > { %v7554_v3 = vmax.f32 %v7490_v18, 0.0  ;;  %v7491_v9 = vadd.f32 %v14539_v44, %v7415_v7 }
 0x7a1   : > { %7618 = vst [vmem:[%s14548_s23 + $0x150] sm:$0xff] %v7554_v3  ;;  %v7555_v0 = vmax.f32 %v7491_v9, 0.0  ;;  %v15894_v9 = vld [vmem:[#allocation94_spill] sm:$0xff] }
 0x7a3   : > { %7619 = vst [vmem:[%s14548_s23 + $0x158] sm:$0xff] %v7555_v0  ;;  %v15895_v0 = vld [vmem:[#allocation8_spill] sm:$0xff] }
 0x7a4   : > { %v3125_v17 = vadd.f32 %v15895_v0, %v15894_v9 }
 0x7a6   : > { %v5242_v28 = vadd.f32 %v14388_v8, %v3125_v17 }
 0x7aa   : > { %v7313_v36 = vpop.f32.mrf.mxu1 }
 0x7ab   : > { %v7416_v24 = vadd.f32 %v7313_v36, %v15883_v21 }
 0x7ac   : > { %v7315_v6 = vpop.f32.mrf.mxu1 }
 0x7ad   : > { %v7492_v38 = vadd.f32 %v14530_v53, %v7416_v24  ;;  %v7417_v2 = vadd.f32 %v7315_v6, %v5234_v51  ;;  %v15896_v6 = vld [vmem:[#allocation182_spill] sm:$0xff] }
 0x7af   : > { %v7556_v39 = vmax.f32 %v7492_v38, 0.0  ;;  %v7493_v14 = vadd.f32 %v14539_v44, %v7417_v2  ;;  %v15897_v38 = vld [vmem:[#allocation73_spill] sm:$0xff] }
 0x7b0   : > { %v3131_v2 = vadd.f32 %v15897_v38, %v15896_v6 }
 0x7b1   : > { %7620 = vst [vmem:[%s14548_s23 + $0x160] sm:$0xff] %v7556_v39  ;;  %v7557_v62 = vmax.f32 %v7493_v14, 0.0  ;;  %v15898_v14 = vld [vmem:[#allocation147_spill] sm:$0xff] }
 0x7b2   : > { %v5244_v8 = vadd.f32 %v15898_v14, %v3131_v2 }
 0x7b3   : > { %7621 = vst [vmem:[%s14548_s23 + $0x168] sm:$0xff] %v7557_v62  ;;  %v15899_v62 = vld [vmem:[#allocation84_spill] sm:$0xff] }
 0x7ba   : > { %v7319_v46 = vpop.f32.mrf.mxu1 }
 0x7bb   : > { %v7418_v55 = vadd.f32 %v7319_v46, %v15887_v13  ;;  %v15900_v13 = vld [vmem:[#allocation158_spill] sm:$0xff] }
 0x7bc   : > { %v7321_v56 = vpop.f32.mrf.mxu1 }
 0x7bd   : > { %v7494_v22 = vadd.f32 %v14530_v53, %v7418_v55  ;;  %v7419_v52 = vadd.f32 %v7321_v56, %v5236_v19  ;;  %v15901_v55 = vld [vmem:[#allocation132_spill] sm:$0xff] }
 0x7be   : > { %v3137_v56 = vadd.f32 %v15901_v55, %v15900_v13 }
 0x7bf   : > { %v7558_v11 = vmax.f32 %v7494_v22, 0.0  ;;  %v7495_v20 = vadd.f32 %v14539_v44, %v7419_v52 }
 0x7c0   : > { %v5246_v52 = vadd.f32 %v14432_v50, %v3137_v56 }
 0x7c1   : > { %7622 = vst [vmem:[%s14548_s23 + $0x170] sm:$0xff] %v7558_v11  ;;  %v7559_v31 = vmax.f32 %v7495_v20, 0.0  ;;  %v15902_v11 = vld [vmem:[#allocation14_spill] sm:$0xff] }
 0x7c3   : > { %7623 = vst [vmem:[%s14548_s23 + $0x178] sm:$0xff] %v7559_v31 }
 0x7ca   : > { %v7325_v34 = vpop.f32.mrf.mxu1 }
 0x7cb   : > { %v7420_v1 = vadd.f32 %v7325_v34, %v15891_v12  ;;  %v15904_v12 = vld [vmem:[#allocation180_spill] sm:$0xff] }
 0x7cc   : > { %v7327_v10 = vpop.f32.mrf.mxu1 }
 0x7cd   : > { %v7496_v60 = vadd.f32 %v14530_v53, %v7420_v1  ;;  %v7421_v49 = vadd.f32 %v7327_v10, %v5238_v30  ;;  %v15903_v30 = vld [vmem:[#allocation125_spill] sm:$0xff] }
 0x7ce   : > { %v3143_v1 = vadd.f32 %v15904_v12, %v15903_v30 }
 0x7cf   : > { %v7560_v42 = vmax.f32 %v7496_v60, 0.0  ;;  %v7497_v33 = vadd.f32 %v14539_v44, %v7421_v49  ;;  %v15905_v60 = vld [vmem:[#allocation32_spill] sm:$0xff]  ;;  %v15906_v49 = vld [vmem:[#allocation75_spill] sm:$0xff] }
 0x7d0   : > { %v5248_v50 = vadd.f32 %v15905_v60, %v3143_v1 }
 0x7d1   : > { %7624 = vst [vmem:[%s14548_s23 + $0x180] sm:$0xff] %v7560_v42  ;;  %v7561_v47 = vmax.f32 %v7497_v33, 0.0 }
 0x7d3   : > { %7625 = vst [vmem:[%s14548_s23 + $0x188] sm:$0xff] %v7561_v47 }
 0x7da   : > { %v7331_v5 = vpop.f32.mrf.mxu1 }
 0x7db   : > { %v7422_v23 = vadd.f32 %v7331_v5, %v14362_v32 }
 0x7dc   : > { %v7333_v58 = vpop.f32.mrf.mxu1 }
 0x7dd   : > { %v7498_v35 = vadd.f32 %v14530_v53, %v7422_v23  ;;  %v7423_v48 = vadd.f32 %v7333_v58, %v5240_v41  ;;  %v15907_v41 = vld [vmem:[#allocation60_spill] sm:$0xff]  ;;  %v15908_v23 = vld [vmem:[#allocation134_spill] sm:$0xff] }
 0x7de   : > { %v3149_v58 = vadd.f32 %v15908_v23, %v15907_v41 }
 0x7df   : > { %v7562_v18 = vmax.f32 %v7498_v35, 0.0  ;;  %v7499_v7 = vadd.f32 %v14539_v44, %v7423_v48  ;;  %v15909_v48 = vld [vmem:[#allocation40_spill] sm:$0xff] }
 0x7e1   : > { %7626 = vst [vmem:[%s14548_s23 + $0x190] sm:$0xff] %v7562_v18  ;;  %v7563_v3 = vmax.f32 %v7499_v7, 0.0  ;;  %v5250_v18 = vadd.f32 %v15909_v48, %v3149_v58  ;;  %v15910_v7 = vld [vmem:[#allocation145_spill] sm:$0xff] }
 0x7e3   : > { %7627 = vst [vmem:[%s14548_s23 + $0x198] sm:$0xff] %v7563_v3 }
 0x7ea   : > { %v7337_v29 = vpop.f32.mrf.mxu1 }
 0x7eb   : > { %v7424_v32 = vadd.f32 %v7337_v29, %v14379_v15 }
 0x7ec   : > { %v7339_v43 = vpop.f32.mrf.mxu1 }
 0x7ed   : > { %v7500_v36 = vadd.f32 %v14530_v53, %v7424_v32  ;;  %v7425_v54 = vadd.f32 %v7339_v43, %v5242_v28  ;;  %v15911_v43 = vld [vmem:[#allocation177_spill] sm:$0xff] }
 0x7ef   : > { %v7564_v51 = vmax.f32 %v7500_v36, 0.0  ;;  %v7501_v21 = vadd.f32 %v14539_v44, %v7425_v54  ;;  %v15912_v36 = vld [vmem:[#allocation20_spill] sm:$0xff] }
 0x7f0   : > { %v3155_v54 = vadd.f32 %v15912_v36, %v15911_v43 }
 0x7f1   : > { %7628 = vst [vmem:[%s14548_s23 + $0x1a0] sm:$0xff] %v7564_v51  ;;  %v7565_v24 = vmax.f32 %v7501_v21, 0.0 }
 0x7f2   : > { %v5252_v21 = vadd.f32 %v14522_v37, %v3155_v54 }
 0x7f3   : > { %7629 = vst [vmem:[%s14548_s23 + $0x1a8] sm:$0xff] %v7565_v24  ;;  %v15913_v24 = vld [vmem:[#allocation138_spill] sm:$0xff] }
 0x7fa   : > { %v7343_v39 = vpop.f32.mrf.mxu1 }
 0x7fb   : > { %v7426_v15 = vadd.f32 %v7343_v39, %v15899_v62 }
 0x7fc   : > { %v7345_v25 = vpop.f32.mrf.mxu1 }
 0x7fd   : > { %v7502_v57 = vadd.f32 %v14530_v53, %v7426_v15  ;;  %v7427_v63 = vadd.f32 %v7345_v25, %v5244_v8 }
 0x7ff   : > { %v7566_v46 = vmax.f32 %v7502_v57, 0.0  ;;  %v7503_v45 = vadd.f32 %v14539_v44, %v7427_v63 }
 0x801   : > { %7630 = vst [vmem:[%s14548_s23 + $0x1b0] sm:$0xff] %v7566_v46  ;;  %v7567_v19 = vmax.f32 %v7503_v45, 0.0 }
 0x803   : > { %7631 = vst [vmem:[%s14548_s23 + $0x1b8] sm:$0xff] %v7567_v19 }
 0x80a   : > { %v7349_v22 = vpop.f32.mrf.mxu1 }
 0x80b   : > { %v7428_v20 = vadd.f32 %v7349_v22, %v15902_v11 }
 0x80c   : > { %v7351_v31 = vpop.f32.mrf.mxu1 }
 0x80d   : > { %v7504_v27 = vadd.f32 %v14530_v53, %v7428_v20  ;;  %v7429_v16 = vadd.f32 %v7351_v31, %v5246_v52 }
 0x80f   : > { %v7568_v40 = vmax.f32 %v7504_v27, 0.0  ;;  %v7505_v34 = vadd.f32 %v14539_v44, %v7429_v16 }
 0x811   : > { %7632 = vst [vmem:[%s14548_s23 + $0x1c0] sm:$0xff] %v7568_v40  ;;  %v7569_v26 = vmax.f32 %v7505_v34, 0.0 }
 0x813   : > { %7633 = vst [vmem:[%s14548_s23 + $0x1c8] sm:$0xff] %v7569_v26 }
 0x81a   : > { %v7355_v10 = vpop.f32.mrf.mxu1 }
 0x81b   : > { %v7430_v42 = vadd.f32 %v7355_v10, %v15906_v49 }
 0x81c   : > { %v7357_v33 = vpop.f32.mrf.mxu1 }
 0x81d   : > { %v7506_v47 = vadd.f32 %v14530_v53, %v7430_v42  ;;  %v7431_v61 = vadd.f32 %v7357_v33, %v5248_v50 }
 0x81f   : > { %v7570_v4 = vmax.f32 %v7506_v47, 0.0  ;;  %v7507_v59 = vadd.f32 %v14539_v44, %v7431_v61 }
 0x821   : > { %7634 = vst [vmem:[%s14548_s23 + $0x1d0] sm:$0xff] %v7570_v4  ;;  %v7571_v5 = vmax.f32 %v7507_v59, 0.0 }
 0x823   : > { %7635 = vst [vmem:[%s14548_s23 + $0x1d8] sm:$0xff] %v7571_v5 }
 0x82a   : > { %v7361_v35 = vpop.f32.mrf.mxu1 }
 0x82b   : > { %v7432_v3 = vadd.f32 %v7361_v35, %v15910_v7 }
 0x82c   : > { %v7363_v9 = vpop.f32.mrf.mxu1 }
 0x82d   : > { %v7508_v0 = vadd.f32 %v14530_v53, %v7432_v3  ;;  %v7433_v17 = vadd.f32 %v7363_v9, %v5250_v18 }
 0x82f   : > { %v7572_v29 = vmax.f32 %v7508_v0, 0.0  ;;  %v7509_v28 = vadd.f32 %v14539_v44, %v7433_v17 }
 0x831   : > { %7636 = vst [vmem:[%s14548_s23 + $0x1e0] sm:$0xff] %v7572_v29  ;;  %v7573_v32 = vmax.f32 %v7509_v28, 0.0 }
 0x833   : > { %7637 = vst [vmem:[%s14548_s23 + $0x1e8] sm:$0xff] %v7573_v32 }
 0x834   : > { %v7367_v51 = vpop.f32.mrf.mxu1 }
 0x835   : > { %v7434_v6 = vadd.f32 %v7367_v51, %v15913_v24 }
 0x836   : > { %v7369_v38 = vpop.f32.mrf.mxu1 }
 0x837   : > { %v7510_v2 = vadd.f32 %v14530_v53, %v7434_v6  ;;  %v7435_v39 = vadd.f32 %v7369_v38, %v5252_v21 }
 0x839   : > { %v7574_v14 = vmax.f32 %v7510_v2, 0.0  ;;  %v7511_v8 = vadd.f32 %v14539_v44, %v7435_v39 }
 0x83b   : > { %7638 = vst [vmem:[%s14548_s23 + $0x1f0] sm:$0xff] %v7574_v14  ;;  %v7575_v62 = vmax.f32 %v7511_v8, 0.0 }
 0x83d   : > { %7639 = vst [vmem:[%s14548_s23 + $0x1f8] sm:$0xff] %v7575_v62 }
 0x83e   : > { %8662 = shalt.err (!%p8659_p3)
}
 0x83f   : > { %s8663_s21 = scalar_lea.hbm %s14899_s0, 8192  ;;  %s8667_s23 = scalar_lea.hbm %s14960_s7, 16384 }
 0x840   : > { %p8664_p5 = scmp.ne.s32.totalorder %s14899_s0, %s8663_s21  ;;  %p8668_p9 = scmp.lt.s32.totalorder %s14899_s0, %s14960_s7 }
 0x841   : > { %p8669_p12 = scmp.lt.s32.totalorder %s8667_s23, %s8663_s21 }
 0x842   : > { %p8665_p6 = pnand %p8664_p5, %p8825_p4 }
 0x843   : > { %p8670_p10 = por %p8669_p12, %p8668_p9 }
 0x844   : > { %p8666_p7 = pneg %p8665_p6 }
 0x846   : > { %p8671_p11 = pnand %p8670_p10, %p8666_p7 }
 0x848   : > { %8674 = shalt.err (!%p8671_p11)
}
 0x849   : > { %s8744_s10 = smov 256  }
 0x84a   : > { %8283 = dma.vmem_to_hbm [thread:$0]  (%p8825_p4), %s14902_s8, 8192, %s14899_s0, %s14907_s22, %s8744_s10, %s8744_s10, %s15467_s20  }
 0x84b PF: > { %p8295_p13 = scmp.ge.s32.totalorder %s8729_s29, 2  ;;  %s7672_s27 = sand.u32 1, %s8709_s24  }
 0x84c   : > { %s7673_s18 = scalar_lea.sflag [#allocation4], %s7672_s27 }
 0x84d   : > { %p8290_p0 = pnand %p8295_p13, %p8832_p8 }
 0x84f   : > { %p8291_p1 = pneg %p8290_p0 }
 0x851   : > { %8704 = dma.done.wait (%p8291_p1), %s7673_s18, 8192  }
 0x852   : > { %8706 = vsyncadd (%p8291_p1), %s7673_s18, 4294959104  ;;  %s21_s29 = sadd.s32 1, %s8729_s29   ;;  %s15914_s24 = smov %s8713_s25 }
 0x853   : > { %p18_p2 = scmp.ge.s32.totalorder %s21_s29, 4   ;;  %s15915_s25 = smov %s8717_s26 }
 0x854   : > { %s15916_s26 = smov %s8838_s14  ;;  %s15917_s27 = smov %s8725_s28 }
 0x855   : > { %s15918_s28 = smov %s15920_s9  ;;  %20 = sbr.rel (!%p18_p2) target bundleno = 7 (0x7), region = 102 }
 0x85a   :  { %7678 = vsyncpa [#allocation3], 1 }
 0x85b   :  { %7680 = vsyncpa [#allocation3 + $0x1], 1 }
 0x85c   :  { %7681 = vsyncpa [#allocation4], 1 }
 0x85d   :  { %7683 = vsyncpa [#allocation4 + $0x1], 1 }

</bundles_post_ra>
